<compile_context>
chip_gen: v7x
topology: tpu7x:2x2x1
jax: 0.10.0
libtpu: 0.0.40
codegen_flags: <defaults>
</compile_context>

<pallas_src>
import numpy as np
import jax
import jax.numpy as jnp
from jax import lax
from jax.experimental import pallas as pl
from jax.experimental.pallas import tpu as pltpu

HIDDEN = 32            # hidden_size
INPUT_FEATURES = 64    # input_features (CNN feature dim)
NUM_LAYERS = 2
OUTPUT_DIM = 2
SEQ_LEN = 8            # also the image-batch size fed to the CNN
FC1_OUT = 1000
FC1_PAD = 1024         # lane-dense zero-padding of FC1 (same math)
C_IN = 3
IMG = 16
C_MID = 8              # channels of the synthetic conv stem
K = 3
PADW = IMG + 2                 # 18 (spatially padded)
LANE_IN = PADW * C_IN          # 54  (lane = jp*C_IN + c)
LANE_CONV = IMG * C_MID        # 128 (lane = j*C_MID + co)
FLAT = 2 * HIDDEN * SEQ_LEN    # 512

VMEM_SPEC = pl.BlockSpec(memory_space=pltpu.MemorySpace.VMEM)
ANY_SPEC = pl.BlockSpec(memory_space=pl.ANY)


# ----------------------------- fused kernel --------------------------------

def fused_forward_kernel(x_ref, cw_ref, cb_ref, pw_ref, pb_ref,
                         wf0_ref, wb0_ref, whh0_ref, bias0_ref,
                         wf1_ref, wb1_ref, whh1_ref, bias1_ref,
                         w1_hbm_ref, fc1b_ref, w2_ref, fc2b_ref,
                         o_ref,
                         gx_scr, seq_scr, flat_scr, w1_vmem, w1_sem):
    """Whole BiLSTM forward pass in a single kernel invocation.

    x_ref:    (T, 18, 54)  f32   padded channels-last images (lane = jp*3+c)
    cw_ref:   (3, 54, 128) bf16  width-structured conv weights (per height tap)
    cb_ref:   (1, 128)     f32   conv bias tiled to lanes j*8+co
    pw_ref:   (C_MID, F)   bf16  projection to INPUT_FEATURES
    pb_ref:   (1, F)       f32
    wfL/wbL:  (D_in, 8H)   bf16  input weights, fwd/bwd lanes (other dir zero)
    whhL:     (2H, 8H)     bf16  block-diagonal recurrent weights
    biasL:    (1, 8H)      f32   [i_f i_b f_f f_b o_f o_b g_f g_b] (b_ih+b_hh)
    w1_hbm:   (2H*T, FC1_PAD) bf16  out1 weight^T, left in HBM (manual DMA)
    fc1b:     (1, FC1_PAD) f32
    w2_ref:   (FC1_PAD, OUT) bf16  out2 weight^T (zero-padded rows)
    fc2b:     (1, OUT)     f32
    o_ref:    (1, OUT)     f32
    """
    H = HIDDEN
    T = SEQ_LEN

    # Kick off the ~1 MiB FC1-weight DMA immediately; it overlaps with the
    # conv stem and both LSTM layers and is waited on right before use.
    w1_copy = pltpu.make_async_copy(w1_hbm_ref, w1_vmem, w1_sem)
    w1_copy.start()

    # ---- CNN stem: 3x3 conv as 3 width-structured matmuls per image,
    #      bias + ReLU, global average pool (sublane + lane-group sums). ----
    cws = [cw_ref[k] for k in range(K)]                     # hoisted (54,128)
    cbb = jnp.broadcast_to(cb_ref[...], (IMG, LANE_CONV))   # hoisted broadcast
    rows = []
    for t in range(T):
        acc = jnp.dot(x_ref[t, 0:IMG, :].astype(jnp.bfloat16), cws[0],
                      preferred_element_type=jnp.float32)
        for ki in range(1, K):
            slab = x_ref[t, ki:ki + IMG, :].astype(jnp.bfloat16)   # (16, 54)
            acc = acc + jnp.dot(slab, cws[ki],
                                preferred_element_type=jnp.float32)
        acc = jnp.maximum(acc + cbb, 0.0)                           # (16, 128)
        rows.append(jnp.sum(acc, axis=0, keepdims=True))            # (1, 128)
    fpre = jnp.concatenate(rows, axis=0)                            # (T, 128)
    pooled = fpre[:, 0:C_MID]
    for j in range(1, IMG):                                         # lane groups
        pooled = pooled + fpre[:, j * C_MID:(j + 1) * C_MID]
    feat_c = pooled * (1.0 / (IMG * IMG))                           # (T, C_MID)

    # ---- projection to INPUT_FEATURES + ReLU  -> (T, F), B=1 dropped ----
    feat = jnp.dot(feat_c.astype(jnp.bfloat16), pw_ref[...],
                   preferred_element_type=jnp.float32) + pb_ref[...]
    feat = jnp.maximum(feat, 0.0)

    # Time-flip permutation matrix: the sequence reversal for the backward
    # direction is done once per layer on the MXU (free slot), not per step.
    row_i = lax.broadcasted_iota(jnp.int32, (T, T), 0)
    col_i = lax.broadcasted_iota(jnp.int32, (T, T), 1)
    flip = (row_i + col_i == T - 1).astype(jnp.bfloat16)            # (T, T)

    def bilstm_layer(seq, wf_ref, wb_ref, whh_ref, bias_ref, store_h):
        # Hoist ALL input-to-gate work out of the recurrence: both directions,
        # all steps, backward time already reversed -> one row read per step.
        seq_b = seq.astype(jnp.bfloat16)                            # (T, D)
        seq_r = jnp.dot(flip, seq_b,
                        preferred_element_type=jnp.float32).astype(jnp.bfloat16)
        gx_scr[...] = (
            jnp.dot(seq_b, wf_ref[...], preferred_element_type=jnp.float32)
            + jnp.dot(seq_r, wb_ref[...], preferred_element_type=jnp.float32)
            + bias_ref[...])                                        # (T, 8H)

        whh = whh_ref[...]                                          # (2H, 8H)
        h = jnp.zeros((1, 2 * H), jnp.float32)                      # [h_f | h_b]
        cst = jnp.zeros((1, 2 * H), jnp.float32)                    # [c_f | c_b]
        for t in range(T):  # fully unrolled; state stays in vregs
            gates = gx_scr[t:t + 1, :] + jnp.dot(
                h.astype(jnp.bfloat16), whh,
                preferred_element_type=jnp.float32)                 # (1, 8H)
            sig = jax.nn.sigmoid(gates[:, 0:6 * H])                 # i, f, o
            ig = sig[:, 0:2 * H]
            fg = sig[:, 2 * H:4 * H]
            og = sig[:, 4 * H:6 * H]
            gg = jnp.tanh(gates[:, 6 * H:8 * H])                    # g
            cst = fg * cst + ig * gg
            h = og * jnp.tanh(cst)                                  # (1, 2H)
            store_h(t, h)                                           # static vst

    # layer 1: store in (T, 2H) sequence layout (fwd at row t, bwd at T-1-t)
    def store_layer1(t, h):
        seq_scr[t:t + 1, 0:H] = h[:, 0:H]
        seq_scr[T - 1 - t:T - t, H:2 * H] = h[:, H:2 * H]

    # layer 2: store straight into the lane-flattened (1, 2H*T) head input
    def store_layer2(t, h):
        flat_scr[:, t * 2 * H:t * 2 * H + H] = h[:, 0:H]
        base = (T - 1 - t) * 2 * H + H
        flat_scr[:, base:base + H] = h[:, H:2 * H]

    bilstm_layer(feat, wf0_ref, wb0_ref, whh0_ref, bias0_ref, store_layer1)
    bilstm_layer(seq_scr[...], wf1_ref, wb1_ref, whh1_ref, bias1_ref,
                 store_layer2)

    # ---- heads: out1 (padded 1000 -> 1024, exact), out2 ----
    w1_copy.wait()                                   # FC1 weight now in VMEM
    flat = flat_scr[...].astype(jnp.bfloat16)                        # (1, 512)
    h1 = jnp.dot(flat, w1_vmem[...],
                 preferred_element_type=jnp.float32) + fc1b_ref[...]
    pred = jnp.dot(h1.astype(jnp.bfloat16), w2_ref[...],
                   preferred_element_type=jnp.float32) + fc2b_ref[...]
    o_ref[...] = pred.astype(o_ref.dtype)


# ------------------------------- init / packing ------------------------------

def init_params(key):
    keys = iter(jax.random.split(key, 64))

    def u(shape, scale):
        return jax.random.uniform(next(keys), shape, jnp.float32, -scale, scale)

    p = {}
    H = HIDDEN

    # Synthetic CNN feature extractor (stands in for the resnet18 backbone).
    # TODO(synk): pretrained ResNet18 has no clean synthetic Pallas equivalent;
    # replaced with conv3x3 + ReLU + global-avg-pool + Linear -> INPUT_FEATURES.
    wconv = np.asarray(u((C_MID, C_IN, K, K), 1.0 / (C_IN * K * K) ** 0.5))
    bconv = u((1, C_MID), 0.05)
    # Width-structured conv weight: Wk[ki, jp*C_IN+c, j*C_MID+co] = w[co,c,ki,jp-j]
    wk = np.zeros((K, LANE_IN, LANE_CONV), np.float32)
    for ki in range(K):
        for kj in range(K):
            for j in range(IMG):
                jp = j + kj
                wk[ki, jp * C_IN:(jp + 1) * C_IN,
                   j * C_MID:(j + 1) * C_MID] = wconv[:, :, ki, kj].T
    p["conv_wk"] = jnp.asarray(wk, jnp.bfloat16)
    p["conv_b"] = jnp.tile(bconv, (1, IMG))                   # lanes j*8+co
    p["proj_wT"] = u((C_MID, INPUT_FEATURES), 1.0 / C_MID ** 0.5).astype(jnp.bfloat16)
    p["proj_b"] = u((1, INPUT_FEATURES), 0.05)

    # Bidirectional, 2-layer LSTM.  Generated in PyTorch layout (gate order
    # i, f, g, o; b_ih + b_hh) then packed at init time into the kernel's
    # lane-contiguous layout [i_f i_b | f_f f_b | o_f o_b | g_f g_b].
    kscale = 1.0 / H ** 0.5
    d_in = INPUT_FEATURES
    for layer in range(NUM_LAYERS):
        wih, whh, bias = [], [], []
        for _d in range(2):                                    # fwd, bwd
            wih.append(u((d_in, 4 * H), kscale))               # W_ih^T
            whh.append(u((H, 4 * H), kscale))                  # W_hh^T
            bias.append(u((1, 4 * H), kscale) + u((1, 4 * H), kscale))

        def gsplit(m):                                         # cols (i, f, g, o)
            return m[:, 0:H], m[:, H:2 * H], m[:, 2 * H:3 * H], m[:, 3 * H:4 * H]

        i_f, f_f, g_f, o_f = gsplit(wih[0])
        i_b, f_b, g_b, o_b = gsplit(wih[1])
        zD = jnp.zeros((d_in, H), jnp.float32)
        p[f"l{layer}_wih_f"] = jnp.concatenate(
            [i_f, zD, f_f, zD, o_f, zD, g_f, zD], axis=1).astype(jnp.bfloat16)
        p[f"l{layer}_wih_b"] = jnp.concatenate(
            [zD, i_b, zD, f_b, zD, o_b, zD, g_b], axis=1).astype(jnp.bfloat16)

        hi_f, hf_f, hg_f, ho_f = gsplit(whh[0])
        hi_b, hf_b, hg_b, ho_b = gsplit(whh[1])
        zH = jnp.zeros((H, H), jnp.float32)
        top = jnp.concatenate([hi_f, zH, hf_f, zH, ho_f, zH, hg_f, zH], axis=1)
        bot = jnp.concatenate([zH, hi_b, zH, hf_b, zH, ho_b, zH, hg_b], axis=1)
        p[f"l{layer}_whh"] = jnp.concatenate([top, bot], axis=0).astype(jnp.bfloat16)

        bi_f, bf_f, bg_f, bo_f = gsplit(bias[0])
        bi_b, bf_b, bg_b, bo_b = gsplit(bias[1])
        p[f"l{layer}_b"] = jnp.concatenate(
            [bi_f, bi_b, bf_f, bf_b, bo_f, bo_b, bg_f, bg_b], axis=1)
        d_in = 2 * H

    # Heads: out1 padded 1000 -> 1024 with zeros (Linear->Linear, so exact).
    w1 = u((FLAT, FC1_OUT), 1.0 / FLAT ** 0.5)
    b1 = u((1, FC1_OUT), 1.0 / FLAT ** 0.5)
    pad = FC1_PAD - FC1_OUT
    p["out1_wT"] = jnp.pad(w1, ((0, 0), (0, pad))).astype(jnp.bfloat16)
    p["out1_b"] = jnp.pad(b1, ((0, 0), (0, pad)))
    w2 = u((FC1_OUT, OUTPUT_DIM), 1.0 / FC1_OUT ** 0.5)
    p["out2_wT"] = jnp.pad(w2, ((0, pad), (0, 0))).astype(jnp.bfloat16)
    p["out2_b"] = u((1, OUTPUT_DIM), 1.0 / FC1_OUT ** 0.5)
    return p


# ------------------------------- wrapper -------------------------------------

def bilstm_forward(x, params):
    # Only wrapper-side layout op: pad + channels-last reshape of the 24 KB
    # image (the 3x3 conv itself, incl. im2col, runs inside the kernel).
    xp = jnp.pad(x, ((0, 0), (0, 0), (1, 1), (1, 1)))
    xcl = xp.transpose(0, 2, 3, 1).reshape(SEQ_LEN, PADW, LANE_IN)

    args = (xcl,
            params["conv_wk"], params["conv_b"],
            params["proj_wT"], params["proj_b"],
            params["l0_wih_f"], params["l0_wih_b"], params["l0_whh"], params["l0_b"],
            params["l1_wih_f"], params["l1_wih_b"], params["l1_whh"], params["l1_b"],
            params["out1_wT"], params["out1_b"],
            params["out2_wT"], params["out2_b"])
    in_specs = [VMEM_SPEC] * len(args)
    in_specs[13] = ANY_SPEC          # out1 weight stays in HBM; DMA'd in-kernel

    pred = pl.pallas_call(
        fused_forward_kernel,
        out_shape=jax.ShapeDtypeStruct((1, OUTPUT_DIM), jnp.float32),
        in_specs=in_specs,
        out_specs=VMEM_SPEC,
        scratch_shapes=[
            pltpu.VMEM((SEQ_LEN, 8 * HIDDEN), jnp.float32),   # combined gx rows
            pltpu.VMEM((SEQ_LEN, 2 * HIDDEN), jnp.float32),   # layer-1 output seq
            pltpu.VMEM((1, FLAT), jnp.float32),               # layer-2 flat output
            pltpu.VMEM((FLAT, FC1_PAD), jnp.bfloat16),        # out1 weight buffer
            pltpu.SemaphoreType.DMA,                          # out1 weight DMA sem
        ],
    )(*args)
    return pred[-1]                                           # (OUTPUT_DIM,)


if __name__ == "__main__":
    key = jax.random.PRNGKey(0)
    kx, kp = jax.random.split(key)
    x = jax.random.normal(kx, (SEQ_LEN, C_IN, IMG, IMG), jnp.float32)
    params = init_params(kp)

    fwd = jax.jit(lambda inp: bilstm_forward(inp, params))
    out = fwd(x)
    jax.block_until_ready(out)

    assert out.shape == (OUTPUT_DIM,), out.shape
    assert bool(jnp.all(jnp.isfinite(out)))
    print("KERNEL_OK")
</pallas_src>

<mosaic_0001>
module attributes {stable_mosaic.version = 11 : i64} {
  func.func @fused_forward_kernel(%arg0: memref<8x18x54xf32, #tpu.memory_space<vmem>>, %arg1: memref<3x54x128xbf16, #tpu.memory_space<vmem>>, %arg2: memref<1x128xf32, #tpu.memory_space<vmem>>, %arg3: memref<8x64xbf16, #tpu.memory_space<vmem>>, %arg4: memref<1x64xf32, #tpu.memory_space<vmem>>, %arg5: memref<64x256xbf16, #tpu.memory_space<vmem>>, %arg6: memref<64x256xbf16, #tpu.memory_space<vmem>>, %arg7: memref<64x256xbf16, #tpu.memory_space<vmem>>, %arg8: memref<1x256xf32, #tpu.memory_space<vmem>>, %arg9: memref<64x256xbf16, #tpu.memory_space<vmem>>, %arg10: memref<64x256xbf16, #tpu.memory_space<vmem>>, %arg11: memref<64x256xbf16, #tpu.memory_space<vmem>>, %arg12: memref<1x256xf32, #tpu.memory_space<vmem>>, %arg13: memref<512x1024xbf16, #tpu.memory_space<any>>, %arg14: memref<1x1024xf32, #tpu.memory_space<vmem>>, %arg15: memref<1024x2xbf16, #tpu.memory_space<vmem>>, %arg16: memref<1x2xf32, #tpu.memory_space<vmem>>, %arg17: memref<1x2xf32, #tpu.memory_space<vmem>>, %arg18: memref<8x256xf32, #tpu.memory_space<vmem>>, %arg19: memref<8x64xf32, #tpu.memory_space<vmem>>, %arg20: memref<1x512xf32, #tpu.memory_space<vmem>>, %arg21: memref<512x1024xbf16, #tpu.memory_space<vmem>>, %arg22: memref<!tpu.dma_semaphore, #tpu.memory_space<semaphore_mem>>) attributes {dimension_semantics = [], scalar_prefetch = 0 : i64, scratch_operands = 5 : i64, tpu.core_type = #tpu.core_type<tc>} {
    tpu.enqueue_dma source(%arg13 : memref<512x1024xbf16, #tpu.memory_space<any>>) target(%arg21 : memref<512x1024xbf16, #tpu.memory_space<vmem>>) target_semaphore(%arg22 : memref<!tpu.dma_semaphore, #tpu.memory_space<semaphore_mem>>)
    %c0 = arith.constant 0 : index
    %c0_0 = arith.constant 0 : index
    %c0_1 = arith.constant 0 : index
    %0 = vector.load %arg1[%c0, %c0_0, %c0_1] : memref<3x54x128xbf16, #tpu.memory_space<vmem>>, vector<1x54x128xbf16>
    %1 = vector.shape_cast %0 : vector<1x54x128xbf16> to vector<54x128xbf16>
    %c1 = arith.constant 1 : index
    %c0_2 = arith.constant 0 : index
    %c0_3 = arith.constant 0 : index
    %2 = vector.load %arg1[%c1, %c0_2, %c0_3] : memref<3x54x128xbf16, #tpu.memory_space<vmem>>, vector<1x54x128xbf16>
    %3 = vector.shape_cast %2 : vector<1x54x128xbf16> to vector<54x128xbf16>
    %c2 = arith.constant 2 : index
    %c0_4 = arith.constant 0 : index
    %c0_5 = arith.constant 0 : index
    %4 = vector.load %arg1[%c2, %c0_4, %c0_5] : memref<3x54x128xbf16, #tpu.memory_space<vmem>>, vector<1x54x128xbf16>
    %5 = vector.shape_cast %4 : vector<1x54x128xbf16> to vector<54x128xbf16>
    %c0_6 = arith.constant 0 : index
    %c0_7 = arith.constant 0 : index
    %6 = vector.load %arg2[%c0_6, %c0_7] : memref<1x128xf32, #tpu.memory_space<vmem>>, vector<1x128xf32>
    %7 = vector.shape_cast %6 : vector<1x128xf32> to vector<1x128xf32>
    %8 = vector.broadcast %7 : vector<1x128xf32> to vector<16x128xf32>
    %c0_8 = arith.constant 0 : index
    %c0_9 = arith.constant 0 : index
    %c0_10 = arith.constant 0 : index
    %9 = vector.load %arg0[%c0_8, %c0_9, %c0_10] : memref<8x18x54xf32, #tpu.memory_space<vmem>>, vector<1x16x54xf32>
    %10 = vector.shape_cast %9 : vector<1x16x54xf32> to vector<16x54xf32>
    %11 = arith.truncf %10 : vector<16x54xf32> to vector<16x54xbf16>
    %cst = arith.constant dense<0.000000e+00> : vector<16x128xf32>
    %12 = tpu.matmul %11, %1, %cst {dimension_numbers = #tpu.dot_dimension_numbers<[1], [0], [0], [1], [0, 0, 1, 1], [], []>} : vector<16x54xbf16>, vector<54x128xbf16>, vector<16x128xf32> -> vector<16x128xf32>
    %c0_11 = arith.constant 0 : index
    %c1_12 = arith.constant 1 : index
    %c0_13 = arith.constant 0 : index
    %13 = vector.load %arg0[%c0_11, %c1_12, %c0_13] : memref<8x18x54xf32, #tpu.memory_space<vmem>>, vector<1x16x54xf32>
    %14 = vector.shape_cast %13 : vector<1x16x54xf32> to vector<16x54xf32>
    %15 = arith.truncf %14 : vector<16x54xf32> to vector<16x54xbf16>
    %cst_14 = arith.constant dense<0.000000e+00> : vector<16x128xf32>
    %16 = tpu.matmul %15, %3, %cst_14 {dimension_numbers = #tpu.dot_dimension_numbers<[1], [0], [0], [1], [0, 0, 1, 1], [], []>} : vector<16x54xbf16>, vector<54x128xbf16>, vector<16x128xf32> -> vector<16x128xf32>
    %17 = arith.addf %12, %16 : vector<16x128xf32>
    %c0_15 = arith.constant 0 : index
    %c2_16 = arith.constant 2 : index
    %c0_17 = arith.constant 0 : index
    %18 = vector.load %arg0[%c0_15, %c2_16, %c0_17] : memref<8x18x54xf32, #tpu.memory_space<vmem>>, vector<1x16x54xf32>
    %19 = vector.shape_cast %18 : vector<1x16x54xf32> to vector<16x54xf32>
    %20 = arith.truncf %19 : vector<16x54xf32> to vector<16x54xbf16>
    %cst_18 = arith.constant dense<0.000000e+00> : vector<16x128xf32>
    %21 = tpu.matmul %20, %5, %cst_18 {dimension_numbers = #tpu.dot_dimension_numbers<[1], [0], [0], [1], [0, 0, 1, 1], [], []>} : vector<16x54xbf16>, vector<54x128xbf16>, vector<16x128xf32> -> vector<16x128xf32>
    %22 = arith.addf %17, %21 : vector<16x128xf32>
    %23 = arith.addf %22, %8 : vector<16x128xf32>
    %cst_19 = arith.constant 0.000000e+00 : f32
    %24 = vector.broadcast %cst_19 : f32 to vector<16x128xf32>
    %25 = arith.maximumf %23, %24 : vector<16x128xf32>
    %cst_20 = arith.constant dense<0.000000e+00> : vector<128xf32>
    %26 = vector.multi_reduction <add>, %25, %cst_20 [0] : vector<16x128xf32> to vector<128xf32>
    %27 = vector.shape_cast %26 : vector<128xf32> to vector<1x128xf32>
    %c1_21 = arith.constant 1 : index
    %c0_22 = arith.constant 0 : index
    %c0_23 = arith.constant 0 : index
    %28 = vector.load %arg0[%c1_21, %c0_22, %c0_23] : memref<8x18x54xf32, #tpu.memory_space<vmem>>, vector<1x16x54xf32>
    %29 = vector.shape_cast %28 : vector<1x16x54xf32> to vector<16x54xf32>
    %30 = arith.truncf %29 : vector<16x54xf32> to vector<16x54xbf16>
    %cst_24 = arith.constant dense<0.000000e+00> : vector<16x128xf32>
    %31 = tpu.matmul %30, %1, %cst_24 {dimension_numbers = #tpu.dot_dimension_numbers<[1], [0], [0], [1], [0, 0, 1, 1], [], []>} : vector<16x54xbf16>, vector<54x128xbf16>, vector<16x128xf32> -> vector<16x128xf32>
    %c1_25 = arith.constant 1 : index
    %c1_26 = arith.constant 1 : index
    %c0_27 = arith.constant 0 : index
    %32 = vector.load %arg0[%c1_25, %c1_26, %c0_27] : memref<8x18x54xf32, #tpu.memory_space<vmem>>, vector<1x16x54xf32>
    %33 = vector.shape_cast %32 : vector<1x16x54xf32> to vector<16x54xf32>
    %34 = arith.truncf %33 : vector<16x54xf32> to vector<16x54xbf16>
    %cst_28 = arith.constant dense<0.000000e+00> : vector<16x128xf32>
    %35 = tpu.matmul %34, %3, %cst_28 {dimension_numbers = #tpu.dot_dimension_numbers<[1], [0], [0], [1], [0, 0, 1, 1], [], []>} : vector<16x54xbf16>, vector<54x128xbf16>, vector<16x128xf32> -> vector<16x128xf32>
    %36 = arith.addf %31, %35 : vector<16x128xf32>
    %c1_29 = arith.constant 1 : index
    %c2_30 = arith.constant 2 : index
    %c0_31 = arith.constant 0 : index
    %37 = vector.load %arg0[%c1_29, %c2_30, %c0_31] : memref<8x18x54xf32, #tpu.memory_space<vmem>>, vector<1x16x54xf32>
    %38 = vector.shape_cast %37 : vector<1x16x54xf32> to vector<16x54xf32>
    %39 = arith.truncf %38 : vector<16x54xf32> to vector<16x54xbf16>
    %cst_32 = arith.constant dense<0.000000e+00> : vector<16x128xf32>
    %40 = tpu.matmul %39, %5, %cst_32 {dimension_numbers = #tpu.dot_dimension_numbers<[1], [0], [0], [1], [0, 0, 1, 1], [], []>} : vector<16x54xbf16>, vector<54x128xbf16>, vector<16x128xf32> -> vector<16x128xf32>
    %41 = arith.addf %36, %40 : vector<16x128xf32>
    %42 = arith.addf %41, %8 : vector<16x128xf32>
    %cst_33 = arith.constant 0.000000e+00 : f32
    %43 = vector.broadcast %cst_33 : f32 to vector<16x128xf32>
    %44 = arith.maximumf %42, %43 : vector<16x128xf32>
    %cst_34 = arith.constant dense<0.000000e+00> : vector<128xf32>
    %45 = vector.multi_reduction <add>, %44, %cst_34 [0] : vector<16x128xf32> to vector<128xf32>
    %46 = vector.shape_cast %45 : vector<128xf32> to vector<1x128xf32>
    %c2_35 = arith.constant 2 : index
    %c0_36 = arith.constant 0 : index
    %c0_37 = arith.constant 0 : index
    %47 = vector.load %arg0[%c2_35, %c0_36, %c0_37] : memref<8x18x54xf32, #tpu.memory_space<vmem>>, vector<1x16x54xf32>
    %48 = vector.shape_cast %47 : vector<1x16x54xf32> to vector<16x54xf32>
    %49 = arith.truncf %48 : vector<16x54xf32> to vector<16x54xbf16>
    %cst_38 = arith.constant dense<0.000000e+00> : vector<16x128xf32>
    %50 = tpu.matmul %49, %1, %cst_38 {dimension_numbers = #tpu.dot_dimension_numbers<[1], [0], [0], [1], [0, 0, 1, 1], [], []>} : vector<16x54xbf16>, vector<54x128xbf16>, vector<16x128xf32> -> vector<16x128xf32>
    %c2_39 = arith.constant 2 : index
    %c1_40 = arith.constant 1 : index
    %c0_41 = arith.constant 0 : index
    %51 = vector.load %arg0[%c2_39, %c1_40, %c0_41] : memref<8x18x54xf32, #tpu.memory_space<vmem>>, vector<1x16x54xf32>
    %52 = vector.shape_cast %51 : vector<1x16x54xf32> to vector<16x54xf32>
    %53 = arith.truncf %52 : vector<16x54xf32> to vector<16x54xbf16>
    %cst_42 = arith.constant dense<0.000000e+00> : vector<16x128xf32>
    %54 = tpu.matmul %53, %3, %cst_42 {dimension_numbers = #tpu.dot_dimension_numbers<[1], [0], [0], [1], [0, 0, 1, 1], [], []>} : vector<16x54xbf16>, vector<54x128xbf16>, vector<16x128xf32> -> vector<16x128xf32>
    %55 = arith.addf %50, %54 : vector<16x128xf32>
    %c2_43 = arith.constant 2 : index
    %c2_44 = arith.constant 2 : index
    %c0_45 = arith.constant 0 : index
    %56 = vector.load %arg0[%c2_43, %c2_44, %c0_45] : memref<8x18x54xf32, #tpu.memory_space<vmem>>, vector<1x16x54xf32>
    %57 = vector.shape_cast %56 : vector<1x16x54xf32> to vector<16x54xf32>
    %58 = arith.truncf %57 : vector<16x54xf32> to vector<16x54xbf16>
    %cst_46 = arith.constant dense<0.000000e+00> : vector<16x128xf32>
    %59 = tpu.matmul %58, %5, %cst_46 {dimension_numbers = #tpu.dot_dimension_numbers<[1], [0], [0], [1], [0, 0, 1, 1], [], []>} : vector<16x54xbf16>, vector<54x128xbf16>, vector<16x128xf32> -> vector<16x128xf32>
    %60 = arith.addf %55, %59 : vector<16x128xf32>
    %61 = arith.addf %60, %8 : vector<16x128xf32>
    %cst_47 = arith.constant 0.000000e+00 : f32
    %62 = vector.broadcast %cst_47 : f32 to vector<16x128xf32>
    %63 = arith.maximumf %61, %62 : vector<16x128xf32>
    %cst_48 = arith.constant dense<0.000000e+00> : vector<128xf32>
    %64 = vector.multi_reduction <add>, %63, %cst_48 [0] : vector<16x128xf32> to vector<128xf32>
    %65 = vector.shape_cast %64 : vector<128xf32> to vector<1x128xf32>
    %c3 = arith.constant 3 : index
    %c0_49 = arith.constant 0 : index
    %c0_50 = arith.constant 0 : index
    %66 = vector.load %arg0[%c3, %c0_49, %c0_50] : memref<8x18x54xf32, #tpu.memory_space<vmem>>, vector<1x16x54xf32>
    %67 = vector.shape_cast %66 : vector<1x16x54xf32> to vector<16x54xf32>
    %68 = arith.truncf %67 : vector<16x54xf32> to vector<16x54xbf16>
    %cst_51 = arith.constant dense<0.000000e+00> : vector<16x128xf32>
    %69 = tpu.matmul %68, %1, %cst_51 {dimension_numbers = #tpu.dot_dimension_numbers<[1], [0], [0], [1], [0, 0, 1, 1], [], []>} : vector<16x54xbf16>, vector<54x128xbf16>, vector<16x128xf32> -> vector<16x128xf32>
    %c3_52 = arith.constant 3 : index
    %c1_53 = arith.constant 1 : index
    %c0_54 = arith.constant 0 : index
    %70 = vector.load %arg0[%c3_52, %c1_53, %c0_54] : memref<8x18x54xf32, #tpu.memory_space<vmem>>, vector<1x16x54xf32>
    %71 = vector.shape_cast %70 : vector<1x16x54xf32> to vector<16x54xf32>
    %72 = arith.truncf %71 : vector<16x54xf32> to vector<16x54xbf16>
    %cst_55 = arith.constant dense<0.000000e+00> : vector<16x128xf32>
    %73 = tpu.matmul %72, %3, %cst_55 {dimension_numbers = #tpu.dot_dimension_numbers<[1], [0], [0], [1], [0, 0, 1, 1], [], []>} : vector<16x54xbf16>, vector<54x128xbf16>, vector<16x128xf32> -> vector<16x128xf32>
    %74 = arith.addf %69, %73 : vector<16x128xf32>
    %c3_56 = arith.constant 3 : index
    %c2_57 = arith.constant 2 : index
    %c0_58 = arith.constant 0 : index
    %75 = vector.load %arg0[%c3_56, %c2_57, %c0_58] : memref<8x18x54xf32, #tpu.memory_space<vmem>>, vector<1x16x54xf32>
    %76 = vector.shape_cast %75 : vector<1x16x54xf32> to vector<16x54xf32>
    %77 = arith.truncf %76 : vector<16x54xf32> to vector<16x54xbf16>
    %cst_59 = arith.constant dense<0.000000e+00> : vector<16x128xf32>
    %78 = tpu.matmul %77, %5, %cst_59 {dimension_numbers = #tpu.dot_dimension_numbers<[1], [0], [0], [1], [0, 0, 1, 1], [], []>} : vector<16x54xbf16>, vector<54x128xbf16>, vector<16x128xf32> -> vector<16x128xf32>
    %79 = arith.addf %74, %78 : vector<16x128xf32>
    %80 = arith.addf %79, %8 : vector<16x128xf32>
    %cst_60 = arith.constant 0.000000e+00 : f32
    %81 = vector.broadcast %cst_60 : f32 to vector<16x128xf32>
    %82 = arith.maximumf %80, %81 : vector<16x128xf32>
    %cst_61 = arith.constant dense<0.000000e+00> : vector<128xf32>
    %83 = vector.multi_reduction <add>, %82, %cst_61 [0] : vector<16x128xf32> to vector<128xf32>
    %84 = vector.shape_cast %83 : vector<128xf32> to vector<1x128xf32>
    %c4 = arith.constant 4 : index
    %c0_62 = arith.constant 0 : index
    %c0_63 = arith.constant 0 : index
    %85 = vector.load %arg0[%c4, %c0_62, %c0_63] : memref<8x18x54xf32, #tpu.memory_space<vmem>>, vector<1x16x54xf32>
    %86 = vector.shape_cast %85 : vector<1x16x54xf32> to vector<16x54xf32>
    %87 = arith.truncf %86 : vector<16x54xf32> to vector<16x54xbf16>
    %cst_64 = arith.constant dense<0.000000e+00> : vector<16x128xf32>
    %88 = tpu.matmul %87, %1, %cst_64 {dimension_numbers = #tpu.dot_dimension_numbers<[1], [0], [0], [1], [0, 0, 1, 1], [], []>} : vector<16x54xbf16>, vector<54x128xbf16>, vector<16x128xf32> -> vector<16x128xf32>
    %c4_65 = arith.constant 4 : index
    %c1_66 = arith.constant 1 : index
    %c0_67 = arith.constant 0 : index
    %89 = vector.load %arg0[%c4_65, %c1_66, %c0_67] : memref<8x18x54xf32, #tpu.memory_space<vmem>>, vector<1x16x54xf32>
    %90 = vector.shape_cast %89 : vector<1x16x54xf32> to vector<16x54xf32>
    %91 = arith.truncf %90 : vector<16x54xf32> to vector<16x54xbf16>
    %cst_68 = arith.constant dense<0.000000e+00> : vector<16x128xf32>
    %92 = tpu.matmul %91, %3, %cst_68 {dimension_numbers = #tpu.dot_dimension_numbers<[1], [0], [0], [1], [0, 0, 1, 1], [], []>} : vector<16x54xbf16>, vector<54x128xbf16>, vector<16x128xf32> -> vector<16x128xf32>
    %93 = arith.addf %88, %92 : vector<16x128xf32>
    %c4_69 = arith.constant 4 : index
    %c2_70 = arith.constant 2 : index
    %c0_71 = arith.constant 0 : index
    %94 = vector.load %arg0[%c4_69, %c2_70, %c0_71] : memref<8x18x54xf32, #tpu.memory_space<vmem>>, vector<1x16x54xf32>
    %95 = vector.shape_cast %94 : vector<1x16x54xf32> to vector<16x54xf32>
    %96 = arith.truncf %95 : vector<16x54xf32> to vector<16x54xbf16>
    %cst_72 = arith.constant dense<0.000000e+00> : vector<16x128xf32>
    %97 = tpu.matmul %96, %5, %cst_72 {dimension_numbers = #tpu.dot_dimension_numbers<[1], [0], [0], [1], [0, 0, 1, 1], [], []>} : vector<16x54xbf16>, vector<54x128xbf16>, vector<16x128xf32> -> vector<16x128xf32>
    %98 = arith.addf %93, %97 : vector<16x128xf32>
    %99 = arith.addf %98, %8 : vector<16x128xf32>
    %cst_73 = arith.constant 0.000000e+00 : f32
    %100 = vector.broadcast %cst_73 : f32 to vector<16x128xf32>
    %101 = arith.maximumf %99, %100 : vector<16x128xf32>
    %cst_74 = arith.constant dense<0.000000e+00> : vector<128xf32>
    %102 = vector.multi_reduction <add>, %101, %cst_74 [0] : vector<16x128xf32> to vector<128xf32>
    %103 = vector.shape_cast %102 : vector<128xf32> to vector<1x128xf32>
    %c5 = arith.constant 5 : index
    %c0_75 = arith.constant 0 : index
    %c0_76 = arith.constant 0 : index
    %104 = vector.load %arg0[%c5, %c0_75, %c0_76] : memref<8x18x54xf32, #tpu.memory_space<vmem>>, vector<1x16x54xf32>
    %105 = vector.shape_cast %104 : vector<1x16x54xf32> to vector<16x54xf32>
    %106 = arith.truncf %105 : vector<16x54xf32> to vector<16x54xbf16>
    %cst_77 = arith.constant dense<0.000000e+00> : vector<16x128xf32>
    %107 = tpu.matmul %106, %1, %cst_77 {dimension_numbers = #tpu.dot_dimension_numbers<[1], [0], [0], [1], [0, 0, 1, 1], [], []>} : vector<16x54xbf16>, vector<54x128xbf16>, vector<16x128xf32> -> vector<16x128xf32>
    %c5_78 = arith.constant 5 : index
    %c1_79 = arith.constant 1 : index
    %c0_80 = arith.constant 0 : index
    %108 = vector.load %arg0[%c5_78, %c1_79, %c0_80] : memref<8x18x54xf32, #tpu.memory_space<vmem>>, vector<1x16x54xf32>
    %109 = vector.shape_cast %108 : vector<1x16x54xf32> to vector<16x54xf32>
    %110 = arith.truncf %109 : vector<16x54xf32> to vector<16x54xbf16>
    %cst_81 = arith.constant dense<0.000000e+00> : vector<16x128xf32>
    %111 = tpu.matmul %110, %3, %cst_81 {dimension_numbers = #tpu.dot_dimension_numbers<[1], [0], [0], [1], [0, 0, 1, 1], [], []>} : vector<16x54xbf16>, vector<54x128xbf16>, vector<16x128xf32> -> vector<16x128xf32>
    %112 = arith.addf %107, %111 : vector<16x128xf32>
    %c5_82 = arith.constant 5 : index
    %c2_83 = arith.constant 2 : index
    %c0_84 = arith.constant 0 : index
    %113 = vector.load %arg0[%c5_82, %c2_83, %c0_84] : memref<8x18x54xf32, #tpu.memory_space<vmem>>, vector<1x16x54xf32>
    %114 = vector.shape_cast %113 : vector<1x16x54xf32> to vector<16x54xf32>
    %115 = arith.truncf %114 : vector<16x54xf32> to vector<16x54xbf16>
    %cst_85 = arith.constant dense<0.000000e+00> : vector<16x128xf32>
    %116 = tpu.matmul %115, %5, %cst_85 {dimension_numbers = #tpu.dot_dimension_numbers<[1], [0], [0], [1], [0, 0, 1, 1], [], []>} : vector<16x54xbf16>, vector<54x128xbf16>, vector<16x128xf32> -> vector<16x128xf32>
    %117 = arith.addf %112, %116 : vector<16x128xf32>
    %118 = arith.addf %117, %8 : vector<16x128xf32>
    %cst_86 = arith.constant 0.000000e+00 : f32
    %119 = vector.broadcast %cst_86 : f32 to vector<16x128xf32>
    %120 = arith.maximumf %118, %119 : vector<16x128xf32>
    %cst_87 = arith.constant dense<0.000000e+00> : vector<128xf32>
    %121 = vector.multi_reduction <add>, %120, %cst_87 [0] : vector<16x128xf32> to vector<128xf32>
    %122 = vector.shape_cast %121 : vector<128xf32> to vector<1x128xf32>
    %c6 = arith.constant 6 : index
    %c0_88 = arith.constant 0 : index
    %c0_89 = arith.constant 0 : index
    %123 = vector.load %arg0[%c6, %c0_88, %c0_89] : memref<8x18x54xf32, #tpu.memory_space<vmem>>, vector<1x16x54xf32>
    %124 = vector.shape_cast %123 : vector<1x16x54xf32> to vector<16x54xf32>
    %125 = arith.truncf %124 : vector<16x54xf32> to vector<16x54xbf16>
    %cst_90 = arith.constant dense<0.000000e+00> : vector<16x128xf32>
    %126 = tpu.matmul %125, %1, %cst_90 {dimension_numbers = #tpu.dot_dimension_numbers<[1], [0], [0], [1], [0, 0, 1, 1], [], []>} : vector<16x54xbf16>, vector<54x128xbf16>, vector<16x128xf32> -> vector<16x128xf32>
    %c6_91 = arith.constant 6 : index
    %c1_92 = arith.constant 1 : index
    %c0_93 = arith.constant 0 : index
    %127 = vector.load %arg0[%c6_91, %c1_92, %c0_93] : memref<8x18x54xf32, #tpu.memory_space<vmem>>, vector<1x16x54xf32>
    %128 = vector.shape_cast %127 : vector<1x16x54xf32> to vector<16x54xf32>
    %129 = arith.truncf %128 : vector<16x54xf32> to vector<16x54xbf16>
    %cst_94 = arith.constant dense<0.000000e+00> : vector<16x128xf32>
    %130 = tpu.matmul %129, %3, %cst_94 {dimension_numbers = #tpu.dot_dimension_numbers<[1], [0], [0], [1], [0, 0, 1, 1], [], []>} : vector<16x54xbf16>, vector<54x128xbf16>, vector<16x128xf32> -> vector<16x128xf32>
    %131 = arith.addf %126, %130 : vector<16x128xf32>
    %c6_95 = arith.constant 6 : index
    %c2_96 = arith.constant 2 : index
    %c0_97 = arith.constant 0 : index
    %132 = vector.load %arg0[%c6_95, %c2_96, %c0_97] : memref<8x18x54xf32, #tpu.memory_space<vmem>>, vector<1x16x54xf32>
    %133 = vector.shape_cast %132 : vector<1x16x54xf32> to vector<16x54xf32>
    %134 = arith.truncf %133 : vector<16x54xf32> to vector<16x54xbf16>
    %cst_98 = arith.constant dense<0.000000e+00> : vector<16x128xf32>
    %135 = tpu.matmul %134, %5, %cst_98 {dimension_numbers = #tpu.dot_dimension_numbers<[1], [0], [0], [1], [0, 0, 1, 1], [], []>} : vector<16x54xbf16>, vector<54x128xbf16>, vector<16x128xf32> -> vector<16x128xf32>
    %136 = arith.addf %131, %135 : vector<16x128xf32>
    %137 = arith.addf %136, %8 : vector<16x128xf32>
    %cst_99 = arith.constant 0.000000e+00 : f32
    %138 = vector.broadcast %cst_99 : f32 to vector<16x128xf32>
    %139 = arith.maximumf %137, %138 : vector<16x128xf32>
    %cst_100 = arith.constant dense<0.000000e+00> : vector<128xf32>
    %140 = vector.multi_reduction <add>, %139, %cst_100 [0] : vector<16x128xf32> to vector<128xf32>
    %141 = vector.shape_cast %140 : vector<128xf32> to vector<1x128xf32>
    %c7 = arith.constant 7 : index
    %c0_101 = arith.constant 0 : index
    %c0_102 = arith.constant 0 : index
    %142 = vector.load %arg0[%c7, %c0_101, %c0_102] : memref<8x18x54xf32, #tpu.memory_space<vmem>>, vector<1x16x54xf32>
    %143 = vector.shape_cast %142 : vector<1x16x54xf32> to vector<16x54xf32>
    %144 = arith.truncf %143 : vector<16x54xf32> to vector<16x54xbf16>
    %cst_103 = arith.constant dense<0.000000e+00> : vector<16x128xf32>
    %145 = tpu.matmul %144, %1, %cst_103 {dimension_numbers = #tpu.dot_dimension_numbers<[1], [0], [0], [1], [0, 0, 1, 1], [], []>} : vector<16x54xbf16>, vector<54x128xbf16>, vector<16x128xf32> -> vector<16x128xf32>
    %c7_104 = arith.constant 7 : index
    %c1_105 = arith.constant 1 : index
    %c0_106 = arith.constant 0 : index
    %146 = vector.load %arg0[%c7_104, %c1_105, %c0_106] : memref<8x18x54xf32, #tpu.memory_space<vmem>>, vector<1x16x54xf32>
    %147 = vector.shape_cast %146 : vector<1x16x54xf32> to vector<16x54xf32>
    %148 = arith.truncf %147 : vector<16x54xf32> to vector<16x54xbf16>
    %cst_107 = arith.constant dense<0.000000e+00> : vector<16x128xf32>
    %149 = tpu.matmul %148, %3, %cst_107 {dimension_numbers = #tpu.dot_dimension_numbers<[1], [0], [0], [1], [0, 0, 1, 1], [], []>} : vector<16x54xbf16>, vector<54x128xbf16>, vector<16x128xf32> -> vector<16x128xf32>
    %150 = arith.addf %145, %149 : vector<16x128xf32>
    %c7_108 = arith.constant 7 : index
    %c2_109 = arith.constant 2 : index
    %c0_110 = arith.constant 0 : index
    %151 = vector.load %arg0[%c7_108, %c2_109, %c0_110] : memref<8x18x54xf32, #tpu.memory_space<vmem>>, vector<1x16x54xf32>
    %152 = vector.shape_cast %151 : vector<1x16x54xf32> to vector<16x54xf32>
    %153 = arith.truncf %152 : vector<16x54xf32> to vector<16x54xbf16>
    %cst_111 = arith.constant dense<0.000000e+00> : vector<16x128xf32>
    %154 = tpu.matmul %153, %5, %cst_111 {dimension_numbers = #tpu.dot_dimension_numbers<[1], [0], [0], [1], [0, 0, 1, 1], [], []>} : vector<16x54xbf16>, vector<54x128xbf16>, vector<16x128xf32> -> vector<16x128xf32>
    %155 = arith.addf %150, %154 : vector<16x128xf32>
    %156 = arith.addf %155, %8 : vector<16x128xf32>
    %cst_112 = arith.constant 0.000000e+00 : f32
    %157 = vector.broadcast %cst_112 : f32 to vector<16x128xf32>
    %158 = arith.maximumf %156, %157 : vector<16x128xf32>
    %cst_113 = arith.constant dense<0.000000e+00> : vector<128xf32>
    %159 = vector.multi_reduction <add>, %158, %cst_113 [0] : vector<16x128xf32> to vector<128xf32>
    %160 = vector.shape_cast %159 : vector<128xf32> to vector<1x128xf32>
    %161 = tpu.concatenate %27, %46, %65, %84, %103, %122, %141, %160 in 0 : vector<1x128xf32>, vector<1x128xf32>, vector<1x128xf32>, vector<1x128xf32>, vector<1x128xf32>, vector<1x128xf32>, vector<1x128xf32>, vector<1x128xf32> -> vector<8x128xf32>
    %162 = vector.extract_strided_slice %161 {offsets = [0, 0], sizes = [8, 8], strides = [1, 1]} : vector<8x128xf32> to vector<8x8xf32>
    %163 = vector.extract_strided_slice %161 {offsets = [0, 8], sizes = [8, 8], strides = [1, 1]} : vector<8x128xf32> to vector<8x8xf32>
    %164 = arith.addf %162, %163 : vector<8x8xf32>
    %165 = vector.extract_strided_slice %161 {offsets = [0, 16], sizes = [8, 8], strides = [1, 1]} : vector<8x128xf32> to vector<8x8xf32>
    %166 = arith.addf %164, %165 : vector<8x8xf32>
    %167 = vector.extract_strided_slice %161 {offsets = [0, 24], sizes = [8, 8], strides = [1, 1]} : vector<8x128xf32> to vector<8x8xf32>
    %168 = arith.addf %166, %167 : vector<8x8xf32>
    %169 = vector.extract_strided_slice %161 {offsets = [0, 32], sizes = [8, 8], strides = [1, 1]} : vector<8x128xf32> to vector<8x8xf32>
    %170 = arith.addf %168, %169 : vector<8x8xf32>
    %171 = vector.extract_strided_slice %161 {offsets = [0, 40], sizes = [8, 8], strides = [1, 1]} : vector<8x128xf32> to vector<8x8xf32>
    %172 = arith.addf %170, %171 : vector<8x8xf32>
    %173 = vector.extract_strided_slice %161 {offsets = [0, 48], sizes = [8, 8], strides = [1, 1]} : vector<8x128xf32> to vector<8x8xf32>
    %174 = arith.addf %172, %173 : vector<8x8xf32>
    %175 = vector.extract_strided_slice %161 {offsets = [0, 56], sizes = [8, 8], strides = [1, 1]} : vector<8x128xf32> to vector<8x8xf32>
    %176 = arith.addf %174, %175 : vector<8x8xf32>
    %177 = vector.extract_strided_slice %161 {offsets = [0, 64], sizes = [8, 8], strides = [1, 1]} : vector<8x128xf32> to vector<8x8xf32>
    %178 = arith.addf %176, %177 : vector<8x8xf32>
    %179 = vector.extract_strided_slice %161 {offsets = [0, 72], sizes = [8, 8], strides = [1, 1]} : vector<8x128xf32> to vector<8x8xf32>
    %180 = arith.addf %178, %179 : vector<8x8xf32>
    %181 = vector.extract_strided_slice %161 {offsets = [0, 80], sizes = [8, 8], strides = [1, 1]} : vector<8x128xf32> to vector<8x8xf32>
    %182 = arith.addf %180, %181 : vector<8x8xf32>
    %183 = vector.extract_strided_slice %161 {offsets = [0, 88], sizes = [8, 8], strides = [1, 1]} : vector<8x128xf32> to vector<8x8xf32>
    %184 = arith.addf %182, %183 : vector<8x8xf32>
    %185 = vector.extract_strided_slice %161 {offsets = [0, 96], sizes = [8, 8], strides = [1, 1]} : vector<8x128xf32> to vector<8x8xf32>
    %186 = arith.addf %184, %185 : vector<8x8xf32>
    %187 = vector.extract_strided_slice %161 {offsets = [0, 104], sizes = [8, 8], strides = [1, 1]} : vector<8x128xf32> to vector<8x8xf32>
    %188 = arith.addf %186, %187 : vector<8x8xf32>
    %189 = vector.extract_strided_slice %161 {offsets = [0, 112], sizes = [8, 8], strides = [1, 1]} : vector<8x128xf32> to vector<8x8xf32>
    %190 = arith.addf %188, %189 : vector<8x8xf32>
    %191 = vector.extract_strided_slice %161 {offsets = [0, 120], sizes = [8, 8], strides = [1, 1]} : vector<8x128xf32> to vector<8x8xf32>
    %192 = arith.addf %190, %191 : vector<8x8xf32>
    %cst_114 = arith.constant 3.906250e-03 : f32
    %193 = vector.broadcast %cst_114 : f32 to vector<8x8xf32>
    %194 = arith.mulf %192, %193 : vector<8x8xf32>
    %195 = arith.truncf %194 : vector<8x8xf32> to vector<8x8xbf16>
    %c0_115 = arith.constant 0 : index
    %c0_116 = arith.constant 0 : index
    %196 = vector.load %arg3[%c0_115, %c0_116] : memref<8x64xbf16, #tpu.memory_space<vmem>>, vector<8x64xbf16>
    %cst_117 = arith.constant dense<0.000000e+00> : vector<8x64xf32>
    %197 = tpu.matmul %195, %196, %cst_117 {dimension_numbers = #tpu.dot_dimension_numbers<[1], [0], [0], [1], [0, 0, 1, 1], [], []>} : vector<8x8xbf16>, vector<8x64xbf16>, vector<8x64xf32> -> vector<8x64xf32>
    %c0_118 = arith.constant 0 : index
    %c0_119 = arith.constant 0 : index
    %198 = vector.load %arg4[%c0_118, %c0_119] : memref<1x64xf32, #tpu.memory_space<vmem>>, vector<1x64xf32>
    %199 = vector.broadcast %198 : vector<1x64xf32> to vector<8x64xf32>
    %200 = arith.addf %197, %199 : vector<8x64xf32>
    %cst_120 = arith.constant 0.000000e+00 : f32
    %201 = vector.broadcast %cst_120 : f32 to vector<8x64xf32>
    %202 = arith.maximumf %200, %201 : vector<8x64xf32>
    %203 = tpu.iota {dimensions = array<i32: 0>} : vector<8x8xi32>
    %204 = tpu.iota {dimensions = array<i32: 1>} : vector<8x8xi32>
    %205 = arith.addi %203, %204 : vector<8x8xi32>
    %c7_i32 = arith.constant 7 : i32
    %206 = vector.broadcast %c7_i32 : i32 to vector<8x8xi32>
    %207 = arith.cmpi eq, %205, %206 : vector<8x8xi32>
    %208 = arith.extui %207 : vector<8x8xi1> to vector<8x8xi32>
    %209 = arith.sitofp %208 : vector<8x8xi32> to vector<8x8xf32>
    %210 = arith.truncf %209 : vector<8x8xf32> to vector<8x8xbf16>
    %211 = arith.truncf %202 : vector<8x64xf32> to vector<8x64xbf16>
    %cst_121 = arith.constant dense<0.000000e+00> : vector<8x64xf32>
    %212 = tpu.matmul %210, %211, %cst_121 {dimension_numbers = #tpu.dot_dimension_numbers<[1], [0], [0], [1], [0, 0, 1, 1], [], []>} : vector<8x8xbf16>, vector<8x64xbf16>, vector<8x64xf32> -> vector<8x64xf32>
    %213 = arith.truncf %212 : vector<8x64xf32> to vector<8x64xbf16>
    %c0_122 = arith.constant 0 : index
    %c0_123 = arith.constant 0 : index
    %214 = vector.load %arg5[%c0_122, %c0_123] : memref<64x256xbf16, #tpu.memory_space<vmem>>, vector<64x256xbf16>
    %cst_124 = arith.constant dense<0.000000e+00> : vector<8x256xf32>
    %215 = tpu.matmul %211, %214, %cst_124 {dimension_numbers = #tpu.dot_dimension_numbers<[1], [0], [0], [1], [0, 0, 1, 1], [], []>} : vector<8x64xbf16>, vector<64x256xbf16>, vector<8x256xf32> -> vector<8x256xf32>
    %c0_125 = arith.constant 0 : index
    %c0_126 = arith.constant 0 : index
    %216 = vector.load %arg6[%c0_125, %c0_126] : memref<64x256xbf16, #tpu.memory_space<vmem>>, vector<64x256xbf16>
    %cst_127 = arith.constant dense<0.000000e+00> : vector<8x256xf32>
    %217 = tpu.matmul %213, %216, %cst_127 {dimension_numbers = #tpu.dot_dimension_numbers<[1], [0], [0], [1], [0, 0, 1, 1], [], []>} : vector<8x64xbf16>, vector<64x256xbf16>, vector<8x256xf32> -> vector<8x256xf32>
    %218 = arith.addf %215, %217 : vector<8x256xf32>
    %c0_128 = arith.constant 0 : index
    %c0_129 = arith.constant 0 : index
    %219 = vector.load %arg8[%c0_128, %c0_129] : memref<1x256xf32, #tpu.memory_space<vmem>>, vector<1x256xf32>
    %220 = vector.broadcast %219 : vector<1x256xf32> to vector<8x256xf32>
    %221 = arith.addf %218, %220 : vector<8x256xf32>
    %c0_130 = arith.constant 0 : index
    %c0_131 = arith.constant 0 : index
    %222 = vector.load %arg18[%c0_130, %c0_131] : memref<8x256xf32, #tpu.memory_space<vmem>>, vector<8x256xf32>
    tpu.vector_store %arg18[%c0_130, %c0_131], %221 {strides = array<i32>} : memref<8x256xf32, #tpu.memory_space<vmem>>, vector<8x256xf32>,
    %c0_132 = arith.constant 0 : index
    %c0_133 = arith.constant 0 : index
    %223 = vector.load %arg7[%c0_132, %c0_133] : memref<64x256xbf16, #tpu.memory_space<vmem>>, vector<64x256xbf16>
    %cst_134 = arith.constant 0.000000e+00 : f32
    %224 = vector.broadcast %cst_134 : f32 to vector<1x64xf32>
    %cst_135 = arith.constant 0.000000e+00 : f32
    %225 = vector.broadcast %cst_135 : f32 to vector<1x64xf32>
    %c0_136 = arith.constant 0 : index
    %c0_137 = arith.constant 0 : index
    %226 = vector.load %arg18[%c0_136, %c0_137] : memref<8x256xf32, #tpu.memory_space<vmem>>, vector<1x256xf32>
    %227 = arith.truncf %224 : vector<1x64xf32> to vector<1x64xbf16>
    %cst_138 = arith.constant dense<0.000000e+00> : vector<1x256xf32>
    %228 = tpu.matmul %227, %223, %cst_138 {dimension_numbers = #tpu.dot_dimension_numbers<[1], [0], [0], [1], [0, 0, 1, 1], [], []>} : vector<1x64xbf16>, vector<64x256xbf16>, vector<1x256xf32> -> vector<1x256xf32>
    %229 = arith.addf %226, %228 : vector<1x256xf32>
    %230 = vector.extract_strided_slice %229 {offsets = [0, 0], sizes = [1, 192], strides = [1, 1]} : vector<1x256xf32> to vector<1x192xf32>
    %231 = arith.negf %230 : vector<1x192xf32>
    %232 = math.exp %231 : vector<1x192xf32>
    %cst_139 = arith.constant 1.000000e+00 : f32
    %233 = vector.broadcast %cst_139 : f32 to vector<1x192xf32>
    %234 = arith.addf %233, %232 : vector<1x192xf32>
    %235 = arith.divf %233, %234 : vector<1x192xf32>
    %236 = vector.extract_strided_slice %235 {offsets = [0, 0], sizes = [1, 64], strides = [1, 1]} : vector<1x192xf32> to vector<1x64xf32>
    %237 = vector.extract_strided_slice %235 {offsets = [0, 64], sizes = [1, 64], strides = [1, 1]} : vector<1x192xf32> to vector<1x64xf32>
    %238 = vector.extract_strided_slice %235 {offsets = [0, 128], sizes = [1, 64], strides = [1, 1]} : vector<1x192xf32> to vector<1x64xf32>
    %239 = vector.extract_strided_slice %229 {offsets = [0, 192], sizes = [1, 64], strides = [1, 1]} : vector<1x256xf32> to vector<1x64xf32>
    %240 = math.tanh %239 : vector<1x64xf32>
    %241 = arith.mulf %237, %225 : vector<1x64xf32>
    %242 = arith.mulf %236, %240 : vector<1x64xf32>
    %243 = arith.addf %241, %242 : vector<1x64xf32>
    %244 = math.tanh %243 : vector<1x64xf32>
    %245 = arith.mulf %238, %244 : vector<1x64xf32>
    %246 = vector.extract_strided_slice %245 {offsets = [0, 0], sizes = [1, 32], strides = [1, 1]} : vector<1x64xf32> to vector<1x32xf32>
    %c0_140 = arith.constant 0 : index
    %c0_141 = arith.constant 0 : index
    %247 = vector.load %arg19[%c0_140, %c0_141] : memref<8x64xf32, #tpu.memory_space<vmem>>, vector<1x32xf32>
    tpu.vector_store %arg19[%c0_140, %c0_141], %246 {strides = array<i32>} : memref<8x64xf32, #tpu.memory_space<vmem>>, vector<1x32xf32>,
    %248 = vector.extract_strided_slice %245 {offsets = [0, 32], sizes = [1, 32], strides = [1, 1]} : vector<1x64xf32> to vector<1x32xf32>
    %c7_142 = arith.constant 7 : index
    %c32 = arith.constant 32 : index
    %249 = vector.load %arg19[%c7_142, %c32] : memref<8x64xf32, #tpu.memory_space<vmem>>, vector<1x32xf32>
    tpu.vector_store %arg19[%c7_142, %c32], %248 {strides = array<i32>} : memref<8x64xf32, #tpu.memory_space<vmem>>, vector<1x32xf32>,
    %c1_143 = arith.constant 1 : index
    %c0_144 = arith.constant 0 : index
    %250 = vector.load %arg18[%c1_143, %c0_144] : memref<8x256xf32, #tpu.memory_space<vmem>>, vector<1x256xf32>
    %251 = arith.truncf %245 : vector<1x64xf32> to vector<1x64xbf16>
    %cst_145 = arith.constant dense<0.000000e+00> : vector<1x256xf32>
    %252 = tpu.matmul %251, %223, %cst_145 {dimension_numbers = #tpu.dot_dimension_numbers<[1], [0], [0], [1], [0, 0, 1, 1], [], []>} : vector<1x64xbf16>, vector<64x256xbf16>, vector<1x256xf32> -> vector<1x256xf32>
    %253 = arith.addf %250, %252 : vector<1x256xf32>
    %254 = vector.extract_strided_slice %253 {offsets = [0, 0], sizes = [1, 192], strides = [1, 1]} : vector<1x256xf32> to vector<1x192xf32>
    %255 = arith.negf %254 : vector<1x192xf32>
    %256 = math.exp %255 : vector<1x192xf32>
    %cst_146 = arith.constant 1.000000e+00 : f32
    %257 = vector.broadcast %cst_146 : f32 to vector<1x192xf32>
    %258 = arith.addf %257, %256 : vector<1x192xf32>
    %259 = arith.divf %257, %258 : vector<1x192xf32>
    %260 = vector.extract_strided_slice %259 {offsets = [0, 0], sizes = [1, 64], strides = [1, 1]} : vector<1x192xf32> to vector<1x64xf32>
    %261 = vector.extract_strided_slice %259 {offsets = [0, 64], sizes = [1, 64], strides = [1, 1]} : vector<1x192xf32> to vector<1x64xf32>
    %262 = vector.extract_strided_slice %259 {offsets = [0, 128], sizes = [1, 64], strides = [1, 1]} : vector<1x192xf32> to vector<1x64xf32>
    %263 = vector.extract_strided_slice %253 {offsets = [0, 192], sizes = [1, 64], strides = [1, 1]} : vector<1x256xf32> to vector<1x64xf32>
    %264 = math.tanh %263 : vector<1x64xf32>
    %265 = arith.mulf %261, %243 : vector<1x64xf32>
    %266 = arith.mulf %260, %264 : vector<1x64xf32>
    %267 = arith.addf %265, %266 : vector<1x64xf32>
    %268 = math.tanh %267 : vector<1x64xf32>
    %269 = arith.mulf %262, %268 : vector<1x64xf32>
    %270 = vector.extract_strided_slice %269 {offsets = [0, 0], sizes = [1, 32], strides = [1, 1]} : vector<1x64xf32> to vector<1x32xf32>
    %c1_147 = arith.constant 1 : index
    %c0_148 = arith.constant 0 : index
    %271 = vector.load %arg19[%c1_147, %c0_148] : memref<8x64xf32, #tpu.memory_space<vmem>>, vector<1x32xf32>
    tpu.vector_store %arg19[%c1_147, %c0_148], %270 {strides = array<i32>} : memref<8x64xf32, #tpu.memory_space<vmem>>, vector<1x32xf32>,
    %272 = vector.extract_strided_slice %269 {offsets = [0, 32], sizes = [1, 32], strides = [1, 1]} : vector<1x64xf32> to vector<1x32xf32>
    %c6_149 = arith.constant 6 : index
    %c32_150 = arith.constant 32 : index
    %273 = vector.load %arg19[%c6_149, %c32_150] : memref<8x64xf32, #tpu.memory_space<vmem>>, vector<1x32xf32>
    tpu.vector_store %arg19[%c6_149, %c32_150], %272 {strides = array<i32>} : memref<8x64xf32, #tpu.memory_space<vmem>>, vector<1x32xf32>,
    %c2_151 = arith.constant 2 : index
    %c0_152 = arith.constant 0 : index
    %274 = vector.load %arg18[%c2_151, %c0_152] : memref<8x256xf32, #tpu.memory_space<vmem>>, vector<1x256xf32>
    %275 = arith.truncf %269 : vector<1x64xf32> to vector<1x64xbf16>
    %cst_153 = arith.constant dense<0.000000e+00> : vector<1x256xf32>
    %276 = tpu.matmul %275, %223, %cst_153 {dimension_numbers = #tpu.dot_dimension_numbers<[1], [0], [0], [1], [0, 0, 1, 1], [], []>} : vector<1x64xbf16>, vector<64x256xbf16>, vector<1x256xf32> -> vector<1x256xf32>
    %277 = arith.addf %274, %276 : vector<1x256xf32>
    %278 = vector.extract_strided_slice %277 {offsets = [0, 0], sizes = [1, 192], strides = [1, 1]} : vector<1x256xf32> to vector<1x192xf32>
    %279 = arith.negf %278 : vector<1x192xf32>
    %280 = math.exp %279 : vector<1x192xf32>
    %cst_154 = arith.constant 1.000000e+00 : f32
    %281 = vector.broadcast %cst_154 : f32 to vector<1x192xf32>
    %282 = arith.addf %281, %280 : vector<1x192xf32>
    %283 = arith.divf %281, %282 : vector<1x192xf32>
    %284 = vector.extract_strided_slice %283 {offsets = [0, 0], sizes = [1, 64], strides = [1, 1]} : vector<1x192xf32> to vector<1x64xf32>
    %285 = vector.extract_strided_slice %283 {offsets = [0, 64], sizes = [1, 64], strides = [1, 1]} : vector<1x192xf32> to vector<1x64xf32>
    %286 = vector.extract_strided_slice %283 {offsets = [0, 128], sizes = [1, 64], strides = [1, 1]} : vector<1x192xf32> to vector<1x64xf32>
    %287 = vector.extract_strided_slice %277 {offsets = [0, 192], sizes = [1, 64], strides = [1, 1]} : vector<1x256xf32> to vector<1x64xf32>
    %288 = math.tanh %287 : vector<1x64xf32>
    %289 = arith.mulf %285, %267 : vector<1x64xf32>
    %290 = arith.mulf %284, %288 : vector<1x64xf32>
    %291 = arith.addf %289, %290 : vector<1x64xf32>
    %292 = math.tanh %291 : vector<1x64xf32>
    %293 = arith.mulf %286, %292 : vector<1x64xf32>
    %294 = vector.extract_strided_slice %293 {offsets = [0, 0], sizes = [1, 32], strides = [1, 1]} : vector<1x64xf32> to vector<1x32xf32>
    %c2_155 = arith.constant 2 : index
    %c0_156 = arith.constant 0 : index
    %295 = vector.load %arg19[%c2_155, %c0_156] : memref<8x64xf32, #tpu.memory_space<vmem>>, vector<1x32xf32>
    tpu.vector_store %arg19[%c2_155, %c0_156], %294 {strides = array<i32>} : memref<8x64xf32, #tpu.memory_space<vmem>>, vector<1x32xf32>,
    %296 = vector.extract_strided_slice %293 {offsets = [0, 32], sizes = [1, 32], strides = [1, 1]} : vector<1x64xf32> to vector<1x32xf32>
    %c5_157 = arith.constant 5 : index
    %c32_158 = arith.constant 32 : index
    %297 = vector.load %arg19[%c5_157, %c32_158] : memref<8x64xf32, #tpu.memory_space<vmem>>, vector<1x32xf32>
    tpu.vector_store %arg19[%c5_157, %c32_158], %296 {strides = array<i32>} : memref<8x64xf32, #tpu.memory_space<vmem>>, vector<1x32xf32>,
    %c3_159 = arith.constant 3 : index
    %c0_160 = arith.constant 0 : index
    %298 = vector.load %arg18[%c3_159, %c0_160] : memref<8x256xf32, #tpu.memory_space<vmem>>, vector<1x256xf32>
    %299 = arith.truncf %293 : vector<1x64xf32> to vector<1x64xbf16>
    %cst_161 = arith.constant dense<0.000000e+00> : vector<1x256xf32>
    %300 = tpu.matmul %299, %223, %cst_161 {dimension_numbers = #tpu.dot_dimension_numbers<[1], [0], [0], [1], [0, 0, 1, 1], [], []>} : vector<1x64xbf16>, vector<64x256xbf16>, vector<1x256xf32> -> vector<1x256xf32>
    %301 = arith.addf %298, %300 : vector<1x256xf32>
    %302 = vector.extract_strided_slice %301 {offsets = [0, 0], sizes = [1, 192], strides = [1, 1]} : vector<1x256xf32> to vector<1x192xf32>
    %303 = arith.negf %302 : vector<1x192xf32>
    %304 = math.exp %303 : vector<1x192xf32>
    %cst_162 = arith.constant 1.000000e+00 : f32
    %305 = vector.broadcast %cst_162 : f32 to vector<1x192xf32>
    %306 = arith.addf %305, %304 : vector<1x192xf32>
    %307 = arith.divf %305, %306 : vector<1x192xf32>
    %308 = vector.extract_strided_slice %307 {offsets = [0, 0], sizes = [1, 64], strides = [1, 1]} : vector<1x192xf32> to vector<1x64xf32>
    %309 = vector.extract_strided_slice %307 {offsets = [0, 64], sizes = [1, 64], strides = [1, 1]} : vector<1x192xf32> to vector<1x64xf32>
    %310 = vector.extract_strided_slice %307 {offsets = [0, 128], sizes = [1, 64], strides = [1, 1]} : vector<1x192xf32> to vector<1x64xf32>
    %311 = vector.extract_strided_slice %301 {offsets = [0, 192], sizes = [1, 64], strides = [1, 1]} : vector<1x256xf32> to vector<1x64xf32>
    %312 = math.tanh %311 : vector<1x64xf32>
    %313 = arith.mulf %309, %291 : vector<1x64xf32>
    %314 = arith.mulf %308, %312 : vector<1x64xf32>
    %315 = arith.addf %313, %314 : vector<1x64xf32>
    %316 = math.tanh %315 : vector<1x64xf32>
    %317 = arith.mulf %310, %316 : vector<1x64xf32>
    %318 = vector.extract_strided_slice %317 {offsets = [0, 0], sizes = [1, 32], strides = [1, 1]} : vector<1x64xf32> to vector<1x32xf32>
    %c3_163 = arith.constant 3 : index
    %c0_164 = arith.constant 0 : index
    %319 = vector.load %arg19[%c3_163, %c0_164] : memref<8x64xf32, #tpu.memory_space<vmem>>, vector<1x32xf32>
    tpu.vector_store %arg19[%c3_163, %c0_164], %318 {strides = array<i32>} : memref<8x64xf32, #tpu.memory_space<vmem>>, vector<1x32xf32>,
    %320 = vector.extract_strided_slice %317 {offsets = [0, 32], sizes = [1, 32], strides = [1, 1]} : vector<1x64xf32> to vector<1x32xf32>
    %c4_165 = arith.constant 4 : index
    %c32_166 = arith.constant 32 : index
    %321 = vector.load %arg19[%c4_165, %c32_166] : memref<8x64xf32, #tpu.memory_space<vmem>>, vector<1x32xf32>
    tpu.vector_store %arg19[%c4_165, %c32_166], %320 {strides = array<i32>} : memref<8x64xf32, #tpu.memory_space<vmem>>, vector<1x32xf32>,
    %c4_167 = arith.constant 4 : index
    %c0_168 = arith.constant 0 : index
    %322 = vector.load %arg18[%c4_167, %c0_168] : memref<8x256xf32, #tpu.memory_space<vmem>>, vector<1x256xf32>
    %323 = arith.truncf %317 : vector<1x64xf32> to vector<1x64xbf16>
    %cst_169 = arith.constant dense<0.000000e+00> : vector<1x256xf32>
    %324 = tpu.matmul %323, %223, %cst_169 {dimension_numbers = #tpu.dot_dimension_numbers<[1], [0], [0], [1], [0, 0, 1, 1], [], []>} : vector<1x64xbf16>, vector<64x256xbf16>, vector<1x256xf32> -> vector<1x256xf32>
    %325 = arith.addf %322, %324 : vector<1x256xf32>
    %326 = vector.extract_strided_slice %325 {offsets = [0, 0], sizes = [1, 192], strides = [1, 1]} : vector<1x256xf32> to vector<1x192xf32>
    %327 = arith.negf %326 : vector<1x192xf32>
    %328 = math.exp %327 : vector<1x192xf32>
    %cst_170 = arith.constant 1.000000e+00 : f32
    %329 = vector.broadcast %cst_170 : f32 to vector<1x192xf32>
    %330 = arith.addf %329, %328 : vector<1x192xf32>
    %331 = arith.divf %329, %330 : vector<1x192xf32>
    %332 = vector.extract_strided_slice %331 {offsets = [0, 0], sizes = [1, 64], strides = [1, 1]} : vector<1x192xf32> to vector<1x64xf32>
    %333 = vector.extract_strided_slice %331 {offsets = [0, 64], sizes = [1, 64], strides = [1, 1]} : vector<1x192xf32> to vector<1x64xf32>
    %334 = vector.extract_strided_slice %331 {offsets = [0, 128], sizes = [1, 64], strides = [1, 1]} : vector<1x192xf32> to vector<1x64xf32>
    %335 = vector.extract_strided_slice %325 {offsets = [0, 192], sizes = [1, 64], strides = [1, 1]} : vector<1x256xf32> to vector<1x64xf32>
    %336 = math.tanh %335 : vector<1x64xf32>
    %337 = arith.mulf %333, %315 : vector<1x64xf32>
    %338 = arith.mulf %332, %336 : vector<1x64xf32>
    %339 = arith.addf %337, %338 : vector<1x64xf32>
    %340 = math.tanh %339 : vector<1x64xf32>
    %341 = arith.mulf %334, %340 : vector<1x64xf32>
    %342 = vector.extract_strided_slice %341 {offsets = [0, 0], sizes = [1, 32], strides = [1, 1]} : vector<1x64xf32> to vector<1x32xf32>
    %c4_171 = arith.constant 4 : index
    %c0_172 = arith.constant 0 : index
    %343 = vector.load %arg19[%c4_171, %c0_172] : memref<8x64xf32, #tpu.memory_space<vmem>>, vector<1x32xf32>
    tpu.vector_store %arg19[%c4_171, %c0_172], %342 {strides = array<i32>} : memref<8x64xf32, #tpu.memory_space<vmem>>, vector<1x32xf32>,
    %344 = vector.extract_strided_slice %341 {offsets = [0, 32], sizes = [1, 32], strides = [1, 1]} : vector<1x64xf32> to vector<1x32xf32>
    %c3_173 = arith.constant 3 : index
    %c32_174 = arith.constant 32 : index
    %345 = vector.load %arg19[%c3_173, %c32_174] : memref<8x64xf32, #tpu.memory_space<vmem>>, vector<1x32xf32>
    tpu.vector_store %arg19[%c3_173, %c32_174], %344 {strides = array<i32>} : memref<8x64xf32, #tpu.memory_space<vmem>>, vector<1x32xf32>,
    %c5_175 = arith.constant 5 : index
    %c0_176 = arith.constant 0 : index
    %346 = vector.load %arg18[%c5_175, %c0_176] : memref<8x256xf32, #tpu.memory_space<vmem>>, vector<1x256xf32>
    %347 = arith.truncf %341 : vector<1x64xf32> to vector<1x64xbf16>
    %cst_177 = arith.constant dense<0.000000e+00> : vector<1x256xf32>
    %348 = tpu.matmul %347, %223, %cst_177 {dimension_numbers = #tpu.dot_dimension_numbers<[1], [0], [0], [1], [0, 0, 1, 1], [], []>} : vector<1x64xbf16>, vector<64x256xbf16>, vector<1x256xf32> -> vector<1x256xf32>
    %349 = arith.addf %346, %348 : vector<1x256xf32>
    %350 = vector.extract_strided_slice %349 {offsets = [0, 0], sizes = [1, 192], strides = [1, 1]} : vector<1x256xf32> to vector<1x192xf32>
    %351 = arith.negf %350 : vector<1x192xf32>
    %352 = math.exp %351 : vector<1x192xf32>
    %cst_178 = arith.constant 1.000000e+00 : f32
    %353 = vector.broadcast %cst_178 : f32 to vector<1x192xf32>
    %354 = arith.addf %353, %352 : vector<1x192xf32>
    %355 = arith.divf %353, %354 : vector<1x192xf32>
    %356 = vector.extract_strided_slice %355 {offsets = [0, 0], sizes = [1, 64], strides = [1, 1]} : vector<1x192xf32> to vector<1x64xf32>
    %357 = vector.extract_strided_slice %355 {offsets = [0, 64], sizes = [1, 64], strides = [1, 1]} : vector<1x192xf32> to vector<1x64xf32>
    %358 = vector.extract_strided_slice %355 {offsets = [0, 128], sizes = [1, 64], strides = [1, 1]} : vector<1x192xf32> to vector<1x64xf32>
    %359 = vector.extract_strided_slice %349 {offsets = [0, 192], sizes = [1, 64], strides = [1, 1]} : vector<1x256xf32> to vector<1x64xf32>
    %360 = math.tanh %359 : vector<1x64xf32>
    %361 = arith.mulf %357, %339 : vector<1x64xf32>
    %362 = arith.mulf %356, %360 : vector<1x64xf32>
    %363 = arith.addf %361, %362 : vector<1x64xf32>
    %364 = math.tanh %363 : vector<1x64xf32>
    %365 = arith.mulf %358, %364 : vector<1x64xf32>
    %366 = vector.extract_strided_slice %365 {offsets = [0, 0], sizes = [1, 32], strides = [1, 1]} : vector<1x64xf32> to vector<1x32xf32>
    %c5_179 = arith.constant 5 : index
    %c0_180 = arith.constant 0 : index
    %367 = vector.load %arg19[%c5_179, %c0_180] : memref<8x64xf32, #tpu.memory_space<vmem>>, vector<1x32xf32>
    tpu.vector_store %arg19[%c5_179, %c0_180], %366 {strides = array<i32>} : memref<8x64xf32, #tpu.memory_space<vmem>>, vector<1x32xf32>,
    %368 = vector.extract_strided_slice %365 {offsets = [0, 32], sizes = [1, 32], strides = [1, 1]} : vector<1x64xf32> to vector<1x32xf32>
    %c2_181 = arith.constant 2 : index
    %c32_182 = arith.constant 32 : index
    %369 = vector.load %arg19[%c2_181, %c32_182] : memref<8x64xf32, #tpu.memory_space<vmem>>, vector<1x32xf32>
    tpu.vector_store %arg19[%c2_181, %c32_182], %368 {strides = array<i32>} : memref<8x64xf32, #tpu.memory_space<vmem>>, vector<1x32xf32>,
    %c6_183 = arith.constant 6 : index
    %c0_184 = arith.constant 0 : index
    %370 = vector.load %arg18[%c6_183, %c0_184] : memref<8x256xf32, #tpu.memory_space<vmem>>, vector<1x256xf32>
    %371 = arith.truncf %365 : vector<1x64xf32> to vector<1x64xbf16>
    %cst_185 = arith.constant dense<0.000000e+00> : vector<1x256xf32>
    %372 = tpu.matmul %371, %223, %cst_185 {dimension_numbers = #tpu.dot_dimension_numbers<[1], [0], [0], [1], [0, 0, 1, 1], [], []>} : vector<1x64xbf16>, vector<64x256xbf16>, vector<1x256xf32> -> vector<1x256xf32>
    %373 = arith.addf %370, %372 : vector<1x256xf32>
    %374 = vector.extract_strided_slice %373 {offsets = [0, 0], sizes = [1, 192], strides = [1, 1]} : vector<1x256xf32> to vector<1x192xf32>
    %375 = arith.negf %374 : vector<1x192xf32>
    %376 = math.exp %375 : vector<1x192xf32>
    %cst_186 = arith.constant 1.000000e+00 : f32
    %377 = vector.broadcast %cst_186 : f32 to vector<1x192xf32>
    %378 = arith.addf %377, %376 : vector<1x192xf32>
    %379 = arith.divf %377, %378 : vector<1x192xf32>
    %380 = vector.extract_strided_slice %379 {offsets = [0, 0], sizes = [1, 64], strides = [1, 1]} : vector<1x192xf32> to vector<1x64xf32>
    %381 = vector.extract_strided_slice %379 {offsets = [0, 64], sizes = [1, 64], strides = [1, 1]} : vector<1x192xf32> to vector<1x64xf32>
    %382 = vector.extract_strided_slice %379 {offsets = [0, 128], sizes = [1, 64], strides = [1, 1]} : vector<1x192xf32> to vector<1x64xf32>
    %383 = vector.extract_strided_slice %373 {offsets = [0, 192], sizes = [1, 64], strides = [1, 1]} : vector<1x256xf32> to vector<1x64xf32>
    %384 = math.tanh %383 : vector<1x64xf32>
    %385 = arith.mulf %381, %363 : vector<1x64xf32>
    %386 = arith.mulf %380, %384 : vector<1x64xf32>
    %387 = arith.addf %385, %386 : vector<1x64xf32>
    %388 = math.tanh %387 : vector<1x64xf32>
    %389 = arith.mulf %382, %388 : vector<1x64xf32>
    %390 = vector.extract_strided_slice %389 {offsets = [0, 0], sizes = [1, 32], strides = [1, 1]} : vector<1x64xf32> to vector<1x32xf32>
    %c6_187 = arith.constant 6 : index
    %c0_188 = arith.constant 0 : index
    %391 = vector.load %arg19[%c6_187, %c0_188] : memref<8x64xf32, #tpu.memory_space<vmem>>, vector<1x32xf32>
    tpu.vector_store %arg19[%c6_187, %c0_188], %390 {strides = array<i32>} : memref<8x64xf32, #tpu.memory_space<vmem>>, vector<1x32xf32>,
    %392 = vector.extract_strided_slice %389 {offsets = [0, 32], sizes = [1, 32], strides = [1, 1]} : vector<1x64xf32> to vector<1x32xf32>
    %c1_189 = arith.constant 1 : index
    %c32_190 = arith.constant 32 : index
    %393 = vector.load %arg19[%c1_189, %c32_190] : memref<8x64xf32, #tpu.memory_space<vmem>>, vector<1x32xf32>
    tpu.vector_store %arg19[%c1_189, %c32_190], %392 {strides = array<i32>} : memref<8x64xf32, #tpu.memory_space<vmem>>, vector<1x32xf32>,
    %c7_191 = arith.constant 7 : index
    %c0_192 = arith.constant 0 : index
    %394 = vector.load %arg18[%c7_191, %c0_192] : memref<8x256xf32, #tpu.memory_space<vmem>>, vector<1x256xf32>
    %395 = arith.truncf %389 : vector<1x64xf32> to vector<1x64xbf16>
    %cst_193 = arith.constant dense<0.000000e+00> : vector<1x256xf32>
    %396 = tpu.matmul %395, %223, %cst_193 {dimension_numbers = #tpu.dot_dimension_numbers<[1], [0], [0], [1], [0, 0, 1, 1], [], []>} : vector<1x64xbf16>, vector<64x256xbf16>, vector<1x256xf32> -> vector<1x256xf32>
    %397 = arith.addf %394, %396 : vector<1x256xf32>
    %398 = vector.extract_strided_slice %397 {offsets = [0, 0], sizes = [1, 192], strides = [1, 1]} : vector<1x256xf32> to vector<1x192xf32>
    %399 = arith.negf %398 : vector<1x192xf32>
    %400 = math.exp %399 : vector<1x192xf32>
    %cst_194 = arith.constant 1.000000e+00 : f32
    %401 = vector.broadcast %cst_194 : f32 to vector<1x192xf32>
    %402 = arith.addf %401, %400 : vector<1x192xf32>
    %403 = arith.divf %401, %402 : vector<1x192xf32>
    %404 = vector.extract_strided_slice %403 {offsets = [0, 0], sizes = [1, 64], strides = [1, 1]} : vector<1x192xf32> to vector<1x64xf32>
    %405 = vector.extract_strided_slice %403 {offsets = [0, 64], sizes = [1, 64], strides = [1, 1]} : vector<1x192xf32> to vector<1x64xf32>
    %406 = vector.extract_strided_slice %403 {offsets = [0, 128], sizes = [1, 64], strides = [1, 1]} : vector<1x192xf32> to vector<1x64xf32>
    %407 = vector.extract_strided_slice %397 {offsets = [0, 192], sizes = [1, 64], strides = [1, 1]} : vector<1x256xf32> to vector<1x64xf32>
    %408 = math.tanh %407 : vector<1x64xf32>
    %409 = arith.mulf %405, %387 : vector<1x64xf32>
    %410 = arith.mulf %404, %408 : vector<1x64xf32>
    %411 = arith.addf %409, %410 : vector<1x64xf32>
    %412 = math.tanh %411 : vector<1x64xf32>
    %413 = arith.mulf %406, %412 : vector<1x64xf32>
    %414 = vector.extract_strided_slice %413 {offsets = [0, 0], sizes = [1, 32], strides = [1, 1]} : vector<1x64xf32> to vector<1x32xf32>
    %c7_195 = arith.constant 7 : index
    %c0_196 = arith.constant 0 : index
    %415 = vector.load %arg19[%c7_195, %c0_196] : memref<8x64xf32, #tpu.memory_space<vmem>>, vector<1x32xf32>
    tpu.vector_store %arg19[%c7_195, %c0_196], %414 {strides = array<i32>} : memref<8x64xf32, #tpu.memory_space<vmem>>, vector<1x32xf32>,
    %416 = vector.extract_strided_slice %413 {offsets = [0, 32], sizes = [1, 32], strides = [1, 1]} : vector<1x64xf32> to vector<1x32xf32>
    %c0_197 = arith.constant 0 : index
    %c32_198 = arith.constant 32 : index
    %417 = vector.load %arg19[%c0_197, %c32_198] : memref<8x64xf32, #tpu.memory_space<vmem>>, vector<1x32xf32>
    tpu.vector_store %arg19[%c0_197, %c32_198], %416 {strides = array<i32>} : memref<8x64xf32, #tpu.memory_space<vmem>>, vector<1x32xf32>,
    %c0_199 = arith.constant 0 : index
    %c0_200 = arith.constant 0 : index
    %418 = vector.load %arg19[%c0_199, %c0_200] : memref<8x64xf32, #tpu.memory_space<vmem>>, vector<8x64xf32>
    %419 = arith.truncf %418 : vector<8x64xf32> to vector<8x64xbf16>
    %cst_201 = arith.constant dense<0.000000e+00> : vector<8x64xf32>
    %420 = tpu.matmul %210, %419, %cst_201 {dimension_numbers = #tpu.dot_dimension_numbers<[1], [0], [0], [1], [0, 0, 1, 1], [], []>} : vector<8x8xbf16>, vector<8x64xbf16>, vector<8x64xf32> -> vector<8x64xf32>
    %421 = arith.truncf %420 : vector<8x64xf32> to vector<8x64xbf16>
    %c0_202 = arith.constant 0 : index
    %c0_203 = arith.constant 0 : index
    %422 = vector.load %arg9[%c0_202, %c0_203] : memref<64x256xbf16, #tpu.memory_space<vmem>>, vector<64x256xbf16>
    %cst_204 = arith.constant dense<0.000000e+00> : vector<8x256xf32>
    %423 = tpu.matmul %419, %422, %cst_204 {dimension_numbers = #tpu.dot_dimension_numbers<[1], [0], [0], [1], [0, 0, 1, 1], [], []>} : vector<8x64xbf16>, vector<64x256xbf16>, vector<8x256xf32> -> vector<8x256xf32>
    %c0_205 = arith.constant 0 : index
    %c0_206 = arith.constant 0 : index
    %424 = vector.load %arg10[%c0_205, %c0_206] : memref<64x256xbf16, #tpu.memory_space<vmem>>, vector<64x256xbf16>
    %cst_207 = arith.constant dense<0.000000e+00> : vector<8x256xf32>
    %425 = tpu.matmul %421, %424, %cst_207 {dimension_numbers = #tpu.dot_dimension_numbers<[1], [0], [0], [1], [0, 0, 1, 1], [], []>} : vector<8x64xbf16>, vector<64x256xbf16>, vector<8x256xf32> -> vector<8x256xf32>
    %426 = arith.addf %423, %425 : vector<8x256xf32>
    %c0_208 = arith.constant 0 : index
    %c0_209 = arith.constant 0 : index
    %427 = vector.load %arg12[%c0_208, %c0_209] : memref<1x256xf32, #tpu.memory_space<vmem>>, vector<1x256xf32>
    %428 = vector.broadcast %427 : vector<1x256xf32> to vector<8x256xf32>
    %429 = arith.addf %426, %428 : vector<8x256xf32>
    %c0_210 = arith.constant 0 : index
    %c0_211 = arith.constant 0 : index
    %430 = vector.load %arg18[%c0_210, %c0_211] : memref<8x256xf32, #tpu.memory_space<vmem>>, vector<8x256xf32>
    tpu.vector_store %arg18[%c0_210, %c0_211], %429 {strides = array<i32>} : memref<8x256xf32, #tpu.memory_space<vmem>>, vector<8x256xf32>,
    %c0_212 = arith.constant 0 : index
    %c0_213 = arith.constant 0 : index
    %431 = vector.load %arg11[%c0_212, %c0_213] : memref<64x256xbf16, #tpu.memory_space<vmem>>, vector<64x256xbf16>
    %cst_214 = arith.constant 0.000000e+00 : f32
    %432 = vector.broadcast %cst_214 : f32 to vector<1x64xf32>
    %cst_215 = arith.constant 0.000000e+00 : f32
    %433 = vector.broadcast %cst_215 : f32 to vector<1x64xf32>
    %c0_216 = arith.constant 0 : index
    %c0_217 = arith.constant 0 : index
    %434 = vector.load %arg18[%c0_216, %c0_217] : memref<8x256xf32, #tpu.memory_space<vmem>>, vector<1x256xf32>
    %435 = arith.truncf %432 : vector<1x64xf32> to vector<1x64xbf16>
    %cst_218 = arith.constant dense<0.000000e+00> : vector<1x256xf32>
    %436 = tpu.matmul %435, %431, %cst_218 {dimension_numbers = #tpu.dot_dimension_numbers<[1], [0], [0], [1], [0, 0, 1, 1], [], []>} : vector<1x64xbf16>, vector<64x256xbf16>, vector<1x256xf32> -> vector<1x256xf32>
    %437 = arith.addf %434, %436 : vector<1x256xf32>
    %438 = vector.extract_strided_slice %437 {offsets = [0, 0], sizes = [1, 192], strides = [1, 1]} : vector<1x256xf32> to vector<1x192xf32>
    %439 = arith.negf %438 : vector<1x192xf32>
    %440 = math.exp %439 : vector<1x192xf32>
    %cst_219 = arith.constant 1.000000e+00 : f32
    %441 = vector.broadcast %cst_219 : f32 to vector<1x192xf32>
    %442 = arith.addf %441, %440 : vector<1x192xf32>
    %443 = arith.divf %441, %442 : vector<1x192xf32>
    %444 = vector.extract_strided_slice %443 {offsets = [0, 0], sizes = [1, 64], strides = [1, 1]} : vector<1x192xf32> to vector<1x64xf32>
    %445 = vector.extract_strided_slice %443 {offsets = [0, 64], sizes = [1, 64], strides = [1, 1]} : vector<1x192xf32> to vector<1x64xf32>
    %446 = vector.extract_strided_slice %443 {offsets = [0, 128], sizes = [1, 64], strides = [1, 1]} : vector<1x192xf32> to vector<1x64xf32>
    %447 = vector.extract_strided_slice %437 {offsets = [0, 192], sizes = [1, 64], strides = [1, 1]} : vector<1x256xf32> to vector<1x64xf32>
    %448 = math.tanh %447 : vector<1x64xf32>
    %449 = arith.mulf %445, %433 : vector<1x64xf32>
    %450 = arith.mulf %444, %448 : vector<1x64xf32>
    %451 = arith.addf %449, %450 : vector<1x64xf32>
    %452 = math.tanh %451 : vector<1x64xf32>
    %453 = arith.mulf %446, %452 : vector<1x64xf32>
    %454 = vector.extract_strided_slice %453 {offsets = [0, 0], sizes = [1, 32], strides = [1, 1]} : vector<1x64xf32> to vector<1x32xf32>
    %c0_220 = arith.constant 0 : index
    %c0_221 = arith.constant 0 : index
    %455 = vector.load %arg20[%c0_220, %c0_221] : memref<1x512xf32, #tpu.memory_space<vmem>>, vector<1x32xf32>
    tpu.vector_store %arg20[%c0_220, %c0_221], %454 {strides = array<i32>} : memref<1x512xf32, #tpu.memory_space<vmem>>, vector<1x32xf32>,
    %456 = vector.extract_strided_slice %453 {offsets = [0, 32], sizes = [1, 32], strides = [1, 1]} : vector<1x64xf32> to vector<1x32xf32>
    %c0_222 = arith.constant 0 : index
    %c480 = arith.constant 480 : index
    %457 = vector.load %arg20[%c0_222, %c480] : memref<1x512xf32, #tpu.memory_space<vmem>>, vector<1x32xf32>
    tpu.vector_store %arg20[%c0_222, %c480], %456 {strides = array<i32>} : memref<1x512xf32, #tpu.memory_space<vmem>>, vector<1x32xf32>,
    %c1_223 = arith.constant 1 : index
    %c0_224 = arith.constant 0 : index
    %458 = vector.load %arg18[%c1_223, %c0_224] : memref<8x256xf32, #tpu.memory_space<vmem>>, vector<1x256xf32>
    %459 = arith.truncf %453 : vector<1x64xf32> to vector<1x64xbf16>
    %cst_225 = arith.constant dense<0.000000e+00> : vector<1x256xf32>
    %460 = tpu.matmul %459, %431, %cst_225 {dimension_numbers = #tpu.dot_dimension_numbers<[1], [0], [0], [1], [0, 0, 1, 1], [], []>} : vector<1x64xbf16>, vector<64x256xbf16>, vector<1x256xf32> -> vector<1x256xf32>
    %461 = arith.addf %458, %460 : vector<1x256xf32>
    %462 = vector.extract_strided_slice %461 {offsets = [0, 0], sizes = [1, 192], strides = [1, 1]} : vector<1x256xf32> to vector<1x192xf32>
    %463 = arith.negf %462 : vector<1x192xf32>
    %464 = math.exp %463 : vector<1x192xf32>
    %cst_226 = arith.constant 1.000000e+00 : f32
    %465 = vector.broadcast %cst_226 : f32 to vector<1x192xf32>
    %466 = arith.addf %465, %464 : vector<1x192xf32>
    %467 = arith.divf %465, %466 : vector<1x192xf32>
    %468 = vector.extract_strided_slice %467 {offsets = [0, 0], sizes = [1, 64], strides = [1, 1]} : vector<1x192xf32> to vector<1x64xf32>
    %469 = vector.extract_strided_slice %467 {offsets = [0, 64], sizes = [1, 64], strides = [1, 1]} : vector<1x192xf32> to vector<1x64xf32>
    %470 = vector.extract_strided_slice %467 {offsets = [0, 128], sizes = [1, 64], strides = [1, 1]} : vector<1x192xf32> to vector<1x64xf32>
    %471 = vector.extract_strided_slice %461 {offsets = [0, 192], sizes = [1, 64], strides = [1, 1]} : vector<1x256xf32> to vector<1x64xf32>
    %472 = math.tanh %471 : vector<1x64xf32>
    %473 = arith.mulf %469, %451 : vector<1x64xf32>
    %474 = arith.mulf %468, %472 : vector<1x64xf32>
    %475 = arith.addf %473, %474 : vector<1x64xf32>
    %476 = math.tanh %475 : vector<1x64xf32>
    %477 = arith.mulf %470, %476 : vector<1x64xf32>
    %478 = vector.extract_strided_slice %477 {offsets = [0, 0], sizes = [1, 32], strides = [1, 1]} : vector<1x64xf32> to vector<1x32xf32>
    %c0_227 = arith.constant 0 : index
    %c64 = arith.constant 64 : index
    %479 = vector.load %arg20[%c0_227, %c64] : memref<1x512xf32, #tpu.memory_space<vmem>>, vector<1x32xf32>
    tpu.vector_store %arg20[%c0_227, %c64], %478 {strides = array<i32>} : memref<1x512xf32, #tpu.memory_space<vmem>>, vector<1x32xf32>,
    %480 = vector.extract_strided_slice %477 {offsets = [0, 32], sizes = [1, 32], strides = [1, 1]} : vector<1x64xf32> to vector<1x32xf32>
    %c0_228 = arith.constant 0 : index
    %c416 = arith.constant 416 : index
    %481 = vector.load %arg20[%c0_228, %c416] : memref<1x512xf32, #tpu.memory_space<vmem>>, vector<1x32xf32>
    tpu.vector_store %arg20[%c0_228, %c416], %480 {strides = array<i32>} : memref<1x512xf32, #tpu.memory_space<vmem>>, vector<1x32xf32>,
    %c2_229 = arith.constant 2 : index
    %c0_230 = arith.constant 0 : index
    %482 = vector.load %arg18[%c2_229, %c0_230] : memref<8x256xf32, #tpu.memory_space<vmem>>, vector<1x256xf32>
    %483 = arith.truncf %477 : vector<1x64xf32> to vector<1x64xbf16>
    %cst_231 = arith.constant dense<0.000000e+00> : vector<1x256xf32>
    %484 = tpu.matmul %483, %431, %cst_231 {dimension_numbers = #tpu.dot_dimension_numbers<[1], [0], [0], [1], [0, 0, 1, 1], [], []>} : vector<1x64xbf16>, vector<64x256xbf16>, vector<1x256xf32> -> vector<1x256xf32>
    %485 = arith.addf %482, %484 : vector<1x256xf32>
    %486 = vector.extract_strided_slice %485 {offsets = [0, 0], sizes = [1, 192], strides = [1, 1]} : vector<1x256xf32> to vector<1x192xf32>
    %487 = arith.negf %486 : vector<1x192xf32>
    %488 = math.exp %487 : vector<1x192xf32>
    %cst_232 = arith.constant 1.000000e+00 : f32
    %489 = vector.broadcast %cst_232 : f32 to vector<1x192xf32>
    %490 = arith.addf %489, %488 : vector<1x192xf32>
    %491 = arith.divf %489, %490 : vector<1x192xf32>
    %492 = vector.extract_strided_slice %491 {offsets = [0, 0], sizes = [1, 64], strides = [1, 1]} : vector<1x192xf32> to vector<1x64xf32>
    %493 = vector.extract_strided_slice %491 {offsets = [0, 64], sizes = [1, 64], strides = [1, 1]} : vector<1x192xf32> to vector<1x64xf32>
    %494 = vector.extract_strided_slice %491 {offsets = [0, 128], sizes = [1, 64], strides = [1, 1]} : vector<1x192xf32> to vector<1x64xf32>
    %495 = vector.extract_strided_slice %485 {offsets = [0, 192], sizes = [1, 64], strides = [1, 1]} : vector<1x256xf32> to vector<1x64xf32>
    %496 = math.tanh %495 : vector<1x64xf32>
    %497 = arith.mulf %493, %475 : vector<1x64xf32>
    %498 = arith.mulf %492, %496 : vector<1x64xf32>
    %499 = arith.addf %497, %498 : vector<1x64xf32>
    %500 = math.tanh %499 : vector<1x64xf32>
    %501 = arith.mulf %494, %500 : vector<1x64xf32>
    %502 = vector.extract_strided_slice %501 {offsets = [0, 0], sizes = [1, 32], strides = [1, 1]} : vector<1x64xf32> to vector<1x32xf32>
    %c0_233 = arith.constant 0 : index
    %c128 = arith.constant 128 : index
    %503 = vector.load %arg20[%c0_233, %c128] : memref<1x512xf32, #tpu.memory_space<vmem>>, vector<1x32xf32>
    tpu.vector_store %arg20[%c0_233, %c128], %502 {strides = array<i32>} : memref<1x512xf32, #tpu.memory_space<vmem>>, vector<1x32xf32>,
    %504 = vector.extract_strided_slice %501 {offsets = [0, 32], sizes = [1, 32], strides = [1, 1]} : vector<1x64xf32> to vector<1x32xf32>
    %c0_234 = arith.constant 0 : index
    %c352 = arith.constant 352 : index
    %505 = vector.load %arg20[%c0_234, %c352] : memref<1x512xf32, #tpu.memory_space<vmem>>, vector<1x32xf32>
    tpu.vector_store %arg20[%c0_234, %c352], %504 {strides = array<i32>} : memref<1x512xf32, #tpu.memory_space<vmem>>, vector<1x32xf32>,
    %c3_235 = arith.constant 3 : index
    %c0_236 = arith.constant 0 : index
    %506 = vector.load %arg18[%c3_235, %c0_236] : memref<8x256xf32, #tpu.memory_space<vmem>>, vector<1x256xf32>
    %507 = arith.truncf %501 : vector<1x64xf32> to vector<1x64xbf16>
    %cst_237 = arith.constant dense<0.000000e+00> : vector<1x256xf32>
    %508 = tpu.matmul %507, %431, %cst_237 {dimension_numbers = #tpu.dot_dimension_numbers<[1], [0], [0], [1], [0, 0, 1, 1], [], []>} : vector<1x64xbf16>, vector<64x256xbf16>, vector<1x256xf32> -> vector<1x256xf32>
    %509 = arith.addf %506, %508 : vector<1x256xf32>
    %510 = vector.extract_strided_slice %509 {offsets = [0, 0], sizes = [1, 192], strides = [1, 1]} : vector<1x256xf32> to vector<1x192xf32>
    %511 = arith.negf %510 : vector<1x192xf32>
    %512 = math.exp %511 : vector<1x192xf32>
    %cst_238 = arith.constant 1.000000e+00 : f32
    %513 = vector.broadcast %cst_238 : f32 to vector<1x192xf32>
    %514 = arith.addf %513, %512 : vector<1x192xf32>
    %515 = arith.divf %513, %514 : vector<1x192xf32>
    %516 = vector.extract_strided_slice %515 {offsets = [0, 0], sizes = [1, 64], strides = [1, 1]} : vector<1x192xf32> to vector<1x64xf32>
    %517 = vector.extract_strided_slice %515 {offsets = [0, 64], sizes = [1, 64], strides = [1, 1]} : vector<1x192xf32> to vector<1x64xf32>
    %518 = vector.extract_strided_slice %515 {offsets = [0, 128], sizes = [1, 64], strides = [1, 1]} : vector<1x192xf32> to vector<1x64xf32>
    %519 = vector.extract_strided_slice %509 {offsets = [0, 192], sizes = [1, 64], strides = [1, 1]} : vector<1x256xf32> to vector<1x64xf32>
    %520 = math.tanh %519 : vector<1x64xf32>
    %521 = arith.mulf %517, %499 : vector<1x64xf32>
    %522 = arith.mulf %516, %520 : vector<1x64xf32>
    %523 = arith.addf %521, %522 : vector<1x64xf32>
    %524 = math.tanh %523 : vector<1x64xf32>
    %525 = arith.mulf %518, %524 : vector<1x64xf32>
    %526 = vector.extract_strided_slice %525 {offsets = [0, 0], sizes = [1, 32], strides = [1, 1]} : vector<1x64xf32> to vector<1x32xf32>
    %c0_239 = arith.constant 0 : index
    %c192 = arith.constant 192 : index
    %527 = vector.load %arg20[%c0_239, %c192] : memref<1x512xf32, #tpu.memory_space<vmem>>, vector<1x32xf32>
    tpu.vector_store %arg20[%c0_239, %c192], %526 {strides = array<i32>} : memref<1x512xf32, #tpu.memory_space<vmem>>, vector<1x32xf32>,
    %528 = vector.extract_strided_slice %525 {offsets = [0, 32], sizes = [1, 32], strides = [1, 1]} : vector<1x64xf32> to vector<1x32xf32>
    %c0_240 = arith.constant 0 : index
    %c288 = arith.constant 288 : index
    %529 = vector.load %arg20[%c0_240, %c288] : memref<1x512xf32, #tpu.memory_space<vmem>>, vector<1x32xf32>
    tpu.vector_store %arg20[%c0_240, %c288], %528 {strides = array<i32>} : memref<1x512xf32, #tpu.memory_space<vmem>>, vector<1x32xf32>,
    %c4_241 = arith.constant 4 : index
    %c0_242 = arith.constant 0 : index
    %530 = vector.load %arg18[%c4_241, %c0_242] : memref<8x256xf32, #tpu.memory_space<vmem>>, vector<1x256xf32>
    %531 = arith.truncf %525 : vector<1x64xf32> to vector<1x64xbf16>
    %cst_243 = arith.constant dense<0.000000e+00> : vector<1x256xf32>
    %532 = tpu.matmul %531, %431, %cst_243 {dimension_numbers = #tpu.dot_dimension_numbers<[1], [0], [0], [1], [0, 0, 1, 1], [], []>} : vector<1x64xbf16>, vector<64x256xbf16>, vector<1x256xf32> -> vector<1x256xf32>
    %533 = arith.addf %530, %532 : vector<1x256xf32>
    %534 = vector.extract_strided_slice %533 {offsets = [0, 0], sizes = [1, 192], strides = [1, 1]} : vector<1x256xf32> to vector<1x192xf32>
    %535 = arith.negf %534 : vector<1x192xf32>
    %536 = math.exp %535 : vector<1x192xf32>
    %cst_244 = arith.constant 1.000000e+00 : f32
    %537 = vector.broadcast %cst_244 : f32 to vector<1x192xf32>
    %538 = arith.addf %537, %536 : vector<1x192xf32>
    %539 = arith.divf %537, %538 : vector<1x192xf32>
    %540 = vector.extract_strided_slice %539 {offsets = [0, 0], sizes = [1, 64], strides = [1, 1]} : vector<1x192xf32> to vector<1x64xf32>
    %541 = vector.extract_strided_slice %539 {offsets = [0, 64], sizes = [1, 64], strides = [1, 1]} : vector<1x192xf32> to vector<1x64xf32>
    %542 = vector.extract_strided_slice %539 {offsets = [0, 128], sizes = [1, 64], strides = [1, 1]} : vector<1x192xf32> to vector<1x64xf32>
    %543 = vector.extract_strided_slice %533 {offsets = [0, 192], sizes = [1, 64], strides = [1, 1]} : vector<1x256xf32> to vector<1x64xf32>
    %544 = math.tanh %543 : vector<1x64xf32>
    %545 = arith.mulf %541, %523 : vector<1x64xf32>
    %546 = arith.mulf %540, %544 : vector<1x64xf32>
    %547 = arith.addf %545, %546 : vector<1x64xf32>
    %548 = math.tanh %547 : vector<1x64xf32>
    %549 = arith.mulf %542, %548 : vector<1x64xf32>
    %550 = vector.extract_strided_slice %549 {offsets = [0, 0], sizes = [1, 32], strides = [1, 1]} : vector<1x64xf32> to vector<1x32xf32>
    %c0_245 = arith.constant 0 : index
    %c256 = arith.constant 256 : index
    %551 = vector.load %arg20[%c0_245, %c256] : memref<1x512xf32, #tpu.memory_space<vmem>>, vector<1x32xf32>
    tpu.vector_store %arg20[%c0_245, %c256], %550 {strides = array<i32>} : memref<1x512xf32, #tpu.memory_space<vmem>>, vector<1x32xf32>,
    %552 = vector.extract_strided_slice %549 {offsets = [0, 32], sizes = [1, 32], strides = [1, 1]} : vector<1x64xf32> to vector<1x32xf32>
    %c0_246 = arith.constant 0 : index
    %c224 = arith.constant 224 : index
    %553 = vector.load %arg20[%c0_246, %c224] : memref<1x512xf32, #tpu.memory_space<vmem>>, vector<1x32xf32>
    tpu.vector_store %arg20[%c0_246, %c224], %552 {strides = array<i32>} : memref<1x512xf32, #tpu.memory_space<vmem>>, vector<1x32xf32>,
    %c5_247 = arith.constant 5 : index
    %c0_248 = arith.constant 0 : index
    %554 = vector.load %arg18[%c5_247, %c0_248] : memref<8x256xf32, #tpu.memory_space<vmem>>, vector<1x256xf32>
    %555 = arith.truncf %549 : vector<1x64xf32> to vector<1x64xbf16>
    %cst_249 = arith.constant dense<0.000000e+00> : vector<1x256xf32>
    %556 = tpu.matmul %555, %431, %cst_249 {dimension_numbers = #tpu.dot_dimension_numbers<[1], [0], [0], [1], [0, 0, 1, 1], [], []>} : vector<1x64xbf16>, vector<64x256xbf16>, vector<1x256xf32> -> vector<1x256xf32>
    %557 = arith.addf %554, %556 : vector<1x256xf32>
    %558 = vector.extract_strided_slice %557 {offsets = [0, 0], sizes = [1, 192], strides = [1, 1]} : vector<1x256xf32> to vector<1x192xf32>
    %559 = arith.negf %558 : vector<1x192xf32>
    %560 = math.exp %559 : vector<1x192xf32>
    %cst_250 = arith.constant 1.000000e+00 : f32
    %561 = vector.broadcast %cst_250 : f32 to vector<1x192xf32>
    %562 = arith.addf %561, %560 : vector<1x192xf32>
    %563 = arith.divf %561, %562 : vector<1x192xf32>
    %564 = vector.extract_strided_slice %563 {offsets = [0, 0], sizes = [1, 64], strides = [1, 1]} : vector<1x192xf32> to vector<1x64xf32>
    %565 = vector.extract_strided_slice %563 {offsets = [0, 64], sizes = [1, 64], strides = [1, 1]} : vector<1x192xf32> to vector<1x64xf32>
    %566 = vector.extract_strided_slice %563 {offsets = [0, 128], sizes = [1, 64], strides = [1, 1]} : vector<1x192xf32> to vector<1x64xf32>
    %567 = vector.extract_strided_slice %557 {offsets = [0, 192], sizes = [1, 64], strides = [1, 1]} : vector<1x256xf32> to vector<1x64xf32>
    %568 = math.tanh %567 : vector<1x64xf32>
    %569 = arith.mulf %565, %547 : vector<1x64xf32>
    %570 = arith.mulf %564, %568 : vector<1x64xf32>
    %571 = arith.addf %569, %570 : vector<1x64xf32>
    %572 = math.tanh %571 : vector<1x64xf32>
    %573 = arith.mulf %566, %572 : vector<1x64xf32>
    %574 = vector.extract_strided_slice %573 {offsets = [0, 0], sizes = [1, 32], strides = [1, 1]} : vector<1x64xf32> to vector<1x32xf32>
    %c0_251 = arith.constant 0 : index
    %c320 = arith.constant 320 : index
    %575 = vector.load %arg20[%c0_251, %c320] : memref<1x512xf32, #tpu.memory_space<vmem>>, vector<1x32xf32>
    tpu.vector_store %arg20[%c0_251, %c320], %574 {strides = array<i32>} : memref<1x512xf32, #tpu.memory_space<vmem>>, vector<1x32xf32>,
    %576 = vector.extract_strided_slice %573 {offsets = [0, 32], sizes = [1, 32], strides = [1, 1]} : vector<1x64xf32> to vector<1x32xf32>
    %c0_252 = arith.constant 0 : index
    %c160 = arith.constant 160 : index
    %577 = vector.load %arg20[%c0_252, %c160] : memref<1x512xf32, #tpu.memory_space<vmem>>, vector<1x32xf32>
    tpu.vector_store %arg20[%c0_252, %c160], %576 {strides = array<i32>} : memref<1x512xf32, #tpu.memory_space<vmem>>, vector<1x32xf32>,
    %c6_253 = arith.constant 6 : index
    %c0_254 = arith.constant 0 : index
    %578 = vector.load %arg18[%c6_253, %c0_254] : memref<8x256xf32, #tpu.memory_space<vmem>>, vector<1x256xf32>
    %579 = arith.truncf %573 : vector<1x64xf32> to vector<1x64xbf16>
    %cst_255 = arith.constant dense<0.000000e+00> : vector<1x256xf32>
    %580 = tpu.matmul %579, %431, %cst_255 {dimension_numbers = #tpu.dot_dimension_numbers<[1], [0], [0], [1], [0, 0, 1, 1], [], []>} : vector<1x64xbf16>, vector<64x256xbf16>, vector<1x256xf32> -> vector<1x256xf32>
    %581 = arith.addf %578, %580 : vector<1x256xf32>
    %582 = vector.extract_strided_slice %581 {offsets = [0, 0], sizes = [1, 192], strides = [1, 1]} : vector<1x256xf32> to vector<1x192xf32>
    %583 = arith.negf %582 : vector<1x192xf32>
    %584 = math.exp %583 : vector<1x192xf32>
    %cst_256 = arith.constant 1.000000e+00 : f32
    %585 = vector.broadcast %cst_256 : f32 to vector<1x192xf32>
    %586 = arith.addf %585, %584 : vector<1x192xf32>
    %587 = arith.divf %585, %586 : vector<1x192xf32>
    %588 = vector.extract_strided_slice %587 {offsets = [0, 0], sizes = [1, 64], strides = [1, 1]} : vector<1x192xf32> to vector<1x64xf32>
    %589 = vector.extract_strided_slice %587 {offsets = [0, 64], sizes = [1, 64], strides = [1, 1]} : vector<1x192xf32> to vector<1x64xf32>
    %590 = vector.extract_strided_slice %587 {offsets = [0, 128], sizes = [1, 64], strides = [1, 1]} : vector<1x192xf32> to vector<1x64xf32>
    %591 = vector.extract_strided_slice %581 {offsets = [0, 192], sizes = [1, 64], strides = [1, 1]} : vector<1x256xf32> to vector<1x64xf32>
    %592 = math.tanh %591 : vector<1x64xf32>
    %593 = arith.mulf %589, %571 : vector<1x64xf32>
    %594 = arith.mulf %588, %592 : vector<1x64xf32>
    %595 = arith.addf %593, %594 : vector<1x64xf32>
    %596 = math.tanh %595 : vector<1x64xf32>
    %597 = arith.mulf %590, %596 : vector<1x64xf32>
    %598 = vector.extract_strided_slice %597 {offsets = [0, 0], sizes = [1, 32], strides = [1, 1]} : vector<1x64xf32> to vector<1x32xf32>
    %c0_257 = arith.constant 0 : index
    %c384 = arith.constant 384 : index
    %599 = vector.load %arg20[%c0_257, %c384] : memref<1x512xf32, #tpu.memory_space<vmem>>, vector<1x32xf32>
    tpu.vector_store %arg20[%c0_257, %c384], %598 {strides = array<i32>} : memref<1x512xf32, #tpu.memory_space<vmem>>, vector<1x32xf32>,
    %600 = vector.extract_strided_slice %597 {offsets = [0, 32], sizes = [1, 32], strides = [1, 1]} : vector<1x64xf32> to vector<1x32xf32>
    %c0_258 = arith.constant 0 : index
    %c96 = arith.constant 96 : index
    %601 = vector.load %arg20[%c0_258, %c96] : memref<1x512xf32, #tpu.memory_space<vmem>>, vector<1x32xf32>
    tpu.vector_store %arg20[%c0_258, %c96], %600 {strides = array<i32>} : memref<1x512xf32, #tpu.memory_space<vmem>>, vector<1x32xf32>,
    %c7_259 = arith.constant 7 : index
    %c0_260 = arith.constant 0 : index
    %602 = vector.load %arg18[%c7_259, %c0_260] : memref<8x256xf32, #tpu.memory_space<vmem>>, vector<1x256xf32>
    %603 = arith.truncf %597 : vector<1x64xf32> to vector<1x64xbf16>
    %cst_261 = arith.constant dense<0.000000e+00> : vector<1x256xf32>
    %604 = tpu.matmul %603, %431, %cst_261 {dimension_numbers = #tpu.dot_dimension_numbers<[1], [0], [0], [1], [0, 0, 1, 1], [], []>} : vector<1x64xbf16>, vector<64x256xbf16>, vector<1x256xf32> -> vector<1x256xf32>
    %605 = arith.addf %602, %604 : vector<1x256xf32>
    %606 = vector.extract_strided_slice %605 {offsets = [0, 0], sizes = [1, 192], strides = [1, 1]} : vector<1x256xf32> to vector<1x192xf32>
    %607 = arith.negf %606 : vector<1x192xf32>
    %608 = math.exp %607 : vector<1x192xf32>
    %cst_262 = arith.constant 1.000000e+00 : f32
    %609 = vector.broadcast %cst_262 : f32 to vector<1x192xf32>
    %610 = arith.addf %609, %608 : vector<1x192xf32>
    %611 = arith.divf %609, %610 : vector<1x192xf32>
    %612 = vector.extract_strided_slice %611 {offsets = [0, 0], sizes = [1, 64], strides = [1, 1]} : vector<1x192xf32> to vector<1x64xf32>
    %613 = vector.extract_strided_slice %611 {offsets = [0, 64], sizes = [1, 64], strides = [1, 1]} : vector<1x192xf32> to vector<1x64xf32>
    %614 = vector.extract_strided_slice %611 {offsets = [0, 128], sizes = [1, 64], strides = [1, 1]} : vector<1x192xf32> to vector<1x64xf32>
    %615 = vector.extract_strided_slice %605 {offsets = [0, 192], sizes = [1, 64], strides = [1, 1]} : vector<1x256xf32> to vector<1x64xf32>
    %616 = math.tanh %615 : vector<1x64xf32>
    %617 = arith.mulf %613, %595 : vector<1x64xf32>
    %618 = arith.mulf %612, %616 : vector<1x64xf32>
    %619 = arith.addf %617, %618 : vector<1x64xf32>
    %620 = math.tanh %619 : vector<1x64xf32>
    %621 = arith.mulf %614, %620 : vector<1x64xf32>
    %622 = vector.extract_strided_slice %621 {offsets = [0, 0], sizes = [1, 32], strides = [1, 1]} : vector<1x64xf32> to vector<1x32xf32>
    %c0_263 = arith.constant 0 : index
    %c448 = arith.constant 448 : index
    %623 = vector.load %arg20[%c0_263, %c448] : memref<1x512xf32, #tpu.memory_space<vmem>>, vector<1x32xf32>
    tpu.vector_store %arg20[%c0_263, %c448], %622 {strides = array<i32>} : memref<1x512xf32, #tpu.memory_space<vmem>>, vector<1x32xf32>,
    %624 = vector.extract_strided_slice %621 {offsets = [0, 32], sizes = [1, 32], strides = [1, 1]} : vector<1x64xf32> to vector<1x32xf32>
    %c0_264 = arith.constant 0 : index
    %c32_265 = arith.constant 32 : index
    %625 = vector.load %arg20[%c0_264, %c32_265] : memref<1x512xf32, #tpu.memory_space<vmem>>, vector<1x32xf32>
    tpu.vector_store %arg20[%c0_264, %c32_265], %624 {strides = array<i32>} : memref<1x512xf32, #tpu.memory_space<vmem>>, vector<1x32xf32>,
    tpu.wait_dma2 semaphore(%arg22 : memref<!tpu.dma_semaphore, #tpu.memory_space<semaphore_mem>>) src(%arg13 : memref<512x1024xbf16, #tpu.memory_space<any>>) dst(%arg21 : memref<512x1024xbf16, #tpu.memory_space<vmem>>)
    %c0_266 = arith.constant 0 : index
    %c0_267 = arith.constant 0 : index
    %626 = vector.load %arg20[%c0_266, %c0_267] : memref<1x512xf32, #tpu.memory_space<vmem>>, vector<1x512xf32>
    %627 = arith.truncf %626 : vector<1x512xf32> to vector<1x512xbf16>
    %c0_268 = arith.constant 0 : index
    %c0_269 = arith.constant 0 : index
    %628 = vector.load %arg21[%c0_268, %c0_269] : memref<512x1024xbf16, #tpu.memory_space<vmem>>, vector<512x1024xbf16>
    %cst_270 = arith.constant dense<0.000000e+00> : vector<1x1024xf32>
    %629 = tpu.matmul %627, %628, %cst_270 {dimension_numbers = #tpu.dot_dimension_numbers<[1], [0], [0], [1], [0, 0, 1, 1], [], []>} : vector<1x512xbf16>, vector<512x1024xbf16>, vector<1x1024xf32> -> vector<1x1024xf32>
    %c0_271 = arith.constant 0 : index
    %c0_272 = arith.constant 0 : index
    %630 = vector.load %arg14[%c0_271, %c0_272] : memref<1x1024xf32, #tpu.memory_space<vmem>>, vector<1x1024xf32>
    %631 = arith.addf %629, %630 : vector<1x1024xf32>
    %632 = arith.truncf %631 : vector<1x1024xf32> to vector<1x1024xbf16>
    %c0_273 = arith.constant 0 : index
    %c0_274 = arith.constant 0 : index
    %633 = vector.load %arg15[%c0_273, %c0_274] : memref<1024x2xbf16, #tpu.memory_space<vmem>>, vector<1024x2xbf16>
    %cst_275 = arith.constant dense<0.000000e+00> : vector<1x2xf32>
    %634 = tpu.matmul %632, %633, %cst_275 {dimension_numbers = #tpu.dot_dimension_numbers<[1], [0], [0], [1], [0, 0, 1, 1], [], []>} : vector<1x1024xbf16>, vector<1024x2xbf16>, vector<1x2xf32> -> vector<1x2xf32>
    %c0_276 = arith.constant 0 : index
    %c0_277 = arith.constant 0 : index
    %635 = vector.load %arg16[%c0_276, %c0_277] : memref<1x2xf32, #tpu.memory_space<vmem>>, vector<1x2xf32>
    %636 = arith.addf %634, %635 : vector<1x2xf32>
    %c0_278 = arith.constant 0 : index
    %c0_279 = arith.constant 0 : index
    %637 = vector.load %arg17[%c0_278, %c0_279] : memref<1x2xf32, #tpu.memory_space<vmem>>, vector<1x2xf32>
    tpu.vector_store %arg17[%c0_278, %c0_279], %636 {strides = array<i32>} : memref<1x2xf32, #tpu.memory_space<vmem>>, vector<1x2xf32>,
    return
  }
}

</mosaic_0001>

<bundles_post_ra>
// kernel: _lambda_.1
= control target key start
LH: loop header
LB: loop body
LE: loop exit
PB: predicated region body
PF: predicated region fallthrough
CT: control target
= control target key end

     0   :  { %s13300_s0 = inlined_call_operand.vmem [shape: f32[8,18,54], index: 0, kind: input, shape index: {}]   ;;  %s13301_s1 = inlined_call_operand.vmem [shape: bf16[3,54,128], index: 1, kind: input, shape index: {}]   ;;  %s13302_s2 = inlined_call_operand.vmem [shape: f32[1,128], index: 2, kind: input, shape index: {}]   ;;  %s13303_s3 = inlined_call_operand.vmem [shape: bf16[8,64], index: 3, kind: input, shape index: {}]   ;;  %s13304_s4 = inlined_call_operand.vmem [shape: f32[1,64], index: 4, kind: input, shape index: {}]   ;;  %s13305_s5 = inlined_call_operand.vmem [shape: bf16[64,256], index: 5, kind: input, shape index: {}]   ;;  %s13306_s6 = inlined_call_operand.vmem [shape: bf16[64,256], index: 6, kind: input, shape index: {}]   ;;  %s13307_s7 = inlined_call_operand.vmem [shape: bf16[64,256], index: 7, kind: input, shape index: {}]   ;;  %s13308_s8 = inlined_call_operand.vmem [shape: f32[1,256], index: 8, kind: input, shape index: {}]   ;;  %s13309_s9 = inlined_call_operand.vmem [shape: bf16[64,256], index: 9, kind: input, shape index: {}]   ;;  %s13310_s10 = inlined_call_operand.vmem [shape: bf16[64,256], index: 10, kind: input, shape index: {}]   ;;  %s13311_s11 = inlined_call_operand.vmem [shape: bf16[64,256], index: 11, kind: input, shape index: {}]   ;;  %s13312_s12 = inlined_call_operand.vmem [shape: f32[1,256], index: 12, kind: input, shape index: {}]   ;;  %s13313_s13 = inlined_call_operand.vmem [shape: bf16[512,1024], index: 13, kind: input, shape index: {}]   ;;  %s13314_s14 = inlined_call_operand.vmem [shape: f32[1,1024], index: 14, kind: input, shape index: {}]   ;;  %s13315_s15 = inlined_call_operand.vmem [shape: bf16[1024,2], index: 15, kind: input, shape index: {}]   ;;  %s13316_s16 = inlined_call_operand.vmem [shape: f32[1,2], index: 16, kind: input, shape index: {}]   ;;  %s13317_s17 = inlined_call_operand.hbm [shape: f32[1,2], index: 17, kind: output, shape index: {}]  }
   0x1   :  { %13320 = sst [smem:[#allocation12_spill]] %s13300_s0 }
   0x2   :  { %13321 = sst [smem:[#allocation13_spill]] %s13301_s1 }
   0x3   :  { %22 = vsyncpa [#allocation8], 0  ;;  %v73_v0 = vld [vmem:[%s13313_s13] sm:$0xf]  ;;  %v77_v2 = vld [vmem:[%s13313_s13 + $0x4] sm:$0xf] }
   0x4   :  { %v75_v1 = vld [vmem:[%s13313_s13 + $0x20] sm:$0xf]  ;;  %74 = vst [vmem:[#allocation5] sm:$0xf] %v73_v0  ;;  %v79_v3 = vld [vmem:[%s13313_s13 + $0x24] sm:$0xf] }
   0x5   :  { %76 = vst [vmem:[#allocation5 + $0x4] sm:$0xf] %v75_v1  ;;  %v81_v4 = vld [vmem:[%s13313_s13 + $0x8] sm:$0xf]  ;;  %78 = vst [vmem:[#allocation5 + $0x8] sm:$0xf] %v77_v2 }
   0x6   :  { %80 = vst [vmem:[#allocation5 + $0xc] sm:$0xf] %v79_v3  ;;  %82 = vst [vmem:[#allocation5 + $0x10] sm:$0xf] %v81_v4  ;;  %v83_v5 = vld [vmem:[%s13313_s13 + $0x28] sm:$0xf] }
   0x7   :  { %v85_v6 = vld [vmem:[%s13313_s13 + $0xc] sm:$0xf]  ;;  %84 = vst [vmem:[#allocation5 + $0x14] sm:$0xf] %v83_v5  ;;  %v89_v8 = vld [vmem:[%s13313_s13 + $0x10] sm:$0xf] }
   0x8   :  { %v87_v7 = vld [vmem:[%s13313_s13 + $0x2c] sm:$0xf]  ;;  %86 = vst [vmem:[#allocation5 + $0x18] sm:$0xf] %v85_v6  ;;  %v91_v9 = vld [vmem:[%s13313_s13 + $0x30] sm:$0xf] }
   0x9   :  { %88 = vst [vmem:[#allocation5 + $0x1c] sm:$0xf] %v87_v7  ;;  %v93_v10 = vld [vmem:[%s13313_s13 + $0x14] sm:$0xf]  ;;  %90 = vst [vmem:[#allocation5 + $0x20] sm:$0xf] %v89_v8 }
   0xa   :  { %92 = vst [vmem:[#allocation5 + $0x24] sm:$0xf] %v91_v9  ;;  %94 = vst [vmem:[#allocation5 + $0x28] sm:$0xf] %v93_v10  ;;  %v95_v11 = vld [vmem:[%s13313_s13 + $0x34] sm:$0xf] }
   0xb   :  { %v97_v12 = vld [vmem:[%s13313_s13 + $0x18] sm:$0xf]  ;;  %96 = vst [vmem:[#allocation5 + $0x2c] sm:$0xf] %v95_v11  ;;  %v101_v14 = vld [vmem:[%s13313_s13 + $0x1c] sm:$0xf] }
   0xc   :  { %v99_v13 = vld [vmem:[%s13313_s13 + $0x38] sm:$0xf]  ;;  %98 = vst [vmem:[#allocation5 + $0x30] sm:$0xf] %v97_v12  ;;  %v103_v15 = vld [vmem:[%s13313_s13 + $0x3c] sm:$0xff]  }
   0xd   :  { %100 = vst [vmem:[#allocation5 + $0x34] sm:$0xf] %v99_v13  ;;  %v107_v16 = vld [vmem:[%s13313_s13 + $0x60] sm:$0xf]  ;;  %102 = vst [vmem:[#allocation5 + $0x38] sm:$0xf] %v101_v14 }
   0xe   :  { %104 = vst [vmem:[#allocation5 + $0x3c] sm:$0xff] %v103_v15   ;;  %108 = vst [vmem:[#allocation5 + $0x44] sm:$0xf] %v107_v16  ;;  %v109_v17 = vld [vmem:[%s13313_s13 + $0x44] sm:$0xf]  ;;  %v135_v30 = vld [vmem:[%s13313_s13 + $0x7c] sm:$0xff]  }
   0xf   :  { %v111_v18 = vld [vmem:[%s13313_s13 + $0x64] sm:$0xf]  ;;  %v113_v19 = vld [vmem:[%s13313_s13 + $0x48] sm:$0xf]  ;;  %110 = vst [vmem:[#allocation5 + $0x48] sm:$0xf] %v109_v17 }
  0x10   :  { %112 = vst [vmem:[#allocation5 + $0x4c] sm:$0xf] %v111_v18  ;;  %114 = vst [vmem:[#allocation5 + $0x50] sm:$0xf] %v113_v19  ;;  %v115_v20 = vld [vmem:[%s13313_s13 + $0x68] sm:$0xf] }
  0x11   :  { %v117_v21 = vld [vmem:[%s13313_s13 + $0x4c] sm:$0xf]  ;;  %116 = vst [vmem:[#allocation5 + $0x54] sm:$0xf] %v115_v20  ;;  %v121_v23 = vld [vmem:[%s13313_s13 + $0x50] sm:$0xf] }
  0x12   :  { %v119_v22 = vld [vmem:[%s13313_s13 + $0x6c] sm:$0xf]  ;;  %118 = vst [vmem:[#allocation5 + $0x58] sm:$0xf] %v117_v21  ;;  %v123_v24 = vld [vmem:[%s13313_s13 + $0x70] sm:$0xf] }
  0x13   :  { %120 = vst [vmem:[#allocation5 + $0x5c] sm:$0xf] %v119_v22  ;;  %v125_v25 = vld [vmem:[%s13313_s13 + $0x54] sm:$0xf]  ;;  %122 = vst [vmem:[#allocation5 + $0x60] sm:$0xf] %v121_v23 }
  0x14   :  { %124 = vst [vmem:[#allocation5 + $0x64] sm:$0xf] %v123_v24  ;;  %126 = vst [vmem:[#allocation5 + $0x68] sm:$0xf] %v125_v25  ;;  %v127_v26 = vld [vmem:[%s13313_s13 + $0x74] sm:$0xf] }
  0x15   :  { %v129_v27 = vld [vmem:[%s13313_s13 + $0x58] sm:$0xf]  ;;  %128 = vst [vmem:[#allocation5 + $0x6c] sm:$0xf] %v127_v26  ;;  %v133_v29 = vld [vmem:[%s13313_s13 + $0x5c] sm:$0xf] }
  0x16   :  { %v131_v28 = vld [vmem:[%s13313_s13 + $0x78] sm:$0xf]  ;;  %130 = vst [vmem:[#allocation5 + $0x70] sm:$0xf] %v129_v27  ;;  %v139_v31 = vld [vmem:[%s13313_s13 + $0xa0] sm:$0xf] }
  0x17   :  { %132 = vst [vmem:[#allocation5 + $0x74] sm:$0xf] %v131_v28  ;;  %134 = vst [vmem:[#allocation5 + $0x78] sm:$0xf] %v133_v29  ;;  %v141_v32 = vld [vmem:[%s13313_s13 + $0x84] sm:$0xf] }
  0x18   :  { %136 = vst [vmem:[#allocation5 + $0x7c] sm:$0xff] %v135_v30   ;;  %140 = vst [vmem:[#allocation5 + $0x84] sm:$0xf] %v139_v31  ;;  %v143_v33 = vld [vmem:[%s13313_s13 + $0xa4] sm:$0xf]  ;;  %v167_v45 = vld [vmem:[%s13313_s13 + $0xbc] sm:$0xff]  }
  0x19   :  { %v145_v34 = vld [vmem:[%s13313_s13 + $0x88] sm:$0xf]  ;;  %142 = vst [vmem:[#allocation5 + $0x88] sm:$0xf] %v141_v32  ;;  %144 = vst [vmem:[#allocation5 + $0x8c] sm:$0xf] %v143_v33 }
  0x1a   :  { %146 = vst [vmem:[#allocation5 + $0x90] sm:$0xf] %v145_v34  ;;  %v147_v35 = vld [vmem:[%s13313_s13 + $0xa8] sm:$0xf]  ;;  %v149_v36 = vld [vmem:[%s13313_s13 + $0x8c] sm:$0xf] }
  0x1b   :  { %v151_v37 = vld [vmem:[%s13313_s13 + $0xac] sm:$0xf]  ;;  %148 = vst [vmem:[#allocation5 + $0x94] sm:$0xf] %v147_v35  ;;  %150 = vst [vmem:[#allocation5 + $0x98] sm:$0xf] %v149_v36 }
  0x1c   :  { %152 = vst [vmem:[#allocation5 + $0x9c] sm:$0xf] %v151_v37  ;;  %v153_v38 = vld [vmem:[%s13313_s13 + $0x90] sm:$0xf]  ;;  %v157_v40 = vld [vmem:[%s13313_s13 + $0x94] sm:$0xf] }
  0x1d   :  { %v155_v39 = vld [vmem:[%s13313_s13 + $0xb0] sm:$0xf]  ;;  %154 = vst [vmem:[#allocation5 + $0xa0] sm:$0xf] %v153_v38  ;;  %158 = vst [vmem:[#allocation5 + $0xa8] sm:$0xf] %v157_v40 }
  0x1e   :  { %156 = vst [vmem:[#allocation5 + $0xa4] sm:$0xf] %v155_v39  ;;  %v159_v41 = vld [vmem:[%s13313_s13 + $0xb4] sm:$0xf]  ;;  %v161_v42 = vld [vmem:[%s13313_s13 + $0x98] sm:$0xf] }
  0x1f   :  { %v163_v43 = vld [vmem:[%s13313_s13 + $0xb8] sm:$0xf]  ;;  %160 = vst [vmem:[#allocation5 + $0xac] sm:$0xf] %v159_v41  ;;  %162 = vst [vmem:[#allocation5 + $0xb0] sm:$0xf] %v161_v42 }
  0x20   :  { %164 = vst [vmem:[#allocation5 + $0xb4] sm:$0xf] %v163_v43  ;;  %v165_v44 = vld [vmem:[%s13313_s13 + $0x9c] sm:$0xf]  ;;  %v171_v46 = vld [vmem:[%s13313_s13 + $0xe0] sm:$0xf] }
  0x21   :  { %166 = vst [vmem:[#allocation5 + $0xb8] sm:$0xf] %v165_v44  ;;  %168 = vst [vmem:[#allocation5 + $0xbc] sm:$0xff] %v167_v45   ;;  %v173_v47 = vld [vmem:[%s13313_s13 + $0xc4] sm:$0xf]  ;;  %v199_v60 = vld [vmem:[%s13313_s13 + $0xfc] sm:$0xff]  }
  0x22   :  { %172 = vst [vmem:[#allocation5 + $0xc4] sm:$0xf] %v171_v46  ;;  %v175_v48 = vld [vmem:[%s13313_s13 + $0xe4] sm:$0xf]  ;;  %v177_v49 = vld [vmem:[%s13313_s13 + $0xc8] sm:$0xf] }
  0x23   :  { %174 = vst [vmem:[#allocation5 + $0xc8] sm:$0xf] %v173_v47  ;;  %176 = vst [vmem:[#allocation5 + $0xcc] sm:$0xf] %v175_v48  ;;  %v179_v50 = vld [vmem:[%s13313_s13 + $0xe8] sm:$0xf] }
  0x24   :  { %178 = vst [vmem:[#allocation5 + $0xd0] sm:$0xf] %v177_v49  ;;  %v181_v51 = vld [vmem:[%s13313_s13 + $0xcc] sm:$0xf]  ;;  %180 = vst [vmem:[#allocation5 + $0xd4] sm:$0xf] %v179_v50 }
  0x25   :  { %v183_v52 = vld [vmem:[%s13313_s13 + $0xec] sm:$0xf]  ;;  %182 = vst [vmem:[#allocation5 + $0xd8] sm:$0xf] %v181_v51  ;;  %v185_v53 = vld [vmem:[%s13313_s13 + $0xd0] sm:$0xf] }
  0x26   :  { %184 = vst [vmem:[#allocation5 + $0xdc] sm:$0xf] %v183_v52  ;;  %v187_v54 = vld [vmem:[%s13313_s13 + $0xf0] sm:$0xf]  ;;  %v189_v55 = vld [vmem:[%s13313_s13 + $0xd4] sm:$0xf] }
  0x27   :  { %186 = vst [vmem:[#allocation5 + $0xe0] sm:$0xf] %v185_v53  ;;  %188 = vst [vmem:[#allocation5 + $0xe4] sm:$0xf] %v187_v54  ;;  %v191_v56 = vld [vmem:[%s13313_s13 + $0xf4] sm:$0xf] }
  0x28   :  { %190 = vst [vmem:[#allocation5 + $0xe8] sm:$0xf] %v189_v55  ;;  %v193_v57 = vld [vmem:[%s13313_s13 + $0xd8] sm:$0xf]  ;;  %192 = vst [vmem:[#allocation5 + $0xec] sm:$0xf] %v191_v56 }
  0x29   :  { %v195_v58 = vld [vmem:[%s13313_s13 + $0xf8] sm:$0xf]  ;;  %194 = vst [vmem:[#allocation5 + $0xf0] sm:$0xf] %v193_v57  ;;  %v197_v59 = vld [vmem:[%s13313_s13 + $0xdc] sm:$0xf] }
  0x2a   :  { %196 = vst [vmem:[#allocation5 + $0xf4] sm:$0xf] %v195_v58  ;;  %v203_v61 = vld [vmem:[%s13313_s13 + $0x120] sm:$0xf]  ;;  %198 = vst [vmem:[#allocation5 + $0xf8] sm:$0xf] %v197_v59 }
  0x2b   :  { %200 = vst [vmem:[#allocation5 + $0xfc] sm:$0xff] %v199_v60   ;;  %204 = vst [vmem:[#allocation5 + $0x104] sm:$0xf] %v203_v61  ;;  %v205_v62 = vld [vmem:[%s13313_s13 + $0x104] sm:$0xf]  ;;  %v231_v11 = vld [vmem:[%s13313_s13 + $0x13c] sm:$0xff]  }
  0x2c   :  { %v207_v63 = vld [vmem:[%s13313_s13 + $0x124] sm:$0xf]  ;;  %v209_v0 = vld [vmem:[%s13313_s13 + $0x108] sm:$0xf]  ;;  %206 = vst [vmem:[#allocation5 + $0x108] sm:$0xf] %v205_v62 }
  0x2d   :  { %208 = vst [vmem:[#allocation5 + $0x10c] sm:$0xf] %v207_v63  ;;  %210 = vst [vmem:[#allocation5 + $0x110] sm:$0xf] %v209_v0  ;;  %v211_v1 = vld [vmem:[%s13313_s13 + $0x128] sm:$0xf] }
  0x2e   :  { %v213_v2 = vld [vmem:[%s13313_s13 + $0x10c] sm:$0xf]  ;;  %212 = vst [vmem:[#allocation5 + $0x114] sm:$0xf] %v211_v1  ;;  %v217_v4 = vld [vmem:[%s13313_s13 + $0x110] sm:$0xf] }
  0x2f   :  { %v215_v3 = vld [vmem:[%s13313_s13 + $0x12c] sm:$0xf]  ;;  %214 = vst [vmem:[#allocation5 + $0x118] sm:$0xf] %v213_v2  ;;  %v219_v5 = vld [vmem:[%s13313_s13 + $0x130] sm:$0xf] }
  0x30   :  { %216 = vst [vmem:[#allocation5 + $0x11c] sm:$0xf] %v215_v3  ;;  %v221_v6 = vld [vmem:[%s13313_s13 + $0x114] sm:$0xf]  ;;  %218 = vst [vmem:[#allocation5 + $0x120] sm:$0xf] %v217_v4 }
  0x31   :  { %220 = vst [vmem:[#allocation5 + $0x124] sm:$0xf] %v219_v5  ;;  %222 = vst [vmem:[#allocation5 + $0x128] sm:$0xf] %v221_v6  ;;  %v223_v7 = vld [vmem:[%s13313_s13 + $0x134] sm:$0xf] }
  0x32   :  { %v225_v8 = vld [vmem:[%s13313_s13 + $0x118] sm:$0xf]  ;;  %224 = vst [vmem:[#allocation5 + $0x12c] sm:$0xf] %v223_v7  ;;  %v229_v10 = vld [vmem:[%s13313_s13 + $0x11c] sm:$0xf] }
  0x33   :  { %v227_v9 = vld [vmem:[%s13313_s13 + $0x138] sm:$0xf]  ;;  %226 = vst [vmem:[#allocation5 + $0x130] sm:$0xf] %v225_v8  ;;  %v235_v12 = vld [vmem:[%s13313_s13 + $0x160] sm:$0xf] }
  0x34   :  { %228 = vst [vmem:[#allocation5 + $0x134] sm:$0xf] %v227_v9  ;;  %230 = vst [vmem:[#allocation5 + $0x138] sm:$0xf] %v229_v10  ;;  %v237_v13 = vld [vmem:[%s13313_s13 + $0x144] sm:$0xf] }
  0x35   :  { %232 = vst [vmem:[#allocation5 + $0x13c] sm:$0xff] %v231_v11   ;;  %236 = vst [vmem:[#allocation5 + $0x144] sm:$0xf] %v235_v12  ;;  %v239_v14 = vld [vmem:[%s13313_s13 + $0x164] sm:$0xf]  ;;  %v263_v26 = vld [vmem:[%s13313_s13 + $0x17c] sm:$0xff]  }
  0x36   :  { %v241_v15 = vld [vmem:[%s13313_s13 + $0x148] sm:$0xf]  ;;  %238 = vst [vmem:[#allocation5 + $0x148] sm:$0xf] %v237_v13  ;;  %240 = vst [vmem:[#allocation5 + $0x14c] sm:$0xf] %v239_v14 }
  0x37   :  { %242 = vst [vmem:[#allocation5 + $0x150] sm:$0xf] %v241_v15  ;;  %v243_v16 = vld [vmem:[%s13313_s13 + $0x168] sm:$0xf]  ;;  %v245_v17 = vld [vmem:[%s13313_s13 + $0x14c] sm:$0xf] }
  0x38   :  { %v247_v18 = vld [vmem:[%s13313_s13 + $0x16c] sm:$0xf]  ;;  %244 = vst [vmem:[#allocation5 + $0x154] sm:$0xf] %v243_v16  ;;  %246 = vst [vmem:[#allocation5 + $0x158] sm:$0xf] %v245_v17 }
  0x39   :  { %248 = vst [vmem:[#allocation5 + $0x15c] sm:$0xf] %v247_v18  ;;  %v249_v19 = vld [vmem:[%s13313_s13 + $0x150] sm:$0xf]  ;;  %v253_v21 = vld [vmem:[%s13313_s13 + $0x154] sm:$0xf] }
  0x3a   :  { %v251_v20 = vld [vmem:[%s13313_s13 + $0x170] sm:$0xf]  ;;  %250 = vst [vmem:[#allocation5 + $0x160] sm:$0xf] %v249_v19  ;;  %254 = vst [vmem:[#allocation5 + $0x168] sm:$0xf] %v253_v21 }
  0x3b   :  { %252 = vst [vmem:[#allocation5 + $0x164] sm:$0xf] %v251_v20  ;;  %v255_v22 = vld [vmem:[%s13313_s13 + $0x174] sm:$0xf]  ;;  %v257_v23 = vld [vmem:[%s13313_s13 + $0x158] sm:$0xf] }
  0x3c   :  { %v259_v24 = vld [vmem:[%s13313_s13 + $0x178] sm:$0xf]  ;;  %256 = vst [vmem:[#allocation5 + $0x16c] sm:$0xf] %v255_v22  ;;  %258 = vst [vmem:[#allocation5 + $0x170] sm:$0xf] %v257_v23 }
  0x3d   :  { %260 = vst [vmem:[#allocation5 + $0x174] sm:$0xf] %v259_v24  ;;  %v261_v25 = vld [vmem:[%s13313_s13 + $0x15c] sm:$0xf]  ;;  %v267_v27 = vld [vmem:[%s13313_s13 + $0x1a0] sm:$0xf] }
  0x3e   :  { %262 = vst [vmem:[#allocation5 + $0x178] sm:$0xf] %v261_v25  ;;  %264 = vst [vmem:[#allocation5 + $0x17c] sm:$0xff] %v263_v26   ;;  %v269_v28 = vld [vmem:[%s13313_s13 + $0x184] sm:$0xf]  ;;  %v295_v41 = vld [vmem:[%s13313_s13 + $0x1bc] sm:$0xff]  }
  0x3f   :  { %268 = vst [vmem:[#allocation5 + $0x184] sm:$0xf] %v267_v27  ;;  %v271_v29 = vld [vmem:[%s13313_s13 + $0x1a4] sm:$0xf]  ;;  %v273_v30 = vld [vmem:[%s13313_s13 + $0x188] sm:$0xf] }
  0x40   :  { %270 = vst [vmem:[#allocation5 + $0x188] sm:$0xf] %v269_v28  ;;  %272 = vst [vmem:[#allocation5 + $0x18c] sm:$0xf] %v271_v29  ;;  %v275_v31 = vld [vmem:[%s13313_s13 + $0x1a8] sm:$0xf] }
  0x41   :  { %274 = vst [vmem:[#allocation5 + $0x190] sm:$0xf] %v273_v30  ;;  %v277_v32 = vld [vmem:[%s13313_s13 + $0x18c] sm:$0xf]  ;;  %276 = vst [vmem:[#allocation5 + $0x194] sm:$0xf] %v275_v31 }
  0x42   :  { %v279_v33 = vld [vmem:[%s13313_s13 + $0x1ac] sm:$0xf]  ;;  %278 = vst [vmem:[#allocation5 + $0x198] sm:$0xf] %v277_v32  ;;  %v281_v34 = vld [vmem:[%s13313_s13 + $0x190] sm:$0xf] }
  0x43   :  { %280 = vst [vmem:[#allocation5 + $0x19c] sm:$0xf] %v279_v33  ;;  %v283_v35 = vld [vmem:[%s13313_s13 + $0x1b0] sm:$0xf]  ;;  %v285_v36 = vld [vmem:[%s13313_s13 + $0x194] sm:$0xf] }
  0x44   :  { %282 = vst [vmem:[#allocation5 + $0x1a0] sm:$0xf] %v281_v34  ;;  %284 = vst [vmem:[#allocation5 + $0x1a4] sm:$0xf] %v283_v35  ;;  %v287_v37 = vld [vmem:[%s13313_s13 + $0x1b4] sm:$0xf] }
  0x45   :  { %286 = vst [vmem:[#allocation5 + $0x1a8] sm:$0xf] %v285_v36  ;;  %v289_v38 = vld [vmem:[%s13313_s13 + $0x198] sm:$0xf]  ;;  %288 = vst [vmem:[#allocation5 + $0x1ac] sm:$0xf] %v287_v37 }
  0x46   :  { %v291_v39 = vld [vmem:[%s13313_s13 + $0x1b8] sm:$0xf]  ;;  %290 = vst [vmem:[#allocation5 + $0x1b0] sm:$0xf] %v289_v38  ;;  %v293_v40 = vld [vmem:[%s13313_s13 + $0x19c] sm:$0xf] }
  0x47   :  { %292 = vst [vmem:[#allocation5 + $0x1b4] sm:$0xf] %v291_v39  ;;  %v299_v42 = vld [vmem:[%s13313_s13 + $0x1e0] sm:$0xf]  ;;  %294 = vst [vmem:[#allocation5 + $0x1b8] sm:$0xf] %v293_v40 }
  0x48   :  { %296 = vst [vmem:[#allocation5 + $0x1bc] sm:$0xff] %v295_v41   ;;  %300 = vst [vmem:[#allocation5 + $0x1c4] sm:$0xf] %v299_v42  ;;  %v301_v43 = vld [vmem:[%s13313_s13 + $0x1c4] sm:$0xf]  ;;  %v327_v56 = vld [vmem:[%s13313_s13 + $0x1fc] sm:$0xff]  }
  0x49   :  { %v303_v44 = vld [vmem:[%s13313_s13 + $0x1e4] sm:$0xf]  ;;  %v305_v45 = vld [vmem:[%s13313_s13 + $0x1c8] sm:$0xf]  ;;  %302 = vst [vmem:[#allocation5 + $0x1c8] sm:$0xf] %v301_v43 }
  0x4a   :  { %304 = vst [vmem:[#allocation5 + $0x1cc] sm:$0xf] %v303_v44  ;;  %306 = vst [vmem:[#allocation5 + $0x1d0] sm:$0xf] %v305_v45  ;;  %v307_v46 = vld [vmem:[%s13313_s13 + $0x1e8] sm:$0xf] }
  0x4b   :  { %v309_v47 = vld [vmem:[%s13313_s13 + $0x1cc] sm:$0xf]  ;;  %308 = vst [vmem:[#allocation5 + $0x1d4] sm:$0xf] %v307_v46  ;;  %v313_v49 = vld [vmem:[%s13313_s13 + $0x1d0] sm:$0xf] }
  0x4c   :  { %v311_v48 = vld [vmem:[%s13313_s13 + $0x1ec] sm:$0xf]  ;;  %310 = vst [vmem:[#allocation5 + $0x1d8] sm:$0xf] %v309_v47  ;;  %v315_v50 = vld [vmem:[%s13313_s13 + $0x1f0] sm:$0xf] }
  0x4d   :  { %312 = vst [vmem:[#allocation5 + $0x1dc] sm:$0xf] %v311_v48  ;;  %v317_v51 = vld [vmem:[%s13313_s13 + $0x1d4] sm:$0xf]  ;;  %314 = vst [vmem:[#allocation5 + $0x1e0] sm:$0xf] %v313_v49 }
  0x4e   :  { %316 = vst [vmem:[#allocation5 + $0x1e4] sm:$0xf] %v315_v50  ;;  %318 = vst [vmem:[#allocation5 + $0x1e8] sm:$0xf] %v317_v51  ;;  %v319_v52 = vld [vmem:[%s13313_s13 + $0x1f4] sm:$0xf] }
  0x4f   :  { %v321_v53 = vld [vmem:[%s13313_s13 + $0x1d8] sm:$0xf]  ;;  %320 = vst [vmem:[#allocation5 + $0x1ec] sm:$0xf] %v319_v52  ;;  %v325_v55 = vld [vmem:[%s13313_s13 + $0x1dc] sm:$0xf] }
  0x50   :  { %v323_v54 = vld [vmem:[%s13313_s13 + $0x1f8] sm:$0xf]  ;;  %322 = vst [vmem:[#allocation5 + $0x1f0] sm:$0xf] %v321_v53  ;;  %v331_v57 = vld [vmem:[%s13313_s13 + $0x220] sm:$0xf] }
  0x51   :  { %324 = vst [vmem:[#allocation5 + $0x1f4] sm:$0xf] %v323_v54  ;;  %326 = vst [vmem:[#allocation5 + $0x1f8] sm:$0xf] %v325_v55  ;;  %v333_v58 = vld [vmem:[%s13313_s13 + $0x204] sm:$0xf] }
  0x52   :  { %328 = vst [vmem:[#allocation5 + $0x1fc] sm:$0xff] %v327_v56   ;;  %332 = vst [vmem:[#allocation5 + $0x204] sm:$0xf] %v331_v57  ;;  %v335_v59 = vld [vmem:[%s13313_s13 + $0x224] sm:$0xf]  ;;  %v359_v7 = vld [vmem:[%s13313_s13 + $0x23c] sm:$0xff]  }
  0x53   :  { %v337_v60 = vld [vmem:[%s13313_s13 + $0x208] sm:$0xf]  ;;  %334 = vst [vmem:[#allocation5 + $0x208] sm:$0xf] %v333_v58  ;;  %336 = vst [vmem:[#allocation5 + $0x20c] sm:$0xf] %v335_v59 }
  0x54   :  { %338 = vst [vmem:[#allocation5 + $0x210] sm:$0xf] %v337_v60  ;;  %v339_v61 = vld [vmem:[%s13313_s13 + $0x228] sm:$0xf]  ;;  %v341_v62 = vld [vmem:[%s13313_s13 + $0x20c] sm:$0xf] }
  0x55   :  { %v343_v63 = vld [vmem:[%s13313_s13 + $0x22c] sm:$0xf]  ;;  %340 = vst [vmem:[#allocation5 + $0x214] sm:$0xf] %v339_v61  ;;  %342 = vst [vmem:[#allocation5 + $0x218] sm:$0xf] %v341_v62 }
  0x56   :  { %344 = vst [vmem:[#allocation5 + $0x21c] sm:$0xf] %v343_v63  ;;  %v345_v0 = vld [vmem:[%s13313_s13 + $0x210] sm:$0xf]  ;;  %v349_v2 = vld [vmem:[%s13313_s13 + $0x214] sm:$0xf] }
  0x57   :  { %v347_v1 = vld [vmem:[%s13313_s13 + $0x230] sm:$0xf]  ;;  %346 = vst [vmem:[#allocation5 + $0x220] sm:$0xf] %v345_v0  ;;  %350 = vst [vmem:[#allocation5 + $0x228] sm:$0xf] %v349_v2 }
  0x58   :  { %348 = vst [vmem:[#allocation5 + $0x224] sm:$0xf] %v347_v1  ;;  %v351_v3 = vld [vmem:[%s13313_s13 + $0x234] sm:$0xf]  ;;  %v353_v4 = vld [vmem:[%s13313_s13 + $0x218] sm:$0xf] }
  0x59   :  { %v355_v5 = vld [vmem:[%s13313_s13 + $0x238] sm:$0xf]  ;;  %352 = vst [vmem:[#allocation5 + $0x22c] sm:$0xf] %v351_v3  ;;  %354 = vst [vmem:[#allocation5 + $0x230] sm:$0xf] %v353_v4 }
  0x5a   :  { %356 = vst [vmem:[#allocation5 + $0x234] sm:$0xf] %v355_v5  ;;  %v357_v6 = vld [vmem:[%s13313_s13 + $0x21c] sm:$0xf]  ;;  %v363_v8 = vld [vmem:[%s13313_s13 + $0x260] sm:$0xf] }
  0x5b   :  { %358 = vst [vmem:[#allocation5 + $0x238] sm:$0xf] %v357_v6  ;;  %360 = vst [vmem:[#allocation5 + $0x23c] sm:$0xff] %v359_v7   ;;  %v365_v9 = vld [vmem:[%s13313_s13 + $0x244] sm:$0xf]  ;;  %v391_v22 = vld [vmem:[%s13313_s13 + $0x27c] sm:$0xff]  }
  0x5c   :  { %364 = vst [vmem:[#allocation5 + $0x244] sm:$0xf] %v363_v8  ;;  %v367_v10 = vld [vmem:[%s13313_s13 + $0x264] sm:$0xf]  ;;  %v369_v11 = vld [vmem:[%s13313_s13 + $0x248] sm:$0xf] }
  0x5d   :  { %366 = vst [vmem:[#allocation5 + $0x248] sm:$0xf] %v365_v9  ;;  %368 = vst [vmem:[#allocation5 + $0x24c] sm:$0xf] %v367_v10  ;;  %v371_v12 = vld [vmem:[%s13313_s13 + $0x268] sm:$0xf] }
  0x5e   :  { %370 = vst [vmem:[#allocation5 + $0x250] sm:$0xf] %v369_v11  ;;  %v373_v13 = vld [vmem:[%s13313_s13 + $0x24c] sm:$0xf]  ;;  %372 = vst [vmem:[#allocation5 + $0x254] sm:$0xf] %v371_v12 }
  0x5f   :  { %v375_v14 = vld [vmem:[%s13313_s13 + $0x26c] sm:$0xf]  ;;  %374 = vst [vmem:[#allocation5 + $0x258] sm:$0xf] %v373_v13  ;;  %v377_v15 = vld [vmem:[%s13313_s13 + $0x250] sm:$0xf] }
  0x60   :  { %376 = vst [vmem:[#allocation5 + $0x25c] sm:$0xf] %v375_v14  ;;  %v379_v16 = vld [vmem:[%s13313_s13 + $0x270] sm:$0xf]  ;;  %v381_v17 = vld [vmem:[%s13313_s13 + $0x254] sm:$0xf] }
  0x61   :  { %378 = vst [vmem:[#allocation5 + $0x260] sm:$0xf] %v377_v15  ;;  %380 = vst [vmem:[#allocation5 + $0x264] sm:$0xf] %v379_v16  ;;  %v383_v18 = vld [vmem:[%s13313_s13 + $0x274] sm:$0xf] }
  0x62   :  { %382 = vst [vmem:[#allocation5 + $0x268] sm:$0xf] %v381_v17  ;;  %v385_v19 = vld [vmem:[%s13313_s13 + $0x258] sm:$0xf]  ;;  %384 = vst [vmem:[#allocation5 + $0x26c] sm:$0xf] %v383_v18 }
  0x63   :  { %v387_v20 = vld [vmem:[%s13313_s13 + $0x278] sm:$0xf]  ;;  %386 = vst [vmem:[#allocation5 + $0x270] sm:$0xf] %v385_v19  ;;  %v389_v21 = vld [vmem:[%s13313_s13 + $0x25c] sm:$0xf] }
  0x64   :  { %388 = vst [vmem:[#allocation5 + $0x274] sm:$0xf] %v387_v20  ;;  %v395_v23 = vld [vmem:[%s13313_s13 + $0x2a0] sm:$0xf]  ;;  %390 = vst [vmem:[#allocation5 + $0x278] sm:$0xf] %v389_v21 }
  0x65   :  { %392 = vst [vmem:[#allocation5 + $0x27c] sm:$0xff] %v391_v22   ;;  %396 = vst [vmem:[#allocation5 + $0x284] sm:$0xf] %v395_v23  ;;  %v397_v24 = vld [vmem:[%s13313_s13 + $0x284] sm:$0xf]  ;;  %v423_v37 = vld [vmem:[%s13313_s13 + $0x2bc] sm:$0xff]  }
  0x66   :  { %v399_v25 = vld [vmem:[%s13313_s13 + $0x2a4] sm:$0xf]  ;;  %v401_v26 = vld [vmem:[%s13313_s13 + $0x288] sm:$0xf]  ;;  %398 = vst [vmem:[#allocation5 + $0x288] sm:$0xf] %v397_v24 }
  0x67   :  { %400 = vst [vmem:[#allocation5 + $0x28c] sm:$0xf] %v399_v25  ;;  %402 = vst [vmem:[#allocation5 + $0x290] sm:$0xf] %v401_v26  ;;  %v403_v27 = vld [vmem:[%s13313_s13 + $0x2a8] sm:$0xf] }
  0x68   :  { %v405_v28 = vld [vmem:[%s13313_s13 + $0x28c] sm:$0xf]  ;;  %404 = vst [vmem:[#allocation5 + $0x294] sm:$0xf] %v403_v27  ;;  %v409_v30 = vld [vmem:[%s13313_s13 + $0x290] sm:$0xf] }
  0x69   :  { %v407_v29 = vld [vmem:[%s13313_s13 + $0x2ac] sm:$0xf]  ;;  %406 = vst [vmem:[#allocation5 + $0x298] sm:$0xf] %v405_v28  ;;  %v411_v31 = vld [vmem:[%s13313_s13 + $0x2b0] sm:$0xf] }
  0x6a   :  { %408 = vst [vmem:[#allocation5 + $0x29c] sm:$0xf] %v407_v29  ;;  %v413_v32 = vld [vmem:[%s13313_s13 + $0x294] sm:$0xf]  ;;  %410 = vst [vmem:[#allocation5 + $0x2a0] sm:$0xf] %v409_v30 }
  0x6b   :  { %412 = vst [vmem:[#allocation5 + $0x2a4] sm:$0xf] %v411_v31  ;;  %414 = vst [vmem:[#allocation5 + $0x2a8] sm:$0xf] %v413_v32  ;;  %v415_v33 = vld [vmem:[%s13313_s13 + $0x2b4] sm:$0xf] }
  0x6c   :  { %v417_v34 = vld [vmem:[%s13313_s13 + $0x298] sm:$0xf]  ;;  %416 = vst [vmem:[#allocation5 + $0x2ac] sm:$0xf] %v415_v33  ;;  %v421_v36 = vld [vmem:[%s13313_s13 + $0x29c] sm:$0xf] }
  0x6d   :  { %v419_v35 = vld [vmem:[%s13313_s13 + $0x2b8] sm:$0xf]  ;;  %418 = vst [vmem:[#allocation5 + $0x2b0] sm:$0xf] %v417_v34  ;;  %v427_v38 = vld [vmem:[%s13313_s13 + $0x2e0] sm:$0xf] }
  0x6e   :  { %420 = vst [vmem:[#allocation5 + $0x2b4] sm:$0xf] %v419_v35  ;;  %422 = vst [vmem:[#allocation5 + $0x2b8] sm:$0xf] %v421_v36  ;;  %v429_v39 = vld [vmem:[%s13313_s13 + $0x2c4] sm:$0xf] }
  0x6f   :  { %424 = vst [vmem:[#allocation5 + $0x2bc] sm:$0xff] %v423_v37   ;;  %428 = vst [vmem:[#allocation5 + $0x2c4] sm:$0xf] %v427_v38  ;;  %v431_v40 = vld [vmem:[%s13313_s13 + $0x2e4] sm:$0xf]  ;;  %v455_v52 = vld [vmem:[%s13313_s13 + $0x2fc] sm:$0xff]  }
  0x70   :  { %v433_v41 = vld [vmem:[%s13313_s13 + $0x2c8] sm:$0xf]  ;;  %430 = vst [vmem:[#allocation5 + $0x2c8] sm:$0xf] %v429_v39  ;;  %432 = vst [vmem:[#allocation5 + $0x2cc] sm:$0xf] %v431_v40 }
  0x71   :  { %434 = vst [vmem:[#allocation5 + $0x2d0] sm:$0xf] %v433_v41  ;;  %v435_v42 = vld [vmem:[%s13313_s13 + $0x2e8] sm:$0xf]  ;;  %v437_v43 = vld [vmem:[%s13313_s13 + $0x2cc] sm:$0xf] }
  0x72   :  { %v439_v44 = vld [vmem:[%s13313_s13 + $0x2ec] sm:$0xf]  ;;  %436 = vst [vmem:[#allocation5 + $0x2d4] sm:$0xf] %v435_v42  ;;  %438 = vst [vmem:[#allocation5 + $0x2d8] sm:$0xf] %v437_v43 }
  0x73   :  { %440 = vst [vmem:[#allocation5 + $0x2dc] sm:$0xf] %v439_v44  ;;  %v441_v45 = vld [vmem:[%s13313_s13 + $0x2d0] sm:$0xf]  ;;  %v445_v47 = vld [vmem:[%s13313_s13 + $0x2d4] sm:$0xf] }
  0x74   :  { %v443_v46 = vld [vmem:[%s13313_s13 + $0x2f0] sm:$0xf]  ;;  %442 = vst [vmem:[#allocation5 + $0x2e0] sm:$0xf] %v441_v45  ;;  %446 = vst [vmem:[#allocation5 + $0x2e8] sm:$0xf] %v445_v47 }
  0x75   :  { %444 = vst [vmem:[#allocation5 + $0x2e4] sm:$0xf] %v443_v46  ;;  %v447_v48 = vld [vmem:[%s13313_s13 + $0x2f4] sm:$0xf]  ;;  %v449_v49 = vld [vmem:[%s13313_s13 + $0x2d8] sm:$0xf] }
  0x76   :  { %v451_v50 = vld [vmem:[%s13313_s13 + $0x2f8] sm:$0xf]  ;;  %448 = vst [vmem:[#allocation5 + $0x2ec] sm:$0xf] %v447_v48  ;;  %450 = vst [vmem:[#allocation5 + $0x2f0] sm:$0xf] %v449_v49 }
  0x77   :  { %452 = vst [vmem:[#allocation5 + $0x2f4] sm:$0xf] %v451_v50  ;;  %v453_v51 = vld [vmem:[%s13313_s13 + $0x2dc] sm:$0xf]  ;;  %v459_v53 = vld [vmem:[%s13313_s13 + $0x320] sm:$0xf] }
  0x78   :  { %454 = vst [vmem:[#allocation5 + $0x2f8] sm:$0xf] %v453_v51  ;;  %456 = vst [vmem:[#allocation5 + $0x2fc] sm:$0xff] %v455_v52   ;;  %v461_v54 = vld [vmem:[%s13313_s13 + $0x304] sm:$0xf]  ;;  %v487_v3 = vld [vmem:[%s13313_s13 + $0x33c] sm:$0xff]  }
  0x79   :  { %460 = vst [vmem:[#allocation5 + $0x304] sm:$0xf] %v459_v53  ;;  %v463_v55 = vld [vmem:[%s13313_s13 + $0x324] sm:$0xf]  ;;  %v465_v56 = vld [vmem:[%s13313_s13 + $0x308] sm:$0xf] }
  0x7a   :  { %462 = vst [vmem:[#allocation5 + $0x308] sm:$0xf] %v461_v54  ;;  %464 = vst [vmem:[#allocation5 + $0x30c] sm:$0xf] %v463_v55  ;;  %v467_v57 = vld [vmem:[%s13313_s13 + $0x328] sm:$0xf] }
  0x7b   :  { %466 = vst [vmem:[#allocation5 + $0x310] sm:$0xf] %v465_v56  ;;  %v469_v58 = vld [vmem:[%s13313_s13 + $0x30c] sm:$0xf]  ;;  %468 = vst [vmem:[#allocation5 + $0x314] sm:$0xf] %v467_v57 }
  0x7c   :  { %v471_v59 = vld [vmem:[%s13313_s13 + $0x32c] sm:$0xf]  ;;  %470 = vst [vmem:[#allocation5 + $0x318] sm:$0xf] %v469_v58  ;;  %v473_v60 = vld [vmem:[%s13313_s13 + $0x310] sm:$0xf] }
  0x7d   :  { %472 = vst [vmem:[#allocation5 + $0x31c] sm:$0xf] %v471_v59  ;;  %v475_v61 = vld [vmem:[%s13313_s13 + $0x330] sm:$0xf]  ;;  %v477_v62 = vld [vmem:[%s13313_s13 + $0x314] sm:$0xf] }
  0x7e   :  { %474 = vst [vmem:[#allocation5 + $0x320] sm:$0xf] %v473_v60  ;;  %476 = vst [vmem:[#allocation5 + $0x324] sm:$0xf] %v475_v61  ;;  %v479_v63 = vld [vmem:[%s13313_s13 + $0x334] sm:$0xf] }
  0x7f   :  { %478 = vst [vmem:[#allocation5 + $0x328] sm:$0xf] %v477_v62  ;;  %v481_v0 = vld [vmem:[%s13313_s13 + $0x318] sm:$0xf]  ;;  %480 = vst [vmem:[#allocation5 + $0x32c] sm:$0xf] %v479_v63 }
  0x80   :  { %v483_v1 = vld [vmem:[%s13313_s13 + $0x338] sm:$0xf]  ;;  %482 = vst [vmem:[#allocation5 + $0x330] sm:$0xf] %v481_v0  ;;  %v485_v2 = vld [vmem:[%s13313_s13 + $0x31c] sm:$0xf] }
  0x81   :  { %484 = vst [vmem:[#allocation5 + $0x334] sm:$0xf] %v483_v1  ;;  %v491_v4 = vld [vmem:[%s13313_s13 + $0x360] sm:$0xf]  ;;  %486 = vst [vmem:[#allocation5 + $0x338] sm:$0xf] %v485_v2 }
  0x82   :  { %488 = vst [vmem:[#allocation5 + $0x33c] sm:$0xff] %v487_v3   ;;  %492 = vst [vmem:[#allocation5 + $0x344] sm:$0xf] %v491_v4  ;;  %v493_v5 = vld [vmem:[%s13313_s13 + $0x344] sm:$0xf]  ;;  %v519_v18 = vld [vmem:[%s13313_s13 + $0x37c] sm:$0xff]  }
  0x83   :  { %v495_v6 = vld [vmem:[%s13313_s13 + $0x364] sm:$0xf]  ;;  %v497_v7 = vld [vmem:[%s13313_s13 + $0x348] sm:$0xf]  ;;  %494 = vst [vmem:[#allocation5 + $0x348] sm:$0xf] %v493_v5 }
  0x84   :  { %496 = vst [vmem:[#allocation5 + $0x34c] sm:$0xf] %v495_v6  ;;  %498 = vst [vmem:[#allocation5 + $0x350] sm:$0xf] %v497_v7  ;;  %v499_v8 = vld [vmem:[%s13313_s13 + $0x368] sm:$0xf] }
  0x85   :  { %v501_v9 = vld [vmem:[%s13313_s13 + $0x34c] sm:$0xf]  ;;  %500 = vst [vmem:[#allocation5 + $0x354] sm:$0xf] %v499_v8  ;;  %v505_v11 = vld [vmem:[%s13313_s13 + $0x350] sm:$0xf] }
  0x86   :  { %v503_v10 = vld [vmem:[%s13313_s13 + $0x36c] sm:$0xf]  ;;  %502 = vst [vmem:[#allocation5 + $0x358] sm:$0xf] %v501_v9  ;;  %v507_v12 = vld [vmem:[%s13313_s13 + $0x370] sm:$0xf] }
  0x87   :  { %504 = vst [vmem:[#allocation5 + $0x35c] sm:$0xf] %v503_v10  ;;  %v509_v13 = vld [vmem:[%s13313_s13 + $0x354] sm:$0xf]  ;;  %506 = vst [vmem:[#allocation5 + $0x360] sm:$0xf] %v505_v11 }
  0x88   :  { %508 = vst [vmem:[#allocation5 + $0x364] sm:$0xf] %v507_v12  ;;  %510 = vst [vmem:[#allocation5 + $0x368] sm:$0xf] %v509_v13  ;;  %v511_v14 = vld [vmem:[%s13313_s13 + $0x374] sm:$0xf] }
  0x89   :  { %v513_v15 = vld [vmem:[%s13313_s13 + $0x358] sm:$0xf]  ;;  %512 = vst [vmem:[#allocation5 + $0x36c] sm:$0xf] %v511_v14  ;;  %v517_v17 = vld [vmem:[%s13313_s13 + $0x35c] sm:$0xf] }
  0x8a   :  { %v515_v16 = vld [vmem:[%s13313_s13 + $0x378] sm:$0xf]  ;;  %514 = vst [vmem:[#allocation5 + $0x370] sm:$0xf] %v513_v15  ;;  %v523_v19 = vld [vmem:[%s13313_s13 + $0x3a0] sm:$0xf] }
  0x8b   :  { %516 = vst [vmem:[#allocation5 + $0x374] sm:$0xf] %v515_v16  ;;  %518 = vst [vmem:[#allocation5 + $0x378] sm:$0xf] %v517_v17  ;;  %v525_v20 = vld [vmem:[%s13313_s13 + $0x384] sm:$0xf] }
  0x8c   :  { %520 = vst [vmem:[#allocation5 + $0x37c] sm:$0xff] %v519_v18   ;;  %524 = vst [vmem:[#allocation5 + $0x384] sm:$0xf] %v523_v19  ;;  %v527_v21 = vld [vmem:[%s13313_s13 + $0x3a4] sm:$0xf]  ;;  %v551_v33 = vld [vmem:[%s13313_s13 + $0x3bc] sm:$0xff]  }
  0x8d   :  { %v529_v22 = vld [vmem:[%s13313_s13 + $0x388] sm:$0xf]  ;;  %526 = vst [vmem:[#allocation5 + $0x388] sm:$0xf] %v525_v20  ;;  %528 = vst [vmem:[#allocation5 + $0x38c] sm:$0xf] %v527_v21 }
  0x8e   :  { %530 = vst [vmem:[#allocation5 + $0x390] sm:$0xf] %v529_v22  ;;  %v531_v23 = vld [vmem:[%s13313_s13 + $0x3a8] sm:$0xf]  ;;  %v533_v24 = vld [vmem:[%s13313_s13 + $0x38c] sm:$0xf] }
  0x8f   :  { %v535_v25 = vld [vmem:[%s13313_s13 + $0x3ac] sm:$0xf]  ;;  %532 = vst [vmem:[#allocation5 + $0x394] sm:$0xf] %v531_v23  ;;  %534 = vst [vmem:[#allocation5 + $0x398] sm:$0xf] %v533_v24 }
  0x90   :  { %536 = vst [vmem:[#allocation5 + $0x39c] sm:$0xf] %v535_v25  ;;  %v537_v26 = vld [vmem:[%s13313_s13 + $0x390] sm:$0xf]  ;;  %v541_v28 = vld [vmem:[%s13313_s13 + $0x394] sm:$0xf] }
  0x91   :  { %v539_v27 = vld [vmem:[%s13313_s13 + $0x3b0] sm:$0xf]  ;;  %538 = vst [vmem:[#allocation5 + $0x3a0] sm:$0xf] %v537_v26  ;;  %542 = vst [vmem:[#allocation5 + $0x3a8] sm:$0xf] %v541_v28 }
  0x92   :  { %540 = vst [vmem:[#allocation5 + $0x3a4] sm:$0xf] %v539_v27  ;;  %v543_v29 = vld [vmem:[%s13313_s13 + $0x3b4] sm:$0xf]  ;;  %v545_v30 = vld [vmem:[%s13313_s13 + $0x398] sm:$0xf] }
  0x93   :  { %v547_v31 = vld [vmem:[%s13313_s13 + $0x3b8] sm:$0xf]  ;;  %544 = vst [vmem:[#allocation5 + $0x3ac] sm:$0xf] %v543_v29  ;;  %546 = vst [vmem:[#allocation5 + $0x3b0] sm:$0xf] %v545_v30 }
  0x94   :  { %548 = vst [vmem:[#allocation5 + $0x3b4] sm:$0xf] %v547_v31  ;;  %v549_v32 = vld [vmem:[%s13313_s13 + $0x39c] sm:$0xf]  ;;  %v555_v34 = vld [vmem:[%s13313_s13 + $0x3e0] sm:$0xf] }
  0x95   :  { %550 = vst [vmem:[#allocation5 + $0x3b8] sm:$0xf] %v549_v32  ;;  %552 = vst [vmem:[#allocation5 + $0x3bc] sm:$0xff] %v551_v33   ;;  %v557_v35 = vld [vmem:[%s13313_s13 + $0x3c4] sm:$0xf]  ;;  %v583_v48 = vld [vmem:[%s13313_s13 + $0x3fc] sm:$0xff]  }
  0x96   :  { %556 = vst [vmem:[#allocation5 + $0x3c4] sm:$0xf] %v555_v34  ;;  %v559_v36 = vld [vmem:[%s13313_s13 + $0x3e4] sm:$0xf]  ;;  %v561_v37 = vld [vmem:[%s13313_s13 + $0x3c8] sm:$0xf] }
  0x97   :  { %558 = vst [vmem:[#allocation5 + $0x3c8] sm:$0xf] %v557_v35  ;;  %560 = vst [vmem:[#allocation5 + $0x3cc] sm:$0xf] %v559_v36  ;;  %v563_v38 = vld [vmem:[%s13313_s13 + $0x3e8] sm:$0xf] }
  0x98   :  { %562 = vst [vmem:[#allocation5 + $0x3d0] sm:$0xf] %v561_v37  ;;  %v565_v39 = vld [vmem:[%s13313_s13 + $0x3cc] sm:$0xf]  ;;  %564 = vst [vmem:[#allocation5 + $0x3d4] sm:$0xf] %v563_v38 }
  0x99   :  { %v567_v40 = vld [vmem:[%s13313_s13 + $0x3ec] sm:$0xf]  ;;  %566 = vst [vmem:[#allocation5 + $0x3d8] sm:$0xf] %v565_v39  ;;  %v569_v41 = vld [vmem:[%s13313_s13 + $0x3d0] sm:$0xf] }
  0x9a   :  { %568 = vst [vmem:[#allocation5 + $0x3dc] sm:$0xf] %v567_v40  ;;  %v571_v42 = vld [vmem:[%s13313_s13 + $0x3f0] sm:$0xf]  ;;  %v573_v43 = vld [vmem:[%s13313_s13 + $0x3d4] sm:$0xf] }
  0x9b   :  { %570 = vst [vmem:[#allocation5 + $0x3e0] sm:$0xf] %v569_v41  ;;  %572 = vst [vmem:[#allocation5 + $0x3e4] sm:$0xf] %v571_v42  ;;  %v575_v44 = vld [vmem:[%s13313_s13 + $0x3f4] sm:$0xf] }
  0x9c   :  { %574 = vst [vmem:[#allocation5 + $0x3e8] sm:$0xf] %v573_v43  ;;  %v577_v45 = vld [vmem:[%s13313_s13 + $0x3d8] sm:$0xf]  ;;  %576 = vst [vmem:[#allocation5 + $0x3ec] sm:$0xf] %v575_v44 }
  0x9d   :  { %v579_v46 = vld [vmem:[%s13313_s13 + $0x3f8] sm:$0xf]  ;;  %578 = vst [vmem:[#allocation5 + $0x3f0] sm:$0xf] %v577_v45  ;;  %v581_v47 = vld [vmem:[%s13313_s13 + $0x3dc] sm:$0xf] }
  0x9e   :  { %580 = vst [vmem:[#allocation5 + $0x3f4] sm:$0xf] %v579_v46  ;;  %v587_v49 = vld [vmem:[%s13313_s13 + $0x420] sm:$0xf]  ;;  %582 = vst [vmem:[#allocation5 + $0x3f8] sm:$0xf] %v581_v47 }
  0x9f   :  { %584 = vst [vmem:[#allocation5 + $0x3fc] sm:$0xff] %v583_v48   ;;  %588 = vst [vmem:[#allocation5 + $0x404] sm:$0xf] %v587_v49  ;;  %v589_v50 = vld [vmem:[%s13313_s13 + $0x404] sm:$0xf]  ;;  %v615_v63 = vld [vmem:[%s13313_s13 + $0x43c] sm:$0xff]  }
  0xa0   :  { %v591_v51 = vld [vmem:[%s13313_s13 + $0x424] sm:$0xf]  ;;  %v593_v52 = vld [vmem:[%s13313_s13 + $0x408] sm:$0xf]  ;;  %590 = vst [vmem:[#allocation5 + $0x408] sm:$0xf] %v589_v50 }
  0xa1   :  { %592 = vst [vmem:[#allocation5 + $0x40c] sm:$0xf] %v591_v51  ;;  %594 = vst [vmem:[#allocation5 + $0x410] sm:$0xf] %v593_v52  ;;  %v595_v53 = vld [vmem:[%s13313_s13 + $0x428] sm:$0xf] }
  0xa2   :  { %v597_v54 = vld [vmem:[%s13313_s13 + $0x40c] sm:$0xf]  ;;  %596 = vst [vmem:[#allocation5 + $0x414] sm:$0xf] %v595_v53  ;;  %v601_v56 = vld [vmem:[%s13313_s13 + $0x410] sm:$0xf] }
  0xa3   :  { %v599_v55 = vld [vmem:[%s13313_s13 + $0x42c] sm:$0xf]  ;;  %598 = vst [vmem:[#allocation5 + $0x418] sm:$0xf] %v597_v54  ;;  %v603_v57 = vld [vmem:[%s13313_s13 + $0x430] sm:$0xf] }
  0xa4   :  { %600 = vst [vmem:[#allocation5 + $0x41c] sm:$0xf] %v599_v55  ;;  %v605_v58 = vld [vmem:[%s13313_s13 + $0x414] sm:$0xf]  ;;  %602 = vst [vmem:[#allocation5 + $0x420] sm:$0xf] %v601_v56 }
  0xa5   :  { %604 = vst [vmem:[#allocation5 + $0x424] sm:$0xf] %v603_v57  ;;  %606 = vst [vmem:[#allocation5 + $0x428] sm:$0xf] %v605_v58  ;;  %v607_v59 = vld [vmem:[%s13313_s13 + $0x434] sm:$0xf] }
  0xa6   :  { %v609_v60 = vld [vmem:[%s13313_s13 + $0x418] sm:$0xf]  ;;  %608 = vst [vmem:[#allocation5 + $0x42c] sm:$0xf] %v607_v59  ;;  %v613_v62 = vld [vmem:[%s13313_s13 + $0x41c] sm:$0xf] }
  0xa7   :  { %v611_v61 = vld [vmem:[%s13313_s13 + $0x438] sm:$0xf]  ;;  %610 = vst [vmem:[#allocation5 + $0x430] sm:$0xf] %v609_v60  ;;  %v619_v0 = vld [vmem:[%s13313_s13 + $0x460] sm:$0xf] }
  0xa8   :  { %612 = vst [vmem:[#allocation5 + $0x434] sm:$0xf] %v611_v61  ;;  %614 = vst [vmem:[#allocation5 + $0x438] sm:$0xf] %v613_v62  ;;  %v621_v1 = vld [vmem:[%s13313_s13 + $0x444] sm:$0xf] }
  0xa9   :  { %616 = vst [vmem:[#allocation5 + $0x43c] sm:$0xff] %v615_v63   ;;  %620 = vst [vmem:[#allocation5 + $0x444] sm:$0xf] %v619_v0  ;;  %v623_v2 = vld [vmem:[%s13313_s13 + $0x464] sm:$0xf]  ;;  %v647_v14 = vld [vmem:[%s13313_s13 + $0x47c] sm:$0xff]  }
  0xaa   :  { %v625_v3 = vld [vmem:[%s13313_s13 + $0x448] sm:$0xf]  ;;  %622 = vst [vmem:[#allocation5 + $0x448] sm:$0xf] %v621_v1  ;;  %624 = vst [vmem:[#allocation5 + $0x44c] sm:$0xf] %v623_v2 }
  0xab   :  { %626 = vst [vmem:[#allocation5 + $0x450] sm:$0xf] %v625_v3  ;;  %v627_v4 = vld [vmem:[%s13313_s13 + $0x468] sm:$0xf]  ;;  %v629_v5 = vld [vmem:[%s13313_s13 + $0x44c] sm:$0xf] }
  0xac   :  { %v631_v6 = vld [vmem:[%s13313_s13 + $0x46c] sm:$0xf]  ;;  %628 = vst [vmem:[#allocation5 + $0x454] sm:$0xf] %v627_v4  ;;  %630 = vst [vmem:[#allocation5 + $0x458] sm:$0xf] %v629_v5 }
  0xad   :  { %632 = vst [vmem:[#allocation5 + $0x45c] sm:$0xf] %v631_v6  ;;  %v633_v7 = vld [vmem:[%s13313_s13 + $0x450] sm:$0xf]  ;;  %v637_v9 = vld [vmem:[%s13313_s13 + $0x454] sm:$0xf] }
  0xae   :  { %v635_v8 = vld [vmem:[%s13313_s13 + $0x470] sm:$0xf]  ;;  %634 = vst [vmem:[#allocation5 + $0x460] sm:$0xf] %v633_v7  ;;  %638 = vst [vmem:[#allocation5 + $0x468] sm:$0xf] %v637_v9 }
  0xaf   :  { %636 = vst [vmem:[#allocation5 + $0x464] sm:$0xf] %v635_v8  ;;  %v639_v10 = vld [vmem:[%s13313_s13 + $0x474] sm:$0xf]  ;;  %v641_v11 = vld [vmem:[%s13313_s13 + $0x458] sm:$0xf] }
  0xb0   :  { %v643_v12 = vld [vmem:[%s13313_s13 + $0x478] sm:$0xf]  ;;  %640 = vst [vmem:[#allocation5 + $0x46c] sm:$0xf] %v639_v10  ;;  %642 = vst [vmem:[#allocation5 + $0x470] sm:$0xf] %v641_v11 }
  0xb1   :  { %644 = vst [vmem:[#allocation5 + $0x474] sm:$0xf] %v643_v12  ;;  %v645_v13 = vld [vmem:[%s13313_s13 + $0x45c] sm:$0xf]  ;;  %v651_v15 = vld [vmem:[%s13313_s13 + $0x4a0] sm:$0xf] }
  0xb2   :  { %646 = vst [vmem:[#allocation5 + $0x478] sm:$0xf] %v645_v13  ;;  %648 = vst [vmem:[#allocation5 + $0x47c] sm:$0xff] %v647_v14   ;;  %v653_v16 = vld [vmem:[%s13313_s13 + $0x484] sm:$0xf]  ;;  %v679_v29 = vld [vmem:[%s13313_s13 + $0x4bc] sm:$0xff]  }
  0xb3   :  { %652 = vst [vmem:[#allocation5 + $0x484] sm:$0xf] %v651_v15  ;;  %v655_v17 = vld [vmem:[%s13313_s13 + $0x4a4] sm:$0xf]  ;;  %v657_v18 = vld [vmem:[%s13313_s13 + $0x488] sm:$0xf] }
  0xb4   :  { %654 = vst [vmem:[#allocation5 + $0x488] sm:$0xf] %v653_v16  ;;  %656 = vst [vmem:[#allocation5 + $0x48c] sm:$0xf] %v655_v17  ;;  %v659_v19 = vld [vmem:[%s13313_s13 + $0x4a8] sm:$0xf] }
  0xb5   :  { %658 = vst [vmem:[#allocation5 + $0x490] sm:$0xf] %v657_v18  ;;  %v661_v20 = vld [vmem:[%s13313_s13 + $0x48c] sm:$0xf]  ;;  %660 = vst [vmem:[#allocation5 + $0x494] sm:$0xf] %v659_v19 }
  0xb6   :  { %v663_v21 = vld [vmem:[%s13313_s13 + $0x4ac] sm:$0xf]  ;;  %662 = vst [vmem:[#allocation5 + $0x498] sm:$0xf] %v661_v20  ;;  %v665_v22 = vld [vmem:[%s13313_s13 + $0x490] sm:$0xf] }
  0xb7   :  { %664 = vst [vmem:[#allocation5 + $0x49c] sm:$0xf] %v663_v21  ;;  %v667_v23 = vld [vmem:[%s13313_s13 + $0x4b0] sm:$0xf]  ;;  %v669_v24 = vld [vmem:[%s13313_s13 + $0x494] sm:$0xf] }
  0xb8   :  { %666 = vst [vmem:[#allocation5 + $0x4a0] sm:$0xf] %v665_v22  ;;  %668 = vst [vmem:[#allocation5 + $0x4a4] sm:$0xf] %v667_v23  ;;  %v671_v25 = vld [vmem:[%s13313_s13 + $0x4b4] sm:$0xf] }
  0xb9   :  { %670 = vst [vmem:[#allocation5 + $0x4a8] sm:$0xf] %v669_v24  ;;  %v673_v26 = vld [vmem:[%s13313_s13 + $0x498] sm:$0xf]  ;;  %672 = vst [vmem:[#allocation5 + $0x4ac] sm:$0xf] %v671_v25 }
  0xba   :  { %v675_v27 = vld [vmem:[%s13313_s13 + $0x4b8] sm:$0xf]  ;;  %674 = vst [vmem:[#allocation5 + $0x4b0] sm:$0xf] %v673_v26  ;;  %v677_v28 = vld [vmem:[%s13313_s13 + $0x49c] sm:$0xf] }
  0xbb   :  { %676 = vst [vmem:[#allocation5 + $0x4b4] sm:$0xf] %v675_v27  ;;  %v683_v30 = vld [vmem:[%s13313_s13 + $0x4e0] sm:$0xf]  ;;  %678 = vst [vmem:[#allocation5 + $0x4b8] sm:$0xf] %v677_v28 }
  0xbc   :  { %680 = vst [vmem:[#allocation5 + $0x4bc] sm:$0xff] %v679_v29   ;;  %684 = vst [vmem:[#allocation5 + $0x4c4] sm:$0xf] %v683_v30  ;;  %v685_v31 = vld [vmem:[%s13313_s13 + $0x4c4] sm:$0xf]  ;;  %v711_v44 = vld [vmem:[%s13313_s13 + $0x4fc] sm:$0xff]  }
  0xbd   :  { %v687_v32 = vld [vmem:[%s13313_s13 + $0x4e4] sm:$0xf]  ;;  %v689_v33 = vld [vmem:[%s13313_s13 + $0x4c8] sm:$0xf]  ;;  %686 = vst [vmem:[#allocation5 + $0x4c8] sm:$0xf] %v685_v31 }
  0xbe   :  { %688 = vst [vmem:[#allocation5 + $0x4cc] sm:$0xf] %v687_v32  ;;  %690 = vst [vmem:[#allocation5 + $0x4d0] sm:$0xf] %v689_v33  ;;  %v691_v34 = vld [vmem:[%s13313_s13 + $0x4e8] sm:$0xf] }
  0xbf   :  { %v693_v35 = vld [vmem:[%s13313_s13 + $0x4cc] sm:$0xf]  ;;  %692 = vst [vmem:[#allocation5 + $0x4d4] sm:$0xf] %v691_v34  ;;  %v697_v37 = vld [vmem:[%s13313_s13 + $0x4d0] sm:$0xf] }
  0xc0   :  { %v695_v36 = vld [vmem:[%s13313_s13 + $0x4ec] sm:$0xf]  ;;  %694 = vst [vmem:[#allocation5 + $0x4d8] sm:$0xf] %v693_v35  ;;  %v699_v38 = vld [vmem:[%s13313_s13 + $0x4f0] sm:$0xf] }
  0xc1   :  { %696 = vst [vmem:[#allocation5 + $0x4dc] sm:$0xf] %v695_v36  ;;  %v701_v39 = vld [vmem:[%s13313_s13 + $0x4d4] sm:$0xf]  ;;  %698 = vst [vmem:[#allocation5 + $0x4e0] sm:$0xf] %v697_v37 }
  0xc2   :  { %700 = vst [vmem:[#allocation5 + $0x4e4] sm:$0xf] %v699_v38  ;;  %702 = vst [vmem:[#allocation5 + $0x4e8] sm:$0xf] %v701_v39  ;;  %v703_v40 = vld [vmem:[%s13313_s13 + $0x4f4] sm:$0xf] }
  0xc3   :  { %v705_v41 = vld [vmem:[%s13313_s13 + $0x4d8] sm:$0xf]  ;;  %704 = vst [vmem:[#allocation5 + $0x4ec] sm:$0xf] %v703_v40  ;;  %v709_v43 = vld [vmem:[%s13313_s13 + $0x4dc] sm:$0xf] }
  0xc4   :  { %v707_v42 = vld [vmem:[%s13313_s13 + $0x4f8] sm:$0xf]  ;;  %706 = vst [vmem:[#allocation5 + $0x4f0] sm:$0xf] %v705_v41  ;;  %v715_v45 = vld [vmem:[%s13313_s13 + $0x520] sm:$0xf] }
  0xc5   :  { %708 = vst [vmem:[#allocation5 + $0x4f4] sm:$0xf] %v707_v42  ;;  %710 = vst [vmem:[#allocation5 + $0x4f8] sm:$0xf] %v709_v43  ;;  %v717_v46 = vld [vmem:[%s13313_s13 + $0x504] sm:$0xf] }
  0xc6   :  { %712 = vst [vmem:[#allocation5 + $0x4fc] sm:$0xff] %v711_v44   ;;  %716 = vst [vmem:[#allocation5 + $0x504] sm:$0xf] %v715_v45  ;;  %v719_v47 = vld [vmem:[%s13313_s13 + $0x524] sm:$0xf]  ;;  %v743_v59 = vld [vmem:[%s13313_s13 + $0x53c] sm:$0xff]  }
  0xc7   :  { %v721_v48 = vld [vmem:[%s13313_s13 + $0x508] sm:$0xf]  ;;  %718 = vst [vmem:[#allocation5 + $0x508] sm:$0xf] %v717_v46  ;;  %720 = vst [vmem:[#allocation5 + $0x50c] sm:$0xf] %v719_v47 }
  0xc8   :  { %722 = vst [vmem:[#allocation5 + $0x510] sm:$0xf] %v721_v48  ;;  %v723_v49 = vld [vmem:[%s13313_s13 + $0x528] sm:$0xf]  ;;  %v725_v50 = vld [vmem:[%s13313_s13 + $0x50c] sm:$0xf] }
  0xc9   :  { %v727_v51 = vld [vmem:[%s13313_s13 + $0x52c] sm:$0xf]  ;;  %724 = vst [vmem:[#allocation5 + $0x514] sm:$0xf] %v723_v49  ;;  %726 = vst [vmem:[#allocation5 + $0x518] sm:$0xf] %v725_v50 }
  0xca   :  { %728 = vst [vmem:[#allocation5 + $0x51c] sm:$0xf] %v727_v51  ;;  %v729_v52 = vld [vmem:[%s13313_s13 + $0x510] sm:$0xf]  ;;  %v733_v54 = vld [vmem:[%s13313_s13 + $0x514] sm:$0xf] }
  0xcb   :  { %v731_v53 = vld [vmem:[%s13313_s13 + $0x530] sm:$0xf]  ;;  %730 = vst [vmem:[#allocation5 + $0x520] sm:$0xf] %v729_v52  ;;  %734 = vst [vmem:[#allocation5 + $0x528] sm:$0xf] %v733_v54 }
  0xcc   :  { %732 = vst [vmem:[#allocation5 + $0x524] sm:$0xf] %v731_v53  ;;  %v735_v55 = vld [vmem:[%s13313_s13 + $0x534] sm:$0xf]  ;;  %v737_v56 = vld [vmem:[%s13313_s13 + $0x518] sm:$0xf] }
  0xcd   :  { %v739_v57 = vld [vmem:[%s13313_s13 + $0x538] sm:$0xf]  ;;  %736 = vst [vmem:[#allocation5 + $0x52c] sm:$0xf] %v735_v55  ;;  %738 = vst [vmem:[#allocation5 + $0x530] sm:$0xf] %v737_v56 }
  0xce   :  { %740 = vst [vmem:[#allocation5 + $0x534] sm:$0xf] %v739_v57  ;;  %v741_v58 = vld [vmem:[%s13313_s13 + $0x51c] sm:$0xf]  ;;  %v747_v60 = vld [vmem:[%s13313_s13 + $0x560] sm:$0xf] }
  0xcf   :  { %742 = vst [vmem:[#allocation5 + $0x538] sm:$0xf] %v741_v58  ;;  %744 = vst [vmem:[#allocation5 + $0x53c] sm:$0xff] %v743_v59   ;;  %v749_v61 = vld [vmem:[%s13313_s13 + $0x544] sm:$0xf]  ;;  %v775_v10 = vld [vmem:[%s13313_s13 + $0x57c] sm:$0xff]  }
  0xd0   :  { %748 = vst [vmem:[#allocation5 + $0x544] sm:$0xf] %v747_v60  ;;  %v751_v62 = vld [vmem:[%s13313_s13 + $0x564] sm:$0xf]  ;;  %v753_v63 = vld [vmem:[%s13313_s13 + $0x548] sm:$0xf] }
  0xd1   :  { %750 = vst [vmem:[#allocation5 + $0x548] sm:$0xf] %v749_v61  ;;  %752 = vst [vmem:[#allocation5 + $0x54c] sm:$0xf] %v751_v62  ;;  %v755_v0 = vld [vmem:[%s13313_s13 + $0x568] sm:$0xf] }
  0xd2   :  { %754 = vst [vmem:[#allocation5 + $0x550] sm:$0xf] %v753_v63  ;;  %v757_v1 = vld [vmem:[%s13313_s13 + $0x54c] sm:$0xf]  ;;  %756 = vst [vmem:[#allocation5 + $0x554] sm:$0xf] %v755_v0 }
  0xd3   :  { %v759_v2 = vld [vmem:[%s13313_s13 + $0x56c] sm:$0xf]  ;;  %758 = vst [vmem:[#allocation5 + $0x558] sm:$0xf] %v757_v1  ;;  %v761_v3 = vld [vmem:[%s13313_s13 + $0x550] sm:$0xf] }
  0xd4   :  { %760 = vst [vmem:[#allocation5 + $0x55c] sm:$0xf] %v759_v2  ;;  %v763_v4 = vld [vmem:[%s13313_s13 + $0x570] sm:$0xf]  ;;  %v765_v5 = vld [vmem:[%s13313_s13 + $0x554] sm:$0xf] }
  0xd5   :  { %762 = vst [vmem:[#allocation5 + $0x560] sm:$0xf] %v761_v3  ;;  %764 = vst [vmem:[#allocation5 + $0x564] sm:$0xf] %v763_v4  ;;  %v767_v6 = vld [vmem:[%s13313_s13 + $0x574] sm:$0xf] }
  0xd6   :  { %766 = vst [vmem:[#allocation5 + $0x568] sm:$0xf] %v765_v5  ;;  %v769_v7 = vld [vmem:[%s13313_s13 + $0x558] sm:$0xf]  ;;  %768 = vst [vmem:[#allocation5 + $0x56c] sm:$0xf] %v767_v6 }
  0xd7   :  { %v771_v8 = vld [vmem:[%s13313_s13 + $0x578] sm:$0xf]  ;;  %770 = vst [vmem:[#allocation5 + $0x570] sm:$0xf] %v769_v7  ;;  %v773_v9 = vld [vmem:[%s13313_s13 + $0x55c] sm:$0xf] }
  0xd8   :  { %772 = vst [vmem:[#allocation5 + $0x574] sm:$0xf] %v771_v8  ;;  %v779_v11 = vld [vmem:[%s13313_s13 + $0x5a0] sm:$0xf]  ;;  %774 = vst [vmem:[#allocation5 + $0x578] sm:$0xf] %v773_v9 }
  0xd9   :  { %776 = vst [vmem:[#allocation5 + $0x57c] sm:$0xff] %v775_v10   ;;  %780 = vst [vmem:[#allocation5 + $0x584] sm:$0xf] %v779_v11  ;;  %v781_v12 = vld [vmem:[%s13313_s13 + $0x584] sm:$0xf]  ;;  %v807_v25 = vld [vmem:[%s13313_s13 + $0x5bc] sm:$0xff]  }
  0xda   :  { %v783_v13 = vld [vmem:[%s13313_s13 + $0x5a4] sm:$0xf]  ;;  %v785_v14 = vld [vmem:[%s13313_s13 + $0x588] sm:$0xf]  ;;  %782 = vst [vmem:[#allocation5 + $0x588] sm:$0xf] %v781_v12 }
  0xdb   :  { %784 = vst [vmem:[#allocation5 + $0x58c] sm:$0xf] %v783_v13  ;;  %786 = vst [vmem:[#allocation5 + $0x590] sm:$0xf] %v785_v14  ;;  %v787_v15 = vld [vmem:[%s13313_s13 + $0x5a8] sm:$0xf] }
  0xdc   :  { %v789_v16 = vld [vmem:[%s13313_s13 + $0x58c] sm:$0xf]  ;;  %788 = vst [vmem:[#allocation5 + $0x594] sm:$0xf] %v787_v15  ;;  %v793_v18 = vld [vmem:[%s13313_s13 + $0x590] sm:$0xf] }
  0xdd   :  { %v791_v17 = vld [vmem:[%s13313_s13 + $0x5ac] sm:$0xf]  ;;  %790 = vst [vmem:[#allocation5 + $0x598] sm:$0xf] %v789_v16  ;;  %v795_v19 = vld [vmem:[%s13313_s13 + $0x5b0] sm:$0xf] }
  0xde   :  { %792 = vst [vmem:[#allocation5 + $0x59c] sm:$0xf] %v791_v17  ;;  %v797_v20 = vld [vmem:[%s13313_s13 + $0x594] sm:$0xf]  ;;  %794 = vst [vmem:[#allocation5 + $0x5a0] sm:$0xf] %v793_v18 }
  0xdf   :  { %796 = vst [vmem:[#allocation5 + $0x5a4] sm:$0xf] %v795_v19  ;;  %798 = vst [vmem:[#allocation5 + $0x5a8] sm:$0xf] %v797_v20  ;;  %v799_v21 = vld [vmem:[%s13313_s13 + $0x5b4] sm:$0xf] }
  0xe0   :  { %v801_v22 = vld [vmem:[%s13313_s13 + $0x598] sm:$0xf]  ;;  %800 = vst [vmem:[#allocation5 + $0x5ac] sm:$0xf] %v799_v21  ;;  %v805_v24 = vld [vmem:[%s13313_s13 + $0x59c] sm:$0xf] }
  0xe1   :  { %v803_v23 = vld [vmem:[%s13313_s13 + $0x5b8] sm:$0xf]  ;;  %802 = vst [vmem:[#allocation5 + $0x5b0] sm:$0xf] %v801_v22  ;;  %v811_v26 = vld [vmem:[%s13313_s13 + $0x5e0] sm:$0xf] }
  0xe2   :  { %804 = vst [vmem:[#allocation5 + $0x5b4] sm:$0xf] %v803_v23  ;;  %806 = vst [vmem:[#allocation5 + $0x5b8] sm:$0xf] %v805_v24  ;;  %v813_v27 = vld [vmem:[%s13313_s13 + $0x5c4] sm:$0xf] }
  0xe3   :  { %808 = vst [vmem:[#allocation5 + $0x5bc] sm:$0xff] %v807_v25   ;;  %812 = vst [vmem:[#allocation5 + $0x5c4] sm:$0xf] %v811_v26  ;;  %v815_v28 = vld [vmem:[%s13313_s13 + $0x5e4] sm:$0xf]  ;;  %v839_v40 = vld [vmem:[%s13313_s13 + $0x5fc] sm:$0xff]  }
  0xe4   :  { %v817_v29 = vld [vmem:[%s13313_s13 + $0x5c8] sm:$0xf]  ;;  %814 = vst [vmem:[#allocation5 + $0x5c8] sm:$0xf] %v813_v27  ;;  %816 = vst [vmem:[#allocation5 + $0x5cc] sm:$0xf] %v815_v28 }
  0xe5   :  { %818 = vst [vmem:[#allocation5 + $0x5d0] sm:$0xf] %v817_v29  ;;  %v819_v30 = vld [vmem:[%s13313_s13 + $0x5e8] sm:$0xf]  ;;  %v821_v31 = vld [vmem:[%s13313_s13 + $0x5cc] sm:$0xf] }
  0xe6   :  { %v823_v32 = vld [vmem:[%s13313_s13 + $0x5ec] sm:$0xf]  ;;  %820 = vst [vmem:[#allocation5 + $0x5d4] sm:$0xf] %v819_v30  ;;  %822 = vst [vmem:[#allocation5 + $0x5d8] sm:$0xf] %v821_v31 }
  0xe7   :  { %824 = vst [vmem:[#allocation5 + $0x5dc] sm:$0xf] %v823_v32  ;;  %v825_v33 = vld [vmem:[%s13313_s13 + $0x5d0] sm:$0xf]  ;;  %v829_v35 = vld [vmem:[%s13313_s13 + $0x5d4] sm:$0xf] }
  0xe8   :  { %v827_v34 = vld [vmem:[%s13313_s13 + $0x5f0] sm:$0xf]  ;;  %826 = vst [vmem:[#allocation5 + $0x5e0] sm:$0xf] %v825_v33  ;;  %830 = vst [vmem:[#allocation5 + $0x5e8] sm:$0xf] %v829_v35 }
  0xe9   :  { %828 = vst [vmem:[#allocation5 + $0x5e4] sm:$0xf] %v827_v34  ;;  %v831_v36 = vld [vmem:[%s13313_s13 + $0x5f4] sm:$0xf]  ;;  %v833_v37 = vld [vmem:[%s13313_s13 + $0x5d8] sm:$0xf] }
  0xea   :  { %v835_v38 = vld [vmem:[%s13313_s13 + $0x5f8] sm:$0xf]  ;;  %832 = vst [vmem:[#allocation5 + $0x5ec] sm:$0xf] %v831_v36  ;;  %834 = vst [vmem:[#allocation5 + $0x5f0] sm:$0xf] %v833_v37 }
  0xeb   :  { %836 = vst [vmem:[#allocation5 + $0x5f4] sm:$0xf] %v835_v38  ;;  %v837_v39 = vld [vmem:[%s13313_s13 + $0x5dc] sm:$0xf]  ;;  %v843_v41 = vld [vmem:[%s13313_s13 + $0x620] sm:$0xf] }
  0xec   :  { %838 = vst [vmem:[#allocation5 + $0x5f8] sm:$0xf] %v837_v39  ;;  %840 = vst [vmem:[#allocation5 + $0x5fc] sm:$0xff] %v839_v40   ;;  %v845_v42 = vld [vmem:[%s13313_s13 + $0x604] sm:$0xf]  ;;  %v871_v55 = vld [vmem:[%s13313_s13 + $0x63c] sm:$0xff]  }
  0xed   :  { %844 = vst [vmem:[#allocation5 + $0x604] sm:$0xf] %v843_v41  ;;  %v847_v43 = vld [vmem:[%s13313_s13 + $0x624] sm:$0xf]  ;;  %v849_v44 = vld [vmem:[%s13313_s13 + $0x608] sm:$0xf] }
  0xee   :  { %846 = vst [vmem:[#allocation5 + $0x608] sm:$0xf] %v845_v42  ;;  %848 = vst [vmem:[#allocation5 + $0x60c] sm:$0xf] %v847_v43  ;;  %v851_v45 = vld [vmem:[%s13313_s13 + $0x628] sm:$0xf] }
  0xef   :  { %850 = vst [vmem:[#allocation5 + $0x610] sm:$0xf] %v849_v44  ;;  %v853_v46 = vld [vmem:[%s13313_s13 + $0x60c] sm:$0xf]  ;;  %852 = vst [vmem:[#allocation5 + $0x614] sm:$0xf] %v851_v45 }
  0xf0   :  { %v855_v47 = vld [vmem:[%s13313_s13 + $0x62c] sm:$0xf]  ;;  %854 = vst [vmem:[#allocation5 + $0x618] sm:$0xf] %v853_v46  ;;  %v857_v48 = vld [vmem:[%s13313_s13 + $0x610] sm:$0xf] }
  0xf1   :  { %856 = vst [vmem:[#allocation5 + $0x61c] sm:$0xf] %v855_v47  ;;  %v859_v49 = vld [vmem:[%s13313_s13 + $0x630] sm:$0xf]  ;;  %v861_v50 = vld [vmem:[%s13313_s13 + $0x614] sm:$0xf] }
  0xf2   :  { %858 = vst [vmem:[#allocation5 + $0x620] sm:$0xf] %v857_v48  ;;  %860 = vst [vmem:[#allocation5 + $0x624] sm:$0xf] %v859_v49  ;;  %v863_v51 = vld [vmem:[%s13313_s13 + $0x634] sm:$0xf] }
  0xf3   :  { %862 = vst [vmem:[#allocation5 + $0x628] sm:$0xf] %v861_v50  ;;  %v865_v52 = vld [vmem:[%s13313_s13 + $0x618] sm:$0xf]  ;;  %864 = vst [vmem:[#allocation5 + $0x62c] sm:$0xf] %v863_v51 }
  0xf4   :  { %v867_v53 = vld [vmem:[%s13313_s13 + $0x638] sm:$0xf]  ;;  %866 = vst [vmem:[#allocation5 + $0x630] sm:$0xf] %v865_v52  ;;  %v869_v54 = vld [vmem:[%s13313_s13 + $0x61c] sm:$0xf] }
  0xf5   :  { %868 = vst [vmem:[#allocation5 + $0x634] sm:$0xf] %v867_v53  ;;  %v875_v56 = vld [vmem:[%s13313_s13 + $0x660] sm:$0xf]  ;;  %870 = vst [vmem:[#allocation5 + $0x638] sm:$0xf] %v869_v54 }
  0xf6   :  { %872 = vst [vmem:[#allocation5 + $0x63c] sm:$0xff] %v871_v55   ;;  %876 = vst [vmem:[#allocation5 + $0x644] sm:$0xf] %v875_v56  ;;  %v877_v57 = vld [vmem:[%s13313_s13 + $0x644] sm:$0xf]  ;;  %v903_v6 = vld [vmem:[%s13313_s13 + $0x67c] sm:$0xff]  }
  0xf7   :  { %v879_v58 = vld [vmem:[%s13313_s13 + $0x664] sm:$0xf]  ;;  %v881_v59 = vld [vmem:[%s13313_s13 + $0x648] sm:$0xf]  ;;  %878 = vst [vmem:[#allocation5 + $0x648] sm:$0xf] %v877_v57 }
  0xf8   :  { %880 = vst [vmem:[#allocation5 + $0x64c] sm:$0xf] %v879_v58  ;;  %882 = vst [vmem:[#allocation5 + $0x650] sm:$0xf] %v881_v59  ;;  %v883_v60 = vld [vmem:[%s13313_s13 + $0x668] sm:$0xf] }
  0xf9   :  { %v885_v61 = vld [vmem:[%s13313_s13 + $0x64c] sm:$0xf]  ;;  %884 = vst [vmem:[#allocation5 + $0x654] sm:$0xf] %v883_v60  ;;  %v889_v63 = vld [vmem:[%s13313_s13 + $0x650] sm:$0xf] }
  0xfa   :  { %v887_v62 = vld [vmem:[%s13313_s13 + $0x66c] sm:$0xf]  ;;  %886 = vst [vmem:[#allocation5 + $0x658] sm:$0xf] %v885_v61  ;;  %v891_v0 = vld [vmem:[%s13313_s13 + $0x670] sm:$0xf] }
  0xfb   :  { %888 = vst [vmem:[#allocation5 + $0x65c] sm:$0xf] %v887_v62  ;;  %v893_v1 = vld [vmem:[%s13313_s13 + $0x654] sm:$0xf]  ;;  %890 = vst [vmem:[#allocation5 + $0x660] sm:$0xf] %v889_v63 }
  0xfc   :  { %892 = vst [vmem:[#allocation5 + $0x664] sm:$0xf] %v891_v0  ;;  %894 = vst [vmem:[#allocation5 + $0x668] sm:$0xf] %v893_v1  ;;  %v895_v2 = vld [vmem:[%s13313_s13 + $0x674] sm:$0xf] }
  0xfd   :  { %v897_v3 = vld [vmem:[%s13313_s13 + $0x658] sm:$0xf]  ;;  %896 = vst [vmem:[#allocation5 + $0x66c] sm:$0xf] %v895_v2  ;;  %v901_v5 = vld [vmem:[%s13313_s13 + $0x65c] sm:$0xf] }
  0xfe   :  { %v899_v4 = vld [vmem:[%s13313_s13 + $0x678] sm:$0xf]  ;;  %898 = vst [vmem:[#allocation5 + $0x670] sm:$0xf] %v897_v3  ;;  %v907_v7 = vld [vmem:[%s13313_s13 + $0x6a0] sm:$0xf] }
  0xff   :  { %900 = vst [vmem:[#allocation5 + $0x674] sm:$0xf] %v899_v4  ;;  %902 = vst [vmem:[#allocation5 + $0x678] sm:$0xf] %v901_v5  ;;  %v909_v8 = vld [vmem:[%s13313_s13 + $0x684] sm:$0xf] }
 0x100   :  { %904 = vst [vmem:[#allocation5 + $0x67c] sm:$0xff] %v903_v6   ;;  %908 = vst [vmem:[#allocation5 + $0x684] sm:$0xf] %v907_v7  ;;  %v911_v9 = vld [vmem:[%s13313_s13 + $0x6a4] sm:$0xf]  ;;  %v935_v21 = vld [vmem:[%s13313_s13 + $0x6bc] sm:$0xff]  }
 0x101   :  { %v913_v10 = vld [vmem:[%s13313_s13 + $0x688] sm:$0xf]  ;;  %910 = vst [vmem:[#allocation5 + $0x688] sm:$0xf] %v909_v8  ;;  %912 = vst [vmem:[#allocation5 + $0x68c] sm:$0xf] %v911_v9 }
 0x102   :  { %914 = vst [vmem:[#allocation5 + $0x690] sm:$0xf] %v913_v10  ;;  %v915_v11 = vld [vmem:[%s13313_s13 + $0x6a8] sm:$0xf]  ;;  %v917_v12 = vld [vmem:[%s13313_s13 + $0x68c] sm:$0xf] }
 0x103   :  { %v919_v13 = vld [vmem:[%s13313_s13 + $0x6ac] sm:$0xf]  ;;  %916 = vst [vmem:[#allocation5 + $0x694] sm:$0xf] %v915_v11  ;;  %918 = vst [vmem:[#allocation5 + $0x698] sm:$0xf] %v917_v12 }
 0x104   :  { %920 = vst [vmem:[#allocation5 + $0x69c] sm:$0xf] %v919_v13  ;;  %v921_v14 = vld [vmem:[%s13313_s13 + $0x690] sm:$0xf]  ;;  %v925_v16 = vld [vmem:[%s13313_s13 + $0x694] sm:$0xf] }
 0x105   :  { %v923_v15 = vld [vmem:[%s13313_s13 + $0x6b0] sm:$0xf]  ;;  %922 = vst [vmem:[#allocation5 + $0x6a0] sm:$0xf] %v921_v14  ;;  %926 = vst [vmem:[#allocation5 + $0x6a8] sm:$0xf] %v925_v16 }
 0x106   :  { %924 = vst [vmem:[#allocation5 + $0x6a4] sm:$0xf] %v923_v15  ;;  %v927_v17 = vld [vmem:[%s13313_s13 + $0x6b4] sm:$0xf]  ;;  %v929_v18 = vld [vmem:[%s13313_s13 + $0x698] sm:$0xf] }
 0x107   :  { %v931_v19 = vld [vmem:[%s13313_s13 + $0x6b8] sm:$0xf]  ;;  %928 = vst [vmem:[#allocation5 + $0x6ac] sm:$0xf] %v927_v17  ;;  %930 = vst [vmem:[#allocation5 + $0x6b0] sm:$0xf] %v929_v18 }
 0x108   :  { %932 = vst [vmem:[#allocation5 + $0x6b4] sm:$0xf] %v931_v19  ;;  %v933_v20 = vld [vmem:[%s13313_s13 + $0x69c] sm:$0xf]  ;;  %v939_v22 = vld [vmem:[%s13313_s13 + $0x6e0] sm:$0xf] }
 0x109   :  { %934 = vst [vmem:[#allocation5 + $0x6b8] sm:$0xf] %v933_v20  ;;  %936 = vst [vmem:[#allocation5 + $0x6bc] sm:$0xff] %v935_v21   ;;  %v941_v23 = vld [vmem:[%s13313_s13 + $0x6c4] sm:$0xf]  ;;  %v967_v36 = vld [vmem:[%s13313_s13 + $0x6fc] sm:$0xff]  }
 0x10a   :  { %940 = vst [vmem:[#allocation5 + $0x6c4] sm:$0xf] %v939_v22  ;;  %v943_v24 = vld [vmem:[%s13313_s13 + $0x6e4] sm:$0xf]  ;;  %v945_v25 = vld [vmem:[%s13313_s13 + $0x6c8] sm:$0xf] }
 0x10b   :  { %942 = vst [vmem:[#allocation5 + $0x6c8] sm:$0xf] %v941_v23  ;;  %944 = vst [vmem:[#allocation5 + $0x6cc] sm:$0xf] %v943_v24  ;;  %v947_v26 = vld [vmem:[%s13313_s13 + $0x6e8] sm:$0xf] }
 0x10c   :  { %946 = vst [vmem:[#allocation5 + $0x6d0] sm:$0xf] %v945_v25  ;;  %v949_v27 = vld [vmem:[%s13313_s13 + $0x6cc] sm:$0xf]  ;;  %948 = vst [vmem:[#allocation5 + $0x6d4] sm:$0xf] %v947_v26 }
 0x10d   :  { %v951_v28 = vld [vmem:[%s13313_s13 + $0x6ec] sm:$0xf]  ;;  %950 = vst [vmem:[#allocation5 + $0x6d8] sm:$0xf] %v949_v27  ;;  %v953_v29 = vld [vmem:[%s13313_s13 + $0x6d0] sm:$0xf] }
 0x10e   :  { %952 = vst [vmem:[#allocation5 + $0x6dc] sm:$0xf] %v951_v28  ;;  %v955_v30 = vld [vmem:[%s13313_s13 + $0x6f0] sm:$0xf]  ;;  %v957_v31 = vld [vmem:[%s13313_s13 + $0x6d4] sm:$0xf] }
 0x10f   :  { %954 = vst [vmem:[#allocation5 + $0x6e0] sm:$0xf] %v953_v29  ;;  %956 = vst [vmem:[#allocation5 + $0x6e4] sm:$0xf] %v955_v30  ;;  %v959_v32 = vld [vmem:[%s13313_s13 + $0x6f4] sm:$0xf] }
 0x110   :  { %958 = vst [vmem:[#allocation5 + $0x6e8] sm:$0xf] %v957_v31  ;;  %v961_v33 = vld [vmem:[%s13313_s13 + $0x6d8] sm:$0xf]  ;;  %960 = vst [vmem:[#allocation5 + $0x6ec] sm:$0xf] %v959_v32 }
 0x111   :  { %v963_v34 = vld [vmem:[%s13313_s13 + $0x6f8] sm:$0xf]  ;;  %962 = vst [vmem:[#allocation5 + $0x6f0] sm:$0xf] %v961_v33  ;;  %v965_v35 = vld [vmem:[%s13313_s13 + $0x6dc] sm:$0xf] }
 0x112   :  { %964 = vst [vmem:[#allocation5 + $0x6f4] sm:$0xf] %v963_v34  ;;  %v971_v37 = vld [vmem:[%s13313_s13 + $0x720] sm:$0xf]  ;;  %966 = vst [vmem:[#allocation5 + $0x6f8] sm:$0xf] %v965_v35 }
 0x113   :  { %968 = vst [vmem:[#allocation5 + $0x6fc] sm:$0xff] %v967_v36   ;;  %972 = vst [vmem:[#allocation5 + $0x704] sm:$0xf] %v971_v37  ;;  %v973_v38 = vld [vmem:[%s13313_s13 + $0x704] sm:$0xf]  ;;  %v999_v51 = vld [vmem:[%s13313_s13 + $0x73c] sm:$0xff]  }
 0x114   :  { %v975_v39 = vld [vmem:[%s13313_s13 + $0x724] sm:$0xf]  ;;  %v977_v40 = vld [vmem:[%s13313_s13 + $0x708] sm:$0xf]  ;;  %974 = vst [vmem:[#allocation5 + $0x708] sm:$0xf] %v973_v38 }
 0x115   :  { %976 = vst [vmem:[#allocation5 + $0x70c] sm:$0xf] %v975_v39  ;;  %978 = vst [vmem:[#allocation5 + $0x710] sm:$0xf] %v977_v40  ;;  %v979_v41 = vld [vmem:[%s13313_s13 + $0x728] sm:$0xf] }
 0x116   :  { %v981_v42 = vld [vmem:[%s13313_s13 + $0x70c] sm:$0xf]  ;;  %980 = vst [vmem:[#allocation5 + $0x714] sm:$0xf] %v979_v41  ;;  %v985_v44 = vld [vmem:[%s13313_s13 + $0x710] sm:$0xf] }
 0x117   :  { %v983_v43 = vld [vmem:[%s13313_s13 + $0x72c] sm:$0xf]  ;;  %982 = vst [vmem:[#allocation5 + $0x718] sm:$0xf] %v981_v42  ;;  %v987_v45 = vld [vmem:[%s13313_s13 + $0x730] sm:$0xf] }
 0x118   :  { %984 = vst [vmem:[#allocation5 + $0x71c] sm:$0xf] %v983_v43  ;;  %v989_v46 = vld [vmem:[%s13313_s13 + $0x714] sm:$0xf]  ;;  %986 = vst [vmem:[#allocation5 + $0x720] sm:$0xf] %v985_v44 }
 0x119   :  { %988 = vst [vmem:[#allocation5 + $0x724] sm:$0xf] %v987_v45  ;;  %990 = vst [vmem:[#allocation5 + $0x728] sm:$0xf] %v989_v46  ;;  %v991_v47 = vld [vmem:[%s13313_s13 + $0x734] sm:$0xf] }
 0x11a   :  { %v993_v48 = vld [vmem:[%s13313_s13 + $0x718] sm:$0xf]  ;;  %992 = vst [vmem:[#allocation5 + $0x72c] sm:$0xf] %v991_v47  ;;  %v997_v50 = vld [vmem:[%s13313_s13 + $0x71c] sm:$0xf] }
 0x11b   :  { %v995_v49 = vld [vmem:[%s13313_s13 + $0x738] sm:$0xf]  ;;  %994 = vst [vmem:[#allocation5 + $0x730] sm:$0xf] %v993_v48  ;;  %v1003_v52 = vld [vmem:[%s13313_s13 + $0x760] sm:$0xf] }
 0x11c   :  { %996 = vst [vmem:[#allocation5 + $0x734] sm:$0xf] %v995_v49  ;;  %998 = vst [vmem:[#allocation5 + $0x738] sm:$0xf] %v997_v50  ;;  %v1005_v53 = vld [vmem:[%s13313_s13 + $0x744] sm:$0xf] }
 0x11d   :  { %1000 = vst [vmem:[#allocation5 + $0x73c] sm:$0xff] %v999_v51   ;;  %1004 = vst [vmem:[#allocation5 + $0x744] sm:$0xf] %v1003_v52  ;;  %v1007_v54 = vld [vmem:[%s13313_s13 + $0x764] sm:$0xf]  ;;  %v1031_v2 = vld [vmem:[%s13313_s13 + $0x77c] sm:$0xff]  }
 0x11e   :  { %v1009_v55 = vld [vmem:[%s13313_s13 + $0x748] sm:$0xf]  ;;  %1006 = vst [vmem:[#allocation5 + $0x748] sm:$0xf] %v1005_v53  ;;  %1008 = vst [vmem:[#allocation5 + $0x74c] sm:$0xf] %v1007_v54 }
 0x11f   :  { %1010 = vst [vmem:[#allocation5 + $0x750] sm:$0xf] %v1009_v55  ;;  %v1011_v56 = vld [vmem:[%s13313_s13 + $0x768] sm:$0xf]  ;;  %v1013_v57 = vld [vmem:[%s13313_s13 + $0x74c] sm:$0xf] }
 0x120   :  { %v1015_v58 = vld [vmem:[%s13313_s13 + $0x76c] sm:$0xf]  ;;  %1012 = vst [vmem:[#allocation5 + $0x754] sm:$0xf] %v1011_v56  ;;  %1014 = vst [vmem:[#allocation5 + $0x758] sm:$0xf] %v1013_v57 }
 0x121   :  { %1016 = vst [vmem:[#allocation5 + $0x75c] sm:$0xf] %v1015_v58  ;;  %v1017_v59 = vld [vmem:[%s13313_s13 + $0x750] sm:$0xf]  ;;  %v1021_v61 = vld [vmem:[%s13313_s13 + $0x754] sm:$0xf] }
 0x122   :  { %v1019_v60 = vld [vmem:[%s13313_s13 + $0x770] sm:$0xf]  ;;  %1018 = vst [vmem:[#allocation5 + $0x760] sm:$0xf] %v1017_v59  ;;  %1022 = vst [vmem:[#allocation5 + $0x768] sm:$0xf] %v1021_v61 }
 0x123   :  { %1020 = vst [vmem:[#allocation5 + $0x764] sm:$0xf] %v1019_v60  ;;  %v1023_v62 = vld [vmem:[%s13313_s13 + $0x774] sm:$0xf]  ;;  %v1025_v63 = vld [vmem:[%s13313_s13 + $0x758] sm:$0xf] }
 0x124   :  { %v1027_v0 = vld [vmem:[%s13313_s13 + $0x778] sm:$0xf]  ;;  %1024 = vst [vmem:[#allocation5 + $0x76c] sm:$0xf] %v1023_v62  ;;  %1026 = vst [vmem:[#allocation5 + $0x770] sm:$0xf] %v1025_v63 }
 0x125   :  { %1028 = vst [vmem:[#allocation5 + $0x774] sm:$0xf] %v1027_v0  ;;  %v1029_v1 = vld [vmem:[%s13313_s13 + $0x75c] sm:$0xf]  ;;  %v1035_v3 = vld [vmem:[%s13313_s13 + $0x7a0] sm:$0xf] }
 0x126   :  { %1030 = vst [vmem:[#allocation5 + $0x778] sm:$0xf] %v1029_v1  ;;  %1032 = vst [vmem:[#allocation5 + $0x77c] sm:$0xff] %v1031_v2   ;;  %v1037_v4 = vld [vmem:[%s13313_s13 + $0x784] sm:$0xf]  ;;  %v1063_v17 = vld [vmem:[%s13313_s13 + $0x7bc] sm:$0xff]  }
 0x127   :  { %1036 = vst [vmem:[#allocation5 + $0x784] sm:$0xf] %v1035_v3  ;;  %v1039_v5 = vld [vmem:[%s13313_s13 + $0x7a4] sm:$0xf]  ;;  %v1041_v6 = vld [vmem:[%s13313_s13 + $0x788] sm:$0xf] }
 0x128   :  { %1038 = vst [vmem:[#allocation5 + $0x788] sm:$0xf] %v1037_v4  ;;  %1040 = vst [vmem:[#allocation5 + $0x78c] sm:$0xf] %v1039_v5  ;;  %v1043_v7 = vld [vmem:[%s13313_s13 + $0x7a8] sm:$0xf] }
 0x129   :  { %1042 = vst [vmem:[#allocation5 + $0x790] sm:$0xf] %v1041_v6  ;;  %v1045_v8 = vld [vmem:[%s13313_s13 + $0x78c] sm:$0xf]  ;;  %1044 = vst [vmem:[#allocation5 + $0x794] sm:$0xf] %v1043_v7 }
 0x12a   :  { %v1047_v9 = vld [vmem:[%s13313_s13 + $0x7ac] sm:$0xf]  ;;  %1046 = vst [vmem:[#allocation5 + $0x798] sm:$0xf] %v1045_v8  ;;  %v1049_v10 = vld [vmem:[%s13313_s13 + $0x790] sm:$0xf] }
 0x12b   :  { %1048 = vst [vmem:[#allocation5 + $0x79c] sm:$0xf] %v1047_v9  ;;  %v1051_v11 = vld [vmem:[%s13313_s13 + $0x7b0] sm:$0xf]  ;;  %v1053_v12 = vld [vmem:[%s13313_s13 + $0x794] sm:$0xf] }
 0x12c   :  { %1050 = vst [vmem:[#allocation5 + $0x7a0] sm:$0xf] %v1049_v10  ;;  %1052 = vst [vmem:[#allocation5 + $0x7a4] sm:$0xf] %v1051_v11  ;;  %v1055_v13 = vld [vmem:[%s13313_s13 + $0x7b4] sm:$0xf] }
 0x12d   :  { %1054 = vst [vmem:[#allocation5 + $0x7a8] sm:$0xf] %v1053_v12  ;;  %v1057_v14 = vld [vmem:[%s13313_s13 + $0x798] sm:$0xf]  ;;  %1056 = vst [vmem:[#allocation5 + $0x7ac] sm:$0xf] %v1055_v13 }
 0x12e   :  { %v1059_v15 = vld [vmem:[%s13313_s13 + $0x7b8] sm:$0xf]  ;;  %1058 = vst [vmem:[#allocation5 + $0x7b0] sm:$0xf] %v1057_v14  ;;  %v1061_v16 = vld [vmem:[%s13313_s13 + $0x79c] sm:$0xf] }
 0x12f   :  { %1060 = vst [vmem:[#allocation5 + $0x7b4] sm:$0xf] %v1059_v15  ;;  %v1067_v18 = vld [vmem:[%s13313_s13 + $0x7e0] sm:$0xf]  ;;  %1062 = vst [vmem:[#allocation5 + $0x7b8] sm:$0xf] %v1061_v16 }
 0x130   :  { %1064 = vst [vmem:[#allocation5 + $0x7bc] sm:$0xff] %v1063_v17   ;;  %1068 = vst [vmem:[#allocation5 + $0x7c4] sm:$0xf] %v1067_v18  ;;  %v1069_v19 = vld [vmem:[%s13313_s13 + $0x7c4] sm:$0xf] }
 0x131   :  { %v1071_v20 = vld [vmem:[%s13313_s13 + $0x7e4] sm:$0xf]  ;;  %v1073_v21 = vld [vmem:[%s13313_s13 + $0x7c8] sm:$0xf]  ;;  %1070 = vst [vmem:[#allocation5 + $0x7c8] sm:$0xf] %v1069_v19 }
 0x132   :  { %1072 = vst [vmem:[#allocation5 + $0x7cc] sm:$0xf] %v1071_v20  ;;  %1074 = vst [vmem:[#allocation5 + $0x7d0] sm:$0xf] %v1073_v21  ;;  %v1075_v22 = vld [vmem:[%s13313_s13 + $0x7e8] sm:$0xf] }
 0x133   :  { %v1077_v23 = vld [vmem:[%s13313_s13 + $0x7cc] sm:$0xf]  ;;  %1076 = vst [vmem:[#allocation5 + $0x7d4] sm:$0xf] %v1075_v22  ;;  %v1081_v25 = vld [vmem:[%s13313_s13 + $0x7d0] sm:$0xf] }
 0x134   :  { %v1079_v24 = vld [vmem:[%s13313_s13 + $0x7ec] sm:$0xf]  ;;  %1078 = vst [vmem:[#allocation5 + $0x7d8] sm:$0xf] %v1077_v23  ;;  %v1083_v26 = vld [vmem:[%s13313_s13 + $0x7f0] sm:$0xf] }
 0x135   :  { %1080 = vst [vmem:[#allocation5 + $0x7dc] sm:$0xf] %v1079_v24  ;;  %v1085_v27 = vld [vmem:[%s13313_s13 + $0x7d4] sm:$0xf]  ;;  %1082 = vst [vmem:[#allocation5 + $0x7e0] sm:$0xf] %v1081_v25 }
 0x136   :  { %1084 = vst [vmem:[#allocation5 + $0x7e4] sm:$0xf] %v1083_v26  ;;  %1086 = vst [vmem:[#allocation5 + $0x7e8] sm:$0xf] %v1085_v27  ;;  %v1087_v28 = vld [vmem:[%s13313_s13 + $0x7f4] sm:$0xf] }
 0x137   :  { %v1089_v29 = vld [vmem:[%s13313_s13 + $0x7d8] sm:$0xf]  ;;  %1088 = vst [vmem:[#allocation5 + $0x7ec] sm:$0xf] %v1087_v28  ;;  %v1093_v31 = vld [vmem:[%s13313_s13 + $0x7dc] sm:$0xf] }
 0x138   :  { %v1091_v30 = vld [vmem:[%s13313_s13 + $0x7f8] sm:$0xf]  ;;  %1090 = vst [vmem:[#allocation5 + $0x7f0] sm:$0xf] %v1089_v29  ;;  %v1095_v32 = vld [vmem:[%s13313_s13 + $0x7fc] sm:$0xf] }
 0x139   :  { %1092 = vst [vmem:[#allocation5 + $0x7f4] sm:$0xf] %v1091_v30  ;;  %1094 = vst [vmem:[#allocation5 + $0x7f8] sm:$0xf] %v1093_v31 }
 0x13a   :  { %1096 = vst [vmem:[#allocation5 + $0x7fc] sm:$0xf] %v1095_v32 }
 0x13b   :  { %4232 = vsyncadd [#allocation6], 32768  ;;  %s13322_s28 = sld [smem:[#allocation13_spill]]  ;;  %v10395_v34 = vmov 0.0   ;;  %vm10396_vm0 = vmmov 0   ;;  %vm4294_vm1 = vcmask 1042432  }
 0x13c   :  { %9743 = vmatprep.subr.bf16.mxu0 %v10395_v34  ;;  %9755 = vmatprep.subr.bf16.mxu1 %v10395_v34  ;;  %s13323_s0 = sld [smem:[#allocation12_spill]]  ;;  %vm4290_vm2 = vcmask 441344   ;;  %vm5576_vm3 = vcmask 1040384   ;;  %vm5578_vm4 = vcmask 1041408   ;;  %vm5581_vm5 = vcmask 1043456   ;;  %s10398_s29 = smov 120  }
 0x13d   :  { %9751 = vmatprep.mubr.msk.bf16.mxu0 %vm10396_vm0, %v10395_v34  ;;  %9763 = vmatprep.mubr.msk.bf16.mxu1 %vm10396_vm0, %v10395_v34  ;;  %vm5583_vm6 = vcmask 1044480   ;;  %vm5585_vm7 = vcmask 1045504   ;;  %vm5587_vm8 = vcmask 1046528   ;;  %s10399_s13 = smov 96   ;;  %s10400_s30 = smov 112   ;;  %vm5660_vm9 = vcmask 64512  }
 0x13e   :  { %s10401_s18 = smov 80   ;;  %s10402_s19 = smov 88   ;;  %vm5821_vm11 = vcmask 523264   ;;  %vm6105_vm12 = vcmask 253952   ;;  %vm6107_vm13 = vcmask 516352  }
 0x13f   :  { %s10403_s1 = smov 64   ;;  %s10404_s20 = smov 72  }
 0x140   :  { %s10405_s21 = smov 48   ;;  %s10407_s22 = smov 32  }
 0x141   :  { %v11951_v33 = vld [vmem:[%s13322_s28 + $0x1c] sm:$0xff]   ;;  %v11965_v36 = vld [vmem:[%s13322_s28 + $0x24] sm:$0xff]   ;;  %v11982_v38 = vld [vmem:[%s13322_s28 + $0x2c] sm:$0xff]   ;;  %s10408_s23 = smov 40   ;;  %s10409_s26 = smov 16  }
 0x142   :  { %9744 = vmatpush3.bf16.msra.mxu0 %v11951_v33  ;;  %v11959_v35 = vld [vmem:[%s13322_s28] sm:$0xff]   ;;  %v11971_v37 = vld [vmem:[%s13322_s28 + $0x8] sm:$0xff]   ;;  %v10099_v39 = vld [vmem:[%s13322_s28 + $0x34] ss:$0 sps:$4 sm:$0x77]   ;;  %s10411_s27 = smov 8  }
 0x143   :  { %9745 = vmatprep.subr.bf16.mxu0 %v10395_v34  ;;  %9756 = vmatpush3.bf16.msra.mxu1 %v11959_v35  ;;  %v11992_v40 = vld [vmem:[%s13322_s28 + $0x10] sm:$0xff]   ;;  %v10100_v41 = vld [vmem:[%s13322_s28 + $0x18] ss:$0 sps:$4 sm:$0x77]   ;;  %v4266_v42 = vld [vmem:[%s13323_s0 + $0x1] sm:$0xff]  ;;  %v12007_v44 = vsel %vm4294_vm1, %v10099_v39, 0 }
 0x144   :  { %9757 = vmatprep.subr.bf16.mxu1 %v10395_v34  ;;  %v4267_v43 = vld [vmem:[%s13323_s0 + $0x9] sm:$0xff]  ;;  %v4263_v45 = vld [vmem:[%s13323_s0] sm:$0xff]  ;;  %v12018_v47 = vsel %vm4294_vm1, %v10100_v41, 0  ;;  %v12024_v49 = vld [vmem:[%s13322_s28 + $0x38] sm:$0xff]  }
 0x145   :  { %v4264_v46 = vld [vmem:[%s13323_s0 + $0x8] sm:$0xff]  ;;  %v4268_v48 = vpack.c.bf16 %v4267_v43, %v4266_v42  ;;  %v12034_v51 = vld [vmem:[%s13322_s28 + $0x40] sm:$0xff]   ;;  %v10104_v53 = vld [vmem:[%s13322_s28 + $0x50] ss:$0 sps:$4 sm:$0x77]  }
 0x146   :  { %9746 = vmatpush3.bf16.msra.mxu0 %v11965_v36  ;;  %v4265_v50 = vpack.c.bf16 %v4264_v46, %v4263_v45  ;;  %v12048_v52 = vld [vmem:[%s13322_s28 + $0x48] sm:$0xff]   ;;  %v9316_v56 = vld [vmem:[%s13323_s0 + $0x19] sm:$0xff]  ;;  %v12071_v58 = vsel %vm4294_vm1, %v10104_v53, 0  ;;  %v9325_v3 = vld [vmem:[%s13323_s0 + $0x31] sm:$0xff]  ;;  %s10406_s28 = smov 56  }
 0x147   :  { %9747 = vmatprep.subr.bf16.mxu0 %v10395_v34  ;;  %9758 = vmatpush3.bf16.msra.mxu1 %v11971_v37  ;;  %v4407_v54 = vld [vmem:[%s13323_s0 + $0x2] sm:$0xff]  ;;  %v4408_v55 = vld [vmem:[%s13323_s0 + $0xa] sm:$0xff]  ;;  %v9314_v61 = vld [vmem:[%s13323_s0 + $0x18] sm:$0xff] }
 0x148   :  { %9759 = vmatprep.subr.bf16.mxu1 %v10395_v34  ;;  %v9317_v57 = vld [vmem:[%s13323_s0 + $0x21] sm:$0xff]  ;;  %v4409_v59 = vpack.c.bf16 %v4408_v55, %v4407_v54  ;;  %v9326_v4 = vld [vmem:[%s13323_s0 + $0x39] sm:$0xff]  ;;  %v9323_v5 = vld [vmem:[%s13323_s0 + $0x30] sm:$0xff] }
 0x149   :  { %v4497_v60 = vpack.c.bf16 %v9317_v57, %v9316_v56  ;;  %v9315_v62 = vld [vmem:[%s13323_s0 + $0x20] sm:$0xff]  ;;  %v9324_v6 = vld [vmem:[%s13323_s0 + $0x38] sm:$0xff]  ;;  %v4652_v7 = vpack.c.bf16 %v9326_v4, %v9325_v3  ;;  %v9334_v11 = vld [vmem:[%s13323_s0 + $0x49] sm:$0xff] }
 0x14a   :  { %9748 = vmatpush3.bf16.msra.mxu0 %v11982_v38  ;;  %v9320_v63 = vld [vmem:[%s13323_s0 + $0x1a] sm:$0xff]  ;;  %v9321_v0 = vld [vmem:[%s13323_s0 + $0x22] sm:$0xff]  ;;  %v4494_v1 = vpack.c.bf16 %v9315_v62, %v9314_v61  ;;  %v4649_v8 = vpack.c.bf16 %v9324_v6, %v9323_v5  ;;  %v9329_v9 = vld [vmem:[%s13323_s0 + $0x32] sm:$0xff] }
 0x14b   :  { %9749 = vmatprep.subr.bf16.mxu0 %v10395_v34  ;;  %9760 = vmatpush3.bf16.msra.mxu1 %v11992_v40  ;;  %v4588_v2 = vpack.c.bf16 %v9321_v0, %v9320_v63  ;;  %v9330_v10 = vld [vmem:[%s13323_s0 + $0x3a] sm:$0xff]  ;;  %v9335_v12 = vld [vmem:[%s13323_s0 + $0x51] sm:$0xff]  ;;  %v9332_v15 = vld [vmem:[%s13323_s0 + $0x48] sm:$0xff] }
 0x14c   :  { %9761 = vmatprep.subr.bf16.mxu1 %v10395_v34  ;;  %v4743_v13 = vpack.c.bf16 %v9330_v10, %v9329_v9  ;;  %v4807_v14 = vpack.c.bf16 %v9335_v12, %v9334_v11  ;;  %v9333_v16 = vld [vmem:[%s13323_s0 + $0x50] sm:$0xff]  ;;  %v9343_v21 = vld [vmem:[%s13323_s0 + $0x61] sm:$0xff]  ;;  %v9352_v29 = vld [vmem:[%s13323_s0 + $0x79] sm:$0xff] }
 0x14d   :  { %v9338_v17 = vld [vmem:[%s13323_s0 + $0x4a] sm:$0xff]  ;;  %v9339_v18 = vld [vmem:[%s13323_s0 + $0x52] sm:$0xff]  ;;  %v4804_v19 = vpack.c.bf16 %v9333_v16, %v9332_v15  ;;  %v9341_v23 = vld [vmem:[%s13323_s0 + $0x60] sm:$0xff] }
 0x14e   :  { %9750 = vmatpush3.bf16.msra.mxu0 %v12007_v44  ;;  %v4898_v20 = vpack.c.bf16 %v9339_v18, %v9338_v17  ;;  %v9344_v22 = vld [vmem:[%s13323_s0 + $0x69] sm:$0xff]  ;;  %v9353_v30 = vld [vmem:[%s13323_s0 + $0x81] sm:$0xff]  ;;  %v9350_v39 = vld [vmem:[%s13323_s0 + $0x78] sm:$0xff] }
 0x14f   :  { %9767 = vmatprep.subr.bf16.mxu0 %v10395_v34  ;;  %9762 = vmatpush3.bf16.msra.mxu1 %v12018_v47  ;;  %v9342_v24 = vld [vmem:[%s13323_s0 + $0x68] sm:$0xff]  ;;  %v4962_v25 = vpack.c.bf16 %v9344_v22, %v9343_v21  ;;  %v5117_v32 = vpack.c.bf16 %v9353_v30, %v9352_v29  ;;  %v9351_v41 = vld [vmem:[%s13323_s0 + $0x80] sm:$0xff]  ;;  %v9359_v53 = vld [vmem:[%s13323_s0 + $0x90] sm:$0xff] }
 0x150   :  { %9779 = vmatprep.subr.bf16.mxu1 %v10395_v34  ;;  %v4959_v26 = vpack.c.bf16 %v9342_v24, %v9341_v23  ;;  %v9347_v27 = vld [vmem:[%s13323_s0 + $0x62] sm:$0xff]  ;;  %v9348_v28 = vld [vmem:[%s13323_s0 + $0x6a] sm:$0xff]  ;;  %v9356_v42 = vld [vmem:[%s13323_s0 + $0x7a] sm:$0xff]  ;;  %v5114_v45 = vpack.c.bf16 %v9351_v41, %v9350_v39 }
 0x151   :  { %9752 = vmatmul.mubr.msk.bf16.vlgmr.msra.gmra.mrb[0].mxu0 %vm4290_vm2, %v4268_v48  ;;  %v5053_v31 = vpack.c.bf16 %v9348_v28, %v9347_v27  ;;  %v9357_v43 = vld [vmem:[%s13323_s0 + $0x82] sm:$0xff]  ;;  %v9361_v48 = vld [vmem:[%s13323_s0 + $0x91] sm:$0xff]  ;;  %v12428_v4 = vld [vmem:[%s13302_s2] ss:$0 sm:$0xff]  ;;  %s10397_s2 = smov 104  }
 0x152   :  { %9768 = vmatpush3.bf16.msra.mxu0 %v12024_v49  ;;  %9775 = vmatprep.mubr.msk.bf16.mxu0 %vm10396_vm0, %v10395_v34  ;;  %v5208_v46 = vpack.c.bf16 %v9357_v43, %v9356_v42  ;;  %v9360_v54 = vld [vmem:[%s13323_s0 + $0x98] sm:$0xff] }
 0x153   :  { %9764 = vmatmul.mubr.msk.bf16.vlgmr.msra.gmra.mrb[0].mxu1 %vm4290_vm2, %v4265_v50  ;;  %9769 = vmatprep.subr.bf16.mxu0 %v10395_v34  ;;  %v9362_v50 = vld [vmem:[%s13323_s0 + $0x99] sm:$0xff]  ;;  %v5269_v56 = vpack.c.bf16 %v9360_v54, %v9359_v53 }
 0x154   :  { %9780 = vmatpush3.bf16.msra.mxu1 %v11951_v33  ;;  %9787 = vmatprep.mubr.msk.bf16.mxu1 %vm10396_vm0, %v10395_v34  ;;  %v5272_v55 = vpack.c.bf16 %v9362_v50, %v9361_v48  ;;  %v9365_v57 = vld [vmem:[%s13323_s0 + $0x92] sm:$0xff] }
 0x155   :  { %9781 = vmatprep.subr.bf16.mxu1 %v10395_v34 }
 0x156   :  { %9770 = vmatpush3.bf16.msra.mxu0 %v12034_v51 }
 0x157   :  { %9771 = vmatprep.subr.bf16.mxu0 %v10395_v34 }
 0x158   :  { %9782 = vmatpush3.bf16.msra.mxu1 %v11965_v36 }
 0x159   :  { %9783 = vmatprep.subr.bf16.mxu1 %v10395_v34 }
 0x15a   :  { %9772 = vmatpush3.bf16.msra.mxu0 %v12048_v52 }
 0x15b   :  { %9773 = vmatprep.subr.bf16.mxu0 %v10395_v34 }
 0x15c   :  { %9784 = vmatpush3.bf16.msra.mxu1 %v11982_v38 }
 0x15d   :  { %9785 = vmatprep.subr.bf16.mxu1 %v10395_v34 }
 0x15e   :  { %9774 = vmatpush3.bf16.msra.mxu0 %v12071_v58 }
 0x15f   :  { %9791 = vmatprep.subr.bf16.mxu0 %v10395_v34 }
 0x160   :  { %9786 = vmatpush3.bf16.msra.mxu1 %v12007_v44 }
 0x161   :  { %9776 = vmatmul.mubr.msk.bf16.vlgmr.msra.gmra.mrb[4].mxu0 %vm4290_vm2, %v4409_v59  ;;  %9803 = vmatprep.subr.bf16.mxu1 %v10395_v34  ;;  %v9371_v59 = vld [vmem:[%s13323_s0 + $0xb1] sm:$0xff] }
 0x162   :  { %9792 = vmatpush3.bf16.msra.mxu0 %v11959_v35  ;;  %9799 = vmatprep.mubr.msk.bf16.mxu0 %vm10396_vm0, %v10395_v34 }
 0x163   :  { %9788 = vmatmul.mubr.msk.bf16.vlgmr.msra.gmra.mrb[4].mxu1 %vm4290_vm2, %v4497_v60  ;;  %9793 = vmatprep.subr.bf16.mxu0 %v10395_v34 }
 0x164   :  { %9804 = vmatpush3.bf16.msra.mxu1 %v12024_v49  ;;  %9811 = vmatprep.mubr.msk.bf16.mxu1 %vm10396_vm0, %v10395_v34 }
 0x165   :  { %9805 = vmatprep.subr.bf16.mxu1 %v10395_v34 }
 0x166   :  { %9794 = vmatpush3.bf16.msra.mxu0 %v11971_v37 }
 0x167   :  { %9795 = vmatprep.subr.bf16.mxu0 %v10395_v34 }
 0x168   :  { %9806 = vmatpush3.bf16.msra.mxu1 %v12034_v51 }
 0x169   :  { %9807 = vmatprep.subr.bf16.mxu1 %v10395_v34 }
 0x16a   :  { %9796 = vmatpush3.bf16.msra.mxu0 %v11992_v40 }
 0x16b   :  { %9797 = vmatprep.subr.bf16.mxu0 %v10395_v34 }
 0x16c   :  { %9808 = vmatpush3.bf16.msra.mxu1 %v12048_v52 }
 0x16d   :  { %9809 = vmatprep.subr.bf16.mxu1 %v10395_v34 }
 0x16e   :  { %9798 = vmatpush3.bf16.msra.mxu0 %v12018_v47 }
 0x16f   :  { %9815 = vmatprep.subr.bf16.mxu0 %v10395_v34 }
 0x170   :  { %9810 = vmatpush3.bf16.msra.mxu1 %v12071_v58 }
 0x171   :  { %9800 = vmatmul.mubr.msk.bf16.vlgmr.msra.gmra.mrb[8].mxu0 %vm4290_vm2, %v4494_v1  ;;  %9827 = vmatprep.subr.bf16.mxu1 %v10395_v34 }
 0x172   :  { %9816 = vmatpush3.bf16.msra.mxu0 %v11951_v33  ;;  %9823 = vmatprep.mubr.msk.bf16.mxu0 %vm10396_vm0, %v10395_v34 }
 0x173   :  { %9812 = vmatmul.mubr.msk.bf16.vlgmr.msra.gmra.mrb[8].mxu1 %vm4290_vm2, %v4588_v2  ;;  %9817 = vmatprep.subr.bf16.mxu0 %v10395_v34 }
 0x174   :  { %9828 = vmatpush3.bf16.msra.mxu1 %v11959_v35  ;;  %9835 = vmatprep.mubr.msk.bf16.mxu1 %vm10396_vm0, %v10395_v34 }
 0x175   :  { %9829 = vmatprep.subr.bf16.mxu1 %v10395_v34 }
 0x176   :  { %9818 = vmatpush3.bf16.msra.mxu0 %v11965_v36 }
 0x177   :  { %9819 = vmatprep.subr.bf16.mxu0 %v10395_v34 }
 0x178   :  { %9830 = vmatpush3.bf16.msra.mxu1 %v11971_v37 }
 0x179   :  { %9831 = vmatprep.subr.bf16.mxu1 %v10395_v34 }
 0x17a   :  { %9820 = vmatpush3.bf16.msra.mxu0 %v11982_v38 }
 0x17b   :  { %9821 = vmatprep.subr.bf16.mxu0 %v10395_v34 }
 0x17c   :  { %9832 = vmatpush3.bf16.msra.mxu1 %v11992_v40 }
 0x17d   :  { %9833 = vmatprep.subr.bf16.mxu1 %v10395_v34 }
 0x17e   :  { %9822 = vmatpush3.bf16.msra.mxu0 %v12007_v44 }
 0x17f   :  { %9839 = vmatprep.subr.bf16.mxu0 %v10395_v34 }
 0x180   :  { %9834 = vmatpush3.bf16.msra.mxu1 %v12018_v47 }
 0x181   :  { %9824 = vmatmul.mubr.msk.bf16.vlgmr.msra.gmra.mrb[12].mxu0 %vm4290_vm2, %v4652_v7  ;;  %9851 = vmatprep.subr.bf16.mxu1 %v10395_v34 }
 0x182   :  { %9840 = vmatpush3.bf16.msra.mxu0 %v12024_v49  ;;  %9847 = vmatprep.mubr.msk.bf16.mxu0 %vm10396_vm0, %v10395_v34 }
 0x183   :  { %9836 = vmatmul.mubr.msk.bf16.vlgmr.msra.gmra.mrb[12].mxu1 %vm4290_vm2, %v4649_v8  ;;  %9841 = vmatprep.subr.bf16.mxu0 %v10395_v34 }
 0x184   :  { %9852 = vmatpush3.bf16.msra.mxu1 %v11951_v33  ;;  %9859 = vmatprep.mubr.msk.bf16.mxu1 %vm10396_vm0, %v10395_v34 }
 0x185   :  { %9853 = vmatprep.subr.bf16.mxu1 %v10395_v34 }
 0x186   :  { %9842 = vmatpush3.bf16.msra.mxu0 %v12034_v51 }
 0x187   :  { %9843 = vmatprep.subr.bf16.mxu0 %v10395_v34 }
 0x188   :  { %9854 = vmatpush3.bf16.msra.mxu1 %v11965_v36 }
 0x189   :  { %9855 = vmatprep.subr.bf16.mxu1 %v10395_v34 }
 0x18a   :  { %9844 = vmatpush3.bf16.msra.mxu0 %v12048_v52 }
 0x18b   :  { %9845 = vmatprep.subr.bf16.mxu0 %v10395_v34 }
 0x18c   :  { %9856 = vmatpush3.bf16.msra.mxu1 %v11982_v38 }
 0x18d   :  { %9857 = vmatprep.subr.bf16.mxu1 %v10395_v34 }
 0x18e   :  { %9846 = vmatpush3.bf16.msra.mxu0 %v12071_v58 }
 0x18f   :  { %9863 = vmatprep.subr.bf16.mxu0 %v10395_v34 }
 0x190   :  { %9858 = vmatpush3.bf16.msra.mxu1 %v12007_v44 }
 0x191   :  { %9848 = vmatmul.mubr.msk.bf16.vlgmr.msra.gmra.mrb[16].mxu0 %vm4290_vm2, %v4743_v13  ;;  %9875 = vmatprep.subr.bf16.mxu1 %v10395_v34 }
 0x192   :  { %9864 = vmatpush3.bf16.msra.mxu0 %v11959_v35  ;;  %9871 = vmatprep.mubr.msk.bf16.mxu0 %vm10396_vm0, %v10395_v34 }
 0x193   :  { %9860 = vmatmul.mubr.msk.bf16.vlgmr.msra.gmra.mrb[16].mxu1 %vm4290_vm2, %v4807_v14  ;;  %9865 = vmatprep.subr.bf16.mxu0 %v10395_v34 }
 0x194   :  { %9876 = vmatpush3.bf16.msra.mxu1 %v12024_v49  ;;  %9883 = vmatprep.mubr.msk.bf16.mxu1 %vm10396_vm0, %v10395_v34 }
 0x195   :  { %9877 = vmatprep.subr.bf16.mxu1 %v10395_v34 }
 0x196   :  { %9866 = vmatpush3.bf16.msra.mxu0 %v11971_v37 }
 0x197   :  { %9867 = vmatprep.subr.bf16.mxu0 %v10395_v34 }
 0x198   :  { %9878 = vmatpush3.bf16.msra.mxu1 %v12034_v51 }
 0x199   :  { %9879 = vmatprep.subr.bf16.mxu1 %v10395_v34 }
 0x19a   :  { %9868 = vmatpush3.bf16.msra.mxu0 %v11992_v40 }
 0x19b   :  { %9869 = vmatprep.subr.bf16.mxu0 %v10395_v34 }
 0x19c   :  { %9880 = vmatpush3.bf16.msra.mxu1 %v12048_v52 }
 0x19d   :  { %9881 = vmatprep.subr.bf16.mxu1 %v10395_v34 }
 0x19e   :  { %9870 = vmatpush3.bf16.msra.mxu0 %v12018_v47 }
 0x19f   :  { %9887 = vmatprep.subr.bf16.mxu0 %v10395_v34 }
 0x1a0   :  { %9882 = vmatpush3.bf16.msra.mxu1 %v12071_v58 }
 0x1a1   :  { %9872 = vmatmul.mubr.msk.bf16.vlgmr.msra.gmra.mrb[20].mxu0 %vm4290_vm2, %v4804_v19  ;;  %9899 = vmatprep.subr.bf16.mxu1 %v10395_v34 }
 0x1a2   :  { %9888 = vmatpush3.bf16.msra.mxu0 %v11951_v33  ;;  %9895 = vmatprep.mubr.msk.bf16.mxu0 %vm10396_vm0, %v10395_v34 }
 0x1a3   :  { %9884 = vmatmul.mubr.msk.bf16.vlgmr.msra.gmra.mrb[20].mxu1 %vm4290_vm2, %v4898_v20  ;;  %9889 = vmatprep.subr.bf16.mxu0 %v10395_v34 }
 0x1a4   :  { %9900 = vmatpush3.bf16.msra.mxu1 %v11959_v35  ;;  %9907 = vmatprep.mubr.msk.bf16.mxu1 %vm10396_vm0, %v10395_v34 }
 0x1a5   :  { %9901 = vmatprep.subr.bf16.mxu1 %v10395_v34 }
 0x1a6   :  { %9890 = vmatpush3.bf16.msra.mxu0 %v11965_v36 }
 0x1a7   :  { %9891 = vmatprep.subr.bf16.mxu0 %v10395_v34 }
 0x1a8   :  { %9902 = vmatpush3.bf16.msra.mxu1 %v11971_v37 }
 0x1a9   :  { %9903 = vmatprep.subr.bf16.mxu1 %v10395_v34 }
 0x1aa   :  { %9892 = vmatpush3.bf16.msra.mxu0 %v11982_v38 }
 0x1ab   :  { %9893 = vmatprep.subr.bf16.mxu0 %v10395_v34 }
 0x1ac   :  { %9904 = vmatpush3.bf16.msra.mxu1 %v11992_v40 }
 0x1ad   :  { %9905 = vmatprep.subr.bf16.mxu1 %v10395_v34 }
 0x1ae   :  { %9894 = vmatpush3.bf16.msra.mxu0 %v12007_v44 }
 0x1af   :  { %9911 = vmatprep.subr.bf16.mxu0 %v10395_v34 }
 0x1b0   :  { %9906 = vmatpush3.bf16.msra.mxu1 %v12018_v47 }
 0x1b1   :  { %9896 = vmatmul.mubr.msk.bf16.vlgmr.msra.gmra.mrb[24].mxu0 %vm4290_vm2, %v4962_v25  ;;  %9923 = vmatprep.subr.bf16.mxu1 %v10395_v34 }
 0x1b2   :  { %9912 = vmatpush3.bf16.msra.mxu0 %v12024_v49  ;;  %9919 = vmatprep.mubr.msk.bf16.mxu0 %vm10396_vm0, %v10395_v34 }
 0x1b3   :  { %9908 = vmatmul.mubr.msk.bf16.vlgmr.msra.gmra.mrb[24].mxu1 %vm4290_vm2, %v4959_v26  ;;  %9913 = vmatprep.subr.bf16.mxu0 %v10395_v34 }
 0x1b4   :  { %9924 = vmatpush3.bf16.msra.mxu1 %v11951_v33  ;;  %9931 = vmatprep.mubr.msk.bf16.mxu1 %vm10396_vm0, %v10395_v34 }
 0x1b5   :  { %9925 = vmatprep.subr.bf16.mxu1 %v10395_v34 }
 0x1b6   :  { %9914 = vmatpush3.bf16.msra.mxu0 %v12034_v51 }
 0x1b7   :  { %9915 = vmatprep.subr.bf16.mxu0 %v10395_v34 }
 0x1b8   :  { %9926 = vmatpush3.bf16.msra.mxu1 %v11965_v36 }
 0x1b9   :  { %9927 = vmatprep.subr.bf16.mxu1 %v10395_v34 }
 0x1ba   :  { %9916 = vmatpush3.bf16.msra.mxu0 %v12048_v52 }
 0x1bb   :  { %9917 = vmatprep.subr.bf16.mxu0 %v10395_v34 }
 0x1bc   :  { %9928 = vmatpush3.bf16.msra.mxu1 %v11982_v38 }
 0x1bd   :  { %9929 = vmatprep.subr.bf16.mxu1 %v10395_v34 }
 0x1be   :  { %9918 = vmatpush3.bf16.msra.mxu0 %v12071_v58 }
 0x1bf   :  { %9935 = vmatprep.subr.bf16.mxu0 %v10395_v34 }
 0x1c0   :  { %9930 = vmatpush3.bf16.msra.mxu1 %v12007_v44 }
 0x1c1   :  { %9920 = vmatmul.mubr.msk.bf16.vlgmr.msra.gmra.mrb[28].mxu0 %vm4290_vm2, %v5053_v31  ;;  %9947 = vmatprep.subr.bf16.mxu1 %v10395_v34 }
 0x1c2   :  { %9936 = vmatpush3.bf16.msra.mxu0 %v11959_v35  ;;  %9943 = vmatprep.mubr.msk.bf16.mxu0 %vm10396_vm0, %v10395_v34 }
 0x1c3   :  { %9932 = vmatmul.mubr.msk.bf16.vlgmr.msra.gmra.mrb[28].mxu1 %vm4290_vm2, %v5117_v32  ;;  %9937 = vmatprep.subr.bf16.mxu0 %v10395_v34 }
 0x1c4   :  { %9948 = vmatpush3.bf16.msra.mxu1 %v12024_v49  ;;  %9955 = vmatprep.mubr.msk.bf16.mxu1 %vm10396_vm0, %v10395_v34 }
 0x1c5   :  { %9949 = vmatprep.subr.bf16.mxu1 %v10395_v34 }
 0x1c6   :  { %9938 = vmatpush3.bf16.msra.mxu0 %v11971_v37 }
 0x1c7   :  { %9939 = vmatprep.subr.bf16.mxu0 %v10395_v34 }
 0x1c8   :  { %9950 = vmatpush3.bf16.msra.mxu1 %v12034_v51 }
 0x1c9   :  { %9951 = vmatprep.subr.bf16.mxu1 %v10395_v34 }
 0x1ca   :  { %9940 = vmatpush3.bf16.msra.mxu0 %v11992_v40 }
 0x1cb   :  { %9941 = vmatprep.subr.bf16.mxu0 %v10395_v34 }
 0x1cc   :  { %9952 = vmatpush3.bf16.msra.mxu1 %v12048_v52 }
 0x1cd   :  { %9953 = vmatprep.subr.bf16.mxu1 %v10395_v34 }
 0x1ce   :  { %9942 = vmatpush3.bf16.msra.mxu0 %v12018_v47 }
 0x1cf   :  { %9959 = vmatprep.subr.bf16.mxu0 %v10395_v34 }
 0x1d0   :  { %9954 = vmatpush3.bf16.msra.mxu1 %v12071_v58 }
 0x1d1   :  { %9944 = vmatmul.mubr.msk.bf16.vlgmr.msra.gmra.mrb[32].mxu0 %vm4290_vm2, %v5114_v45  ;;  %9971 = vmatprep.subr.bf16.mxu1 %v10395_v34 }
 0x1d2   :  { %9960 = vmatpush3.bf16.msra.mxu0 %v11951_v33  ;;  %9967 = vmatprep.mubr.msk.bf16.mxu0 %vm10396_vm0, %v10395_v34 }
 0x1d3   :  { %9956 = vmatmul.mubr.msk.bf16.vlgmr.msra.gmra.mrb[32].mxu1 %vm4290_vm2, %v5208_v46  ;;  %9961 = vmatprep.subr.bf16.mxu0 %v10395_v34 }
 0x1d4   :  { %9972 = vmatpush3.bf16.msra.mxu1 %v11959_v35  ;;  %9979 = vmatprep.mubr.msk.bf16.mxu1 %vm10396_vm0, %v10395_v34 }
 0x1d5   :  { %9973 = vmatprep.subr.bf16.mxu1 %v10395_v34 }
 0x1d6   :  { %9962 = vmatpush3.bf16.msra.mxu0 %v11965_v36 }
 0x1d7   :  { %9963 = vmatprep.subr.bf16.mxu0 %v10395_v34 }
 0x1d8   :  { %9974 = vmatpush3.bf16.msra.mxu1 %v11971_v37 }
 0x1d9   :  { %9975 = vmatprep.subr.bf16.mxu1 %v10395_v34 }
 0x1da   :  { %9964 = vmatpush3.bf16.msra.mxu0 %v11982_v38 }
 0x1db   :  { %9965 = vmatprep.subr.bf16.mxu0 %v10395_v34 }
 0x1dc   :  { %9976 = vmatpush3.bf16.msra.mxu1 %v11992_v40 }
 0x1dd   :  { %9977 = vmatprep.subr.bf16.mxu1 %v10395_v34 }
 0x1de   :  { %9966 = vmatpush3.bf16.msra.mxu0 %v12007_v44 }
 0x1df   :  { %9983 = vmatprep.subr.bf16.mxu0 %v10395_v34 }
 0x1e0   :  { %9978 = vmatpush3.bf16.msra.mxu1 %v12018_v47 }
 0x1e1   :  { %9968 = vmatmul.mubr.msk.bf16.vlgmr.msra.gmra.mrb[36].mxu0 %vm4290_vm2, %v5272_v55  ;;  %9995 = vmatprep.subr.bf16.mxu1 %v10395_v34 }
 0x1e2   :  { %9984 = vmatpush3.bf16.msra.mxu0 %v12024_v49  ;;  %9991 = vmatprep.mubr.msk.bf16.mxu0 %vm10396_vm0, %v10395_v34 }
 0x1e3   :  { %9980 = vmatmul.mubr.msk.bf16.vlgmr.msra.gmra.mrb[36].mxu1 %vm4290_vm2, %v5269_v56  ;;  %9985 = vmatprep.subr.bf16.mxu0 %v10395_v34 }
 0x1e4   :  { %9996 = vmatpush3.bf16.msra.mxu1 %v11951_v33  ;;  %10003 = vmatprep.mubr.msk.bf16.mxu1 %vm10396_vm0, %v10395_v34  ;;  %v9366_v33 = vld [vmem:[%s13323_s0 + $0x9a] sm:$0xff] }
 0x1e5   :  { %9997 = vmatprep.subr.bf16.mxu1 %v10395_v34  ;;  %v5363_v60 = vpack.c.bf16 %v9366_v33, %v9365_v57 }
 0x1e6   :  { %9986 = vmatpush3.bf16.msra.mxu0 %v12034_v51 }
 0x1e7   :  { %9987 = vmatprep.subr.bf16.mxu0 %v10395_v34 }
 0x1e8   :  { %9998 = vmatpush3.bf16.msra.mxu1 %v11965_v36  ;;  %v9370_v36 = vld [vmem:[%s13323_s0 + $0xa9] sm:$0xff] }
 0x1e9   :  { %9999 = vmatprep.subr.bf16.mxu1 %v10395_v34  ;;  %v5427_v61 = vpack.c.bf16 %v9371_v59, %v9370_v36 }
 0x1ea   :  { %9988 = vmatpush3.bf16.msra.mxu0 %v12048_v52 }
 0x1eb   :  { %9989 = vmatprep.subr.bf16.mxu0 %v10395_v34 }
 0x1ec   :  { %10000 = vmatpush3.bf16.msra.mxu1 %v11982_v38  ;;  %v9369_v38 = vld [vmem:[%s13323_s0 + $0xb0] sm:$0xff] }
 0x1ed   :  { %10001 = vmatprep.subr.bf16.mxu1 %v10395_v34 }
 0x1ee   :  { %9990 = vmatpush3.bf16.msra.mxu0 %v12071_v58 }
 0x1ef   :  { %10007 = vmatprep.subr.bf16.mxu0 %v10395_v34 }
 0x1f0   :  { %10002 = vmatpush3.bf16.msra.mxu1 %v12007_v44 }
 0x1f1   :  { %9992 = vmatmul.mubr.msk.bf16.vlgmr.msra.gmra.mrb[40].mxu0 %vm4290_vm2, %v5363_v60  ;;  %10019 = vmatprep.subr.bf16.mxu1 %v10395_v34 }
 0x1f2   :  { %10008 = vmatpush3.bf16.msra.mxu0 %v11959_v35  ;;  %10015 = vmatprep.mubr.msk.bf16.mxu0 %vm10396_vm0, %v10395_v34  ;;  %v9368_v35 = vld [vmem:[%s13323_s0 + $0xa8] sm:$0xff] }
 0x1f3   :  { %10004 = vmatmul.mubr.msk.bf16.vlgmr.msra.gmra.mrb[40].mxu1 %vm4290_vm2, %v5427_v61  ;;  %10009 = vmatprep.subr.bf16.mxu0 %v10395_v34  ;;  %v5424_v44 = vpack.c.bf16 %v9369_v38, %v9368_v35 }
 0x1f4   :  { %10020 = vmatpush3.bf16.msra.mxu1 %v12024_v49  ;;  %10027 = vmatprep.mubr.msk.bf16.mxu1 %vm10396_vm0, %v10395_v34 }
 0x1f5   :  { %10021 = vmatprep.subr.bf16.mxu1 %v10395_v34 }
 0x1f6   :  { %10010 = vmatpush3.bf16.msra.mxu0 %v11971_v37  ;;  %v9374_v37 = vld [vmem:[%s13323_s0 + $0xaa] sm:$0xff] }
 0x1f7   :  { %10011 = vmatprep.subr.bf16.mxu0 %v10395_v34 }
 0x1f8   :  { %10022 = vmatpush3.bf16.msra.mxu1 %v12034_v51 }
 0x1f9   :  { %10023 = vmatprep.subr.bf16.mxu1 %v10395_v34 }
 0x1fa   :  { %10012 = vmatpush3.bf16.msra.mxu0 %v11992_v40  ;;  %v9375_v40 = vld [vmem:[%s13323_s0 + $0xb2] sm:$0xff]  ;;  %s10410_s0 = smov 24  }
 0x1fb   :  { %10013 = vmatprep.subr.bf16.mxu0 %v10395_v34  ;;  %v5518_v49 = vpack.c.bf16 %v9375_v40, %v9374_v37 }
 0x1fc   :  { %10024 = vmatpush3.bf16.msra.mxu1 %v12048_v52 }
 0x1fd   :  { %10025 = vmatprep.subr.bf16.mxu1 %v10395_v34 }
 0x1fe   :  { %10014 = vmatpush3.bf16.msra.mxu0 %v12018_v47 }
 0x1ff   :  { %10031 = vmatprep.subr.bf16.mxu0 %v10395_v34 }
 0x200   :  { %10026 = vmatpush3.bf16.msra.mxu1 %v12071_v58 }
 0x201   :  { %10016 = vmatmul.mubr.msk.bf16.vlgmr.msra.gmra.mrb[44].mxu0 %vm4290_vm2, %v5424_v44  ;;  %10037 = vmatprep.subr.bf16.mxu1 %v10395_v34 }
 0x202   :  { %10033 = vmatprep.mubr.msk.bf16.mxu0 %vm10396_vm0, %v10395_v34 }
 0x203   :  { %10028 = vmatmul.mubr.msk.bf16.vlgmr.msra.gmra.mrb[44].mxu1 %vm4290_vm2, %v5518_v49 }
 0x204   :  { %10039 = vmatprep.mubr.msk.bf16.mxu1 %vm10396_vm0, %v10395_v34 }
 0x224   :  { %v4332_v51 = vpop.f32.mrb[0].mxu0 }
 0x225   :  { %v9753_v52 = vpop.f32.mrb[1].mxu0 }
 0x226   :  { %v4400_v47 = vpop.f32.mrb[0].mxu1  ;;  %v4335_v62 = vpop.f32.mrb[2].mxu0 }
 0x227   :  { %v4401_v63 = vadd.f32 %v4400_v47, %v4332_v51  ;;  %v9765_v0 = vpop.f32.mrb[1].mxu1  ;;  %v9754_v1 = vpop.f32.mrb[3].mxu0 }
 0x228   :  { %v4403_v58 = vpop.f32.mrb[2].mxu1 }
 0x229   :  { %v4404_v2 = vadd.f32 %v4403_v58, %v4335_v62  ;;  %v9766_v3 = vpop.f32.mrb[3].mxu1 }
 0x234   :  { %v4471_v5 = vpop.f32.mrb[4].mxu0 }
 0x235   :  { %v4478_v6 = vadd.f32 %v4471_v5, %v4401_v63  ;;  %v9777_v7 = vpop.f32.mrb[5].mxu0 }
 0x236   :  { %v4535_v8 = vpop.f32.mrb[4].mxu1  ;;  %v4474_v9 = vpop.f32.mrb[6].mxu0 }
 0x237   :  { %v4480_v10 = vadd.f32 %v12428_v4, %v4478_v6  ;;  %v9789_v11 = vpop.f32.mrb[5].mxu1  ;;  %v4479_v12 = vadd.f32 %v4474_v9, %v4404_v2  ;;  %v9778_v13 = vpop.f32.mrb[7].mxu0 }
 0x238   :  { %v4538_v14 = vpop.f32.mrb[6].mxu1 }
 0x239   :  { %v4481_v15 = vadd.f32 %v12428_v4, %v4479_v12  ;;  %v9790_v16 = vpop.f32.mrb[7].mxu1  ;;  %v4482_v17 = vmax.f32 %v4480_v10, 0.0 }
 0x23b   :  { %v4483_v18 = vmax.f32 %v4481_v15, 0.0 }
 0x23d   :  { %v4484_v19 = vadd.f32 %v4483_v18, %v4482_v17 }
 0x23f   :  { %v4485_v25 = vrot.slane %v4484_v19, 4 }
 0x241   :  { %v4486_v41 = vadd.f32 %v4485_v25, %v4484_v19 }
 0x243   :  { %v4487_v46 = vrot.slane %v4486_v41, 2 }
 0x244   :  { %v4579_v20 = vpop.f32.mrb[8].mxu0 }
 0x245   :  { %v4580_v21 = vadd.f32 %v4579_v20, %v4535_v8  ;;  %v9801_v22 = vpop.f32.mrb[9].mxu0  ;;  %v4488_v53 = vadd.f32 %v4487_v46, %v4486_v41 }
 0x246   :  { %v4626_v23 = vpop.f32.mrb[8].mxu1  ;;  %v4582_v24 = vpop.f32.mrb[10].mxu0 }
 0x247   :  { %v4633_v26 = vadd.f32 %v4626_v23, %v4580_v21  ;;  %v9813_v27 = vpop.f32.mrb[9].mxu1  ;;  %v4583_v28 = vadd.f32 %v4582_v24, %v4538_v14  ;;  %v9802_v29 = vpop.f32.mrb[11].mxu0  ;;  %v4489_v59 = vrot.slane %v4488_v53, 1 }
 0x248   :  { %v4629_v30 = vpop.f32.mrb[10].mxu1 }
 0x249   :  { %v4635_v31 = vadd.f32 %v12428_v4, %v4633_v26  ;;  %v4634_v32 = vadd.f32 %v4629_v30, %v4583_v28  ;;  %v9814_v39 = vpop.f32.mrb[11].mxu1  ;;  %v4490_v51 = vadd.f32 %v4489_v59, %v4488_v53 }
 0x24b   :  { %v4636_v42 = vadd.f32 %v12428_v4, %v4634_v32  ;;  %v4637_v43 = vmax.f32 %v4635_v31, 0.0 }
 0x24d   :  { %v4638_v45 = vmax.f32 %v4636_v42, 0.0 }
 0x24f   :  { %v4639_v48 = vadd.f32 %v4638_v45, %v4637_v43 }
 0x251   :  { %v4640_v50 = vrot.slane %v4639_v48, 4 }
 0x253   :  { %v4641_v54 = vadd.f32 %v4640_v50, %v4639_v48 }
 0x254   :  { %v4690_v55 = vpop.f32.mrb[12].mxu0 }
 0x255   :  { %v4642_v56 = vrot.slane %v4641_v54, 2  ;;  %v9825_v57 = vpop.f32.mrb[13].mxu0 }
 0x256   :  { %v4734_v33 = vpop.f32.mrb[12].mxu1  ;;  %v4693_v36 = vpop.f32.mrb[14].mxu0 }
 0x257   :  { %v4643_v60 = vadd.f32 %v4642_v56, %v4641_v54  ;;  %v4735_v61 = vadd.f32 %v4734_v33, %v4690_v55  ;;  %v9837_v35 = vpop.f32.mrb[13].mxu1  ;;  %v9826_v38 = vpop.f32.mrb[15].mxu0 }
 0x258   :  { %v4737_v37 = vpop.f32.mrb[14].mxu1 }
 0x259   :  { %v4644_v40 = vrot.slane %v4643_v60, 1  ;;  %v4738_v44 = vadd.f32 %v4737_v37, %v4693_v36  ;;  %v9838_v49 = vpop.f32.mrb[15].mxu1 }
 0x25b   :  { %v4645_v52 = vadd.f32 %v4644_v40, %v4643_v60 }
 0x25d   :  { %v5577_v47 = vsel %vm5576_vm3, %v4490_v51, %v4645_v52 }
 0x264   :  { %v4781_v62 = vpop.f32.mrb[16].mxu0 }
 0x265   :  { %v4788_v63 = vadd.f32 %v4781_v62, %v4735_v61  ;;  %v9849_v0 = vpop.f32.mrb[17].mxu0 }
 0x266   :  { %v4845_v1 = vpop.f32.mrb[16].mxu1  ;;  %v4784_v58 = vpop.f32.mrb[18].mxu0 }
 0x267   :  { %v4790_v2 = vadd.f32 %v12428_v4, %v4788_v63  ;;  %v9861_v3 = vpop.f32.mrb[17].mxu1  ;;  %v4789_v5 = vadd.f32 %v4784_v58, %v4738_v44  ;;  %v9850_v6 = vpop.f32.mrb[19].mxu0 }
 0x268   :  { %v4848_v7 = vpop.f32.mrb[18].mxu1 }
 0x269   :  { %v4791_v8 = vadd.f32 %v12428_v4, %v4789_v5  ;;  %v9862_v9 = vpop.f32.mrb[19].mxu1  ;;  %v4792_v10 = vmax.f32 %v4790_v2, 0.0 }
 0x26b   :  { %v4793_v11 = vmax.f32 %v4791_v8, 0.0 }
 0x26d   :  { %v4794_v12 = vadd.f32 %v4793_v11, %v4792_v10 }
 0x26f   :  { %v4795_v13 = vrot.slane %v4794_v12, 4 }
 0x271   :  { %v4796_v14 = vadd.f32 %v4795_v13, %v4794_v12 }
 0x273   :  { %v4797_v15 = vrot.slane %v4796_v14, 2 }
 0x274   :  { %v4889_v16 = vpop.f32.mrb[20].mxu0 }
 0x275   :  { %v4798_v17 = vadd.f32 %v4797_v15, %v4796_v14  ;;  %v4890_v18 = vadd.f32 %v4889_v16, %v4845_v1  ;;  %v9873_v19 = vpop.f32.mrb[21].mxu0 }
 0x276   :  { %v4936_v20 = vpop.f32.mrb[20].mxu1  ;;  %v4892_v21 = vpop.f32.mrb[22].mxu0 }
 0x277   :  { %v4799_v22 = vrot.slane %v4798_v17, 1  ;;  %v4943_v23 = vadd.f32 %v4936_v20, %v4890_v18  ;;  %v9885_v24 = vpop.f32.mrb[21].mxu1  ;;  %v4893_v25 = vadd.f32 %v4892_v21, %v4848_v7  ;;  %v9874_v26 = vpop.f32.mrb[23].mxu0 }
 0x278   :  { %v4939_v27 = vpop.f32.mrb[22].mxu1 }
 0x279   :  { %v4800_v28 = vadd.f32 %v4799_v22, %v4798_v17  ;;  %v4945_v29 = vadd.f32 %v12428_v4, %v4943_v23  ;;  %v4944_v30 = vadd.f32 %v4939_v27, %v4893_v25  ;;  %v9886_v31 = vpop.f32.mrb[23].mxu1 }
 0x27b   :  { %v5579_v32 = vsel %vm5578_vm4, %v5577_v47, %v4800_v28  ;;  %v4946_v39 = vadd.f32 %v12428_v4, %v4944_v30  ;;  %v4947_v41 = vmax.f32 %v4945_v29, 0.0 }
 0x27d   :  { %v4948_v42 = vmax.f32 %v4946_v39, 0.0 }
 0x27f   :  { %v4949_v43 = vadd.f32 %v4948_v42, %v4947_v41 }
 0x281   :  { %v4950_v45 = vrot.slane %v4949_v43, 4 }
 0x283   :  { %v4951_v46 = vadd.f32 %v4950_v45, %v4949_v43 }
 0x284   :  { %v5000_v48 = vpop.f32.mrb[24].mxu0 }
 0x285   :  { %v4952_v50 = vrot.slane %v4951_v46, 2  ;;  %v9897_v53 = vpop.f32.mrb[25].mxu0 }
 0x286   :  { %v5044_v54 = vpop.f32.mrb[24].mxu1  ;;  %v5003_v55 = vpop.f32.mrb[26].mxu0 }
 0x287   :  { %v4953_v56 = vadd.f32 %v4952_v50, %v4951_v46  ;;  %v5045_v57 = vadd.f32 %v5044_v54, %v5000_v48  ;;  %v9909_v33 = vpop.f32.mrb[25].mxu1  ;;  %v9898_v36 = vpop.f32.mrb[27].mxu0 }
 0x288   :  { %v5047_v59 = vpop.f32.mrb[26].mxu1 }
 0x289   :  { %v4954_v60 = vrot.slane %v4953_v56, 1  ;;  %v5048_v61 = vadd.f32 %v5047_v59, %v5003_v55  ;;  %v9910_v35 = vpop.f32.mrb[27].mxu1 }
 0x28b   :  { %v4955_v38 = vadd.f32 %v4954_v60, %v4953_v56 }
 0x28d   :  { %v5580_v37 = vsel %vm4294_vm1, %v5579_v32, %v4955_v38 }
 0x294   :  { %v5091_v40 = vpop.f32.mrb[28].mxu0 }
 0x295   :  { %v5098_v44 = vadd.f32 %v5091_v40, %v5045_v57  ;;  %v9921_v49 = vpop.f32.mrb[29].mxu0 }
 0x296   :  { %v5155_v51 = vpop.f32.mrb[28].mxu1  ;;  %v5094_v52 = vpop.f32.mrb[30].mxu0 }
 0x297   :  { %v5100_v47 = vadd.f32 %v12428_v4, %v5098_v44  ;;  %v9933_v62 = vpop.f32.mrb[29].mxu1  ;;  %v5099_v63 = vadd.f32 %v5094_v52, %v5048_v61  ;;  %v9922_v0 = vpop.f32.mrb[31].mxu0 }
 0x298   :  { %v5158_v1 = vpop.f32.mrb[30].mxu1 }
 0x299   :  { %v5101_v58 = vadd.f32 %v12428_v4, %v5099_v63  ;;  %v9934_v2 = vpop.f32.mrb[31].mxu1  ;;  %v5102_v3 = vmax.f32 %v5100_v47, 0.0 }
 0x29b   :  { %v5103_v5 = vmax.f32 %v5101_v58, 0.0 }
 0x29d   :  { %v5104_v6 = vadd.f32 %v5103_v5, %v5102_v3 }
 0x29f   :  { %v5105_v7 = vrot.slane %v5104_v6, 4 }
 0x2a1   :  { %v5106_v8 = vadd.f32 %v5105_v7, %v5104_v6 }
 0x2a3   :  { %v5107_v9 = vrot.slane %v5106_v8, 2 }
 0x2a4   :  { %v5199_v10 = vpop.f32.mrb[32].mxu0 }
 0x2a5   :  { %v5108_v11 = vadd.f32 %v5107_v9, %v5106_v8  ;;  %v5200_v12 = vadd.f32 %v5199_v10, %v5155_v51  ;;  %v9945_v13 = vpop.f32.mrb[33].mxu0 }
 0x2a6   :  { %v5246_v14 = vpop.f32.mrb[32].mxu1  ;;  %v5202_v15 = vpop.f32.mrb[34].mxu0 }
 0x2a7   :  { %v5109_v16 = vrot.slane %v5108_v11, 1  ;;  %v5253_v17 = vadd.f32 %v5246_v14, %v5200_v12  ;;  %v9957_v18 = vpop.f32.mrb[33].mxu1  ;;  %v5203_v19 = vadd.f32 %v5202_v15, %v5158_v1  ;;  %v9946_v20 = vpop.f32.mrb[35].mxu0 }
 0x2a8   :  { %v5249_v21 = vpop.f32.mrb[34].mxu1 }
 0x2a9   :  { %v5110_v22 = vadd.f32 %v5109_v16, %v5108_v11  ;;  %v5255_v23 = vadd.f32 %v12428_v4, %v5253_v17  ;;  %v5254_v24 = vadd.f32 %v5249_v21, %v5203_v19  ;;  %v9958_v25 = vpop.f32.mrb[35].mxu1 }
 0x2ab   :  { %v5582_v26 = vsel %vm5581_vm5, %v5580_v37, %v5110_v22  ;;  %v5256_v27 = vadd.f32 %v12428_v4, %v5254_v24  ;;  %v5257_v28 = vmax.f32 %v5255_v23, 0.0 }
 0x2ad   :  { %v5258_v29 = vmax.f32 %v5256_v27, 0.0 }
 0x2af   :  { %v5259_v30 = vadd.f32 %v5258_v29, %v5257_v28 }
 0x2b1   :  { %v5260_v31 = vrot.slane %v5259_v30, 4 }
 0x2b3   :  { %v5261_v32 = vadd.f32 %v5260_v31, %v5259_v30 }
 0x2b4   :  { %v5310_v39 = vpop.f32.mrb[36].mxu0 }
 0x2b5   :  { %v5262_v41 = vrot.slane %v5261_v32, 2  ;;  %v9969_v42 = vpop.f32.mrb[37].mxu0 }
 0x2b6   :  { %v5354_v43 = vpop.f32.mrb[36].mxu1  ;;  %v5313_v45 = vpop.f32.mrb[38].mxu0 }
 0x2b7   :  { %v5263_v46 = vadd.f32 %v5262_v41, %v5261_v32  ;;  %v5355_v48 = vadd.f32 %v5354_v43, %v5310_v39  ;;  %v9981_v50 = vpop.f32.mrb[37].mxu1  ;;  %v9970_v53 = vpop.f32.mrb[39].mxu0 }
 0x2b8   :  { %v5357_v54 = vpop.f32.mrb[38].mxu1 }
 0x2b9   :  { %v5264_v55 = vrot.slane %v5263_v46, 1  ;;  %v5358_v56 = vadd.f32 %v5357_v54, %v5313_v45  ;;  %v9982_v57 = vpop.f32.mrb[39].mxu1 }
 0x2bb   :  { %v5265_v33 = vadd.f32 %v5264_v55, %v5263_v46 }
 0x2bd   :  { %v5584_v36 = vsel %vm5583_vm6, %v5582_v26, %v5265_v33 }
 0x2c4   :  { %v5401_v59 = vpop.f32.mrb[40].mxu0 }
 0x2c5   :  { %v5408_v60 = vadd.f32 %v5401_v59, %v5355_v48  ;;  %v9993_v61 = vpop.f32.mrb[41].mxu0 }
 0x2c6   :  { %v5465_v35 = vpop.f32.mrb[40].mxu1  ;;  %v5404_v38 = vpop.f32.mrb[42].mxu0 }
 0x2c7   :  { %v5410_v37 = vadd.f32 %v12428_v4, %v5408_v60  ;;  %v10005_v40 = vpop.f32.mrb[41].mxu1  ;;  %v5409_v44 = vadd.f32 %v5404_v38, %v5358_v56  ;;  %v9994_v49 = vpop.f32.mrb[43].mxu0 }
 0x2c8   :  { %v5468_v51 = vpop.f32.mrb[42].mxu1 }
 0x2c9   :  { %v5411_v52 = vadd.f32 %v12428_v4, %v5409_v44  ;;  %v10006_v47 = vpop.f32.mrb[43].mxu1  ;;  %v5412_v62 = vmax.f32 %v5410_v37, 0.0 }
 0x2cb   :  { %v5413_v63 = vmax.f32 %v5411_v52, 0.0 }
 0x2cd   :  { %v5414_v0 = vadd.f32 %v5413_v63, %v5412_v62 }
 0x2cf   :  { %v5415_v1 = vrot.slane %v5414_v0, 4 }
 0x2d1   :  { %v5416_v58 = vadd.f32 %v5415_v1, %v5414_v0 }
 0x2d3   :  { %v5417_v2 = vrot.slane %v5416_v58, 2 }
 0x2d4   :  { %v5509_v3 = vpop.f32.mrb[44].mxu0 }
 0x2d5   :  { %v5418_v5 = vadd.f32 %v5417_v2, %v5416_v58  ;;  %v5510_v6 = vadd.f32 %v5509_v3, %v5465_v35  ;;  %v10017_v7 = vpop.f32.mrb[45].mxu0  ;;  %v10412_v2 = vmov 0   ;;  %v10117_v3 = vld [vmem:[%s13306_s6] ss:$8 sps:$4 sm:$0xff]  }
 0x2d6   :  { %v5556_v8 = vpop.f32.mrb[44].mxu1  ;;  %v5512_v9 = vpop.f32.mrb[46].mxu0  ;;  %v10120_v7 = vld [vmem:[%s13306_s6 + $0x10] ss:$8 sps:$4 sm:$0xff]  }
 0x2d7   :  { %v5419_v10 = vrot.slane %v5418_v5, 1  ;;  %v5563_v11 = vadd.f32 %v5556_v8, %v5510_v6  ;;  %v10029_v12 = vpop.f32.mrb[45].mxu1  ;;  %v5513_v13 = vadd.f32 %v5512_v9, %v5468_v51  ;;  %v10018_v14 = vpop.f32.mrb[47].mxu0  ;;  %v10122_v6 = vld [vmem:[%s13306_s6 + $0x14] ss:$8 sps:$4 sm:$0xff]  }
 0x2d8   :  { %v5559_v15 = vpop.f32.mrb[46].mxu1  ;;  %v10125_v8 = vld [vmem:[%s13306_s6 + $0x24] ss:$8 sps:$4 sm:$0xff]   ;;  %v10123_v9 = vld [vmem:[%s13306_s6 + $0x20] ss:$8 sps:$4 sm:$0xff]   ;;  %v5708_v12 = vlaneseq }
 0x2d9   :  { %v5420_v16 = vadd.f32 %v5419_v10, %v5418_v5  ;;  %v5565_v17 = vadd.f32 %v12428_v4, %v5563_v11  ;;  %v5564_v18 = vadd.f32 %v5559_v15, %v5513_v13  ;;  %v10030_v19 = vpop.f32.mrb[47].mxu1  ;;  %v10119_v5 = vld [vmem:[%s13306_s6 + $0x4] ss:$8 sps:$4 sm:$0xff]   ;;  %v10128_v10 = vld [vmem:[%s13306_s6 + $0x34] ss:$8 sps:$4 sm:$0xff]  }
 0x2da   :  { %v10126_v11 = vld [vmem:[%s13306_s6 + $0x30] ss:$8 sps:$4 sm:$0xff]   ;;  %v12480_v13 = vshrl.u32 %v5708_v12, 7  ;;  %v5711_v14 = vand.u32 127, %v5708_v12  ;;  %vm12849_vm14 = vcmp.lt.s32.totalorder %v5708_v12, 32  ;;  %vm7172_vm15 = vcmp.ge.s32.totalorder %v5708_v12, 96 }
 0x2db   :  { %v5586_v20 = vsel %vm5585_vm7, %v5584_v36, %v5420_v16  ;;  %v5566_v21 = vadd.f32 %v12428_v4, %v5564_v18  ;;  %v5567_v22 = vmax.f32 %v5565_v17, 0.0  ;;  %v5652_v4 = vld [vmem:[%s13303_s3] sm:$0xf]  ;;  %vm7277_vm1 = vcmp.ge.s32.totalorder %v5708_v12, 32 }
 0x2dc   :  { %v5665_v32 = vsel %vm5581_vm5, %v5652_v4, 0  ;;  %v5712_v15 = vadd.s32 %v5711_v14, %v12480_v13  ;;  %v9377_v16 = vld [vmem:[%s13304_s4] ss:$0 sm:$0xff]  ;;  %vm7278_vm2 = vcmp.lt.s32.totalorder %v5708_v12, 64  ;;  %vm7274_vm6 = vcmp.lt.s32.totalorder %v5708_v12, 96 }
 0x2dd   :  { %v5568_v23 = vmax.f32 %v5566_v21, 0.0  ;;  %10032 = vmatpush3.bf16.msra.mxu0 %v5665_v32  ;;  %v10111_v4 = vld [vmem:[%s13305_s5 + $0x20] ss:$8 sps:$4 sm:$0xff]   ;;  %v10116_v32 = vld [vmem:[%s13305_s5 + $0x34] ss:$8 sps:$4 sm:$0xff]   ;;  %vm12983_vm4 = vmand %vm7277_vm1, %vm7278_vm2 }
 0x2de   :  { %5825 = vmatprep.subr.bf16.mxu0 %v10119_v5  ;;  %vm5713_vm10 = vcmp.eq.s32.totalorder %v5712_v15, 7 }
 0x2df   :  { %v5569_v24 = vadd.f32 %v5568_v23, %v5567_v22  ;;  %v9379_v23 = vsel %vm5713_vm10, 1.0, %v10395_v34 }
 0x2e1   :  { %v5570_v25 = vrot.slane %v5569_v24, 4 }
 0x2e3   :  { %v5571_v26 = vadd.f32 %v5570_v25, %v5569_v24  ;;  %v10107_v25 = vld [vmem:[%s13305_s5 + $0x4] ss:$8 sps:$4 sm:$0xff]  }
 0x2e5   :  { %v5572_v27 = vrot.slane %v5571_v26, 2 }
 0x2e7   :  { %v5573_v28 = vadd.f32 %v5572_v27, %v5571_v26  ;;  %v12492_v27 = vpack.c.bf16 %v9379_v23, %v9379_v23 }
 0x2e9   :  { %v5574_v29 = vrot.slane %v5573_v28, 1 }
 0x2eb   :  { %v5575_v30 = vadd.f32 %v5574_v29, %v5573_v28  ;;  %v10105_v28 = vld [vmem:[%s13305_s5] ss:$8 sps:$4 sm:$0xff]   ;;  %v10110_v29 = vld [vmem:[%s13305_s5 + $0x14] ss:$8 sps:$4 sm:$0xff]  }
 0x2ed   :  { %v5588_v31 = vsel %vm5587_vm8, %v5586_v20, %v5575_v30  ;;  %v10108_v30 = vld [vmem:[%s13305_s5 + $0x10] ss:$8 sps:$4 sm:$0xff]  }
 0x2ee   :  { %5598 = vrot.lane.b32.xlu1 %v5588_v31, %s10397_s2  ;;  %5590 = vrot.lane.b32.xlu0 %v5588_v31, %s10398_s29 }
 0x2f2   :  { %5602 = vrot.lane.b32.xlu1 %v5588_v31, %s10399_s13  ;;  %5594 = vrot.lane.b32.xlu0 %v5588_v31, %s10400_s30 }
 0x2f6   :  { %5610 = vrot.lane.b32.xlu1 %v5588_v31, %s10401_s18  ;;  %5606 = vrot.lane.b32.xlu0 %v5588_v31, %s10402_s19 }
 0x2fa   :  { %5618 = vrot.lane.b32.xlu1 %v5588_v31, %s10403_s1  ;;  %5614 = vrot.lane.b32.xlu0 %v5588_v31, %s10404_s20 }
 0x2fe   :  { %5626 = vrot.lane.b32.xlu1 %v5588_v31, %s10405_s21  ;;  %5622 = vrot.lane.b32.xlu0 %v5588_v31, %s10406_s28 }
 0x302   :  { %5634 = vrot.lane.b32.xlu1 %v5588_v31, %s10407_s22  ;;  %5630 = vrot.lane.b32.xlu0 %v5588_v31, %s10408_s23 }
 0x306   :  { %5642 = vrot.lane.b32.xlu1 %v5588_v31, %s10409_s26  ;;  %5638 = vrot.lane.b32.xlu0 %v5588_v31, %s10410_s0 }
 0x30a   :  { %5646 = vrot.lane.b32.xlu0 %v5588_v31, %s10411_s27 }
 0x360   :  { %v5599_v39 = vpop.permute.xlu1 %5598  ;;  %v5591_v41 = vpop.permute.xlu0 %5590 }
 0x361   :  { %v5593_v42 = vadd.f32 %v5591_v41, %v5588_v31  ;;  %v10113_v31 = vld [vmem:[%s13305_s5 + $0x24] ss:$8 sps:$4 sm:$0xff]  }
 0x362   :  { %v12523_v41 = vld [vmem:[%s13307_s7 + $0x4] ss:$8 sps:$4 sm:$0xff]  }
 0x364   :  { %v5603_v43 = vpop.permute.xlu1 %5602  ;;  %v5595_v45 = vpop.permute.xlu0 %5594 }
 0x365   :  { %v5597_v46 = vadd.f32 %v5595_v45, %v5593_v42  ;;  %v12528_v42 = vld [vmem:[%s13307_s7] ss:$8 sps:$4 sm:$0xff]   ;;  %v12542_v45 = vld [vmem:[%s13307_s7 + $0x10] ss:$8 sps:$4 sm:$0xff]  }
 0x367   :  { %v5601_v48 = vadd.f32 %v5599_v39, %v5597_v46  ;;  %v10114_v39 = vld [vmem:[%s13305_s5 + $0x30] ss:$8 sps:$4 sm:$0xff]   ;;  %v12547_v46 = vld [vmem:[%s13307_s7 + $0x24] ss:$8 sps:$4 sm:$0xff]  }
 0x368   :  { %v5611_v50 = vpop.permute.xlu1 %5610  ;;  %v5607_v53 = vpop.permute.xlu0 %5606 }
 0x369   :  { %v5605_v54 = vadd.f32 %v5603_v43, %v5601_v48  ;;  %v12534_v43 = vld [vmem:[%s13307_s7 + $0x14] ss:$8 sps:$4 sm:$0xff]   ;;  %v12554_v48 = vld [vmem:[%s13307_s7 + $0x20] ss:$8 sps:$4 sm:$0xff]  }
 0x36b   :  { %v5609_v55 = vadd.f32 %v5607_v53, %v5605_v54  ;;  %v12566_v53 = vld [vmem:[%s13307_s7 + $0x30] ss:$8 sps:$4 sm:$0xff]  }
 0x36c   :  { %v5619_v56 = vpop.permute.xlu1 %5618  ;;  %v5615_v57 = vpop.permute.xlu0 %5614 }
 0x36d   :  { %v5613_v33 = vadd.f32 %v5611_v50, %v5609_v55  ;;  %v12559_v50 = vld [vmem:[%s13307_s7 + $0x34] ss:$8 sps:$4 sm:$0xff]  }
 0x36f   :  { %v5617_v36 = vadd.f32 %v5615_v57, %v5613_v33 }
 0x370   :  { %v5627_v59 = vpop.permute.xlu1 %5626  ;;  %v5623_v60 = vpop.permute.xlu0 %5622 }
 0x371   :  { %v5621_v61 = vadd.f32 %v5619_v56, %v5617_v36 }
 0x373   :  { %v5625_v35 = vadd.f32 %v5623_v60, %v5621_v61 }
 0x374   :  { %v5631_v38 = vpop.permute.xlu0 %5630  ;;  %v5635_v40 = vpop.permute.xlu1 %5634 }
 0x375   :  { %v5629_v37 = vadd.f32 %v5627_v59, %v5625_v35  ;;  %v12591_v35 = vsub.s32 0, %v12480_v13 }
 0x377   :  { %v5633_v44 = vadd.f32 %v5631_v38, %v5629_v37  ;;  %v5949_v38 = vld [vmem:[%s13308_s8] sm:$0x3]  ;;  %v12597_v37 = vsub.s32 1, %v12480_v13 }
 0x378   :  { %v5639_v49 = vpop.permute.xlu0 %5638  ;;  %v5643_v47 = vpop.permute.xlu1 %5642 }
 0x379   :  { %v5637_v51 = vadd.f32 %v5635_v40, %v5633_v44  ;;  %v5954_v40 = vrot.slane %v5949_v38, %v12591_v35 }
 0x37b   :  { %v5641_v52 = vadd.f32 %v5639_v49, %v5637_v51  ;;  %v5958_v49 = vrot.slane %v5949_v38, %v12597_v37 }
 0x37c   :  { %v5647_v63 = vpop.permute.xlu0 %5646 }
 0x37d   :  { %v5645_v62 = vadd.f32 %v5643_v47, %v5641_v52 }
 0x37f   :  { %v5649_v0 = vadd.f32 %v5647_v63, %v5645_v62 }
 0x381   :  { %v5650_v1 = vmul.f32 0.00390625, %v5649_v0 }
 0x383   :  { %v5651_v58 = vpack.c.bf16 %v5650_v1, %v5650_v1 }
 0x385   :  { %10034 = vmatmul.mubr.msk.bf16.vlgmr.msra.gmra.mrb[48].mxu0 %vm5660_vm9, %v5651_v58  ;;  %v10413_v58 = vmov 1966171168  }
 0x386   :  { %5857 = vmatprep.mubr.bf16.mxu0 %v10412_v2  ;;  %5826 = vmatpush1.bf16.msra.mxu0 %v10117_v3  ;;  %v6062_v3 = vunpack.c.l.s4 %v10413_v58 }
 0x387   :  { %5827 = vmatprep.subr.bf16.mxu0 %v10122_v6 }
 0x388   :  { %v6063_v5 = vunpack.c.0.s8 %v6062_v3 }
 0x38a   :  { %5828 = vmatpush1.bf16.msra.mxu0 %v10120_v7  ;;  %v12602_v6 = vsub.s32 %v6063_v5, %v12480_v13 }
 0x38b   :  { %5829 = vmatprep.subr.bf16.mxu0 %v10125_v8 }
 0x38e   :  { %5830 = vmatpush1.bf16.msra.mxu0 %v10123_v9 }
 0x38f   :  { %5831 = vmatprep.subr.bf16.mxu0 %v10128_v10 }
 0x392   :  { %5832 = vmatpush1.bf16.msra.mxu0 %v10126_v11 }
 0x393   :  { %6017 = vmatprep.subr.bf16.mxu0 %v12523_v41 }
 0x458   :  { %v5701_v17 = vpop.f32.mrb[48].mxu0 }
 0x459   :  { %v5702_v18 = vadd.f32 %v9377_v16, %v5701_v17  ;;  %v10035_v19 = vpop.f32.mrb[49].mxu0 }
 0x45a   :  { %v5704_v20 = vpop.f32.mrb[50].mxu0 }
 0x45b   :  { %v5707_v21 = vmax.f32 %v5702_v18, 0.0  ;;  %v10036_v22 = vpop.f32.mrb[51].mxu0 }
 0x45d   :  { %v5717_v24 = vpack.c.bf16 %v5707_v21, %v5707_v21 }
 0x45f   :  { %v5722_v26 = vsel %vm5581_vm5, %v5717_v24, 0 }
 0x460   :  { %10038 = vmatpush3.bf16.msra.mxu1 %v5722_v26 }
 0x461   :  { %5908 = vmatprep.subr.bf16.mxu1 %v10107_v25 }
 0x463   :  { %10040 = vmatmul.mubr.msk.bf16.vlgmr.msra.gmra.mrb[48].mxu1 %vm5660_vm9, %v12492_v27 }
 0x464   :  { %5909 = vmatpush1.bf16.msra.mxu1 %v10105_v28  ;;  %5940 = vmatprep.mubr.bf16.mxu1 %v10412_v2 }
 0x465   :  { %5910 = vmatprep.subr.bf16.mxu1 %v10110_v29 }
 0x468   :  { %5911 = vmatpush1.bf16.msra.mxu1 %v10108_v30 }
 0x469   :  { %5912 = vmatprep.subr.bf16.mxu1 %v10113_v31 }
 0x46c   :  { %5913 = vmatpush1.bf16.msra.mxu1 %v10111_v4 }
 0x46d   :  { %5914 = vmatprep.subr.bf16.mxu1 %v10116_v32 }
 0x470   :  { %5915 = vmatpush1.bf16.msra.mxu1 %v10114_v39 }
 0x471   :  { %6115 = vmatprep.subr.bf16.mxu1 %v12523_v41 }
 0x473   :  { %9398 = vmatmul.mubr.msk.bf16.vlgmr.msra.gmra.mrb[52].mxu1 %vm5821_vm11, %v5717_v24 }
 0x474   :  { %6147 = vmatprep.mubr.bf16.mxu1 %v10412_v2  ;;  %6116 = vmatpush1.bf16.msra.mxu1 %v12528_v42 }
 0x475   :  { %6117 = vmatprep.subr.bf16.mxu1 %v12534_v43 }
 0x478   :  { %6118 = vmatpush1.bf16.msra.mxu1 %v12542_v45 }
 0x479   :  { %6119 = vmatprep.subr.bf16.mxu1 %v12547_v46 }
 0x47c   :  { %6120 = vmatpush1.bf16.msra.mxu1 %v12554_v48 }
 0x47d   :  { %6121 = vmatprep.subr.bf16.mxu1 %v12559_v50 }
 0x480   :  { %6122 = vmatpush1.bf16.msra.mxu1 %v12566_v53 }
 0x481   :  { %6307 = vmatprep.subr.bf16.mxu1 %v12523_v41 }
 0x536   :  { %v5758_v54 = vpop.f32.mrb[48].mxu1 }
 0x537   :  { %v5764_v55 = vpack.c.bf16 %v5758_v54, %v5758_v54  ;;  %v10041_v56 = vpop.f32.mrb[49].mxu1 }
 0x538   :  { %v5761_v57 = vpop.f32.mrb[50].mxu1 }
 0x539   :  { %v10042_v33 = vpop.f32.mrb[51].mxu1  ;;  %9389 = vmatmul.mubr.msk.bf16.vlgmr.msra.gmra.mrb[52].mxu0 %vm5821_vm11, %v5764_v55 }
 0x53a   :  { %6018 = vmatpush1.bf16.msra.mxu0 %v12528_v42  ;;  %6049 = vmatprep.mubr.bf16.mxu0 %v10412_v2 }
 0x53b   :  { %6019 = vmatprep.subr.bf16.mxu0 %v12534_v43 }
 0x53e   :  { %6020 = vmatpush1.bf16.msra.mxu0 %v12542_v45 }
 0x53f   :  { %6021 = vmatprep.subr.bf16.mxu0 %v12547_v46 }
 0x542   :  { %6022 = vmatpush1.bf16.msra.mxu0 %v12554_v48 }
 0x543   :  { %6023 = vmatprep.subr.bf16.mxu0 %v12559_v50 }
 0x546   :  { %6024 = vmatpush1.bf16.msra.mxu0 %v12566_v53  ;;  %v5942_v36 = vpop.f32.mrb[52].mxu1 }
 0x547   :  { %v5944_v59 = vpop.f32.mrb[53].mxu1  ;;  %6211 = vmatprep.subr.bf16.mxu0 %v12523_v41 }
 0x548   :  { %v5946_v60 = vpop.f32.mrb[54].mxu1 }
 0x549   :  { %6050 = vmatmul.mubr.bf16.vlgmr.msra.gmra.mrb[56].mxu0 %v10412_v2  ;;  %v5947_v61 = vpop.f32.mrb[55].mxu1 }
 0x54a   :  { %6212 = vmatpush1.bf16.msra.mxu0 %v12528_v42  ;;  %6243 = vmatprep.mubr.bf16.mxu0 %v10412_v2 }
 0x54b   :  { %6213 = vmatprep.subr.bf16.mxu0 %v12534_v43 }
 0x54e   :  { %6214 = vmatpush1.bf16.msra.mxu0 %v12542_v45 }
 0x54f   :  { %6215 = vmatprep.subr.bf16.mxu0 %v12547_v46 }
 0x552   :  { %6216 = vmatpush1.bf16.msra.mxu0 %v12554_v48 }
 0x553   :  { %6217 = vmatprep.subr.bf16.mxu0 %v12559_v50 }
 0x556   :  { %6218 = vmatpush1.bf16.msra.mxu0 %v12566_v53 }
 0x557   :  { %6403 = vmatprep.subr.bf16.mxu0 %v12523_v41 }
 0x60c   :  { %v5859_v44 = vpop.f32.mrb[52].mxu0 }
 0x60d   :  { %v5943_v51 = vadd.f32 %v5942_v36, %v5859_v44  ;;  %v5861_v52 = vpop.f32.mrb[53].mxu0 }
 0x60e   :  { %v5945_v47 = vadd.f32 %v5944_v59, %v5861_v52  ;;  %v5863_v62 = vpop.f32.mrb[54].mxu0 }
 0x60f   :  { %v5961_v63 = vadd.f32 %v5954_v40, %v5943_v51  ;;  %v5864_v0 = vpop.f32.mrb[55].mxu0 }
 0x610   :  { %v5962_v1 = vadd.f32 %v5958_v49, %v5945_v47 }
 0x611   :  { %5963 = vst [vmem:[#allocation2] sm:$0xff] %v5961_v63 }
 0x612   :  { %5964 = vst [vmem:[#allocation2 + $0x8] sm:$0xff] %v5962_v1 }
 0x619   :  { %v5973_v16 = vld [vmem:[#allocation2] ss:$8 sm:$0x3]  ;;  %v6110_v60 = vld [vmem:[#allocation2 + $0x1] ss:$8 sm:$0x3] }
 0x61c   :  { %v6051_v7 = vpop.f32.mrb[56].mxu0 }
 0x61d   :  { %v6053_v8 = vpop.f32.mrb[57].mxu0 }
 0x61e   :  { %v6060_v9 = vcombine.low %v6051_v7, %v6053_v8  ;;  %v6055_v10 = vpop.f32.mrb[58].mxu0 }
 0x61f   :  { %v6056_v11 = vpop.f32.mrb[59].mxu0 }
 0x620   :  { %v6067_v14 = vrot.slane %v6060_v9, %v12602_v6 }
 0x622   :  { %v6074_v15 = vrot.slane %v6067_v14, %v12602_v6 }
 0x624   :  { %v6076_v17 = vadd.f32 %v6074_v15, %v5973_v16 }
 0x626   :  { %6084 = vrot.lane.b32.xlu1 %v6076_v17, %s10403_s1  ;;  %v9407_v18 = vmul.f32 -1.442695, %v6076_v17 }
 0x628   :  { %10177 = vpow2.f32 %v9407_v18  ;;  %v6206_v18 = vld [vmem:[#allocation2 + $0x2] ss:$8 sm:$0x3] }
 0x632   :  { %v10178_v19 = vpop.eup %10177 }
 0x633   :  { %v6080_v20 = vadd.f32 1.0, %v10178_v19 }
 0x635   :  { %10179 = vrcp.f32 %v6080_v20 }
 0x63f   :  { %v10180_v23 = vpop.eup %10179 }
 0x640   :  { %v6089_v26 = vmul.f32 0.0, %v10180_v23  ;;  %v6098_v31 = vrot.slane %v10180_v23, 1 }
 0x698   :  { %v6085_v21 = vpop.permute.xlu1 %6084 }
 0x699   :  { %v6086_v22 = vrot.slane %v6085_v21, 1 }
 0x69b   :  { %10181 = vtanh.f32 %v6086_v22 }
 0x6a5   :  { %v10182_v24 = vpop.eup %10181 }
 0x6a6   :  { %v6090_v25 = vmul.f32 %v10182_v24, %v10180_v23 }
 0x6a8   :  { %6092 = vrot.lane.b32.xlu0 %v6090_v25, %s10403_s1 }
 0x71a   :  { %v6093_v28 = vpop.permute.xlu0 %6092 }
 0x71b   :  { %v6095_v29 = vadd.f32 %v6093_v28, %v6089_v26 }
 0x71d   :  { %10183 = vtanh.f32 %v6095_v29 }
 0x727   :  { %v10184_v30 = vpop.eup %10183 }
 0x728   :  { %6101 = vrot.lane.b32.xlu1 %v10184_v30, %s10403_s1 }
 0x79a   :  { %v6102_v4 = vpop.permute.xlu1 %6101 }
 0x79b   :  { %v6104_v32 = vmul.f32 %v6102_v4, %v6098_v31 }
 0x79d   :  { %6106 = vst.msk [vmem:[#allocation3] sm:$0x1] %vm6105_vm12, %v6104_v32  ;;  %v6111_v39 = vpack.c.bf16 %v6104_v32, %v6104_v32 }
 0x79e   :  { %6108 = vst.msk [vmem:[#allocation3 + $0x7] sm:$0x1] %vm6107_vm13, %v6104_v32 }
 0x79f   :  { %9408 = vmatmul.mubr.msk.bf16.vlgmr.msra.gmra.mrb[56].mxu1 %vm5821_vm11, %v6111_v39 }
 0x7a0   :  { %6308 = vmatpush1.bf16.msra.mxu1 %v12528_v42  ;;  %6339 = vmatprep.mubr.bf16.mxu1 %v10412_v2 }
 0x7a1   :  { %6309 = vmatprep.subr.bf16.mxu1 %v12534_v43 }
 0x7a4   :  { %6310 = vmatpush1.bf16.msra.mxu1 %v12542_v45 }
 0x7a5   :  { %6311 = vmatprep.subr.bf16.mxu1 %v12547_v46 }
 0x7a8   :  { %6312 = vmatpush1.bf16.msra.mxu1 %v12554_v48 }
 0x7a9   :  { %6313 = vmatprep.subr.bf16.mxu1 %v12559_v50 }
 0x7ac   :  { %6314 = vmatpush1.bf16.msra.mxu1 %v12566_v53 }
 0x7ad   :  { %6499 = vmatprep.subr.bf16.mxu1 %v12523_v41 }
 0x872   :  { %v6149_v54 = vpop.f32.mrb[56].mxu1 }
 0x873   :  { %v6151_v55 = vpop.f32.mrb[57].mxu1 }
 0x874   :  { %v6158_v56 = vcombine.low %v6149_v54, %v6151_v55  ;;  %v6153_v57 = vpop.f32.mrb[58].mxu1 }
 0x875   :  { %v6154_v33 = vpop.f32.mrb[59].mxu1 }
 0x876   :  { %v6165_v36 = vrot.slane %v6158_v56, %v12602_v6 }
 0x878   :  { %v6172_v59 = vrot.slane %v6165_v36, %v12602_v6 }
 0x87a   :  { %v6174_v61 = vadd.f32 %v6172_v59, %v6110_v60 }
 0x87c   :  { %6182 = vrot.lane.b32.xlu0 %v6174_v61, %s10403_s1  ;;  %v9409_v38 = vmul.f32 -1.442695, %v6174_v61 }
 0x87e   :  { %10185 = vpow2.f32 %v9409_v38  ;;  %v6302_v38 = vld [vmem:[#allocation2 + $0x3] ss:$8 sm:$0x3] }
 0x888   :  { %v10186_v40 = vpop.eup %10185 }
 0x889   :  { %v6178_v44 = vadd.f32 1.0, %v10186_v40 }
 0x88b   :  { %10187 = vrcp.f32 %v6178_v44 }
 0x895   :  { %v10188_v52 = vpop.eup %10187 }
 0x896   :  { %v6187_v63 = vmul.f32 %v10188_v52, %v6095_v29  ;;  %v6196_v3 = vrot.slane %v10188_v52, 1 }
 0x8ee   :  { %v6183_v49 = vpop.permute.xlu0 %6182 }
 0x8ef   :  { %v6184_v51 = vrot.slane %v6183_v49, 1 }
 0x8f1   :  { %10189 = vtanh.f32 %v6184_v51 }
 0x8fb   :  { %v10190_v47 = vpop.eup %10189 }
 0x8fc   :  { %v6188_v62 = vmul.f32 %v10190_v47, %v10188_v52 }
 0x8fe   :  { %6190 = vrot.lane.b32.xlu1 %v6188_v62, %s10403_s1 }
 0x970   :  { %v6191_v0 = vpop.permute.xlu1 %6190 }
 0x971   :  { %v6193_v1 = vadd.f32 %v6191_v0, %v6187_v63 }
 0x973   :  { %10191 = vtanh.f32 %v6193_v1 }
 0x97d   :  { %v10192_v58 = vpop.eup %10191 }
 0x97e   :  { %6199 = vrot.lane.b32.xlu0 %v10192_v58, %s10403_s1 }
 0x9f0   :  { %v6200_v5 = vpop.permute.xlu0 %6199 }
 0x9f1   :  { %v6202_v7 = vmul.f32 %v6200_v5, %v6196_v3 }
 0x9f3   :  { %6203 = vst.msk [vmem:[#allocation3 + $0x1] sm:$0x1] %vm6105_vm12, %v6202_v7  ;;  %v6207_v8 = vpack.c.bf16 %v6202_v7, %v6202_v7 }
 0x9f4   :  { %6204 = vst.msk [vmem:[#allocation3 + $0x6] sm:$0x1] %vm6107_vm13, %v6202_v7 }
 0x9f5   :  { %9410 = vmatmul.mubr.msk.bf16.vlgmr.msra.gmra.mrb[60].mxu0 %vm5821_vm11, %v6207_v8 }
 0x9f6   :  { %6404 = vmatpush1.bf16.msra.mxu0 %v12528_v42  ;;  %6435 = vmatprep.mubr.bf16.mxu0 %v10412_v2 }
 0x9f7   :  { %6405 = vmatprep.subr.bf16.mxu0 %v12534_v43 }
 0x9fa   :  { %6406 = vmatpush1.bf16.msra.mxu0 %v12542_v45 }
 0x9fb   :  { %6407 = vmatprep.subr.bf16.mxu0 %v12547_v46 }
 0x9fe   :  { %6408 = vmatpush1.bf16.msra.mxu0 %v12554_v48 }
 0x9ff   :  { %6409 = vmatprep.subr.bf16.mxu0 %v12559_v50 }
 0xa02   :  { %6410 = vmatpush1.bf16.msra.mxu0 %v12566_v53 }
 0xa03   :  { %6595 = vmatprep.subr.bf16.mxu0 %v12523_v41 }
 0xac8   :  { %v6245_v9 = vpop.f32.mrb[60].mxu0 }
 0xac9   :  { %v6247_v10 = vpop.f32.mrb[61].mxu0 }
 0xaca   :  { %v6254_v11 = vcombine.low %v6245_v9, %v6247_v10  ;;  %v6249_v14 = vpop.f32.mrb[62].mxu0 }
 0xacb   :  { %v6250_v15 = vpop.f32.mrb[63].mxu0 }
 0xacc   :  { %v6261_v16 = vrot.slane %v6254_v11, %v12602_v6 }
 0xace   :  { %v6268_v17 = vrot.slane %v6261_v16, %v12602_v6 }
 0xad0   :  { %v6270_v19 = vadd.f32 %v6268_v17, %v6206_v18 }
 0xad2   :  { %6278 = vrot.lane.b32.xlu1 %v6270_v19, %s10403_s1  ;;  %v9411_v20 = vmul.f32 -1.442695, %v6270_v19  ;;  %v6398_v19 = vld [vmem:[#allocation2 + $0x4] ss:$8 sm:$0x3] }
 0xad4   :  { %10193 = vpow2.f32 %v9411_v20 }
 0xade   :  { %v10194_v21 = vpop.eup %10193 }
 0xadf   :  { %v6274_v22 = vadd.f32 1.0, %v10194_v21 }
 0xae1   :  { %10195 = vrcp.f32 %v6274_v22 }
 0xaeb   :  { %v10196_v25 = vpop.eup %10195 }
 0xaec   :  { %v6283_v29 = vmul.f32 %v10196_v25, %v6193_v1  ;;  %v6292_v32 = vrot.slane %v10196_v25, 1 }
 0xb44   :  { %v6279_v23 = vpop.permute.xlu1 %6278 }
 0xb45   :  { %v6280_v24 = vrot.slane %v6279_v23, 1 }
 0xb47   :  { %10197 = vtanh.f32 %v6280_v24 }
 0xb51   :  { %v10198_v26 = vpop.eup %10197 }
 0xb52   :  { %v6284_v28 = vmul.f32 %v10198_v26, %v10196_v25 }
 0xb54   :  { %6286 = vrot.lane.b32.xlu0 %v6284_v28, %s10403_s1 }
 0xbc6   :  { %v6287_v30 = vpop.permute.xlu0 %6286 }
 0xbc7   :  { %v6289_v31 = vadd.f32 %v6287_v30, %v6283_v29 }
 0xbc9   :  { %10199 = vtanh.f32 %v6289_v31 }
 0xbd3   :  { %v10200_v4 = vpop.eup %10199 }
 0xbd4   :  { %6295 = vrot.lane.b32.xlu1 %v10200_v4, %s10403_s1 }
 0xc46   :  { %v6296_v39 = vpop.permute.xlu1 %6295 }
 0xc47   :  { %v6298_v54 = vmul.f32 %v6296_v39, %v6292_v32 }
 0xc49   :  { %6299 = vst.msk [vmem:[#allocation3 + $0x2] sm:$0x1] %vm6105_vm12, %v6298_v54  ;;  %v6303_v55 = vpack.c.bf16 %v6298_v54, %v6298_v54 }
 0xc4a   :  { %6300 = vst.msk [vmem:[#allocation3 + $0x5] sm:$0x1] %vm6107_vm13, %v6298_v54 }
 0xc4b   :  { %9412 = vmatmul.mubr.msk.bf16.vlgmr.msra.gmra.mrb[60].mxu1 %vm5821_vm11, %v6303_v55 }
 0xc4c   :  { %6500 = vmatpush1.bf16.msra.mxu1 %v12528_v42  ;;  %6531 = vmatprep.mubr.bf16.mxu1 %v10412_v2 }
 0xc4d   :  { %6501 = vmatprep.subr.bf16.mxu1 %v12534_v43 }
 0xc50   :  { %6502 = vmatpush1.bf16.msra.mxu1 %v12542_v45 }
 0xc51   :  { %6503 = vmatprep.subr.bf16.mxu1 %v12547_v46 }
 0xc54   :  { %6504 = vmatpush1.bf16.msra.mxu1 %v12554_v48 }
 0xc55   :  { %6505 = vmatprep.subr.bf16.mxu1 %v12559_v50 }
 0xc58   :  { %6506 = vmatpush1.bf16.msra.mxu1 %v12566_v53 }
 0xc59   :  { %6691 = vmatprep.subr.bf16.mxu1 %v12523_v41 }
 0xd1e   :  { %v6341_v56 = vpop.f32.mrb[60].mxu1 }
 0xd1f   :  { %v6343_v57 = vpop.f32.mrb[61].mxu1 }
 0xd20   :  { %v6350_v33 = vcombine.low %v6341_v56, %v6343_v57  ;;  %v6345_v36 = vpop.f32.mrb[62].mxu1 }
 0xd21   :  { %v6346_v59 = vpop.f32.mrb[63].mxu1 }
 0xd22   :  { %v6357_v60 = vrot.slane %v6350_v33, %v12602_v6 }
 0xd24   :  { %v6364_v61 = vrot.slane %v6357_v60, %v12602_v6 }
 0xd26   :  { %v6366_v40 = vadd.f32 %v6364_v61, %v6302_v38 }
 0xd28   :  { %6374 = vrot.lane.b32.xlu0 %v6366_v40, %s10403_s1  ;;  %v9413_v44 = vmul.f32 -1.442695, %v6366_v40 }
 0xd2a   :  { %10201 = vpow2.f32 %v9413_v44 }
 0xd34   :  { %v10202_v49 = vpop.eup %10201 }
 0xd35   :  { %v6370_v51 = vadd.f32 1.0, %v10202_v49 }
 0xd37   :  { %10203 = vrcp.f32 %v6370_v51 }
 0xd41   :  { %v10204_v41 = vpop.eup %10203 }
 0xd42   :  { %v6379_v0 = vmul.f32 %v10204_v41, %v6289_v31  ;;  %v6388_v5 = vrot.slane %v10204_v41, 1 }
 0xd9a   :  { %v6375_v52 = vpop.permute.xlu0 %6374 }
 0xd9b   :  { %v6376_v47 = vrot.slane %v6375_v52, 1 }
 0xd9d   :  { %10205 = vtanh.f32 %v6376_v47 }
 0xda7   :  { %v10206_v62 = vpop.eup %10205 }
 0xda8   :  { %v6380_v63 = vmul.f32 %v10206_v62, %v10204_v41 }
 0xdaa   :  { %6382 = vrot.lane.b32.xlu1 %v6380_v63, %s10403_s1 }
 0xe1c   :  { %v6383_v1 = vpop.permute.xlu1 %6382 }
 0xe1d   :  { %v6385_v58 = vadd.f32 %v6383_v1, %v6379_v0 }
 0xe1f   :  { %10207 = vtanh.f32 %v6385_v58 }
 0xe29   :  { %v10208_v3 = vpop.eup %10207 }
 0xe2a   :  { %6391 = vrot.lane.b32.xlu0 %v10208_v3, %s10403_s1 }
 0xe9c   :  { %v6392_v7 = vpop.permute.xlu0 %6391 }
 0xe9d   :  { %v6394_v8 = vmul.f32 %v6392_v7, %v6388_v5 }
 0xe9f   :  { %6395 = vst.msk [vmem:[#allocation3 + $0x3] sm:$0x1] %vm6105_vm12, %v6394_v8  ;;  %v6399_v9 = vpack.c.bf16 %v6394_v8, %v6394_v8 }
 0xea0   :  { %6396 = vst.msk [vmem:[#allocation3 + $0x4] sm:$0x1] %vm6107_vm13, %v6394_v8 }
 0xea1   :  { %9414 = vmatmul.mubr.msk.bf16.vlgmr.msra.gmra.mrb[64].mxu0 %vm5821_vm11, %v6399_v9 }
 0xea2   :  { %6596 = vmatpush1.bf16.msra.mxu0 %v12528_v42  ;;  %6627 = vmatprep.mubr.bf16.mxu0 %v10412_v2 }
 0xea3   :  { %6597 = vmatprep.subr.bf16.mxu0 %v12534_v43 }
 0xea6   :  { %6598 = vmatpush1.bf16.msra.mxu0 %v12542_v45 }
 0xea7   :  { %6599 = vmatprep.subr.bf16.mxu0 %v12547_v46 }
 0xeaa   :  { %6600 = vmatpush1.bf16.msra.mxu0 %v12554_v48 }
 0xeab   :  { %6601 = vmatprep.subr.bf16.mxu0 %v12559_v50 }
 0xeae   :  { %6602 = vmatpush1.bf16.msra.mxu0 %v12566_v53 }
 0xeaf   :  { %10043 = vmatprep.subr.bf16.mxu0 %v10395_v34 }
 0xf74   :  { %v6437_v10 = vpop.f32.mrb[64].mxu0 }
 0xf75   :  { %v6439_v11 = vpop.f32.mrb[65].mxu0 }
 0xf76   :  { %v6446_v14 = vcombine.low %v6437_v10, %v6439_v11  ;;  %v6441_v15 = vpop.f32.mrb[66].mxu0  ;;  %v6590_v11 = vld [vmem:[#allocation2 + $0x6] ss:$8 sm:$0x3] }
 0xf77   :  { %v6442_v16 = vpop.f32.mrb[67].mxu0 }
 0xf78   :  { %v6453_v17 = vrot.slane %v6446_v14, %v12602_v6 }
 0xf7a   :  { %v6460_v18 = vrot.slane %v6453_v17, %v12602_v6 }
 0xf7c   :  { %v6462_v20 = vadd.f32 %v6460_v18, %v6398_v19 }
 0xf7e   :  { %6470 = vrot.lane.b32.xlu1 %v6462_v20, %s10403_s1  ;;  %v9415_v21 = vmul.f32 -1.442695, %v6462_v20 }
 0xf80   :  { %10209 = vpow2.f32 %v9415_v21 }
 0xf8a   :  { %v10210_v22 = vpop.eup %10209 }
 0xf8b   :  { %v6466_v23 = vadd.f32 1.0, %v10210_v22 }
 0xf8d   :  { %10211 = vrcp.f32 %v6466_v23 }
 0xf97   :  { %v10212_v26 = vpop.eup %10211 }
 0xf98   :  { %v6475_v30 = vmul.f32 %v10212_v26, %v6385_v58  ;;  %v6484_v39 = vrot.slane %v10212_v26, 1 }
 0xff0   :  { %v6471_v24 = vpop.permute.xlu1 %6470 }
 0xff1   :  { %v6472_v25 = vrot.slane %v6471_v24, 1 }
 0xff3   :  { %10213 = vtanh.f32 %v6472_v25 }
 0xffd   :  { %v10214_v28 = vpop.eup %10213 }
 0xffe   :  { %v6476_v29 = vmul.f32 %v10214_v28, %v10212_v26 }
0x1000   :  { %6478 = vrot.lane.b32.xlu0 %v6476_v29, %s10403_s1 }
0x1072   :  { %v6479_v31 = vpop.permute.xlu0 %6478 }
0x1073   :  { %v6481_v4 = vadd.f32 %v6479_v31, %v6475_v30 }
0x1075   :  { %10215 = vtanh.f32 %v6481_v4 }
0x107f   :  { %v10216_v32 = vpop.eup %10215 }
0x1080   :  { %6487 = vrot.lane.b32.xlu1 %v10216_v32, %s10403_s1 }
0x10f2   :  { %v6488_v54 = vpop.permute.xlu1 %6487 }
0x10f3   :  { %v6490_v55 = vmul.f32 %v6488_v54, %v6484_v39 }
0x10f5   :  { %6491 = vst.msk [vmem:[#allocation3 + $0x4] sm:$0x1] %vm6105_vm12, %v6490_v55  ;;  %v6495_v56 = vpack.c.bf16 %v6490_v55, %v6490_v55 }
0x10f6   :  { %6492 = vst.msk [vmem:[#allocation3 + $0x3] sm:$0x1] %vm6107_vm13, %v6490_v55 }
0x10f7   :  { %9416 = vmatmul.mubr.msk.bf16.vlgmr.msra.gmra.mrb[64].mxu1 %vm5821_vm11, %v6495_v56 }
0x10f8   :  { %6692 = vmatpush1.bf16.msra.mxu1 %v12528_v42  ;;  %6723 = vmatprep.mubr.bf16.mxu1 %v10412_v2 }
0x10f9   :  { %6693 = vmatprep.subr.bf16.mxu1 %v12534_v43  ;;  %v6494_v43 = vld [vmem:[#allocation2 + $0x5] ss:$8 sm:$0x3] }
0x10fc   :  { %6694 = vmatpush1.bf16.msra.mxu1 %v12542_v45 }
0x10fd   :  { %6695 = vmatprep.subr.bf16.mxu1 %v12547_v46 }
0x1100   :  { %6696 = vmatpush1.bf16.msra.mxu1 %v12554_v48 }
0x1101   :  { %6697 = vmatprep.subr.bf16.mxu1 %v12559_v50 }
0x1104   :  { %6698 = vmatpush1.bf16.msra.mxu1 %v12566_v53 }
0x11ca   :  { %v6533_v57 = vpop.f32.mrb[64].mxu1 }
0x11cb   :  { %v6535_v33 = vpop.f32.mrb[65].mxu1 }
0x11cc   :  { %v6542_v36 = vcombine.low %v6533_v57, %v6535_v33  ;;  %v6537_v59 = vpop.f32.mrb[66].mxu1  ;;  %v6686_v57 = vld [vmem:[#allocation2 + $0x7] ss:$8 sm:$0x3] }
0x11cd   :  { %v6538_v60 = vpop.f32.mrb[67].mxu1 }
0x11ce   :  { %v6549_v42 = vrot.slane %v6542_v36, %v12602_v6 }
0x11d0   :  { %v6556_v61 = vrot.slane %v6549_v42, %v12602_v6 }
0x11d2   :  { %v6558_v38 = vadd.f32 %v6556_v61, %v6494_v43 }
0x11d4   :  { %6566 = vrot.lane.b32.xlu0 %v6558_v38, %s10403_s1  ;;  %v9417_v45 = vmul.f32 -1.442695, %v6558_v38 }
0x11d6   :  { %10217 = vpow2.f32 %v9417_v45 }
0x11e0   :  { %v10218_v46 = vpop.eup %10217 }
0x11e1   :  { %v6562_v48 = vadd.f32 1.0, %v10218_v46 }
0x11e3   :  { %10219 = vrcp.f32 %v6562_v48 }
0x11ed   :  { %v10220_v53 = vpop.eup %10219 }
0x11ee   :  { %v6571_v51 = vmul.f32 %v10220_v53, %v6481_v4  ;;  %v6580_v62 = vrot.slane %v10220_v53, 1 }
0x1246   :  { %v6567_v50 = vpop.permute.xlu0 %6566 }
0x1247   :  { %v6568_v40 = vrot.slane %v6567_v50, 1 }
0x1249   :  { %10221 = vtanh.f32 %v6568_v40 }
0x1253   :  { %v10222_v44 = vpop.eup %10221 }
0x1254   :  { %v6572_v49 = vmul.f32 %v10222_v44, %v10220_v53  ;;  %v10153_v53 = vld [vmem:[%s13310_s10] ss:$8 sps:$4 sm:$0xff]   ;;  %v10155_v44 = vld [vmem:[%s13310_s10 + $0x4] ss:$8 sps:$4 sm:$0xff]  }
0x1255   :  { %6886 = vmatprep.subr.bf16.mxu1 %v10155_v44 }
0x1256   :  { %6574 = vrot.lane.b32.xlu1 %v6572_v49, %s10403_s1  ;;  %v10158_v49 = vld [vmem:[%s13310_s10 + $0x14] ss:$8 sps:$4 sm:$0xff]  }
0x12c8   :  { %v6575_v52 = vpop.permute.xlu1 %6574 }
0x12c9   :  { %v6577_v47 = vadd.f32 %v6575_v52, %v6571_v51  ;;  %v10156_v51 = vld [vmem:[%s13310_s10 + $0x10] ss:$8 sps:$4 sm:$0xff]   ;;  %v10161_v52 = vld [vmem:[%s13310_s10 + $0x24] ss:$8 sps:$4 sm:$0xff]  }
0x12cb   :  { %10223 = vtanh.f32 %v6577_v47 }
0x12d5   :  { %v10224_v41 = vpop.eup %10223 }
0x12d6   :  { %6583 = vrot.lane.b32.xlu0 %v10224_v41, %s10403_s1  ;;  %v10164_v41 = vld [vmem:[%s13310_s10 + $0x34] ss:$8 sps:$4 sm:$0xff]  }
0x1348   :  { %v6584_v63 = vpop.permute.xlu0 %6583 }
0x1349   :  { %v6586_v0 = vmul.f32 %v6584_v63, %v6580_v62  ;;  %v10162_v62 = vld [vmem:[%s13310_s10 + $0x30] ss:$8 sps:$4 sm:$0xff]  }
0x134b   :  { %6587 = vst.msk [vmem:[#allocation3 + $0x5] sm:$0x1] %vm6105_vm12, %v6586_v0  ;;  %v6591_v1 = vpack.c.bf16 %v6586_v0, %v6586_v0 }
0x134c   :  { %6588 = vst.msk [vmem:[#allocation3 + $0x2] sm:$0x1] %vm6107_vm13, %v6586_v0 }
0x134d   :  { %9418 = vmatmul.mubr.msk.bf16.vlgmr.msra.gmra.mrb[68].mxu0 %vm5821_vm11, %v6591_v1 }
0x134e   :  { %10045 = vmatprep.mubr.msk.bf16.mxu0 %vm10396_vm0, %v10395_v34  ;;  %vm7173_vm0 = vcmp.lt.s32.totalorder %v5708_v12, 128 }
0x134f   :  { %vm12979_vm3 = vmand %vm7172_vm15, %vm7173_vm0 }
0x1420   :  { %v6629_v58 = vpop.f32.mrb[68].mxu0 }
0x1421   :  { %v6631_v3 = vpop.f32.mrb[69].mxu0 }
0x1422   :  { %v6638_v5 = vcombine.low %v6629_v58, %v6631_v3  ;;  %v6633_v7 = vpop.f32.mrb[70].mxu0 }
0x1423   :  { %v6634_v8 = vpop.f32.mrb[71].mxu0 }
0x1424   :  { %v6645_v9 = vrot.slane %v6638_v5, %v12602_v6  ;;  %v10143_v5 = vld [vmem:[%s13309_s9 + $0x4] ss:$8 sps:$4 sm:$0xff]   ;;  %v10141_v8 = vld [vmem:[%s13309_s9] ss:$8 sps:$4 sm:$0xff]  }
0x1426   :  { %v6652_v10 = vrot.slane %v6645_v9, %v12602_v6  ;;  %v10146_v9 = vld [vmem:[%s13309_s9 + $0x14] ss:$8 sps:$4 sm:$0xff]  }
0x1428   :  { %v6654_v14 = vadd.f32 %v6652_v10, %v6590_v11  ;;  %v10144_v10 = vld [vmem:[%s13309_s9 + $0x10] ss:$8 sps:$4 sm:$0xff]   ;;  %v10149_v11 = vld [vmem:[%s13309_s9 + $0x24] ss:$8 sps:$4 sm:$0xff]  }
0x142a   :  { %6662 = vrot.lane.b32.xlu1 %v6654_v14, %s10403_s1  ;;  %v9419_v15 = vmul.f32 -1.442695, %v6654_v14  ;;  %v10147_v14 = vld [vmem:[%s13309_s9 + $0x20] ss:$8 sps:$4 sm:$0xff]  }
0x142c   :  { %10225 = vpow2.f32 %v9419_v15  ;;  %v10150_v15 = vld [vmem:[%s13309_s9 + $0x30] ss:$8 sps:$4 sm:$0xff]  }
0x1436   :  { %v10226_v16 = vpop.eup %10225 }
0x1437   :  { %v6658_v17 = vadd.f32 1.0, %v10226_v16  ;;  %v12771_v16 = vld [vmem:[%s13311_s11 + $0x4] ss:$8 sps:$4 sm:$0xff]  }
0x1439   :  { %10227 = vrcp.f32 %v6658_v17  ;;  %v12777_v17 = vld [vmem:[%s13311_s11] ss:$8 sps:$4 sm:$0xff]  }
0x1443   :  { %v10228_v34 = vpop.eup %10227 }
0x1444   :  { %v6667_v22 = vmul.f32 %v10228_v34, %v6577_v47  ;;  %v6676_v26 = vrot.slane %v10228_v34, 1  ;;  %v10159_v47 = vld [vmem:[%s13310_s10 + $0x20] ss:$8 sps:$4 sm:$0xff]  }
0x149c   :  { %v6663_v18 = vpop.permute.xlu1 %6662 }
0x149d   :  { %v6664_v19 = vrot.slane %v6663_v18, 1  ;;  %v12783_v18 = vld [vmem:[%s13311_s11 + $0x14] ss:$8 sps:$4 sm:$0xff]  }
0x149f   :  { %10229 = vtanh.f32 %v6664_v19  ;;  %v12790_v19 = vld [vmem:[%s13311_s11 + $0x10] ss:$8 sps:$4 sm:$0xff]  }
0x14a9   :  { %v10230_v20 = vpop.eup %10229 }
0x14aa   :  { %v6668_v21 = vmul.f32 %v10230_v20, %v10228_v34  ;;  %v12795_v34 = vld [vmem:[%s13311_s11 + $0x24] ss:$8 sps:$4 sm:$0xff]   ;;  %v12802_v20 = vld [vmem:[%s13311_s11 + $0x20] ss:$8 sps:$4 sm:$0xff]  }
0x14ac   :  { %6670 = vrot.lane.b32.xlu0 %v6668_v21, %s10403_s1  ;;  %v12807_v21 = vld [vmem:[%s13311_s11 + $0x34] ss:$8 sps:$4 sm:$0xff]  }
0x151e   :  { %v6671_v23 = vpop.permute.xlu0 %6670 }
0x151f   :  { %v6673_v24 = vadd.f32 %v6671_v23, %v6667_v22  ;;  %v12814_v22 = vld [vmem:[%s13311_s11 + $0x30] ss:$8 sps:$4 sm:$0xff]  }
0x1521   :  { %10231 = vtanh.f32 %v6673_v24 }
0x152b   :  { %v10232_v25 = vpop.eup %10231 }
0x152c   :  { %6679 = vrot.lane.b32.xlu1 %v10232_v25, %s10403_s1 }
0x159e   :  { %v6680_v28 = vpop.permute.xlu1 %6679 }
0x159f   :  { %v6682_v29 = vmul.f32 %v6680_v28, %v6676_v26 }
0x15a1   :  { %6683 = vst.msk [vmem:[#allocation3 + $0x6] sm:$0x1] %vm6105_vm12, %v6682_v29  ;;  %v6687_v30 = vpack.c.bf16 %v6682_v29, %v6682_v29 }
0x15a2   :  { %6684 = vst.msk [vmem:[#allocation3 + $0x1] sm:$0x1] %vm6107_vm13, %v6682_v29 }
0x15a3   :  { %9420 = vmatmul.mubr.msk.bf16.vlgmr.msra.gmra.mrb[68].mxu1 %vm5821_vm11, %v6687_v30 }
0x15a4   :  { %6918 = vmatprep.mubr.bf16.mxu1 %v10412_v2  ;;  %6887 = vmatpush1.bf16.msra.mxu1 %v10153_v53 }
0x15a5   :  { %6888 = vmatprep.subr.bf16.mxu1 %v10158_v49 }
0x15a8   :  { %6889 = vmatpush1.bf16.msra.mxu1 %v10156_v51 }
0x15a9   :  { %6890 = vmatprep.subr.bf16.mxu1 %v10161_v52 }
0x15ac   :  { %6891 = vmatpush1.bf16.msra.mxu1 %v10159_v47 }
0x15ad   :  { %6892 = vmatprep.subr.bf16.mxu1 %v10164_v41 }
0x15b0   :  { %6893 = vmatpush1.bf16.msra.mxu1 %v10162_v62 }
0x15b1   :  { %7075 = vmatprep.subr.bf16.mxu1 %v12771_v16 }
0x1676   :  { %v6725_v31 = vpop.f32.mrb[68].mxu1 }
0x1677   :  { %v6727_v4 = vpop.f32.mrb[69].mxu1 }
0x1678   :  { %v6734_v32 = vcombine.low %v6725_v31, %v6727_v4  ;;  %v6729_v39 = vpop.f32.mrb[70].mxu1 }
0x1679   :  { %v6730_v54 = vpop.f32.mrb[71].mxu1 }
0x167a   :  { %v6741_v55 = vrot.slane %v6734_v32, %v12602_v6  ;;  %v7010_v32 = vld [vmem:[%s13312_s12] sm:$0x3] }
0x167b   :  { %v7015_v39 = vrot.slane %v7010_v32, %v12591_v35 }
0x167c   :  { %v6748_v56 = vrot.slane %v6741_v55, %v12602_v6  ;;  %v7019_v55 = vrot.slane %v7010_v32, %v12597_v37 }
0x167e   :  { %v6750_v33 = vadd.f32 %v6748_v56, %v6686_v57 }
0x1680   :  { %6758 = vrot.lane.b32.xlu0 %v6750_v33, %s10403_s1  ;;  %v9421_v36 = vmul.f32 -1.442695, %v6750_v33 }
0x1682   :  { %10233 = vpow2.f32 %v9421_v36 }
0x168c   :  { %v10234_v59 = vpop.eup %10233 }
0x168d   :  { %v6754_v60 = vadd.f32 1.0, %v10234_v59 }
0x168f   :  { %10235 = vrcp.f32 %v6754_v60 }
0x1699   :  { %v10236_v43 = vpop.eup %10235 }
0x169a   :  { %v6763_v46 = vmul.f32 %v10236_v43, %v6673_v24  ;;  %v6772_v63 = vrot.slane %v10236_v43, 1 }
0x16f2   :  { %v6759_v42 = vpop.permute.xlu0 %6758 }
0x16f3   :  { %v6760_v61 = vrot.slane %v6759_v42, 1 }
0x16f5   :  { %10237 = vtanh.f32 %v6760_v61 }
0x16ff   :  { %v10238_v38 = vpop.eup %10237 }
0x1700   :  { %v6764_v45 = vmul.f32 %v10238_v38, %v10236_v43 }
0x1702   :  { %6766 = vrot.lane.b32.xlu1 %v6764_v45, %s10403_s1 }
0x1774   :  { %v6767_v48 = vpop.permute.xlu1 %6766 }
0x1775   :  { %v6769_v50 = vadd.f32 %v6767_v48, %v6763_v46 }
0x1777   :  { %10239 = vtanh.f32 %v6769_v50 }
0x1781   :  { %v10240_v40 = vpop.eup %10239 }
0x1782   :  { %6775 = vrot.lane.b32.xlu0 %v10240_v40, %s10403_s1 }
0x17f4   :  { %v6776_v0 = vpop.permute.xlu0 %6775 }
0x17f5   :  { %v6778_v1 = vmul.f32 %v6776_v0, %v6772_v63 }
0x17f7   :  { %6779 = vst.msk [vmem:[#allocation3 + $0x7] sm:$0x1] %vm6105_vm12, %v6778_v1 }
0x17f8   :  { %6780 = vst.msk [vmem:[#allocation3] sm:$0x1] %vm6107_vm13, %v6778_v1 }
0x17ff   :  { %v6781_v58 = vld [vmem:[#allocation3] sm:$0xff] }
0x1800   :  { %v6782_v3 = vpack.c.bf16 %v6781_v58, %v6781_v58 }
0x1802   :  { %v6784_v7 = vsel %vm5581_vm5, %v6782_v3, 0  ;;  %vm7273_vm5 = vcmp.ge.s32.totalorder %v5708_v12, 64 }
0x1803   :  { %10044 = vmatpush3.bf16.msra.mxu0 %v6784_v7  ;;  %vm12994_vm7 = vmand %vm7273_vm5, %vm7274_vm6 }
0x1804   :  { %6969 = vmatprep.subr.bf16.mxu0 %v10143_v5 }
0x1806   :  { %10046 = vmatmul.mubr.msk.bf16.vlgmr.msra.gmra.mrb[72].mxu0 %vm5660_vm9, %v12492_v27  ;;  %v10152_v27 = vld [vmem:[%s13309_s9 + $0x34] ss:$8 sps:$4 sm:$0xff]  }
0x1807   :  { %6970 = vmatpush1.bf16.msra.mxu0 %v10141_v8  ;;  %7001 = vmatprep.mubr.bf16.mxu0 %v10412_v2 }
0x1808   :  { %6971 = vmatprep.subr.bf16.mxu0 %v10146_v9 }
0x180b   :  { %6972 = vmatpush1.bf16.msra.mxu0 %v10144_v10 }
0x180c   :  { %6973 = vmatprep.subr.bf16.mxu0 %v10149_v11 }
0x180f   :  { %6974 = vmatpush1.bf16.msra.mxu0 %v10147_v14 }
0x1810   :  { %6975 = vmatprep.subr.bf16.mxu0 %v10152_v27 }
0x1813   :  { %6976 = vmatpush1.bf16.msra.mxu0 %v10150_v15 }
0x1814   :  { %7181 = vmatprep.subr.bf16.mxu0 %v12771_v16 }
0x1816   :  { %9440 = vmatmul.mubr.msk.bf16.vlgmr.msra.gmra.mrb[76].mxu0 %vm5821_vm11, %v6782_v3 }
0x1817   :  { %7213 = vmatprep.mubr.bf16.mxu0 %v10412_v2  ;;  %7182 = vmatpush1.bf16.msra.mxu0 %v12777_v17 }
0x1818   :  { %7183 = vmatprep.subr.bf16.mxu0 %v12783_v18 }
0x181b   :  { %7184 = vmatpush1.bf16.msra.mxu0 %v12790_v19 }
0x181c   :  { %7185 = vmatprep.subr.bf16.mxu0 %v12795_v34 }
0x181f   :  { %7186 = vmatpush1.bf16.msra.mxu0 %v12802_v20 }
0x1820   :  { %7187 = vmatprep.subr.bf16.mxu0 %v12807_v21 }
0x1823   :  { %7188 = vmatpush1.bf16.msra.mxu0 %v12814_v22 }
0x1824   :  { %7385 = vmatprep.subr.bf16.mxu0 %v12771_v16 }
0x18d9   :  { %v6820_v23 = vpop.f32.mrb[72].mxu0 }
0x18da   :  { %v6826_v24 = vpack.c.bf16 %v6820_v23, %v6820_v23  ;;  %v10047_v25 = vpop.f32.mrb[73].mxu0 }
0x18db   :  { %v6823_v26 = vpop.f32.mrb[74].mxu0 }
0x18dc   :  { %9431 = vmatmul.mubr.msk.bf16.vlgmr.msra.gmra.mrb[72].mxu1 %vm5821_vm11, %v6826_v24  ;;  %v10048_v28 = vpop.f32.mrb[75].mxu0 }
0x18dd   :  { %7076 = vmatpush1.bf16.msra.mxu1 %v12777_v17  ;;  %7107 = vmatprep.mubr.bf16.mxu1 %v10412_v2 }
0x18de   :  { %7077 = vmatprep.subr.bf16.mxu1 %v12783_v18 }
0x18e1   :  { %7078 = vmatpush1.bf16.msra.mxu1 %v12790_v19 }
0x18e2   :  { %7079 = vmatprep.subr.bf16.mxu1 %v12795_v34 }
0x18e5   :  { %7080 = vmatpush1.bf16.msra.mxu1 %v12802_v20 }
0x18e6   :  { %7081 = vmatprep.subr.bf16.mxu1 %v12807_v21 }
0x18e9   :  { %7082 = vmatpush1.bf16.msra.mxu1 %v12814_v22  ;;  %v7003_v29 = vpop.f32.mrb[76].mxu0 }
0x18ea   :  { %v7005_v30 = vpop.f32.mrb[77].mxu0  ;;  %7286 = vmatprep.subr.bf16.mxu1 %v12771_v16 }
0x18eb   :  { %v7007_v31 = vpop.f32.mrb[78].mxu0 }
0x18ec   :  { %7108 = vmatmul.mubr.bf16.vlgmr.msra.gmra.mrb[76].mxu1 %v10412_v2  ;;  %v7008_v4 = vpop.f32.mrb[79].mxu0 }
0x18ed   :  { %7287 = vmatpush1.bf16.msra.mxu1 %v12777_v17  ;;  %7318 = vmatprep.mubr.bf16.mxu1 %v10412_v2 }
0x18ee   :  { %7288 = vmatprep.subr.bf16.mxu1 %v12783_v18 }
0x18f1   :  { %7289 = vmatpush1.bf16.msra.mxu1 %v12790_v19 }
0x18f2   :  { %7290 = vmatprep.subr.bf16.mxu1 %v12795_v34 }
0x18f5   :  { %7291 = vmatpush1.bf16.msra.mxu1 %v12802_v20 }
0x18f6   :  { %7292 = vmatprep.subr.bf16.mxu1 %v12807_v21 }
0x18f9   :  { %7293 = vmatpush1.bf16.msra.mxu1 %v12814_v22 }
0x18fa   :  { %7484 = vmatprep.subr.bf16.mxu1 %v12771_v16 }
0x19af   :  { %v6920_v54 = vpop.f32.mrb[72].mxu1 }
0x19b0   :  { %v7004_v56 = vadd.f32 %v7003_v29, %v6920_v54  ;;  %v6922_v57 = vpop.f32.mrb[73].mxu1 }
0x19b1   :  { %v7006_v33 = vadd.f32 %v7005_v30, %v6922_v57  ;;  %v6924_v36 = vpop.f32.mrb[74].mxu1 }
0x19b2   :  { %v7022_v59 = vadd.f32 %v7015_v39, %v7004_v56  ;;  %v6925_v60 = vpop.f32.mrb[75].mxu1 }
0x19b3   :  { %v7023_v42 = vadd.f32 %v7019_v55, %v7006_v33 }
0x19b4   :  { %7024 = vst [vmem:[#allocation2] sm:$0xff] %v7022_v59 }
0x19b5   :  { %7025 = vst [vmem:[#allocation2 + $0x8] sm:$0xff] %v7023_v42 }
0x19bc   :  { %v7034_v40 = vld [vmem:[#allocation2] ss:$8 sm:$0x3]  ;;  %v7176_v26 = vld [vmem:[#allocation2 + $0x1] ss:$8 sm:$0x3] }
0x19bf   :  { %v7109_v61 = vpop.f32.mrb[76].mxu1 }
0x19c0   :  { %v7111_v43 = vpop.f32.mrb[77].mxu1 }
0x19c1   :  { %v7118_v38 = vcombine.low %v7109_v61, %v7111_v43  ;;  %v7113_v45 = vpop.f32.mrb[78].mxu1 }
0x19c2   :  { %v7114_v46 = vpop.f32.mrb[79].mxu1 }
0x19c3   :  { %v7125_v48 = vrot.slane %v7118_v38, %v12602_v6 }
0x19c5   :  { %v7132_v50 = vrot.slane %v7125_v48, %v12602_v6 }
0x19c7   :  { %v7134_v53 = vadd.f32 %v7132_v50, %v7034_v40 }
0x19c9   :  { %7142 = vrot.lane.b32.xlu1 %v7134_v53, %s10403_s1  ;;  %v9449_v44 = vmul.f32 -1.442695, %v7134_v53  ;;  %v7281_v53 = vld [vmem:[#allocation2 + $0x2] ss:$8 sm:$0x3] }
0x19cb   :  { %10241 = vpow2.f32 %v9449_v44 }
0x19d5   :  { %v10242_v49 = vpop.eup %10241 }
0x19d6   :  { %v7138_v51 = vadd.f32 1.0, %v10242_v49 }
0x19d8   :  { %10243 = vrcp.f32 %v7138_v51 }
0x19e2   :  { %v10244_v41 = vpop.eup %10243 }
0x19e3   :  { %v7147_v0 = vmul.f32 0.0, %v10244_v41  ;;  %v7156_v5 = vrot.slane %v10244_v41, 1 }
0x1a3b   :  { %v7143_v52 = vpop.permute.xlu1 %7142 }
0x1a3c   :  { %v7144_v47 = vrot.slane %v7143_v52, 1 }
0x1a3e   :  { %10245 = vtanh.f32 %v7144_v47 }
0x1a48   :  { %v10246_v62 = vpop.eup %10245 }
0x1a49   :  { %v7148_v63 = vmul.f32 %v10246_v62, %v10244_v41 }
0x1a4b   :  { %7150 = vrot.lane.b32.xlu0 %v7148_v63, %s10403_s1 }
0x1abd   :  { %v7151_v1 = vpop.permute.xlu0 %7150 }
0x1abe   :  { %v7153_v58 = vadd.f32 %v7151_v1, %v7147_v0 }
0x1ac0   :  { %10247 = vtanh.f32 %v7153_v58 }
0x1aca   :  { %v10248_v3 = vpop.eup %10247 }
0x1acb   :  { %7159 = vrot.lane.b32.xlu1 %v10248_v3, %s10403_s1 }
0x1b3d   :  { %v7160_v7 = vpop.permute.xlu1 %7159 }
0x1b3e   :  { %v12853_v9 = vmul.f32 %v7160_v7, %v7156_v5 }
0x1b40   :  { %v7177_v10 = vpack.c.bf16 %v12853_v9, %v12853_v9  ;;  %7167 = vst.msk [vmem:[#allocation4] sm:$0x1] %vm12849_vm14, %v12853_v9 }
0x1b42   :  { %9450 = vmatmul.mubr.msk.bf16.vlgmr.msra.gmra.mrb[80].mxu0 %vm5821_vm11, %v7177_v10 }
0x1b43   :  { %7386 = vmatpush1.bf16.msra.mxu0 %v12777_v17  ;;  %7417 = vmatprep.mubr.bf16.mxu0 %v10412_v2 }
0x1b44   :  { %7387 = vmatprep.subr.bf16.mxu0 %v12783_v18 }
0x1b47   :  { %7388 = vmatpush1.bf16.msra.mxu0 %v12790_v19 }
0x1b48   :  { %7389 = vmatprep.subr.bf16.mxu0 %v12795_v34 }
0x1b4b   :  { %7390 = vmatpush1.bf16.msra.mxu0 %v12802_v20 }
0x1b4c   :  { %7391 = vmatprep.subr.bf16.mxu0 %v12807_v21 }
0x1b4f   :  { %7392 = vmatpush1.bf16.msra.mxu0 %v12814_v22 }
0x1b50   :  { %7583 = vmatprep.subr.bf16.mxu0 %v12771_v16 }
0x1c15   :  { %v7215_v11 = vpop.f32.mrb[80].mxu0 }
0x1c16   :  { %v7217_v14 = vpop.f32.mrb[81].mxu0 }
0x1c17   :  { %v7224_v27 = vcombine.low %v7215_v11, %v7217_v14  ;;  %v7219_v15 = vpop.f32.mrb[82].mxu0 }
0x1c18   :  { %v7220_v23 = vpop.f32.mrb[83].mxu0 }
0x1c19   :  { %v7231_v24 = vrot.slane %v7224_v27, %v12602_v6 }
0x1c1b   :  { %v7238_v25 = vrot.slane %v7231_v24, %v12602_v6 }
0x1c1d   :  { %v7240_v28 = vadd.f32 %v7238_v25, %v7176_v26 }
0x1c1f   :  { %7248 = vrot.lane.b32.xlu0 %v7240_v28, %s10403_s1  ;;  %v9451_v29 = vmul.f32 -1.442695, %v7240_v28 }
0x1c21   :  { %10249 = vpow2.f32 %v9451_v29  ;;  %v7380_v29 = vld [vmem:[#allocation2 + $0x3] ss:$8 sm:$0x3] }
0x1c2b   :  { %v10250_v30 = vpop.eup %10249 }
0x1c2c   :  { %v7244_v31 = vadd.f32 1.0, %v10250_v30 }
0x1c2e   :  { %10251 = vrcp.f32 %v7244_v31 }
0x1c38   :  { %v10252_v39 = vpop.eup %10251 }
0x1c39   :  { %v7253_v56 = vmul.f32 %v10252_v39, %v7153_v58  ;;  %v7262_v59 = vrot.slane %v10252_v39, 1 }
0x1c91   :  { %v7249_v4 = vpop.permute.xlu0 %7248 }
0x1c92   :  { %v7250_v32 = vrot.slane %v7249_v4, 1 }
0x1c94   :  { %10253 = vtanh.f32 %v7250_v32 }
0x1c9e   :  { %v10254_v54 = vpop.eup %10253 }
0x1c9f   :  { %v7254_v55 = vmul.f32 %v10254_v54, %v10252_v39 }
0x1ca1   :  { %7256 = vrot.lane.b32.xlu1 %v7254_v55, %s10403_s1 }
0x1d13   :  { %v7257_v57 = vpop.permute.xlu1 %7256 }
0x1d14   :  { %v7259_v33 = vadd.f32 %v7257_v57, %v7253_v56 }
0x1d16   :  { %10255 = vtanh.f32 %v7259_v33 }
0x1d20   :  { %v10256_v36 = vpop.eup %10255 }
0x1d21   :  { %7265 = vrot.lane.b32.xlu0 %v10256_v36, %s10403_s1 }
0x1d93   :  { %v7266_v60 = vpop.permute.xlu0 %7265 }
0x1d94   :  { %v12875_v42 = vmul.f32 %v7266_v60, %v7262_v59 }
0x1d96   :  { %v7282_v61 = vpack.c.bf16 %v12875_v42, %v12875_v42 }
0x1d98   :  { %9452 = vmatmul.mubr.msk.bf16.vlgmr.msra.gmra.mrb[80].mxu1 %vm5821_vm11, %v7282_v61 }
0x1d99   :  { %7485 = vmatpush1.bf16.msra.mxu1 %v12777_v17  ;;  %7516 = vmatprep.mubr.bf16.mxu1 %v10412_v2 }
0x1d9a   :  { %7486 = vmatprep.subr.bf16.mxu1 %v12783_v18 }
0x1d9d   :  { %7487 = vmatpush1.bf16.msra.mxu1 %v12790_v19 }
0x1d9e   :  { %7488 = vmatprep.subr.bf16.mxu1 %v12795_v34 }
0x1da1   :  { %7489 = vmatpush1.bf16.msra.mxu1 %v12802_v20 }
0x1da2   :  { %7490 = vmatprep.subr.bf16.mxu1 %v12807_v21 }
0x1da5   :  { %7491 = vmatpush1.bf16.msra.mxu1 %v12814_v22 }
0x1da6   :  { %7682 = vmatprep.subr.bf16.mxu1 %v12771_v16 }
0x1e6b   :  { %v7320_v43 = vpop.f32.mrb[80].mxu1 }
0x1e6c   :  { %v7322_v38 = vpop.f32.mrb[81].mxu1 }
0x1e6d   :  { %v7329_v45 = vcombine.low %v7320_v43, %v7322_v38  ;;  %v7324_v46 = vpop.f32.mrb[82].mxu1 }
0x1e6e   :  { %v7325_v48 = vpop.f32.mrb[83].mxu1 }
0x1e6f   :  { %v7336_v50 = vrot.slane %v7329_v45, %v12602_v6 }
0x1e71   :  { %v7343_v40 = vrot.slane %v7336_v50, %v12602_v6 }
0x1e73   :  { %v7345_v44 = vadd.f32 %v7343_v40, %v7281_v53 }
0x1e75   :  { %7353 = vrot.lane.b32.xlu1 %v7345_v44, %s10403_s1  ;;  %v9453_v49 = vmul.f32 -1.442695, %v7345_v44 }
0x1e77   :  { %10257 = vpow2.f32 %v9453_v49  ;;  %v7479_v49 = vld [vmem:[#allocation2 + $0x4] ss:$8 sm:$0x3] }
0x1e81   :  { %v10258_v51 = vpop.eup %10257 }
0x1e82   :  { %v7349_v52 = vadd.f32 1.0, %v10258_v51 }
0x1e84   :  { %10259 = vrcp.f32 %v7349_v52 }
0x1e8e   :  { %v10260_v62 = vpop.eup %10259 }
0x1e8f   :  { %v7358_v1 = vmul.f32 %v10260_v62, %v7259_v33  ;;  %v7367_v7 = vrot.slane %v10260_v62, 1 }
0x1ee7   :  { %v7354_v47 = vpop.permute.xlu1 %7353 }
0x1ee8   :  { %v7355_v41 = vrot.slane %v7354_v47, 1 }
0x1eea   :  { %10261 = vtanh.f32 %v7355_v41 }
0x1ef4   :  { %v10262_v63 = vpop.eup %10261 }
0x1ef5   :  { %v7359_v0 = vmul.f32 %v10262_v63, %v10260_v62 }
0x1ef7   :  { %7361 = vrot.lane.b32.xlu0 %v7359_v0, %s10403_s1 }
0x1f69   :  { %v7362_v58 = vpop.permute.xlu0 %7361 }
0x1f6a   :  { %v7364_v3 = vadd.f32 %v7362_v58, %v7358_v1 }
0x1f6c   :  { %10263 = vtanh.f32 %v7364_v3 }
0x1f76   :  { %v10264_v5 = vpop.eup %10263 }
0x1f77   :  { %7370 = vrot.lane.b32.xlu1 %v10264_v5, %s10403_s1 }
0x1fe9   :  { %v7371_v10 = vpop.permute.xlu1 %7370 }
0x1fea   :  { %v12894_v11 = vmul.f32 %v7371_v10, %v7367_v7 }
0x1fec   :  { %v7381_v14 = vpack.c.bf16 %v12894_v11, %v12894_v11  ;;  %7374 = vst.msk [vmem:[#allocation4 + $0x1] sm:$0x1] %vm12849_vm14, %v12894_v11 }
0x1fee   :  { %9454 = vmatmul.mubr.msk.bf16.vlgmr.msra.gmra.mrb[84].mxu0 %vm5821_vm11, %v7381_v14 }
0x1fef   :  { %7584 = vmatpush1.bf16.msra.mxu0 %v12777_v17  ;;  %7615 = vmatprep.mubr.bf16.mxu0 %v10412_v2 }
0x1ff0   :  { %7585 = vmatprep.subr.bf16.mxu0 %v12783_v18 }
0x1ff3   :  { %7586 = vmatpush1.bf16.msra.mxu0 %v12790_v19 }
0x1ff4   :  { %7587 = vmatprep.subr.bf16.mxu0 %v12795_v34 }
0x1ff7   :  { %7588 = vmatpush1.bf16.msra.mxu0 %v12802_v20 }
0x1ff8   :  { %7589 = vmatprep.subr.bf16.mxu0 %v12807_v21 }
0x1ffb   :  { %7590 = vmatpush1.bf16.msra.mxu0 %v12814_v22 }
0x1ffc   :  { %7781 = vmatprep.subr.bf16.mxu0 %v12771_v16 }
0x20c1   :  { %v7419_v27 = vpop.f32.mrb[84].mxu0 }
0x20c2   :  { %v7421_v15 = vpop.f32.mrb[85].mxu0 }
0x20c3   :  { %v7428_v23 = vcombine.low %v7419_v27, %v7421_v15  ;;  %v7423_v24 = vpop.f32.mrb[86].mxu0 }
0x20c4   :  { %v7424_v25 = vpop.f32.mrb[87].mxu0 }
0x20c5   :  { %v7435_v26 = vrot.slane %v7428_v23, %v12602_v6 }
0x20c7   :  { %v7442_v28 = vrot.slane %v7435_v26, %v12602_v6 }
0x20c9   :  { %v7444_v30 = vadd.f32 %v7442_v28, %v7380_v29 }
0x20cb   :  { %7452 = vrot.lane.b32.xlu0 %v7444_v30, %s10403_s1  ;;  %v9455_v31 = vmul.f32 -1.442695, %v7444_v30 }
0x20cd   :  { %10265 = vpow2.f32 %v9455_v31 }
0x20d7   :  { %v10266_v4 = vpop.eup %10265 }
0x20d8   :  { %v7448_v32 = vadd.f32 1.0, %v10266_v4 }
0x20da   :  { %10267 = vrcp.f32 %v7448_v32 }
0x20e4   :  { %v10268_v16 = vpop.eup %10267 }
0x20e5   :  { %v7457_v57 = vmul.f32 %v10268_v16, %v7364_v3  ;;  %v7466_v60 = vrot.slane %v10268_v16, 1 }
0x213d   :  { %v7453_v39 = vpop.permute.xlu0 %7452 }
0x213e   :  { %v7454_v54 = vrot.slane %v7453_v39, 1 }
0x2140   :  { %10269 = vtanh.f32 %v7454_v54 }
0x214a   :  { %v10270_v55 = vpop.eup %10269 }
0x214b   :  { %v7458_v56 = vmul.f32 %v10270_v55, %v10268_v16 }
0x214d   :  { %7460 = vrot.lane.b32.xlu1 %v7458_v56, %s10403_s1 }
0x21bf   :  { %v7461_v33 = vpop.permute.xlu1 %7460 }
0x21c0   :  { %v7463_v36 = vadd.f32 %v7461_v33, %v7457_v57 }
0x21c2   :  { %10271 = vtanh.f32 %v7463_v36 }
0x21cc   :  { %v10272_v59 = vpop.eup %10271 }
0x21cd   :  { %7469 = vrot.lane.b32.xlu0 %v10272_v59, %s10403_s1 }
0x223f   :  { %v7470_v61 = vpop.permute.xlu0 %7469 }
0x2240   :  { %v12916_v43 = vmul.f32 %v7470_v61, %v7466_v60 }
0x2242   :  { %v7480_v38 = vpack.c.bf16 %v12916_v43, %v12916_v43 }
0x2244   :  { %9456 = vmatmul.mubr.msk.bf16.vlgmr.msra.gmra.mrb[84].mxu1 %vm5821_vm11, %v7480_v38 }
0x2245   :  { %7683 = vmatpush1.bf16.msra.mxu1 %v12777_v17  ;;  %7714 = vmatprep.mubr.bf16.mxu1 %v10412_v2 }
0x2246   :  { %7684 = vmatprep.subr.bf16.mxu1 %v12783_v18 }
0x2249   :  { %7685 = vmatpush1.bf16.msra.mxu1 %v12790_v19 }
0x224a   :  { %7686 = vmatprep.subr.bf16.mxu1 %v12795_v34 }
0x224d   :  { %7687 = vmatpush1.bf16.msra.mxu1 %v12802_v20 }
0x224e   :  { %7688 = vmatprep.subr.bf16.mxu1 %v12807_v21 }
0x2251   :  { %7689 = vmatpush1.bf16.msra.mxu1 %v12814_v22 }
0x2317   :  { %v7518_v45 = vpop.f32.mrb[84].mxu1 }
0x2318   :  { %v7520_v46 = vpop.f32.mrb[85].mxu1 }
0x2319   :  { %v7527_v48 = vcombine.low %v7518_v45, %v7520_v46  ;;  %v7522_v50 = vpop.f32.mrb[86].mxu1 }
0x231a   :  { %v7523_v40 = vpop.f32.mrb[87].mxu1  ;;  %v7677_v50 = vld [vmem:[#allocation2 + $0x6] ss:$8 sm:$0x3] }
0x231b   :  { %v7534_v53 = vrot.slane %v7527_v48, %v12602_v6 }
0x231d   :  { %v7541_v44 = vrot.slane %v7534_v53, %v12602_v6 }
0x231f   :  { %v7543_v51 = vadd.f32 %v7541_v44, %v7479_v49 }
0x2321   :  { %7551 = vrot.lane.b32.xlu1 %v7543_v51, %s10403_s1  ;;  %v9457_v52 = vmul.f32 -1.442695, %v7543_v51 }
0x2323   :  { %10273 = vpow2.f32 %v9457_v52 }
0x232d   :  { %v10274_v47 = vpop.eup %10273 }
0x232e   :  { %v7547_v41 = vadd.f32 1.0, %v10274_v47 }
0x2330   :  { %10275 = vrcp.f32 %v7547_v41 }
0x233a   :  { %v10276_v0 = vpop.eup %10275 }
0x233b   :  { %v7556_v3 = vmul.f32 %v10276_v0, %v7463_v36  ;;  %v7565_v14 = vrot.slane %v10276_v0, 1 }
0x2393   :  { %v7552_v62 = vpop.permute.xlu1 %7551 }
0x2394   :  { %v7553_v63 = vrot.slane %v7552_v62, 1 }
0x2396   :  { %10277 = vtanh.f32 %v7553_v63 }
0x23a0   :  { %v10278_v1 = vpop.eup %10277 }
0x23a1   :  { %v7557_v58 = vmul.f32 %v10278_v1, %v10276_v0 }
0x23a3   :  { %7559 = vrot.lane.b32.xlu0 %v7557_v58, %s10403_s1 }
0x2415   :  { %v7560_v5 = vpop.permute.xlu0 %7559 }
0x2416   :  { %v7562_v7 = vadd.f32 %v7560_v5, %v7556_v3 }
0x2418   :  { %10279 = vtanh.f32 %v7562_v7 }
0x2422   :  { %v10280_v10 = vpop.eup %10279 }
0x2423   :  { %7568 = vrot.lane.b32.xlu1 %v10280_v10, %s10403_s1 }
0x2495   :  { %v7569_v27 = vpop.permute.xlu1 %7568 }
0x2496   :  { %v12934_v15 = vmul.f32 %v7569_v27, %v7565_v14 }
0x2498   :  { %v7579_v23 = vpack.c.bf16 %v12934_v15, %v12934_v15 }
0x249a   :  { %9458 = vmatmul.mubr.msk.bf16.vlgmr.msra.gmra.mrb[88].mxu0 %vm5821_vm11, %v7579_v23 }
0x249b   :  { %7782 = vmatpush1.bf16.msra.mxu0 %v12777_v17  ;;  %7813 = vmatprep.mubr.bf16.mxu0 %v10412_v2 }
0x249c   :  { %7783 = vmatprep.subr.bf16.mxu0 %v12783_v18  ;;  %v7578_v18 = vld [vmem:[#allocation2 + $0x5] ss:$8 sm:$0x3] }
0x249f   :  { %7784 = vmatpush1.bf16.msra.mxu0 %v12790_v19 }
0x24a0   :  { %7785 = vmatprep.subr.bf16.mxu0 %v12795_v34 }
0x24a3   :  { %7786 = vmatpush1.bf16.msra.mxu0 %v12802_v20 }
0x24a4   :  { %7787 = vmatprep.subr.bf16.mxu0 %v12807_v21 }
0x24a7   :  { %7788 = vmatpush1.bf16.msra.mxu0 %v12814_v22 }
0x256d   :  { %v7617_v24 = vpop.f32.mrb[88].mxu0 }
0x256e   :  { %v7619_v25 = vpop.f32.mrb[89].mxu0 }
0x256f   :  { %v7626_v26 = vcombine.low %v7617_v24, %v7619_v25  ;;  %v7621_v28 = vpop.f32.mrb[90].mxu0 }
0x2570   :  { %v7622_v29 = vpop.f32.mrb[91].mxu0 }
0x2571   :  { %v7633_v17 = vrot.slane %v7626_v26, %v12602_v6  ;;  %v7776_v29 = vld [vmem:[#allocation2 + $0x7] ss:$8 sm:$0x3] }
0x2573   :  { %v7640_v2 = vrot.slane %v7633_v17, %v12602_v6 }
0x2575   :  { %v7642_v30 = vadd.f32 %v7640_v2, %v7578_v18 }
0x2577   :  { %7650 = vrot.lane.b32.xlu0 %v7642_v30, %s10403_s1  ;;  %v9459_v19 = vmul.f32 -1.442695, %v7642_v30 }
0x2579   :  { %10281 = vpow2.f32 %v9459_v19 }
0x2583   :  { %v10282_v34 = vpop.eup %10281 }
0x2584   :  { %v7646_v20 = vadd.f32 1.0, %v10282_v34 }
0x2586   :  { %10283 = vrcp.f32 %v7646_v20 }
0x2590   :  { %v10284_v22 = vpop.eup %10283 }
0x2591   :  { %v7655_v39 = vmul.f32 %v10284_v22, %v7562_v7  ;;  %v7664_v56 = vrot.slane %v10284_v22, 1 }
0x25e9   :  { %v7651_v21 = vpop.permute.xlu0 %7650 }
0x25ea   :  { %v7652_v31 = vrot.slane %v7651_v21, 1 }
0x25ec   :  { %10285 = vtanh.f32 %v7652_v31 }
0x25f6   :  { %v10286_v4 = vpop.eup %10285 }
0x25f7   :  { %v7656_v32 = vmul.f32 %v10286_v4, %v10284_v22 }
0x25f9   :  { %7658 = vrot.lane.b32.xlu1 %v7656_v32, %s10403_s1 }
0x266b   :  { %v7659_v54 = vpop.permute.xlu1 %7658 }
0x266c   :  { %v7661_v16 = vadd.f32 %v7659_v54, %v7655_v39 }
0x266e   :  { %10287 = vtanh.f32 %v7661_v16 }
0x2678   :  { %v10288_v55 = vpop.eup %10287 }
0x2679   :  { %7667 = vrot.lane.b32.xlu0 %v10288_v55, %s10403_s1 }
0x26eb   :  { %v7668_v57 = vpop.permute.xlu0 %7667 }
0x26ec   :  { %v12952_v33 = vmul.f32 %v7668_v57, %v7664_v56 }
0x26ee   :  { %v7678_v36 = vpack.c.bf16 %v12952_v33, %v12952_v33 }
0x26f0   :  { %9460 = vmatmul.mubr.msk.bf16.vlgmr.msra.gmra.mrb[88].mxu1 %vm5821_vm11, %v7678_v36 }
0x27c3   :  { %v7716_v59 = vpop.f32.mrb[88].mxu1 }
0x27c4   :  { %v7718_v60 = vpop.f32.mrb[89].mxu1 }
0x27c5   :  { %v7725_v61 = vcombine.low %v7716_v59, %v7718_v60  ;;  %v7720_v38 = vpop.f32.mrb[90].mxu1 }
0x27c6   :  { %v7721_v45 = vpop.f32.mrb[91].mxu1 }
0x27c7   :  { %v7732_v46 = vrot.slane %v7725_v61, %v12602_v6 }
0x27c9   :  { %v7739_v48 = vrot.slane %v7732_v46, %v12602_v6 }
0x27cb   :  { %v7741_v40 = vadd.f32 %v7739_v48, %v7677_v50 }
0x27cd   :  { %7749 = vrot.lane.b32.xlu1 %v7741_v40, %s10403_s1  ;;  %v9461_v53 = vmul.f32 -1.442695, %v7741_v40 }
0x27cf   :  { %10289 = vpow2.f32 %v9461_v53 }
0x27d9   :  { %v10290_v44 = vpop.eup %10289 }
0x27da   :  { %v7745_v49 = vadd.f32 1.0, %v10290_v44 }
0x27dc   :  { %10291 = vrcp.f32 %v7745_v49 }
0x27e6   :  { %v10292_v47 = vpop.eup %10291 }
0x27e7   :  { %v7754_v63 = vmul.f32 %v10292_v47, %v7661_v16  ;;  %v7763_v3 = vrot.slane %v10292_v47, 1 }
0x283f   :  { %v7750_v51 = vpop.permute.xlu1 %7749 }
0x2840   :  { %v7751_v52 = vrot.slane %v7750_v51, 1 }
0x2842   :  { %10293 = vtanh.f32 %v7751_v52 }
0x284c   :  { %v10294_v41 = vpop.eup %10293 }
0x284d   :  { %v7755_v62 = vmul.f32 %v10294_v41, %v10292_v47 }
0x284f   :  { %7757 = vrot.lane.b32.xlu0 %v7755_v62, %s10403_s1 }
0x28c1   :  { %v7758_v0 = vpop.permute.xlu0 %7757 }
0x28c2   :  { %v7760_v1 = vadd.f32 %v7758_v0, %v7754_v63 }
0x28c4   :  { %10295 = vtanh.f32 %v7760_v1 }
0x28ce   :  { %v10296_v58 = vpop.eup %10295 }
0x28cf   :  { %7766 = vrot.lane.b32.xlu1 %v10296_v58, %s10403_s1 }
0x2941   :  { %v7767_v5 = vpop.permute.xlu1 %7766 }
0x2942   :  { %v7769_v7 = vmul.f32 %v7767_v5, %v7763_v3 }
0x2944   :  { %v7777_v10 = vpack.c.bf16 %v7769_v7, %v7769_v7 }
0x2946   :  { %9462 = vmatmul.mubr.msk.bf16.vlgmr.msra.gmra.mrb[92].mxu0 %vm5821_vm11, %v7777_v10 }
0x2a19   :  { %v7815_v14 = vpop.f32.mrb[92].mxu0 }
0x2a1a   :  { %v7817_v27 = vpop.f32.mrb[93].mxu0 }
0x2a1b   :  { %v7824_v23 = vcombine.low %v7815_v14, %v7817_v27  ;;  %v7819_v24 = vpop.f32.mrb[94].mxu0 }
0x2a1c   :  { %v7820_v25 = vpop.f32.mrb[95].mxu0 }
0x2a1d   :  { %v7831_v26 = vrot.slane %v7824_v23, %v12602_v6 }
0x2a1f   :  { %v7838_v28 = vrot.slane %v7831_v26, %v12602_v6 }
0x2a21   :  { %v7840_v17 = vadd.f32 %v7838_v28, %v7776_v29 }
0x2a23   :  { %7848 = vrot.lane.b32.xlu0 %v7840_v17, %s10403_s1  ;;  %v9463_v2 = vmul.f32 -1.442695, %v7840_v17 }
0x2a25   :  { %10297 = vpow2.f32 %v9463_v2 }
0x2a2f   :  { %v10298_v18 = vpop.eup %10297 }
0x2a30   :  { %v7844_v30 = vadd.f32 1.0, %v10298_v18 }
0x2a32   :  { %10299 = vrcp.f32 %v7844_v30 }
0x2a3c   :  { %v10300_v20 = vpop.eup %10299 }
0x2a3d   :  { %v7853_v6 = vmul.f32 %v10300_v20, %v7760_v1 }
0x2a95   :  { %v7849_v19 = vpop.permute.xlu0 %7848 }
0x2a96   :  { %v7850_v34 = vrot.slane %v7849_v19, 1 }
0x2a98   :  { %10301 = vtanh.f32 %v7850_v34 }
0x2aa2   :  { %v10302_v21 = vpop.eup %10301 }
0x2aa3   :  { %v7854_v31 = vmul.f32 %v10302_v21, %v10300_v20 }
0x2aa5   :  { %7856 = vrot.lane.b32.xlu1 %v7854_v31, %s10403_s1 }
0x2aa9   :  { %7169 = vrot.lane.b32.xlu1 %v12853_v9, %s10403_s1 }
0x2aad   :  { %7270 = vrot.lane.b32.xlu1 %v12875_v42, %s10403_s1 }
0x2ab1   :  { %7574 = vrot.lane.b32.xlu1 %v12934_v15, %s10403_s1 }
0x2ab5   :  { %7672 = vrot.lane.b32.xlu1 %v12952_v33, %s10403_s1 }
0x2b17   :  { %v7857_v22 = vpop.permute.xlu1 %7856 }
0x2b18   :  { %v7859_v9 = vadd.f32 %v7857_v22, %v7853_v6 }
0x2b1a   :  { %10303 = vtanh.f32 %v7859_v9 }
0x2b1b   :  { %v7170_v39 = vpop.permute.xlu1 %7169 }
0x2b1c   :  { %7175 = vst.msk [vmem:[#allocation4 + $0x3] sm:$0x1] %vm12979_vm3, %v7170_v39 }
0x2b1d   :  { %7280 = vst.msk [vmem:[#allocation4 + $0x3] sm:$0x1] %vm12983_vm4, %v12875_v42  ;;  %v7862_v42 = vrot.slane %v10300_v20, 1 }
0x2b1e   :  { %7770 = vst.msk [vmem:[#allocation4 + $0x3] sm:$0x1] %vm12849_vm14, %v7769_v7 }
0x2b1f   :  { %v7271_v16 = vpop.permute.xlu1 %7270 }
0x2b20   :  { %7276 = vst.msk [vmem:[#allocation4] sm:$0x1] %vm12994_vm7, %v7271_v16 }
0x2b23   :  { %v7575_v56 = vpop.permute.xlu1 %7574 }
0x2b24   :  { %v10304_v12 = vpop.eup %10303 }
0x2b25   :  { %7865 = vrot.lane.b32.xlu0 %v10304_v12, %s10403_s1 }
0x2b29   :  { %7376 = vrot.lane.b32.xlu0 %v12894_v11, %s10403_s1  ;;  %v7673_v11 = vpop.permute.xlu1 %7672 }
0x2b2d   :  { %7474 = vrot.lane.b32.xlu0 %v12916_v43, %s10403_s1 }
0x2b31   :  { %7772 = vrot.lane.b32.xlu0 %v7769_v7, %s10403_s1 }
0x2b97   :  { %v7866_v55 = vpop.permute.xlu0 %7865 }
0x2b98   :  { %v7868_v57 = vmul.f32 %v7866_v55, %v7862_v42 }
0x2b9a   :  { %7870 = vrot.lane.b32.xlu0 %v7868_v57, %s10403_s1 }
0x2b9b   :  { %v7377_v36 = vpop.permute.xlu0 %7376 }
0x2b9c   :  { %7379 = vst.msk [vmem:[#allocation4 + $0x2] sm:$0x1] %vm12979_vm3, %v7377_v36 }
0x2b9d   :  { %7478 = vst.msk [vmem:[#allocation4 + $0x2] sm:$0x1] %vm12983_vm4, %v12916_v43 }
0x2b9e   :  { %7572 = vst.msk [vmem:[#allocation4 + $0x2] sm:$0x1] %vm12849_vm14, %v12934_v15 }
0x2b9f   :  { %7675 = vst.msk [vmem:[#allocation4 + $0x2] sm:$0x1] %vm12994_vm7, %v7673_v11  ;;  %v7475_v59 = vpop.permute.xlu0 %7474 }
0x2ba0   :  { %7477 = vst.msk [vmem:[#allocation4 + $0x1] sm:$0x1] %vm12994_vm7, %v7475_v59 }
0x2ba1   :  { %7577 = vst.msk [vmem:[#allocation4 + $0x1] sm:$0x1] %vm12979_vm3, %v7575_v56 }
0x2ba2   :  { %7676 = vst.msk [vmem:[#allocation4 + $0x1] sm:$0x1] %vm12983_vm4, %v12952_v33 }
0x2ba3   :  { %v7773_v43 = vpop.permute.xlu0 %7772 }
0x2ba4   :  { %7775 = vst.msk [vmem:[#allocation4] sm:$0x1] %vm12979_vm3, %v7773_v43 }
0x2ba5   :  { %7874 = vst.msk [vmem:[#allocation4] sm:$0x1] %vm12983_vm4, %v7868_v57 }
0x2c0c   :  { %v7871_v8 = vpop.permute.xlu0 %7870 }
0x2c0d   :  { %7873 = vst.msk [vmem:[#allocation4 + $0x3] sm:$0x1] %vm12994_vm7, %v7871_v8 }
0x2c0e   :  { %10391 = dma.done.wait [#allocation6], 32768 }
0x2c0f   :  { %10392 = vsyncadd [#allocation6], 4294934528  ;;  %v7906_v15 = vld [vmem:[#allocation5 + $0x8] sm:$0xff]  ;;  %v7908_v60 = vld [vmem:[#allocation5 + $0x18] sm:$0xff]  ;;  %vm9212_vm8 = vcmask 8192  }
0x2c10   :  { %v7905_v61 = vld [vmem:[#allocation5] sm:$0xff]  ;;  %8203 = vmatprep.subr.bf16.mxu1 %v7906_v15  ;;  %8285 = vmatprep.subr.bf16.mxu0 %v7908_v60  ;;  %v7907_v38 = vld [vmem:[#allocation5 + $0x10] sm:$0xff]  ;;  %v7914_v33 = vld [vmem:[#allocation5 + $0x48] sm:$0xff] }
0x2c11   :  { %v7916_v45 = vld [vmem:[#allocation5 + $0x58] sm:$0xff]  ;;  %8204 = vmatpush1.bf16.msra.mxu1 %v7905_v61  ;;  %8286 = vmatpush1.bf16.msra.mxu0 %v7907_v38  ;;  %v7913_v46 = vld [vmem:[#allocation5 + $0x40] sm:$0xff]  ;;  %v7915_v48 = vld [vmem:[#allocation5 + $0x50] sm:$0xff] }
0x2c12   :  { %8205 = vmatprep.subr.bf16.mxu1 %v7914_v33  ;;  %8287 = vmatprep.subr.bf16.mxu0 %v7916_v45  ;;  %v7922_v50 = vld [vmem:[#allocation5 + $0x88] sm:$0xff]  ;;  %v7924_v40 = vld [vmem:[#allocation5 + $0x98] sm:$0xff]  ;;  %v7921_v53 = vld [vmem:[#allocation5 + $0x80] sm:$0xff]  ;;  %v7895_v33 = vsub.s32 3, %v12480_v13 }
0x2c13   :  { %v7923_v44 = vld [vmem:[#allocation5 + $0x90] sm:$0xff]  ;;  %v7930_v49 = vld [vmem:[#allocation5 + $0xc8] sm:$0xff]  ;;  %v7932_v51 = vld [vmem:[#allocation5 + $0xd8] sm:$0xff] }
0x2c14   :  { %v7929_v52 = vld [vmem:[#allocation5 + $0xc0] sm:$0xff]  ;;  %v7931_v47 = vld [vmem:[#allocation5 + $0xd0] sm:$0xff]  ;;  %v7938_v41 = vld [vmem:[#allocation5 + $0x108] sm:$0xff] }
0x2c15   :  { %8206 = vmatpush1.bf16.msra.mxu1 %v7913_v46  ;;  %8288 = vmatpush1.bf16.msra.mxu0 %v7915_v48  ;;  %v7940_v62 = vld [vmem:[#allocation5 + $0x118] sm:$0xff]  ;;  %v7937_v63 = vld [vmem:[#allocation5 + $0x100] sm:$0xff]  ;;  %v7939_v0 = vld [vmem:[#allocation5 + $0x110] sm:$0xff] }
0x2c16   :  { %8207 = vmatprep.subr.bf16.mxu1 %v7922_v50  ;;  %8289 = vmatprep.subr.bf16.mxu0 %v7924_v40  ;;  %v7946_v1 = vld [vmem:[#allocation5 + $0x148] sm:$0xff]  ;;  %v7948_v58 = vld [vmem:[#allocation5 + $0x158] sm:$0xff]  ;;  %v7945_v3 = vld [vmem:[#allocation5 + $0x140] sm:$0xff] }
0x2c17   :  { %v7947_v5 = vld [vmem:[#allocation5 + $0x150] sm:$0xff]  ;;  %v7954_v7 = vld [vmem:[#allocation5 + $0x188] sm:$0xff]  ;;  %v7956_v10 = vld [vmem:[#allocation5 + $0x198] sm:$0xff] }
0x2c18   :  { %v13032_v14 = vld [vmem:[#allocation4] sm:$0xf]  ;;  %v7953_v23 = vld [vmem:[#allocation5 + $0x180] sm:$0xff]  ;;  %v7955_v24 = vld [vmem:[#allocation5 + $0x190] sm:$0xff] }
0x2c19   :  { %8208 = vmatpush1.bf16.msra.mxu1 %v7921_v53  ;;  %8290 = vmatpush1.bf16.msra.mxu0 %v7923_v44  ;;  %v7888_v27 = vrot.slane %v13032_v14, %v12597_v37  ;;  %v7962_v25 = vld [vmem:[#allocation5 + $0x1c8] sm:$0xff]  ;;  %v7964_v26 = vld [vmem:[#allocation5 + $0x1d8] sm:$0xff]  ;;  %v7961_v29 = vld [vmem:[#allocation5 + $0x1c0] sm:$0xff]  ;;  %v7884_v45 = vrot.slane %v13032_v14, %v12591_v35  ;;  %v7896_v53 = vrot.slane %v13032_v14, %v7895_v33 }
0x2c1a   :  { %8209 = vmatprep.subr.bf16.mxu1 %v7930_v49  ;;  %8291 = vmatprep.subr.bf16.mxu0 %v7932_v51  ;;  %v7963_v17 = vld [vmem:[#allocation5 + $0x1d0] sm:$0xff]  ;;  %v7970_v2 = vld [vmem:[#allocation5 + $0x208] sm:$0xff]  ;;  %v7972_v18 = vld [vmem:[#allocation5 + $0x218] sm:$0xff] }
0x2c1b   :  { %v13036_v28 = vpack.c.bf16 %v7888_v27, %v7888_v27  ;;  %v7969_v30 = vld [vmem:[#allocation5 + $0x200] sm:$0xff]  ;;  %v7971_v19 = vld [vmem:[#allocation5 + $0x210] sm:$0xff]  ;;  %v7978_v34 = vld [vmem:[#allocation5 + $0x248] sm:$0xff]  ;;  %v13046_v44 = vpack.c.bf16 %v7884_v45, %v7884_v45 }
0x2c1c   :  { %v7980_v20 = vld [vmem:[#allocation5 + $0x258] sm:$0xff]  ;;  %v7977_v21 = vld [vmem:[#allocation5 + $0x240] sm:$0xff]  ;;  %v7979_v31 = vld [vmem:[#allocation5 + $0x250] sm:$0xff] }
0x2c1d   :  { %8210 = vmatpush1.bf16.msra.mxu1 %v7929_v52  ;;  %8292 = vmatpush1.bf16.msra.mxu0 %v7931_v47  ;;  %v7986_v6 = vld [vmem:[#allocation5 + $0x288] sm:$0xff]  ;;  %v7988_v22 = vld [vmem:[#allocation5 + $0x298] sm:$0xff]  ;;  %v7985_v9 = vld [vmem:[#allocation5 + $0x280] sm:$0xff] }
0x2c1e   :  { %8211 = vmatprep.subr.bf16.mxu1 %v7938_v41  ;;  %8293 = vmatprep.subr.bf16.mxu0 %v7940_v62  ;;  %v7987_v4 = vld [vmem:[#allocation5 + $0x290] sm:$0xff]  ;;  %v7994_v32 = vld [vmem:[#allocation5 + $0x2c8] sm:$0xff]  ;;  %v7996_v39 = vld [vmem:[#allocation5 + $0x2d8] sm:$0xff]  ;;  %v13048_v41 = vpack.c.bf16 %v7896_v53, %v7896_v53 }
0x2c1f   :  { %8235 = vmatprep.mubr.bf16.mxu1 %v13036_v28  ;;  %8317 = vmatprep.mubr.bf16.mxu0 %v13036_v28  ;;  %v7993_v54 = vld [vmem:[#allocation5 + $0x2c0] sm:$0xff]  ;;  %v7995_v16 = vld [vmem:[#allocation5 + $0x2d0] sm:$0xff]  ;;  %v8002_v12 = vld [vmem:[#allocation5 + $0x308] sm:$0xff] }
0x2c20   :  { %v8004_v42 = vld [vmem:[#allocation5 + $0x318] sm:$0xff]  ;;  %v8001_v55 = vld [vmem:[#allocation5 + $0x300] sm:$0xff]  ;;  %v8003_v56 = vld [vmem:[#allocation5 + $0x310] sm:$0xff] }
0x2c21   :  { %8212 = vmatpush1.bf16.msra.mxu1 %v7937_v63  ;;  %8294 = vmatpush1.bf16.msra.mxu0 %v7939_v0  ;;  %v8010_v57 = vld [vmem:[#allocation5 + $0x348] sm:$0xff]  ;;  %v8012_v36 = vld [vmem:[#allocation5 + $0x358] sm:$0xff]  ;;  %v8009_v11 = vld [vmem:[#allocation5 + $0x340] sm:$0xff] }
0x2c22   :  { %8213 = vmatprep.subr.bf16.mxu1 %v7946_v1  ;;  %8295 = vmatprep.subr.bf16.mxu0 %v7948_v58  ;;  %v8011_v59 = vld [vmem:[#allocation5 + $0x350] sm:$0xff]  ;;  %v8018_v43 = vld [vmem:[#allocation5 + $0x388] sm:$0xff]  ;;  %v8020_v8 = vld [vmem:[#allocation5 + $0x398] sm:$0xff] }
0x2c23   :  { %v8017_v15 = vld [vmem:[#allocation5 + $0x380] sm:$0xff]  ;;  %v8019_v60 = vld [vmem:[#allocation5 + $0x390] sm:$0xff]  ;;  %v8026_v61 = vld [vmem:[#allocation5 + $0x3c8] sm:$0xff] }
0x2c24   :  { %v8028_v38 = vld [vmem:[#allocation5 + $0x3d8] sm:$0xff]  ;;  %v8025_v46 = vld [vmem:[#allocation5 + $0x3c0] sm:$0xff]  ;;  %v8027_v48 = vld [vmem:[#allocation5 + $0x3d0] sm:$0xff] }
0x2c25   :  { %8214 = vmatpush1.bf16.msra.mxu1 %v7945_v3  ;;  %8296 = vmatpush1.bf16.msra.mxu0 %v7947_v5  ;;  %v8034_v50 = vld [vmem:[#allocation5 + $0x408] sm:$0xff]  ;;  %v8036_v40 = vld [vmem:[#allocation5 + $0x418] sm:$0xff]  ;;  %v8033_v49 = vld [vmem:[#allocation5 + $0x400] sm:$0xff] }
0x2c26   :  { %8215 = vmatprep.subr.bf16.mxu1 %v7954_v7  ;;  %8297 = vmatprep.subr.bf16.mxu0 %v7956_v10  ;;  %v8035_v51 = vld [vmem:[#allocation5 + $0x410] sm:$0xff]  ;;  %v8042_v52 = vld [vmem:[#allocation5 + $0x448] sm:$0xff]  ;;  %v8044_v47 = vld [vmem:[#allocation5 + $0x458] sm:$0xff] }
0x2c27   :  { %v8041_v62 = vld [vmem:[#allocation5 + $0x440] sm:$0xff]  ;;  %v8043_v63 = vld [vmem:[#allocation5 + $0x450] sm:$0xff]  ;;  %v8050_v0 = vld [vmem:[#allocation5 + $0x488] sm:$0xff] }
0x2c28   :  { %v8052_v1 = vld [vmem:[#allocation5 + $0x498] sm:$0xff]  ;;  %v8049_v58 = vld [vmem:[#allocation5 + $0x480] sm:$0xff]  ;;  %v8051_v3 = vld [vmem:[#allocation5 + $0x490] sm:$0xff] }
0x2c29   :  { %8216 = vmatpush1.bf16.msra.mxu1 %v7953_v23  ;;  %8298 = vmatpush1.bf16.msra.mxu0 %v7955_v24  ;;  %v8058_v5 = vld [vmem:[#allocation5 + $0x4c8] sm:$0xff]  ;;  %v8060_v7 = vld [vmem:[#allocation5 + $0x4d8] sm:$0xff]  ;;  %v8057_v10 = vld [vmem:[#allocation5 + $0x4c0] sm:$0xff] }
0x2c2a   :  { %8217 = vmatprep.subr.bf16.mxu1 %v7962_v25  ;;  %8299 = vmatprep.subr.bf16.mxu0 %v7964_v26  ;;  %v8059_v27 = vld [vmem:[#allocation5 + $0x4d0] sm:$0xff]  ;;  %v8066_v23 = vld [vmem:[#allocation5 + $0x508] sm:$0xff]  ;;  %v8068_v24 = vld [vmem:[#allocation5 + $0x518] sm:$0xff] }
0x2c2b   :  { %v8065_v25 = vld [vmem:[#allocation5 + $0x500] sm:$0xff]  ;;  %v8067_v26 = vld [vmem:[#allocation5 + $0x510] sm:$0xff]  ;;  %v8138_v45 = vld [vmem:[#allocation5 + $0x748] sm:$0xff] }
0x2c2c   :  { %v8148_v53 = vld [vmem:[#allocation5 + $0x798] sm:$0xff] }
0x2c2d   :  { %8218 = vmatpush1.bf16.msra.mxu1 %v7961_v29  ;;  %8300 = vmatpush1.bf16.msra.mxu0 %v7963_v17  ;;  %v8074_v29 = vld [vmem:[#allocation5 + $0x548] sm:$0xff]  ;;  %v8076_v17 = vld [vmem:[#allocation5 + $0x558] sm:$0xff] }
0x2c2e   :  { %8219 = vmatprep.subr.bf16.mxu1 %v7970_v2  ;;  %8301 = vmatprep.subr.bf16.mxu0 %v7972_v18  ;;  %v8073_v2 = vld [vmem:[#allocation5 + $0x540] sm:$0xff]  ;;  %v8075_v18 = vld [vmem:[#allocation5 + $0x550] sm:$0xff] }
0x2c31   :  { %8220 = vmatpush1.bf16.msra.mxu1 %v7969_v30  ;;  %8302 = vmatpush1.bf16.msra.mxu0 %v7971_v19  ;;  %v8082_v30 = vld [vmem:[#allocation5 + $0x588] sm:$0xff]  ;;  %v8084_v19 = vld [vmem:[#allocation5 + $0x598] sm:$0xff] }
0x2c32   :  { %8221 = vmatprep.subr.bf16.mxu1 %v7978_v34  ;;  %8303 = vmatprep.subr.bf16.mxu0 %v7980_v20  ;;  %v8081_v34 = vld [vmem:[#allocation5 + $0x580] sm:$0xff]  ;;  %v8083_v20 = vld [vmem:[#allocation5 + $0x590] sm:$0xff] }
0x2c35   :  { %8222 = vmatpush1.bf16.msra.mxu1 %v7977_v21  ;;  %8304 = vmatpush1.bf16.msra.mxu0 %v7979_v31  ;;  %v8090_v21 = vld [vmem:[#allocation5 + $0x5c8] sm:$0xff]  ;;  %v8092_v31 = vld [vmem:[#allocation5 + $0x5d8] sm:$0xff] }
0x2c36   :  { %8223 = vmatprep.subr.bf16.mxu1 %v7986_v6  ;;  %8305 = vmatprep.subr.bf16.mxu0 %v7988_v22  ;;  %v8089_v6 = vld [vmem:[#allocation5 + $0x5c0] sm:$0xff]  ;;  %v8091_v22 = vld [vmem:[#allocation5 + $0x5d0] sm:$0xff] }
0x2c39   :  { %8224 = vmatpush1.bf16.msra.mxu1 %v7985_v9  ;;  %8306 = vmatpush1.bf16.msra.mxu0 %v7987_v4  ;;  %v8098_v9 = vld [vmem:[#allocation5 + $0x608] sm:$0xff]  ;;  %v8100_v4 = vld [vmem:[#allocation5 + $0x618] sm:$0xff] }
0x2c3a   :  { %8225 = vmatprep.subr.bf16.mxu1 %v7994_v32  ;;  %8307 = vmatprep.subr.bf16.mxu0 %v7996_v39  ;;  %v8097_v32 = vld [vmem:[#allocation5 + $0x600] sm:$0xff]  ;;  %v8099_v39 = vld [vmem:[#allocation5 + $0x610] sm:$0xff] }
0x2c3d   :  { %8226 = vmatpush1.bf16.msra.mxu1 %v7993_v54  ;;  %8308 = vmatpush1.bf16.msra.mxu0 %v7995_v16  ;;  %v8106_v54 = vld [vmem:[#allocation5 + $0x648] sm:$0xff]  ;;  %v8108_v16 = vld [vmem:[#allocation5 + $0x658] sm:$0xff] }
0x2c3e   :  { %8227 = vmatprep.subr.bf16.mxu1 %v8002_v12  ;;  %8309 = vmatprep.subr.bf16.mxu0 %v8004_v42  ;;  %v8105_v12 = vld [vmem:[#allocation5 + $0x640] sm:$0xff]  ;;  %v8107_v42 = vld [vmem:[#allocation5 + $0x650] sm:$0xff] }
0x2c41   :  { %8228 = vmatpush1.bf16.msra.mxu1 %v8001_v55  ;;  %8310 = vmatpush1.bf16.msra.mxu0 %v8003_v56  ;;  %v8114_v55 = vld [vmem:[#allocation5 + $0x688] sm:$0xff]  ;;  %v8116_v56 = vld [vmem:[#allocation5 + $0x698] sm:$0xff] }
0x2c42   :  { %8229 = vmatprep.subr.bf16.mxu1 %v8010_v57  ;;  %8311 = vmatprep.subr.bf16.mxu0 %v8012_v36  ;;  %v8113_v57 = vld [vmem:[#allocation5 + $0x680] sm:$0xff]  ;;  %v8115_v36 = vld [vmem:[#allocation5 + $0x690] sm:$0xff] }
0x2c45   :  { %8230 = vmatpush1.bf16.msra.mxu1 %v8009_v11  ;;  %8312 = vmatpush1.bf16.msra.mxu0 %v8011_v59  ;;  %v8122_v11 = vld [vmem:[#allocation5 + $0x6c8] sm:$0xff]  ;;  %v8124_v59 = vld [vmem:[#allocation5 + $0x6d8] sm:$0xff] }
0x2c46   :  { %8231 = vmatprep.subr.bf16.mxu1 %v8018_v43  ;;  %8313 = vmatprep.subr.bf16.mxu0 %v8020_v8  ;;  %v8121_v43 = vld [vmem:[#allocation5 + $0x6c0] sm:$0xff]  ;;  %v8123_v8 = vld [vmem:[#allocation5 + $0x6d0] sm:$0xff] }
0x2c49   :  { %8232 = vmatpush1.bf16.msra.mxu1 %v8017_v15  ;;  %8314 = vmatpush1.bf16.msra.mxu0 %v8019_v60  ;;  %v8130_v15 = vld [vmem:[#allocation5 + $0x708] sm:$0xff]  ;;  %v8132_v60 = vld [vmem:[#allocation5 + $0x718] sm:$0xff] }
0x2c4a   :  { %8233 = vmatprep.subr.bf16.mxu1 %v8026_v61  ;;  %8315 = vmatprep.subr.bf16.mxu0 %v8028_v38  ;;  %v8129_v61 = vld [vmem:[#allocation5 + $0x700] sm:$0xff]  ;;  %v8131_v38 = vld [vmem:[#allocation5 + $0x710] sm:$0xff] }
0x2c4d   :  { %8234 = vmatpush1.bf16.msra.mxu1 %v8025_v46  ;;  %8316 = vmatpush1.bf16.msra.mxu0 %v8027_v48  ;;  %v8140_v46 = vld [vmem:[#allocation5 + $0x758] sm:$0xff]  ;;  %v8137_v48 = vld [vmem:[#allocation5 + $0x740] sm:$0xff] }
0x2c4e   :  { %8244 = vmatprep.subr.bf16.mxu1 %v8034_v50  ;;  %8326 = vmatprep.subr.bf16.mxu0 %v8036_v40  ;;  %v8139_v50 = vld [vmem:[#allocation5 + $0x750] sm:$0xff]  ;;  %v8146_v40 = vld [vmem:[#allocation5 + $0x788] sm:$0xff] }
0x2c50   :  { %8236 = vmatmul.mubr.bf16.vlgmr.msra.gmra.mrb[92].mxu1 %v13046_v44  ;;  %8318 = vmatmul.mubr.bf16.vlgmr.msra.gmra.mrb[96].mxu0 %v13046_v44 }
0x2c51   :  { %8245 = vmatpush1.bf16.msra.mxu1 %v8033_v49  ;;  %8327 = vmatpush1.bf16.msra.mxu0 %v8035_v51  ;;  %v8145_v49 = vld [vmem:[#allocation5 + $0x780] sm:$0xff]  ;;  %v7891_v51 = vsub.s32 2, %v12480_v13 }
0x2c52   :  { %8246 = vmatprep.subr.bf16.mxu1 %v8042_v52  ;;  %8328 = vmatprep.subr.bf16.mxu0 %v8044_v47  ;;  %v8147_v52 = vld [vmem:[#allocation5 + $0x790] sm:$0xff]  ;;  %v8154_v47 = vld [vmem:[#allocation5 + $0x7c8] sm:$0xff] }
0x2c53   :  { %8276 = vmatprep.mubr.bf16.mxu1 %v13048_v41  ;;  %8358 = vmatprep.mubr.bf16.mxu0 %v13048_v41 }
0x2c55   :  { %8247 = vmatpush1.bf16.msra.mxu1 %v8041_v62  ;;  %8329 = vmatpush1.bf16.msra.mxu0 %v8043_v63  ;;  %v8156_v62 = vld [vmem:[#allocation5 + $0x7d8] sm:$0xff]  ;;  %v8153_v63 = vld [vmem:[#allocation5 + $0x7c0] sm:$0xff] }
0x2c56   :  { %8248 = vmatprep.subr.bf16.mxu1 %v8050_v0  ;;  %8330 = vmatprep.subr.bf16.mxu0 %v8052_v1  ;;  %v7892_v0 = vrot.slane %v13032_v14, %v7891_v51  ;;  %v8155_v1 = vld [vmem:[#allocation5 + $0x7d0] sm:$0xff]  ;;  %v7917_v14 = vld [vmem:[#allocation5 + $0x60] sm:$0xff] }
0x2c59   :  { %8249 = vmatpush1.bf16.msra.mxu1 %v8049_v58  ;;  %8331 = vmatpush1.bf16.msra.mxu0 %v8051_v3  ;;  %v7910_v58 = vld [vmem:[#allocation5 + $0x28] sm:$0xff]  ;;  %v7912_v3 = vld [vmem:[#allocation5 + $0x38] sm:$0xff] }
0x2c5a   :  { %8250 = vmatprep.subr.bf16.mxu1 %v8058_v5  ;;  %8332 = vmatprep.subr.bf16.mxu0 %v8060_v7  ;;  %v13058_v5 = vpack.c.bf16 %v7892_v0, %v7892_v0  ;;  %v7909_v7 = vld [vmem:[#allocation5 + $0x20] sm:$0xff] }
0x2c5b   :  { %v8013_v0 = vld [vmem:[#allocation5 + $0x360] sm:$0xff] }
0x2c5d   :  { %8251 = vmatpush1.bf16.msra.mxu1 %v8057_v10  ;;  %8333 = vmatpush1.bf16.msra.mxu0 %v8059_v27  ;;  %v7911_v10 = vld [vmem:[#allocation5 + $0x30] sm:$0xff]  ;;  %v7918_v27 = vld [vmem:[#allocation5 + $0x68] sm:$0xff] }
0x2c5e   :  { %8252 = vmatprep.subr.bf16.mxu1 %v8066_v23  ;;  %8334 = vmatprep.subr.bf16.mxu0 %v8068_v24  ;;  %v7920_v23 = vld [vmem:[#allocation5 + $0x78] sm:$0xff]  ;;  %v7919_v24 = vld [vmem:[#allocation5 + $0x70] sm:$0xff] }
0x2c61   :  { %8253 = vmatpush1.bf16.msra.mxu1 %v8065_v25  ;;  %8335 = vmatpush1.bf16.msra.mxu0 %v8067_v26  ;;  %v7926_v25 = vld [vmem:[#allocation5 + $0xa8] sm:$0xff]  ;;  %v7928_v26 = vld [vmem:[#allocation5 + $0xb8] sm:$0xff] }
0x2c62   :  { %8254 = vmatprep.subr.bf16.mxu1 %v8074_v29  ;;  %8336 = vmatprep.subr.bf16.mxu0 %v8076_v17  ;;  %v7925_v29 = vld [vmem:[#allocation5 + $0xa0] sm:$0xff]  ;;  %v7927_v17 = vld [vmem:[#allocation5 + $0xb0] sm:$0xff] }
0x2c65   :  { %8255 = vmatpush1.bf16.msra.mxu1 %v8073_v2  ;;  %8337 = vmatpush1.bf16.msra.mxu0 %v8075_v18  ;;  %v7934_v2 = vld [vmem:[#allocation5 + $0xe8] sm:$0xff]  ;;  %v7936_v18 = vld [vmem:[#allocation5 + $0xf8] sm:$0xff] }
0x2c66   :  { %8256 = vmatprep.subr.bf16.mxu1 %v8082_v30  ;;  %8338 = vmatprep.subr.bf16.mxu0 %v8084_v19  ;;  %v7933_v30 = vld [vmem:[#allocation5 + $0xe0] sm:$0xff]  ;;  %v7935_v19 = vld [vmem:[#allocation5 + $0xf0] sm:$0xff] }
0x2c69   :  { %8257 = vmatpush1.bf16.msra.mxu1 %v8081_v34  ;;  %8339 = vmatpush1.bf16.msra.mxu0 %v8083_v20  ;;  %v7942_v34 = vld [vmem:[#allocation5 + $0x128] sm:$0xff]  ;;  %v7944_v20 = vld [vmem:[#allocation5 + $0x138] sm:$0xff] }
0x2c6a   :  { %8258 = vmatprep.subr.bf16.mxu1 %v8090_v21  ;;  %8340 = vmatprep.subr.bf16.mxu0 %v8092_v31  ;;  %v7943_v21 = vld [vmem:[#allocation5 + $0x130] sm:$0xff]  ;;  %v7950_v31 = vld [vmem:[#allocation5 + $0x168] sm:$0xff] }
0x2c6d   :  { %8259 = vmatpush1.bf16.msra.mxu1 %v8089_v6  ;;  %8341 = vmatpush1.bf16.msra.mxu0 %v8091_v22  ;;  %v7952_v6 = vld [vmem:[#allocation5 + $0x178] sm:$0xff]  ;;  %v7949_v22 = vld [vmem:[#allocation5 + $0x160] sm:$0xff] }
0x2c6e   :  { %8260 = vmatprep.subr.bf16.mxu1 %v8098_v9  ;;  %8342 = vmatprep.subr.bf16.mxu0 %v8100_v4  ;;  %v7951_v9 = vld [vmem:[#allocation5 + $0x170] sm:$0xff]  ;;  %v7958_v4 = vld [vmem:[#allocation5 + $0x1a8] sm:$0xff] }
0x2c71   :  { %8261 = vmatpush1.bf16.msra.mxu1 %v8097_v32  ;;  %8343 = vmatpush1.bf16.msra.mxu0 %v8099_v39  ;;  %v7960_v32 = vld [vmem:[#allocation5 + $0x1b8] sm:$0xff]  ;;  %v7957_v39 = vld [vmem:[#allocation5 + $0x1a0] sm:$0xff] }
0x2c72   :  { %8262 = vmatprep.subr.bf16.mxu1 %v8106_v54  ;;  %8344 = vmatprep.subr.bf16.mxu0 %v8108_v16  ;;  %v7959_v54 = vld [vmem:[#allocation5 + $0x1b0] sm:$0xff]  ;;  %v7966_v16 = vld [vmem:[#allocation5 + $0x1e8] sm:$0xff] }
0x2c75   :  { %8263 = vmatpush1.bf16.msra.mxu1 %v8105_v12  ;;  %8345 = vmatpush1.bf16.msra.mxu0 %v8107_v42  ;;  %v7968_v12 = vld [vmem:[#allocation5 + $0x1f8] sm:$0xff]  ;;  %v7965_v42 = vld [vmem:[#allocation5 + $0x1e0] sm:$0xff] }
0x2c76   :  { %8264 = vmatprep.subr.bf16.mxu1 %v8114_v55  ;;  %8346 = vmatprep.subr.bf16.mxu0 %v8116_v56  ;;  %v7967_v55 = vld [vmem:[#allocation5 + $0x1f0] sm:$0xff]  ;;  %v7974_v56 = vld [vmem:[#allocation5 + $0x228] sm:$0xff] }
0x2c79   :  { %8265 = vmatpush1.bf16.msra.mxu1 %v8113_v57  ;;  %8347 = vmatpush1.bf16.msra.mxu0 %v8115_v36  ;;  %v7976_v57 = vld [vmem:[#allocation5 + $0x238] sm:$0xff]  ;;  %v7973_v36 = vld [vmem:[#allocation5 + $0x220] sm:$0xff] }
0x2c7a   :  { %8266 = vmatprep.subr.bf16.mxu1 %v8122_v11  ;;  %8348 = vmatprep.subr.bf16.mxu0 %v8124_v59  ;;  %v7975_v11 = vld [vmem:[#allocation5 + $0x230] sm:$0xff]  ;;  %v7982_v59 = vld [vmem:[#allocation5 + $0x268] sm:$0xff] }
0x2c7d   :  { %8267 = vmatpush1.bf16.msra.mxu1 %v8121_v43  ;;  %8349 = vmatpush1.bf16.msra.mxu0 %v8123_v8  ;;  %v7984_v43 = vld [vmem:[#allocation5 + $0x278] sm:$0xff]  ;;  %v7981_v8 = vld [vmem:[#allocation5 + $0x260] sm:$0xff] }
0x2c7e   :  { %8268 = vmatprep.subr.bf16.mxu1 %v8130_v15  ;;  %8350 = vmatprep.subr.bf16.mxu0 %v8132_v60  ;;  %v7983_v15 = vld [vmem:[#allocation5 + $0x270] sm:$0xff]  ;;  %v7990_v60 = vld [vmem:[#allocation5 + $0x2a8] sm:$0xff] }
0x2c81   :  { %8269 = vmatpush1.bf16.msra.mxu1 %v8129_v61  ;;  %8351 = vmatpush1.bf16.msra.mxu0 %v8131_v38  ;;  %v7992_v61 = vld [vmem:[#allocation5 + $0x2b8] sm:$0xff]  ;;  %v7989_v38 = vld [vmem:[#allocation5 + $0x2a0] sm:$0xff] }
0x2c82   :  { %8270 = vmatprep.subr.bf16.mxu1 %v8138_v45  ;;  %8352 = vmatprep.subr.bf16.mxu0 %v8140_v46  ;;  %v7991_v45 = vld [vmem:[#allocation5 + $0x2b0] sm:$0xff]  ;;  %v7998_v46 = vld [vmem:[#allocation5 + $0x2e8] sm:$0xff] }
0x2c85   :  { %8271 = vmatpush1.bf16.msra.mxu1 %v8137_v48  ;;  %8353 = vmatpush1.bf16.msra.mxu0 %v8139_v50  ;;  %v8000_v48 = vld [vmem:[#allocation5 + $0x2f8] sm:$0xff]  ;;  %v7997_v50 = vld [vmem:[#allocation5 + $0x2e0] sm:$0xff] }
0x2c86   :  { %8272 = vmatprep.subr.bf16.mxu1 %v8146_v40  ;;  %8354 = vmatprep.subr.bf16.mxu0 %v8148_v53  ;;  %v7999_v40 = vld [vmem:[#allocation5 + $0x2f0] sm:$0xff]  ;;  %v8006_v53 = vld [vmem:[#allocation5 + $0x328] sm:$0xff] }
0x2c89   :  { %8273 = vmatpush1.bf16.msra.mxu1 %v8145_v49  ;;  %8355 = vmatpush1.bf16.msra.mxu0 %v8147_v52  ;;  %v8008_v49 = vld [vmem:[#allocation5 + $0x338] sm:$0xff]  ;;  %v8005_v52 = vld [vmem:[#allocation5 + $0x320] sm:$0xff] }
0x2c8a   :  { %8274 = vmatprep.subr.bf16.mxu1 %v8154_v47  ;;  %8356 = vmatprep.subr.bf16.mxu0 %v8156_v62  ;;  %v8007_v47 = vld [vmem:[#allocation5 + $0x330] sm:$0xff]  ;;  %v8014_v62 = vld [vmem:[#allocation5 + $0x368] sm:$0xff] }
0x2c8d   :  { %8275 = vmatpush1.bf16.msra.mxu1 %v8153_v63  ;;  %8357 = vmatpush1.bf16.msra.mxu0 %v8155_v1  ;;  %v8016_v63 = vld [vmem:[#allocation5 + $0x378] sm:$0xff]  ;;  %v8015_v1 = vld [vmem:[#allocation5 + $0x370] sm:$0xff] }
0x2c8e   :  { %8367 = vmatprep.subr.bf16.mxu1 %v7910_v58  ;;  %8449 = vmatprep.subr.bf16.mxu0 %v7912_v3  ;;  %v8022_v58 = vld [vmem:[#allocation5 + $0x3a8] sm:$0xff]  ;;  %v8024_v3 = vld [vmem:[#allocation5 + $0x3b8] sm:$0xff] }
0x2c90   :  { %8277 = vmatmul.mubr.bf16.vlgmr.msra.gmra.mrb[92].mxu1 %v13058_v5  ;;  %8359 = vmatmul.mubr.bf16.vlgmr.msra.gmra.mrb[96].mxu0 %v13058_v5 }
0x2c91   :  { %8368 = vmatpush1.bf16.msra.mxu1 %v7909_v7  ;;  %8450 = vmatpush1.bf16.msra.mxu0 %v7911_v10  ;;  %v8021_v7 = vld [vmem:[#allocation5 + $0x3a0] sm:$0xff]  ;;  %v8023_v10 = vld [vmem:[#allocation5 + $0x3b0] sm:$0xff] }
0x2c92   :  { %8369 = vmatprep.subr.bf16.mxu1 %v7918_v27  ;;  %8451 = vmatprep.subr.bf16.mxu0 %v7920_v23  ;;  %v8030_v27 = vld [vmem:[#allocation5 + $0x3e8] sm:$0xff]  ;;  %v8032_v23 = vld [vmem:[#allocation5 + $0x3f8] sm:$0xff] }
0x2c93   :  { %8399 = vmatprep.mubr.bf16.mxu1 %v13036_v28  ;;  %8481 = vmatprep.mubr.bf16.mxu0 %v13036_v28  ;;  %v7941_v28 = vld [vmem:[#allocation5 + $0x120] sm:$0xff] }
0x2c95   :  { %8370 = vmatpush1.bf16.msra.mxu1 %v7917_v14  ;;  %8452 = vmatpush1.bf16.msra.mxu0 %v7919_v24  ;;  %v8029_v14 = vld [vmem:[#allocation5 + $0x3e0] sm:$0xff]  ;;  %v8031_v24 = vld [vmem:[#allocation5 + $0x3f0] sm:$0xff] }
0x2c96   :  { %8371 = vmatprep.subr.bf16.mxu1 %v7926_v25  ;;  %8453 = vmatprep.subr.bf16.mxu0 %v7928_v26  ;;  %v8038_v25 = vld [vmem:[#allocation5 + $0x428] sm:$0xff]  ;;  %v8040_v26 = vld [vmem:[#allocation5 + $0x438] sm:$0xff] }
0x2c99   :  { %8372 = vmatpush1.bf16.msra.mxu1 %v7925_v29  ;;  %8454 = vmatpush1.bf16.msra.mxu0 %v7927_v17  ;;  %v8037_v29 = vld [vmem:[#allocation5 + $0x420] sm:$0xff]  ;;  %v8039_v17 = vld [vmem:[#allocation5 + $0x430] sm:$0xff] }
0x2c9a   :  { %8373 = vmatprep.subr.bf16.mxu1 %v7934_v2  ;;  %8455 = vmatprep.subr.bf16.mxu0 %v7936_v18  ;;  %v8046_v2 = vld [vmem:[#allocation5 + $0x468] sm:$0xff]  ;;  %v8048_v18 = vld [vmem:[#allocation5 + $0x478] sm:$0xff] }
0x2c9d   :  { %8374 = vmatpush1.bf16.msra.mxu1 %v7933_v30  ;;  %8456 = vmatpush1.bf16.msra.mxu0 %v7935_v19  ;;  %v8045_v30 = vld [vmem:[#allocation5 + $0x460] sm:$0xff]  ;;  %v8047_v19 = vld [vmem:[#allocation5 + $0x470] sm:$0xff] }
0x2c9e   :  { %8375 = vmatprep.subr.bf16.mxu1 %v7942_v34  ;;  %8457 = vmatprep.subr.bf16.mxu0 %v7944_v20  ;;  %v8054_v34 = vld [vmem:[#allocation5 + $0x4a8] sm:$0xff]  ;;  %v8056_v20 = vld [vmem:[#allocation5 + $0x4b8] sm:$0xff] }
0x2ca1   :  { %8376 = vmatpush1.bf16.msra.mxu1 %v7941_v28  ;;  %8458 = vmatpush1.bf16.msra.mxu0 %v7943_v21  ;;  %v8053_v28 = vld [vmem:[#allocation5 + $0x4a0] sm:$0xff]  ;;  %v8055_v21 = vld [vmem:[#allocation5 + $0x4b0] sm:$0xff] }
0x2ca2   :  { %8377 = vmatprep.subr.bf16.mxu1 %v7950_v31  ;;  %8459 = vmatprep.subr.bf16.mxu0 %v7952_v6  ;;  %v8062_v31 = vld [vmem:[#allocation5 + $0x4e8] sm:$0xff]  ;;  %v8061_v6 = vld [vmem:[#allocation5 + $0x4e0] sm:$0xff] }
0x2ca5   :  { %8378 = vmatpush1.bf16.msra.mxu1 %v7949_v22  ;;  %8460 = vmatpush1.bf16.msra.mxu0 %v7951_v9  ;;  %v8063_v22 = vld [vmem:[#allocation5 + $0x4f0] sm:$0xff]  ;;  %v8070_v9 = vld [vmem:[#allocation5 + $0x528] sm:$0xff] }
0x2ca6   :  { %8379 = vmatprep.subr.bf16.mxu1 %v7958_v4  ;;  %8461 = vmatprep.subr.bf16.mxu0 %v7960_v32  ;;  %v8072_v4 = vld [vmem:[#allocation5 + $0x538] sm:$0xff]  ;;  %v8071_v32 = vld [vmem:[#allocation5 + $0x530] sm:$0xff] }
0x2ca9   :  { %8380 = vmatpush1.bf16.msra.mxu1 %v7957_v39  ;;  %8462 = vmatpush1.bf16.msra.mxu0 %v7959_v54  ;;  %v8078_v39 = vld [vmem:[#allocation5 + $0x568] sm:$0xff]  ;;  %v8080_v54 = vld [vmem:[#allocation5 + $0x578] sm:$0xff] }
0x2caa   :  { %8381 = vmatprep.subr.bf16.mxu1 %v7966_v16  ;;  %8463 = vmatprep.subr.bf16.mxu0 %v7968_v12  ;;  %v8077_v16 = vld [vmem:[#allocation5 + $0x560] sm:$0xff]  ;;  %v8079_v12 = vld [vmem:[#allocation5 + $0x570] sm:$0xff] }
0x2cad   :  { %8382 = vmatpush1.bf16.msra.mxu1 %v7965_v42  ;;  %8464 = vmatpush1.bf16.msra.mxu0 %v7967_v55  ;;  %v8086_v42 = vld [vmem:[#allocation5 + $0x5a8] sm:$0xff]  ;;  %v8088_v55 = vld [vmem:[#allocation5 + $0x5b8] sm:$0xff] }
0x2cae   :  { %8383 = vmatprep.subr.bf16.mxu1 %v7974_v56  ;;  %8465 = vmatprep.subr.bf16.mxu0 %v7976_v57  ;;  %v8085_v56 = vld [vmem:[#allocation5 + $0x5a0] sm:$0xff]  ;;  %v8087_v57 = vld [vmem:[#allocation5 + $0x5b0] sm:$0xff] }
0x2cb1   :  { %8384 = vmatpush1.bf16.msra.mxu1 %v7973_v36  ;;  %8466 = vmatpush1.bf16.msra.mxu0 %v7975_v11  ;;  %v8094_v36 = vld [vmem:[#allocation5 + $0x5e8] sm:$0xff]  ;;  %v8096_v11 = vld [vmem:[#allocation5 + $0x5f8] sm:$0xff] }
0x2cb2   :  { %8385 = vmatprep.subr.bf16.mxu1 %v7982_v59  ;;  %8467 = vmatprep.subr.bf16.mxu0 %v7984_v43  ;;  %v8093_v59 = vld [vmem:[#allocation5 + $0x5e0] sm:$0xff]  ;;  %v8095_v43 = vld [vmem:[#allocation5 + $0x5f0] sm:$0xff] }
0x2cb5   :  { %8386 = vmatpush1.bf16.msra.mxu1 %v7981_v8  ;;  %8468 = vmatpush1.bf16.msra.mxu0 %v7983_v15  ;;  %v8102_v8 = vld [vmem:[#allocation5 + $0x628] sm:$0xff]  ;;  %v8104_v15 = vld [vmem:[#allocation5 + $0x638] sm:$0xff] }
0x2cb6   :  { %8387 = vmatprep.subr.bf16.mxu1 %v7990_v60  ;;  %8469 = vmatprep.subr.bf16.mxu0 %v7992_v61  ;;  %v8101_v60 = vld [vmem:[#allocation5 + $0x620] sm:$0xff]  ;;  %v8103_v61 = vld [vmem:[#allocation5 + $0x630] sm:$0xff] }
0x2cb9   :  { %8388 = vmatpush1.bf16.msra.mxu1 %v7989_v38  ;;  %8470 = vmatpush1.bf16.msra.mxu0 %v7991_v45  ;;  %v8110_v38 = vld [vmem:[#allocation5 + $0x668] sm:$0xff]  ;;  %v8112_v45 = vld [vmem:[#allocation5 + $0x678] sm:$0xff] }
0x2cba   :  { %8389 = vmatprep.subr.bf16.mxu1 %v7998_v46  ;;  %8471 = vmatprep.subr.bf16.mxu0 %v8000_v48  ;;  %v8109_v46 = vld [vmem:[#allocation5 + $0x660] sm:$0xff]  ;;  %v8111_v48 = vld [vmem:[#allocation5 + $0x670] sm:$0xff] }
0x2cbd   :  { %8390 = vmatpush1.bf16.msra.mxu1 %v7997_v50  ;;  %8472 = vmatpush1.bf16.msra.mxu0 %v7999_v40  ;;  %v8118_v50 = vld [vmem:[#allocation5 + $0x6a8] sm:$0xff]  ;;  %v8120_v40 = vld [vmem:[#allocation5 + $0x6b8] sm:$0xff] }
0x2cbe   :  { %8391 = vmatprep.subr.bf16.mxu1 %v8006_v53  ;;  %8473 = vmatprep.subr.bf16.mxu0 %v8008_v49  ;;  %v8117_v53 = vld [vmem:[#allocation5 + $0x6a0] sm:$0xff]  ;;  %v8119_v49 = vld [vmem:[#allocation5 + $0x6b0] sm:$0xff] }
0x2cc1   :  { %8392 = vmatpush1.bf16.msra.mxu1 %v8005_v52  ;;  %8474 = vmatpush1.bf16.msra.mxu0 %v8007_v47  ;;  %v8126_v52 = vld [vmem:[#allocation5 + $0x6e8] sm:$0xff]  ;;  %v8128_v47 = vld [vmem:[#allocation5 + $0x6f8] sm:$0xff] }
0x2cc2   :  { %8393 = vmatprep.subr.bf16.mxu1 %v8014_v62  ;;  %8475 = vmatprep.subr.bf16.mxu0 %v8016_v63  ;;  %v8125_v62 = vld [vmem:[#allocation5 + $0x6e0] sm:$0xff]  ;;  %v8127_v63 = vld [vmem:[#allocation5 + $0x6f0] sm:$0xff] }
0x2cc5   :  { %8394 = vmatpush1.bf16.msra.mxu1 %v8013_v0  ;;  %8476 = vmatpush1.bf16.msra.mxu0 %v8015_v1  ;;  %v8134_v0 = vld [vmem:[#allocation5 + $0x728] sm:$0xff]  ;;  %v8136_v1 = vld [vmem:[#allocation5 + $0x738] sm:$0xff] }
0x2cc6   :  { %8395 = vmatprep.subr.bf16.mxu1 %v8022_v58  ;;  %8477 = vmatprep.subr.bf16.mxu0 %v8024_v3  ;;  %v8133_v58 = vld [vmem:[#allocation5 + $0x720] sm:$0xff]  ;;  %v8135_v3 = vld [vmem:[#allocation5 + $0x730] sm:$0xff] }
0x2cc9   :  { %8396 = vmatpush1.bf16.msra.mxu1 %v8021_v7  ;;  %8478 = vmatpush1.bf16.msra.mxu0 %v8023_v10  ;;  %v8142_v7 = vld [vmem:[#allocation5 + $0x768] sm:$0xff]  ;;  %v8144_v10 = vld [vmem:[#allocation5 + $0x778] sm:$0xff] }
0x2cca   :  { %8397 = vmatprep.subr.bf16.mxu1 %v8030_v27  ;;  %8479 = vmatprep.subr.bf16.mxu0 %v8032_v23  ;;  %v8141_v27 = vld [vmem:[#allocation5 + $0x760] sm:$0xff]  ;;  %v8143_v23 = vld [vmem:[#allocation5 + $0x770] sm:$0xff] }
0x2ccd   :  { %8398 = vmatpush1.bf16.msra.mxu1 %v8029_v14  ;;  %8480 = vmatpush1.bf16.msra.mxu0 %v8031_v24  ;;  %v8150_v14 = vld [vmem:[#allocation5 + $0x7a8] sm:$0xff]  ;;  %v8152_v24 = vld [vmem:[#allocation5 + $0x7b8] sm:$0xff] }
0x2cce   :  { %8408 = vmatprep.subr.bf16.mxu1 %v8038_v25  ;;  %8490 = vmatprep.subr.bf16.mxu0 %v8040_v26  ;;  %v8149_v25 = vld [vmem:[#allocation5 + $0x7a0] sm:$0xff]  ;;  %v8151_v26 = vld [vmem:[#allocation5 + $0x7b0] sm:$0xff] }
0x2cd0   :  { %8400 = vmatmul.mubr.bf16.vlgmr.msra.gmra.mrb[96].mxu1 %v13046_v44  ;;  %8482 = vmatmul.mubr.bf16.vlgmr.msra.gmra.mrb[100].mxu0 %v13046_v44  ;;  %v8064_v44 = vld [vmem:[#allocation5 + $0x4f8] sm:$0xff] }
0x2cd1   :  { %8409 = vmatpush1.bf16.msra.mxu1 %v8037_v29  ;;  %8491 = vmatpush1.bf16.msra.mxu0 %v8039_v17  ;;  %v8158_v29 = vld [vmem:[#allocation5 + $0x7e8] sm:$0xff]  ;;  %v8160_v17 = vld [vmem:[#allocation5 + $0x7f8] sm:$0xff] }
0x2cd2   :  { %8410 = vmatprep.subr.bf16.mxu1 %v8046_v2  ;;  %8492 = vmatprep.subr.bf16.mxu0 %v8048_v18  ;;  %v8157_v2 = vld [vmem:[#allocation5 + $0x7e0] sm:$0xff]  ;;  %v8159_v18 = vld [vmem:[#allocation5 + $0x7f0] sm:$0xff] }
0x2cd3   :  { %8440 = vmatprep.mubr.bf16.mxu1 %v13048_v41  ;;  %8522 = vmatprep.mubr.bf16.mxu0 %v13048_v41  ;;  %v8069_v41 = vld [vmem:[#allocation5 + $0x520] sm:$0xff] }
0x2cd5   :  { %8411 = vmatpush1.bf16.msra.mxu1 %v8045_v30  ;;  %8493 = vmatpush1.bf16.msra.mxu0 %v8047_v19  ;;  %v10305_v30 = vld [vmem:[%s13315_s15 + $0x40] sm:$0xff]  }
0x2cd6   :  { %8412 = vmatprep.subr.bf16.mxu1 %v8054_v34  ;;  %8494 = vmatprep.subr.bf16.mxu0 %v8056_v20  ;;  %v10306_v19 = vld [vmem:[%s13315_s15 + $0xc0] sm:$0xff]  }
0x2cd7   :  { %v10307_v34 = vld [vmem:[%s13315_s15] sm:$0xff]  }
0x2cd8   :  { %v10308_v20 = vld [vmem:[%s13315_s15 + $0x80] sm:$0xff]  }
0x2cd9   :  { %8413 = vmatpush1.bf16.msra.mxu1 %v8053_v28  ;;  %8495 = vmatpush1.bf16.msra.mxu0 %v8055_v21  ;;  %v10309_v28 = vld [vmem:[%s13315_s15 + $0x48] sm:$0xff]  }
0x2cda   :  { %8414 = vmatprep.subr.bf16.mxu1 %v8062_v31  ;;  %8496 = vmatprep.subr.bf16.mxu0 %v8064_v44  ;;  %v10310_v21 = vld [vmem:[%s13315_s15 + $0xc8] sm:$0xff]  }
0x2cdb   :  { %v10311_v31 = vld [vmem:[%s13315_s15 + $0x8] sm:$0xff]  }
0x2cdc   :  { %v10312_v44 = vld [vmem:[%s13315_s15 + $0x88] sm:$0xff]  }
0x2cdd   :  { %8415 = vmatpush1.bf16.msra.mxu1 %v8061_v6  ;;  %8497 = vmatpush1.bf16.msra.mxu0 %v8063_v22  ;;  %v10313_v6 = vld [vmem:[%s13315_s15 + $0x50] sm:$0xff]  }
0x2cde   :  { %8416 = vmatprep.subr.bf16.mxu1 %v8070_v9  ;;  %8498 = vmatprep.subr.bf16.mxu0 %v8072_v4  ;;  %v10315_v22 = vld [vmem:[%s13315_s15 + $0x10] sm:$0xff]   ;;  %v10317_v4 = vld [vmem:[%s13315_s15 + $0x58] sm:$0xff]  }
0x2cdf   :  { %v10316_v9 = vld [vmem:[%s13315_s15 + $0x90] sm:$0xff]  }
0x2ce1   :  { %8417 = vmatpush1.bf16.msra.mxu1 %v8069_v41  ;;  %8499 = vmatpush1.bf16.msra.mxu0 %v8071_v32  ;;  %v10318_v41 = vld [vmem:[%s13315_s15 + $0xd8] sm:$0xff]  }
0x2ce2   :  { %8418 = vmatprep.subr.bf16.mxu1 %v8078_v39  ;;  %8500 = vmatprep.subr.bf16.mxu0 %v8080_v54  ;;  %v10319_v32 = vld [vmem:[%s13315_s15 + $0x18] sm:$0xff]   ;;  %v10321_v54 = vld [vmem:[%s13315_s15 + $0x60] sm:$0xff]  }
0x2ce3   :  { %v10320_v39 = vld [vmem:[%s13315_s15 + $0x98] sm:$0xff]  }
0x2ce5   :  { %8419 = vmatpush1.bf16.msra.mxu1 %v8077_v16  ;;  %8501 = vmatpush1.bf16.msra.mxu0 %v8079_v12  ;;  %v10322_v16 = vld [vmem:[%s13315_s15 + $0xe0] sm:$0xff]  }
0x2ce6   :  { %8420 = vmatprep.subr.bf16.mxu1 %v8086_v42  ;;  %8502 = vmatprep.subr.bf16.mxu0 %v8088_v55  ;;  %v10323_v12 = vld [vmem:[%s13315_s15 + $0x20] sm:$0xff]   ;;  %v10325_v55 = vld [vmem:[%s13315_s15 + $0x68] sm:$0xff]  }
0x2ce7   :  { %v10324_v42 = vld [vmem:[%s13315_s15 + $0xa0] sm:$0xff]  }
0x2ce9   :  { %8421 = vmatpush1.bf16.msra.mxu1 %v8085_v56  ;;  %8503 = vmatpush1.bf16.msra.mxu0 %v8087_v57  ;;  %v10326_v56 = vld [vmem:[%s13315_s15 + $0xe8] sm:$0xff]  }
0x2cea   :  { %8422 = vmatprep.subr.bf16.mxu1 %v8094_v36  ;;  %8504 = vmatprep.subr.bf16.mxu0 %v8096_v11  ;;  %v10327_v57 = vld [vmem:[%s13315_s15 + $0x28] sm:$0xff]   ;;  %v10329_v11 = vld [vmem:[%s13315_s15 + $0x70] sm:$0xff]  }
0x2ceb   :  { %v10328_v36 = vld [vmem:[%s13315_s15 + $0xa8] sm:$0xff]  }
0x2ced   :  { %8423 = vmatpush1.bf16.msra.mxu1 %v8093_v59  ;;  %8505 = vmatpush1.bf16.msra.mxu0 %v8095_v43  ;;  %v10330_v59 = vld [vmem:[%s13315_s15 + $0xf0] sm:$0xff]  }
0x2cee   :  { %8424 = vmatprep.subr.bf16.mxu1 %v8102_v8  ;;  %8506 = vmatprep.subr.bf16.mxu0 %v8104_v15  ;;  %v10331_v43 = vld [vmem:[%s13315_s15 + $0x30] sm:$0xff]   ;;  %v10333_v15 = vld [vmem:[%s13315_s15 + $0x78] sm:$0xff]  }
0x2cef   :  { %v10332_v8 = vld [vmem:[%s13315_s15 + $0xb0] sm:$0xff]  }
0x2cf1   :  { %8425 = vmatpush1.bf16.msra.mxu1 %v8101_v60  ;;  %8507 = vmatpush1.bf16.msra.mxu0 %v8103_v61  ;;  %v10334_v60 = vld [vmem:[%s13315_s15 + $0xf8] sm:$0xff]  }
0x2cf2   :  { %8426 = vmatprep.subr.bf16.mxu1 %v8110_v38  ;;  %8508 = vmatprep.subr.bf16.mxu0 %v8112_v45  ;;  %v10335_v61 = vld [vmem:[%s13315_s15 + $0x38] sm:$0xff]   ;;  %v10337_v45 = vld [vmem:[%s13315_s15 + $0x140] sm:$0xff]  }
0x2cf3   :  { %v10336_v38 = vld [vmem:[%s13315_s15 + $0xb8] sm:$0xff]  }
0x2cf5   :  { %8427 = vmatpush1.bf16.msra.mxu1 %v8109_v46  ;;  %8509 = vmatpush1.bf16.msra.mxu0 %v8111_v48  ;;  %v10338_v46 = vld [vmem:[%s13315_s15 + $0x1c0] sm:$0xff]  }
0x2cf6   :  { %8428 = vmatprep.subr.bf16.mxu1 %v8118_v50  ;;  %8510 = vmatprep.subr.bf16.mxu0 %v8120_v40  ;;  %v13175_v48 = vld [vmem:[%s13314_s14] sm:$0xff] }
0x2cf7   :  { %v8166_v50 = vrot.slane %v13175_v48, %v12591_v35  ;;  %v8174_v40 = vrot.slane %v13175_v48, %v7891_v51 }
0x2cf9   :  { %8429 = vmatpush1.bf16.msra.mxu1 %v8117_v53  ;;  %8511 = vmatpush1.bf16.msra.mxu0 %v8119_v49  ;;  %v8170_v53 = vrot.slane %v13175_v48, %v12597_v37  ;;  %v8178_v49 = vrot.slane %v13175_v48, %v7895_v33  ;;  %v10339_v37 = vld [vmem:[%s13315_s15 + $0x100] sm:$0xff]  }
0x2cfa   :  { %8430 = vmatprep.subr.bf16.mxu1 %v8126_v52  ;;  %8512 = vmatprep.subr.bf16.mxu0 %v8128_v47  ;;  %v10340_v33 = vld [vmem:[%s13315_s15 + $0x180] sm:$0xff]  }
0x2cfd   :  { %8431 = vmatpush1.bf16.msra.mxu1 %v8125_v62  ;;  %8513 = vmatpush1.bf16.msra.mxu0 %v8127_v63 }
0x2cfe   :  { %8432 = vmatprep.subr.bf16.mxu1 %v8134_v0  ;;  %8514 = vmatprep.subr.bf16.mxu0 %v8136_v1 }
0x2d01   :  { %8433 = vmatpush1.bf16.msra.mxu1 %v8133_v58  ;;  %8515 = vmatpush1.bf16.msra.mxu0 %v8135_v3 }
0x2d02   :  { %8434 = vmatprep.subr.bf16.mxu1 %v8142_v7  ;;  %8516 = vmatprep.subr.bf16.mxu0 %v8144_v10 }
0x2d05   :  { %8435 = vmatpush1.bf16.msra.mxu1 %v8141_v27  ;;  %8517 = vmatpush1.bf16.msra.mxu0 %v8143_v23 }
0x2d06   :  { %8436 = vmatprep.subr.bf16.mxu1 %v8150_v14  ;;  %8518 = vmatprep.subr.bf16.mxu0 %v8152_v24 }
0x2d09   :  { %8437 = vmatpush1.bf16.msra.mxu1 %v8149_v25  ;;  %8519 = vmatpush1.bf16.msra.mxu0 %v8151_v26  ;;  %v10341_v25 = vld [vmem:[%s13315_s15 + $0x148] sm:$0xff]  }
0x2d0a   :  { %8438 = vmatprep.subr.bf16.mxu1 %v8158_v29  ;;  %8520 = vmatprep.subr.bf16.mxu0 %v8160_v17  ;;  %v10342_v26 = vld [vmem:[%s13315_s15 + $0x1c8] sm:$0xff]  }
0x2d0b   :  { %v10343_v29 = vld [vmem:[%s13315_s15 + $0x108] sm:$0xff]  }
0x2d0c   :  { %v10344_v17 = vld [vmem:[%s13315_s15 + $0x188] sm:$0xff]  }
0x2d0d   :  { %8439 = vmatpush1.bf16.msra.mxu1 %v8157_v2  ;;  %8521 = vmatpush1.bf16.msra.mxu0 %v8159_v18  ;;  %v10345_v2 = vld [vmem:[%s13315_s15 + $0x150] sm:$0xff]  }
0x2d0e   :  { %9655 = vmatprep.subr.bf16.mxu1 %v10305_v30  ;;  %9677 = vmatprep.subr.bf16.mxu0 %v10306_v19  ;;  %v10346_v18 = vld [vmem:[%s13315_s15 + $0x1d0] sm:$0xff]  }
0x2d0f   :  { %v10347_v30 = vld [vmem:[%s13315_s15 + $0x110] sm:$0xff]  }
0x2d10   :  { %8441 = vmatmul.mubr.bf16.vlgmr.msra.gmra.mrb[96].mxu1 %v13058_v5  ;;  %8523 = vmatmul.mubr.bf16.vlgmr.msra.gmra.mrb[100].mxu0 %v13058_v5  ;;  %v10314_v5 = vld [vmem:[%s13315_s15 + $0xd0] sm:$0xff]  }
0x2d11   :  { %9656 = vmatpush3.bf16.msra.mxu1 %v10307_v34  ;;  %9678 = vmatpush3.bf16.msra.mxu0 %v10308_v20  ;;  %v10348_v19 = vld [vmem:[%s13315_s15 + $0x190] sm:$0xff]   ;;  %v10349_v34 = vld [vmem:[%s13315_s15 + $0x158] sm:$0xff]  }
0x2d12   :  { %9657 = vmatprep.subr.bf16.mxu1 %v10309_v28  ;;  %9679 = vmatprep.subr.bf16.mxu0 %v10310_v21  ;;  %v10350_v20 = vld [vmem:[%s13315_s15 + $0x1d8] sm:$0xff]  }
0x2d13   :  { %v10351_v28 = vld [vmem:[%s13315_s15 + $0x118] sm:$0xff]  }
0x2d14   :  { %v10352_v21 = vld [vmem:[%s13315_s15 + $0x198] sm:$0xff]  }
0x2d15   :  { %9658 = vmatpush3.bf16.msra.mxu1 %v10311_v31  ;;  %9680 = vmatpush3.bf16.msra.mxu0 %v10312_v44  ;;  %v10353_v31 = vld [vmem:[%s13315_s15 + $0x160] sm:$0xff]  }
0x2d16   :  { %9659 = vmatprep.subr.bf16.mxu1 %v10313_v6  ;;  %9681 = vmatprep.subr.bf16.mxu0 %v10314_v5  ;;  %v10354_v44 = vld [vmem:[%s13315_s15 + $0x1e0] sm:$0xff]  }
0x2d17   :  { %v10355_v6 = vld [vmem:[%s13315_s15 + $0x120] sm:$0xff]  }
0x2d18   :  { %v10356_v5 = vld [vmem:[%s13315_s15 + $0x1a0] sm:$0xff]  }
0x2d19   :  { %9660 = vmatpush3.bf16.msra.mxu1 %v10315_v22  ;;  %9682 = vmatpush3.bf16.msra.mxu0 %v10316_v9  ;;  %v10357_v22 = vld [vmem:[%s13315_s15 + $0x168] sm:$0xff]  }
0x2d1a   :  { %9661 = vmatprep.subr.bf16.mxu1 %v10317_v4  ;;  %9683 = vmatprep.subr.bf16.mxu0 %v10318_v41  ;;  %v10358_v9 = vld [vmem:[%s13315_s15 + $0x1e8] sm:$0xff]  }
0x2d1b   :  { %v10359_v4 = vld [vmem:[%s13315_s15 + $0x128] sm:$0xff]  }
0x2d1c   :  { %v10360_v41 = vld [vmem:[%s13315_s15 + $0x1a8] sm:$0xff]  }
0x2d1d   :  { %9662 = vmatpush3.bf16.msra.mxu1 %v10319_v32  ;;  %9684 = vmatpush3.bf16.msra.mxu0 %v10320_v39  ;;  %v10361_v32 = vld [vmem:[%s13315_s15 + $0x170] sm:$0xff]  }
0x2d1e   :  { %9663 = vmatprep.subr.bf16.mxu1 %v10321_v54  ;;  %9685 = vmatprep.subr.bf16.mxu0 %v10322_v16  ;;  %v10362_v39 = vld [vmem:[%s13315_s15 + $0x1f0] sm:$0xff]  }
0x2d1f   :  { %v10363_v54 = vld [vmem:[%s13315_s15 + $0x130] sm:$0xff]  }
0x2d20   :  { %v10364_v16 = vld [vmem:[%s13315_s15 + $0x1b0] sm:$0xff]  }
0x2d21   :  { %9664 = vmatpush3.bf16.msra.mxu1 %v10323_v12  ;;  %9686 = vmatpush3.bf16.msra.mxu0 %v10324_v42  ;;  %v10365_v12 = vld [vmem:[%s13315_s15 + $0x178] sm:$0xff]  }
0x2d22   :  { %9665 = vmatprep.subr.bf16.mxu1 %v10325_v55  ;;  %9687 = vmatprep.subr.bf16.mxu0 %v10326_v56  ;;  %v10366_v42 = vld [vmem:[%s13315_s15 + $0x1f8] sm:$0xff]  }
0x2d23   :  { %v10367_v55 = vld [vmem:[%s13315_s15 + $0x138] sm:$0xff]  }
0x2d24   :  { %v10368_v56 = vld [vmem:[%s13315_s15 + $0x1b8] sm:$0xff]  }
0x2d25   :  { %9666 = vmatpush3.bf16.msra.mxu1 %v10327_v57  ;;  %9688 = vmatpush3.bf16.msra.mxu0 %v10328_v36  ;;  %v8181_v57 = vsub.s32 4, %v12480_v13  ;;  %v8189_v36 = vsub.s32 6, %v12480_v13 }
0x2d26   :  { %9667 = vmatprep.subr.bf16.mxu1 %v10329_v11  ;;  %9689 = vmatprep.subr.bf16.mxu0 %v10330_v59  ;;  %v8185_v11 = vsub.s32 5, %v12480_v13  ;;  %v8193_v59 = vsub.s32 7, %v12480_v13 }
0x2d29   :  { %9668 = vmatpush3.bf16.msra.mxu1 %v10331_v43  ;;  %9690 = vmatpush3.bf16.msra.mxu0 %v10332_v8  ;;  %v8182_v43 = vrot.slane %v13175_v48, %v8181_v57  ;;  %v8190_v8 = vrot.slane %v13175_v48, %v8189_v36 }
0x2d2a   :  { %9669 = vmatprep.subr.bf16.mxu1 %v10333_v15  ;;  %9691 = vmatprep.subr.bf16.mxu0 %v10334_v60  ;;  %v8186_v15 = vrot.slane %v13175_v48, %v8185_v11  ;;  %v8194_v60 = vrot.slane %v13175_v48, %v8193_v59 }
0x2d2d   :  { %9670 = vmatpush3.bf16.msra.mxu1 %v10335_v61  ;;  %9692 = vmatpush3.bf16.msra.mxu0 %v10336_v38 }
0x2d2e   :  { %9699 = vmatprep.subr.bf16.mxu1 %v10337_v45  ;;  %9721 = vmatprep.subr.bf16.mxu0 %v10338_v46 }
0x2d63   :  { %v8278_v52 = vpop.f32.mrb[92].mxu1  ;;  %v8360_v47 = vpop.f32.mrb[96].mxu0 }
0x2d64   :  { %v10049_v62 = vadd.f32 %v8278_v52, %v8166_v50  ;;  %v10051_v63 = vadd.f32 %v8360_v47, %v8174_v40  ;;  %v8280_v0 = vpop.f32.mrb[93].mxu1  ;;  %v8362_v1 = vpop.f32.mrb[97].mxu0 }
0x2d65   :  { %v10050_v58 = vadd.f32 %v8280_v0, %v8170_v53  ;;  %v10052_v3 = vadd.f32 %v8362_v1, %v8178_v49  ;;  %v8282_v35 = vpop.f32.mrb[94].mxu1  ;;  %v8364_v7 = vpop.f32.mrb[98].mxu0 }
0x2d66   :  { %v8283_v10 = vpop.f32.mrb[95].mxu1  ;;  %v8365_v27 = vpop.f32.mrb[99].mxu0  ;;  %v8531_v14 = vpack.c.bf16 %v10049_v62, %v10049_v62  ;;  %v8533_v24 = vpack.c.bf16 %v10051_v63, %v10051_v63  ;;  %v8667_v35 = vld [vmem:[%s13316_s16] sm:$0x1]  ;;  %s10414_s16 = smov [#allocation7]  }
0x2d67   :  { %v8532_v51 = vpack.c.bf16 %v10050_v58, %v10050_v58  ;;  %v8534_v23 = vpack.c.bf16 %v10052_v3, %v10052_v3  ;;  %s9220_s10 = sshll.u32 %s10414_s16, 4  ;;  %s9221_s10 = int_to_ptr.vmem [resolvable:$true] %s9220_s10 }
0x2d68   :  { %s10369_s22 = scalar_lea.vmem %s9221_s10, 16  ;;  %s10373_s7 = scalar_lea.vmem %s9221_s10, 32 }
0x2d69   :  { %9084 = vmatprep.mubr.bf16.mxu1 %v8532_v51  ;;  %9124 = vmatprep.mubr.bf16.mxu0 %v8534_v23  ;;  %p10370_p0 = scmp.ne.s32.totalorder %s9221_s10, %s10369_s22  ;;  %p10374_p1 = scmp.lt.s32.totalorder %s9221_s10, %s9221_s10 }
0x2d6a   :  { %9085 = vmatmul.mubr.bf16.vlgmr.msra.gmra.mrb[100].mxu1 %v8531_v14  ;;  %9125 = vmatmul.mubr.bf16.vlgmr.msra.gmra.mrb[104].mxu0 %v8533_v24  ;;  %p10375_p2 = scmp.lt.s32.totalorder %s10373_s7, %s10369_s22 }
0x2d6b   :  { %9700 = vmatpush3.bf16.msra.mxu1 %v10339_v37  ;;  %9722 = vmatpush3.bf16.msra.mxu0 %v10340_v33 }
0x2d6c   :  { %9701 = vmatprep.subr.bf16.mxu1 %v10341_v25  ;;  %9723 = vmatprep.subr.bf16.mxu0 %v10342_v26  ;;  %p10376_p3 = por %p10375_p2, %p10374_p1 }
0x2d6e   :  { %p10377_p4 = pnand %p10376_p3, %p10370_p0 }
0x2d6f   :  { %9702 = vmatpush3.bf16.msra.mxu1 %v10343_v29  ;;  %9724 = vmatpush3.bf16.msra.mxu0 %v10344_v17 }
0x2d70   :  { %9703 = vmatprep.subr.bf16.mxu1 %v10345_v2  ;;  %9725 = vmatprep.subr.bf16.mxu0 %v10346_v18 }
0x2d73   :  { %9704 = vmatpush3.bf16.msra.mxu1 %v10347_v30  ;;  %9726 = vmatpush3.bf16.msra.mxu0 %v10348_v19 }
0x2d74   :  { %9705 = vmatprep.subr.bf16.mxu1 %v10349_v34  ;;  %9727 = vmatprep.subr.bf16.mxu0 %v10350_v20 }
0x2d77   :  { %9706 = vmatpush3.bf16.msra.mxu1 %v10351_v28  ;;  %9728 = vmatpush3.bf16.msra.mxu0 %v10352_v21 }
0x2d78   :  { %9707 = vmatprep.subr.bf16.mxu1 %v10353_v31  ;;  %9729 = vmatprep.subr.bf16.mxu0 %v10354_v44 }
0x2d7b   :  { %9708 = vmatpush3.bf16.msra.mxu1 %v10355_v6  ;;  %9730 = vmatpush3.bf16.msra.mxu0 %v10356_v5 }
0x2d7c   :  { %9709 = vmatprep.subr.bf16.mxu1 %v10357_v22  ;;  %9731 = vmatprep.subr.bf16.mxu0 %v10358_v9 }
0x2d7f   :  { %9710 = vmatpush3.bf16.msra.mxu1 %v10359_v4  ;;  %9732 = vmatpush3.bf16.msra.mxu0 %v10360_v41 }
0x2d80   :  { %9711 = vmatprep.subr.bf16.mxu1 %v10361_v32  ;;  %9733 = vmatprep.subr.bf16.mxu0 %v10362_v39 }
0x2d83   :  { %9712 = vmatpush3.bf16.msra.mxu1 %v10363_v54  ;;  %9734 = vmatpush3.bf16.msra.mxu0 %v10364_v16 }
0x2d84   :  { %9713 = vmatprep.subr.bf16.mxu1 %v10365_v12  ;;  %9735 = vmatprep.subr.bf16.mxu0 %v10366_v42 }
0x2d87   :  { %9714 = vmatpush3.bf16.msra.mxu1 %v10367_v55  ;;  %9736 = vmatpush3.bf16.msra.mxu0 %v10368_v56 }
0x2de3   :  { %v8442_v61 = vpop.f32.mrb[96].mxu1  ;;  %v8524_v38 = vpop.f32.mrb[100].mxu0 }
0x2de4   :  { %v10053_v45 = vadd.f32 %v8442_v61, %v8182_v43  ;;  %v10055_v46 = vadd.f32 %v8524_v38, %v8190_v8  ;;  %v8444_v50 = vpop.f32.mrb[97].mxu1  ;;  %v8526_v40 = vpop.f32.mrb[101].mxu0 }
0x2de5   :  { %v10054_v53 = vadd.f32 %v8444_v50, %v8186_v15  ;;  %v10056_v49 = vadd.f32 %v8526_v40, %v8194_v60  ;;  %v8446_v52 = vpop.f32.mrb[98].mxu1  ;;  %v8528_v47 = vpop.f32.mrb[102].mxu0 }
0x2de6   :  { %v8447_v62 = vpop.f32.mrb[99].mxu1  ;;  %v8529_v13 = vpop.f32.mrb[103].mxu0  ;;  %v8535_v1 = vpack.c.bf16 %v10053_v45, %v10053_v45  ;;  %v8537_v58 = vpack.c.bf16 %v10055_v46, %v10055_v46 }
0x2de7   :  { %v8536_v63 = vpack.c.bf16 %v10054_v53, %v10054_v53  ;;  %v8538_v0 = vpack.c.bf16 %v10056_v49, %v10056_v49 }
0x2de9   :  { %9164 = vmatprep.mubr.bf16.mxu1 %v8536_v63  ;;  %9204 = vmatprep.mubr.bf16.mxu0 %v8538_v0 }
0x2dea   :  { %9165 = vmatmul.mubr.bf16.vlgmr.msra.gmra.mrb[104].mxu1 %v8535_v1  ;;  %9205 = vmatmul.mubr.bf16.vlgmr.msra.gmra.mrb[108].mxu0 %v8537_v58 }
0x2e3d   :  { %v9671_v48 = vpop.f32.mrb[100].mxu1  ;;  %v9693_v3 = vpop.f32.mrb[104].mxu0 }
0x2e3e   :  { %v9672_v7 = vpop.f32.mrb[101].mxu1  ;;  %v9694_v10 = vpop.f32.mrb[105].mxu0 }
0x2e3f   :  { %v9673_v27 = vadd.f32 %v9672_v7, %v9671_v48  ;;  %v9695_v51 = vadd.f32 %v9694_v10, %v9693_v3  ;;  %v9674_v23 = vpop.f32.mrb[102].mxu1  ;;  %v9696_v37 = vpop.f32.mrb[106].mxu0 }
0x2e40   :  { %v9675_v33 = vpop.f32.mrb[103].mxu1  ;;  %v9697_v14 = vpop.f32.mrb[107].mxu0 }
0x2e41   :  { %v9087_v24 = vadd.f32 %v9673_v27, %v8667_v35 }
0x2e43   :  { %v9127_v25 = vadd.f32 %v9695_v51, %v9087_v24 }
0x2ebd   :  { %v9715_v26 = vpop.f32.mrb[104].mxu1  ;;  %v9737_v29 = vpop.f32.mrb[108].mxu0 }
0x2ebe   :  { %v9716_v17 = vpop.f32.mrb[105].mxu1  ;;  %v9738_v2 = vpop.f32.mrb[109].mxu0 }
0x2ebf   :  { %v9717_v18 = vadd.f32 %v9716_v17, %v9715_v26  ;;  %v9739_v30 = vadd.f32 %v9738_v2, %v9737_v29  ;;  %v9718_v19 = vpop.f32.mrb[106].mxu1  ;;  %v9740_v34 = vpop.f32.mrb[110].mxu0 }
0x2ec0   :  { %v9719_v20 = vpop.f32.mrb[107].mxu1  ;;  %v9741_v28 = vpop.f32.mrb[111].mxu0 }
0x2ec1   :  { %v9167_v21 = vadd.f32 %v9717_v18, %v9127_v25 }
0x2ec3   :  { %v9207_v31 = vadd.f32 %v9739_v30, %v9167_v21 }
0x2ec5   :  { %9213 = vst.msk [vmem:[#allocation7] sm:$0x1] %vm9212_vm8, %v9207_v31 }
0x2ec6   :  { %10380 = shalt.err (!%p10377_p4)
}
0x2ec7   :  { %s10381_s11 = scalar_lea.hbm %s13317_s17, 16 }
0x2ec8   :  { %p10382_p5 = scmp.ne.s32.totalorder %s13317_s17, %s10381_s11  ;;  %p10385_p6 = scmp.lt.u32.totalorder %s10381_s11, %s13317_s17 }
0x2eca   :  { %p10387_p7 = pnand %p10385_p6, %p10382_p5 }
0x2ecc   :  { %10390 = shalt.err (!%p10387_p7)
}
0x2ecd   :  { %9223 = dma.vmem_to_hbm [thread:$0]  %s9221_s10, 16, %s13317_s17, [#allocation8]  }
0x2ece   :  { %10393 = dma.done.wait [#allocation8], 16  }
0x2ecf   :  { %10394 = vsyncadd [#allocation8], 4294967280 }
0x2ed0   :  { %9227 = vsyncpa [#allocation8], 1 }
0x2ed1   :  { %9228 = vsyncmov [#allocation6] }
0x2ed4   :  { %s9229_s27 = vpop.sfrf %9228 }
0x2ed5   :  { %p9528_p8 = scmp.ne.s32.totalorder %s9229_s27, 0 }
0x2ed7   :  { %9233 = shalt.err (%p9528_p8)  }

</bundles_post_ra>
